<compile_context>
chip_gen: v5e
topology: v5e:2x2
jax: 0.10.0
libtpu: 0.0.40
codegen_flags: <defaults>
</compile_context>

<pallas_src>
import functools

import jax
import jax.numpy as jnp
from jax.experimental import pallas as pl
from jax.experimental.pallas import tpu as pltpu

# Padded / model sizes.
C1P = 128    # conv1 out channels 20 -> 128 (lane-dense)
C2P = 128    # conv2 out channels 50 -> 128
K1P = 32     # conv1 im2col taps 25 -> 32
M = 500
MP = 512     # fc1 features 500 -> 512
L = 128
NC = 4
KH = KW = 5


# ---------------------------------------------------------------------------
# Kernel 1: fused feature extractor (conv1+ReLU+pool1+conv2+ReLU+pool2).
# ---------------------------------------------------------------------------
def _feature_kernel(pat_ref, w1_ref, b1_ref, w2_ref, b2_ref, o_ref, *,
                    oh1, pw1, oh2, ow2):
    bsz, rows1, kp = pat_ref.shape
    c1p = w1_ref.shape[1]
    c2p = w2_ref.shape[2]
    ph1 = oh1 // 2
    ph2, pw2 = oh2 // 2, ow2 // 2

    # conv1: a single MXU dot over the (zero-padded) 25-tap im2col contraction.
    a1 = jnp.dot(pat_ref[...].reshape(bsz * rows1, kp), w1_ref[...],
                 preferred_element_type=jnp.float32)
    a1 = jnp.maximum(a1 + b1_ref[...], 0.0)               # (bsz*2*oh1*pw1, C1P) f32

    # pool1, W step: patch rows are ordered (w-phase, h, x), so the W
    # de-interleave is a max over a major dim (no strided gather).
    a1 = a1.reshape(bsz, 2, oh1 * pw1, c1p)
    mh = jnp.maximum(a1[:, 0], a1[:, 1])                   # (bsz, oh1*pw1, C1P)
    # pool1, H step: consecutive (2, pw1) row chunks hold h = 2y and 2y+1.
    mh = mh.reshape(bsz * ph1, 2 * pw1, c1p)
    p1 = jnp.maximum(mh[:, :pw1, :], mh[:, pw1:, :])       # (bsz*ph1, pw1, C1P)
    p1 = p1.reshape(bsz, ph1, pw1, c1p).astype(jnp.bfloat16)

    # conv2: 25-tap accumulate.  The 5 dj (sublane) window shifts are hoisted
    # out of the di loop so only 5 relayout copies are made instead of 25; the
    # di shifts slice a major dim and are free.  bsz=2 keeps the f32
    # accumulator at (128, 128) = 16 vregs (no spills).
    pshift = [p1[:, :, dj:dj + ow2, :] for dj in range(KW)]
    acc = jnp.zeros((bsz * oh2 * ow2, c2p), jnp.float32)
    for di in range(KH):
        for dj in range(KW):
            win = pshift[dj][:, di:di + oh2, :, :]          # (bsz, oh2, ow2, C1P)
            acc = acc + jnp.dot(win.reshape(bsz * oh2 * ow2, c1p),
                                w2_ref[di * KW + dj],
                                preferred_element_type=jnp.float32)
    a2 = jnp.maximum(acc + b2_ref[...], 0.0)                # (bsz*oh2*ow2, C2P) f32

    # pool2, H step: consecutive (2, ow2) row chunks hold i = 2y and 2y+1.
    a2 = a2.reshape(bsz * ph2, 2 * ow2, c2p)
    mi = jnp.maximum(a2[:, :ow2, :], a2[:, ow2:, :])        # (bsz*ph2, ow2, C2P)
    mi = mi.reshape(bsz, ph2, ow2, c2p)
    # pool2, W step: pairwise max of adjacent j columns, written straight into
    # the compact (ph2, pw2) output layout via sub-slice stores.
    for x2 in range(pw2):
        pooled = jnp.maximum(mi[:, :, 2 * x2:2 * x2 + 1, :],
                             mi[:, :, 2 * x2 + 1:2 * x2 + 2, :])
        o_ref[:, :, x2:x2 + 1, :] = pooled.astype(o_ref.dtype)


def _pick_batch_tile(nk):
    # >=2 grid blocks when possible (v7x megacore), bsz=2 keeps register
    # pressure in the conv2 accumulator low (review item).
    for bsz in (2, 1):
        if nk % bsz == 0 and (nk // bsz >= 2 or bsz == nk):
            return bsz
    return 1


def feature_extractor(pat, w1, b1, w2, b2, *, oh1, pw1, oh2, ow2, out_c):
    nk = pat.shape[0]
    bsz = _pick_batch_tile(nk)
    ph2, pw2 = oh2 // 2, ow2 // 2
    kern = functools.partial(_feature_kernel, oh1=oh1, pw1=pw1, oh2=oh2, ow2=ow2)
    return pl.pallas_call(
        kern,
        out_shape=jax.ShapeDtypeStruct((nk, ph2, pw2, out_c), jnp.bfloat16),
        grid=(nk // bsz,),
        in_specs=[
            pl.BlockSpec((bsz, pat.shape[1], pat.shape[2]), lambda i: (i, 0, 0)),
            pl.BlockSpec(w1.shape, lambda i: (0, 0)),
            pl.BlockSpec(b1.shape, lambda i: (0, 0)),
            pl.BlockSpec(w2.shape, lambda i: (0, 0, 0)),
            pl.BlockSpec(b2.shape, lambda i: (0, 0)),
        ],
        out_specs=pl.BlockSpec((bsz, ph2, pw2, out_c), lambda i: (i, 0, 0, 0)),
        compiler_params=pltpu.CompilerParams(dimension_semantics=("parallel",)),
    )(pat, w1, b1, w2, b2)


# ---------------------------------------------------------------------------
# Kernel 2: fc1 + ReLU + attention + per-bag softmax + classifier (one step).
# ---------------------------------------------------------------------------
def _head_kernel(feat_ref, wf_ref, bf_ref, wa1_ref, ba1_ref, wa2_ref, ba2_ref,
                 wc_ref, bc_ref, p_ref, a_ref, *, n, k):
    nk = n * k
    nsp = wf_ref.shape[0]               # pooled spatial positions (16)
    mp = wf_ref.shape[2]

    # fc1 as an accumulation over the 16 pooled spatial positions: each step is
    # a dense (nk, 128) @ (128, MP) MXU dot (slices on the leading ref axis).
    acc = jnp.zeros((nk, mp), jnp.float32)
    for s in range(nsp):
        acc = acc + jnp.dot(feat_ref[s], wf_ref[s],
                            preferred_element_type=jnp.float32)
    h = jnp.maximum(acc + bf_ref[...], 0.0)                  # (nk, MP) f32

    # attention projection + logits (logits as a VPU lane reduction).
    t = jnp.tanh(jnp.dot(h.astype(jnp.bfloat16), wa1_ref[...],
                         preferred_element_type=jnp.float32) + ba1_ref[...])
    logit = jnp.sum(t * wa2_ref[...], axis=1, keepdims=True) + ba2_ref[...]   # (nk, 1)

    # Per-bag softmax / weighted sum / classifier.  Bags are contiguous blocks
    # of k rows, so everything is a static row-group slice + reduce (no group
    # matrices).  Per-bag max shift keeps the softmax stable.
    for b in range(n):
        lb = logit[b * k:(b + 1) * k, :]                      # (k, 1)
        mb = jnp.max(lb, axis=0, keepdims=True)
        eb = jnp.exp(lb - mb)
        ab = eb / jnp.sum(eb, axis=0, keepdims=True)          # (k, 1) attention
        hb = h[b * k:(b + 1) * k, :]                          # (k, MP)
        zb = jnp.sum(hb * ab, axis=0, keepdims=True)          # (1, MP)
        cl = jnp.dot(zb, wc_ref[...], preferred_element_type=jnp.float32) + bc_ref[...]
        cl = cl - jnp.max(cl, axis=1, keepdims=True)
        e2 = jnp.exp(cl)
        p_ref[b:b + 1, :] = e2 / jnp.sum(e2, axis=1, keepdims=True)
        a_ref[b * k:(b + 1) * k, :] = ab


def head(feat_t, q, *, n, k):
    nk = n * k

    def full(shape):
        return pl.BlockSpec(shape, lambda i, _s=shape: (0,) * len(_s))

    return pl.pallas_call(
        functools.partial(_head_kernel, n=n, k=k),
        out_shape=(jax.ShapeDtypeStruct((n, NC), jnp.float32),
                   jax.ShapeDtypeStruct((nk, 1), jnp.float32)),
        grid=(1,),
        in_specs=[full(feat_t.shape), full(q["wf"].shape), full(q["bf"].shape),
                  full(q["wa1"].shape), full(q["ba1"].shape),
                  full(q["wa2"].shape), full(q["ba2"].shape),
                  full(q["wc"].shape), full(q["bc"].shape)],
        out_specs=(full((n, NC)), full((nk, 1))),
        compiler_params=pltpu.CompilerParams(dimension_semantics=("arbitrary",)),
    )(feat_t, q["wf"], q["bf"], q["wa1"], q["ba1"], q["wa2"], q["ba2"],
      q["wc"], q["bc"])


# ------------------------------ parameters -----------------------------------
def _uniform(key, shape, bound):
    return jax.random.uniform(key, shape, jnp.float32, -bound, bound)


def init_params(seed=0, num_classes=NC):
    keys = jax.random.split(jax.random.PRNGKey(seed), 12)

    def lin(kw_, kb_, fan_in, shape_w, shape_b):
        bound = 1.0 / (fan_in ** 0.5)
        return _uniform(kw_, shape_w, bound), _uniform(kb_, shape_b, bound)

    # NOTE: linear weights here are generated in (in, out) layout; a real
    # torch.nn.Linear checkpoint stores (out, in) and would need a transpose.
    p = {}
    p["w_conv1"], p["b_conv1"] = lin(keys[0], keys[1], 1 * 5 * 5, (20, 1, 5, 5), (20,))
    p["w_conv2"], p["b_conv2"] = lin(keys[2], keys[3], 20 * 5 * 5, (50, 20, 5, 5), (50,))
    p["w_fc1"], p["b_fc1"] = lin(keys[4], keys[5], 50 * 4 * 4, (50 * 4 * 4, M), (M,))
    p["w_att1"], p["b_att1"] = lin(keys[6], keys[7], M, (M, L), (L,))
    p["w_att2"], p["b_att2"] = lin(keys[8], keys[9], L, (1, L), (1,))   # torch (out,in)
    p["w_cls"], p["b_cls"] = lin(keys[10], keys[11], M, (M, num_classes), (num_classes,))
    return p


def prepare_params(p):
    """Pad / reorder PyTorch-layout params into lane-dense bf16 kernel layouts."""
    q = {}
    # conv1: (20,1,5,5) -> (taps 25 padded to 32, 128)
    w1 = jnp.transpose(p["w_conv1"], (2, 3, 1, 0)).reshape(KH * KW, 20)
    q["w1"] = jnp.pad(w1, ((0, K1P - KH * KW), (0, C1P - 20))).astype(jnp.bfloat16)
    q["b1"] = jnp.pad(p["b_conv1"], (0, C1P - 20)).reshape(1, C1P).astype(jnp.float32)
    # conv2: (50,20,5,5) -> (25, 128, 128)
    w2 = jnp.transpose(p["w_conv2"], (2, 3, 1, 0)).reshape(KH * KW, 20, 50)
    q["w2"] = jnp.pad(w2, ((0, 0), (0, C1P - 20), (0, C2P - 50))).astype(jnp.bfloat16)
    q["b2"] = jnp.pad(p["b_conv2"], (0, C2P - 50)).reshape(1, C2P).astype(jnp.float32)
    # fc1: stored (in=800 ordered c,h,w ; out=500) -> (16 spatial, 128, 512)
    wf = jnp.transpose(p["w_fc1"].reshape(50, 4, 4, M), (1, 2, 0, 3))   # (4,4,50,M)
    wf = jnp.pad(wf, ((0, 0), (0, 0), (0, C2P - 50), (0, MP - M)))
    q["wf"] = wf.reshape(16, C2P, MP).astype(jnp.bfloat16)
    q["bf"] = jnp.pad(p["b_fc1"], (0, MP - M)).reshape(1, MP).astype(jnp.float32)
    # attention
    q["wa1"] = jnp.pad(p["w_att1"], ((0, MP - M), (0, 0))).astype(jnp.bfloat16)  # (512,128)
    q["ba1"] = p["b_att1"].reshape(1, L).astype(jnp.float32)
    q["wa2"] = p["w_att2"].astype(jnp.float32)                                   # (1,128)
    q["ba2"] = p["b_att2"].reshape(1, 1).astype(jnp.float32)
    # classifier (tiny, kept f32)
    q["wc"] = jnp.pad(p["w_cls"], ((0, MP - M), (0, 0))).astype(jnp.float32)     # (512,4)
    q["bc"] = p["b_cls"].reshape(1, NC).astype(jnp.float32)
    return q


# -------------------------------- forward ------------------------------------
def attention_forward(x, q):
    n, k, c, hh, ww = x.shape
    assert c == 1 and hh == 28 and ww == 28, "fc1 expects 50*4*4 conv features"
    nk = n * k
    xi = x.reshape(nk, hh, ww)

    oh1, ow1 = hh - KH + 1, ww - KW + 1        # 24, 24
    ph1, pw1 = oh1 // 2, ow1 // 2              # 12, 12
    oh2, ow2 = ph1 - KH + 1, pw1 - KW + 1      # 8, 8
    ph2, pw2 = oh2 // 2, ow2 // 2              # 4, 4

    # conv1 im2col built once in XLA (bf16, ~0.6 MB) with rows ordered
    # (w-phase, h, x) so pool1's W de-interleave becomes a row-group max
    # inside the fused feature kernel.
    taps = [xi[:, di:di + oh1, dj:dj + ow1] for di in range(KH) for dj in range(KW)]
    pat = jnp.stack(taps, axis=-1)                            # (nk, 24, 24, 25)
    pat = pat.reshape(nk, oh1, pw1, 2, KH * KW)
    pat = jnp.transpose(pat, (0, 3, 1, 2, 4))                 # (nk, 2, 24, 12, 25)
    pat = pat.reshape(nk, 2 * oh1 * pw1, KH * KW)
    pat = jnp.pad(pat, ((0, 0), (0, 0), (0, K1P - KH * KW))).astype(jnp.bfloat16)

    feat = feature_extractor(pat, q["w1"], q["b1"], q["w2"], q["b2"],
                             oh1=oh1, pw1=pw1, oh2=oh2, ow2=ow2, out_c=C2P)
    # (nk, 4, 4, 128) -> (16, nk, 128): spatial-major so the head kernel's fc1
    # accumulation indexes the leading ref axis (documented ref[i] pattern).
    feat_t = jnp.transpose(feat.reshape(nk, ph2 * pw2, C2P), (1, 0, 2))

    y_proba, a_col = head(feat_t, q, n=n, k=k)
    a = a_col.reshape(n, k)
    # TODO(synk): torch.argmax returns int64; jnp.argmax gives int32 (TPU-native).
    y_hat = jnp.argmax(y_proba, axis=1)
    return y_proba, y_hat, a


if __name__ == "__main__":
    # Input must be 28x28 so the flattened conv features are 50*4*4 = 800.
    N, K = 2, 8
    x = jax.random.normal(jax.random.PRNGKey(0), (N, K, 1, 28, 28), jnp.float32)
    params = init_params(seed=0)
    prepped = prepare_params(params)
    fwd = jax.jit(attention_forward)
    y_proba, y_hat, A = fwd(x, prepped)
    jax.block_until_ready((y_proba, y_hat, A))
    assert y_proba.shape == (N, NC)
    assert y_hat.shape == (N,)
    assert A.shape == (N, K)
    assert bool(jnp.all(jnp.isfinite(y_proba)))
    assert bool(jnp.all(jnp.isfinite(A)))
    assert bool(jnp.all(jnp.abs(jnp.sum(y_proba, axis=1) - 1.0) < 1e-3))
    assert bool(jnp.all(jnp.abs(jnp.sum(A, axis=1) - 1.0) < 1e-3))
    print("KERNEL_OK")
</pallas_src>

<mosaic_0001>
module attributes {stable_mosaic.version = 11 : i64} {
  func.func @_feature_kernel(%arg0: i32, %arg1: memref<2x576x32xbf16, #tpu.memory_space<vmem>>, %arg2: memref<32x128xbf16, #tpu.memory_space<vmem>>, %arg3: memref<1x128xf32, #tpu.memory_space<vmem>>, %arg4: memref<25x128x128xbf16, #tpu.memory_space<vmem>>, %arg5: memref<1x128xf32, #tpu.memory_space<vmem>>, %arg6: memref<2x4x4x128xbf16, #tpu.memory_space<vmem>>) attributes {dimension_semantics = [#tpu.dimension_semantics<parallel>], iteration_bounds = array<i64: 8>, scalar_prefetch = 0 : i64, scratch_operands = 0 : i64, tpu.core_type = #tpu.core_type<tc>, window_params = [{transform_indices = @transform_0, window_bounds = array<i64: 2, 576, 32>}, {pipeline_mode = #tpu.pipeline_mode<synchronous>, transform_indices = @transform_1, window_bounds = array<i64: 32, 128>}, {pipeline_mode = #tpu.pipeline_mode<synchronous>, transform_indices = @transform_2, window_bounds = array<i64: 1, 128>}, {pipeline_mode = #tpu.pipeline_mode<synchronous>, transform_indices = @transform_3, window_bounds = array<i64: 25, 128, 128>}, {pipeline_mode = #tpu.pipeline_mode<synchronous>, transform_indices = @transform_4, window_bounds = array<i64: 1, 128>}, {transform_indices = @transform_5, window_bounds = array<i64: 2, 4, 4, 128>}]} {
    %c0 = arith.constant 0 : index
    %c0_0 = arith.constant 0 : index
    %c0_1 = arith.constant 0 : index
    %0 = vector.load %arg1[%c0, %c0_0, %c0_1] : memref<2x576x32xbf16, #tpu.memory_space<vmem>>, vector<2x576x32xbf16>
    %1 = vector.shape_cast %0 : vector<2x576x32xbf16> to vector<1152x32xbf16>
    %c0_2 = arith.constant 0 : index
    %c0_3 = arith.constant 0 : index
    %2 = vector.load %arg2[%c0_2, %c0_3] : memref<32x128xbf16, #tpu.memory_space<vmem>>, vector<32x128xbf16>
    %cst = arith.constant dense<0.000000e+00> : vector<1152x128xf32>
    %3 = tpu.matmul %1, %2, %cst {dimension_numbers = #tpu.dot_dimension_numbers<[1], [0], [0], [1], [0, 0, 1, 1], [], []>} : vector<1152x32xbf16>, vector<32x128xbf16>, vector<1152x128xf32> -> vector<1152x128xf32>
    %c0_4 = arith.constant 0 : index
    %c0_5 = arith.constant 0 : index
    %4 = vector.load %arg3[%c0_4, %c0_5] : memref<1x128xf32, #tpu.memory_space<vmem>>, vector<1x128xf32>
    %5 = vector.broadcast %4 : vector<1x128xf32> to vector<1152x128xf32>
    %6 = arith.addf %3, %5 : vector<1152x128xf32>
    %cst_6 = arith.constant 0.000000e+00 : f32
    %7 = vector.broadcast %cst_6 : f32 to vector<1152x128xf32>
    %8 = arith.maximumf %6, %7 : vector<1152x128xf32>
    %9 = vector.shape_cast %8 : vector<1152x128xf32> to vector<2x2x288x128xf32>
    %10 = vector.extract_strided_slice %9 {offsets = [0, 0, 0, 0], sizes = [2, 1, 288, 128], strides = [1, 1, 1, 1]} : vector<2x2x288x128xf32> to vector<2x1x288x128xf32>
    %11 = vector.shape_cast %10 : vector<2x1x288x128xf32> to vector<2x288x128xf32>
    %12 = vector.extract_strided_slice %9 {offsets = [0, 1, 0, 0], sizes = [2, 1, 288, 128], strides = [1, 1, 1, 1]} : vector<2x2x288x128xf32> to vector<2x1x288x128xf32>
    %13 = vector.shape_cast %12 : vector<2x1x288x128xf32> to vector<2x288x128xf32>
    %14 = arith.maximumf %11, %13 : vector<2x288x128xf32>
    %15 = vector.shape_cast %14 : vector<2x288x128xf32> to vector<24x24x128xf32>
    %16 = vector.extract_strided_slice %15 {offsets = [0, 0, 0], sizes = [24, 12, 128], strides = [1, 1, 1]} : vector<24x24x128xf32> to vector<24x12x128xf32>
    %17 = vector.extract_strided_slice %15 {offsets = [0, 12, 0], sizes = [24, 12, 128], strides = [1, 1, 1]} : vector<24x24x128xf32> to vector<24x12x128xf32>
    %18 = arith.maximumf %16, %17 : vector<24x12x128xf32>
    %19 = vector.shape_cast %18 : vector<24x12x128xf32> to vector<2x12x12x128xf32>
    %20 = arith.truncf %19 : vector<2x12x12x128xf32> to vector<2x12x12x128xbf16>
    %21 = vector.extract_strided_slice %20 {offsets = [0, 0, 0, 0], sizes = [2, 12, 8, 128], strides = [1, 1, 1, 1]} : vector<2x12x12x128xbf16> to vector<2x12x8x128xbf16>
    %22 = vector.extract_strided_slice %20 {offsets = [0, 0, 1, 0], sizes = [2, 12, 8, 128], strides = [1, 1, 1, 1]} : vector<2x12x12x128xbf16> to vector<2x12x8x128xbf16>
    %23 = vector.extract_strided_slice %20 {offsets = [0, 0, 2, 0], sizes = [2, 12, 8, 128], strides = [1, 1, 1, 1]} : vector<2x12x12x128xbf16> to vector<2x12x8x128xbf16>
    %24 = vector.extract_strided_slice %20 {offsets = [0, 0, 3, 0], sizes = [2, 12, 8, 128], strides = [1, 1, 1, 1]} : vector<2x12x12x128xbf16> to vector<2x12x8x128xbf16>
    %25 = vector.extract_strided_slice %20 {offsets = [0, 0, 4, 0], sizes = [2, 12, 8, 128], strides = [1, 1, 1, 1]} : vector<2x12x12x128xbf16> to vector<2x12x8x128xbf16>
    %cst_7 = arith.constant 0.000000e+00 : f32
    %26 = vector.broadcast %cst_7 : f32 to vector<128x128xf32>
    %27 = vector.extract_strided_slice %21 {offsets = [0, 0, 0, 0], sizes = [2, 8, 8, 128], strides = [1, 1, 1, 1]} : vector<2x12x8x128xbf16> to vector<2x8x8x128xbf16>
    %28 = vector.shape_cast %27 : vector<2x8x8x128xbf16> to vector<128x128xbf16>
    %c0_8 = arith.constant 0 : index
    %c0_9 = arith.constant 0 : index
    %c0_10 = arith.constant 0 : index
    %29 = vector.load %arg4[%c0_8, %c0_9, %c0_10] : memref<25x128x128xbf16, #tpu.memory_space<vmem>>, vector<1x128x128xbf16>
    %30 = vector.shape_cast %29 : vector<1x128x128xbf16> to vector<128x128xbf16>
    %cst_11 = arith.constant dense<0.000000e+00> : vector<128x128xf32>
    %31 = tpu.matmul %28, %30, %cst_11 {dimension_numbers = #tpu.dot_dimension_numbers<[1], [0], [0], [1], [0, 0, 1, 1], [], []>} : vector<128x128xbf16>, vector<128x128xbf16>, vector<128x128xf32> -> vector<128x128xf32>
    %32 = arith.addf %26, %31 : vector<128x128xf32>
    %33 = vector.extract_strided_slice %22 {offsets = [0, 0, 0, 0], sizes = [2, 8, 8, 128], strides = [1, 1, 1, 1]} : vector<2x12x8x128xbf16> to vector<2x8x8x128xbf16>
    %34 = vector.shape_cast %33 : vector<2x8x8x128xbf16> to vector<128x128xbf16>
    %c1 = arith.constant 1 : index
    %c0_12 = arith.constant 0 : index
    %c0_13 = arith.constant 0 : index
    %35 = vector.load %arg4[%c1, %c0_12, %c0_13] : memref<25x128x128xbf16, #tpu.memory_space<vmem>>, vector<1x128x128xbf16>
    %36 = vector.shape_cast %35 : vector<1x128x128xbf16> to vector<128x128xbf16>
    %cst_14 = arith.constant dense<0.000000e+00> : vector<128x128xf32>
    %37 = tpu.matmul %34, %36, %cst_14 {dimension_numbers = #tpu.dot_dimension_numbers<[1], [0], [0], [1], [0, 0, 1, 1], [], []>} : vector<128x128xbf16>, vector<128x128xbf16>, vector<128x128xf32> -> vector<128x128xf32>
    %38 = arith.addf %32, %37 : vector<128x128xf32>
    %39 = vector.extract_strided_slice %23 {offsets = [0, 0, 0, 0], sizes = [2, 8, 8, 128], strides = [1, 1, 1, 1]} : vector<2x12x8x128xbf16> to vector<2x8x8x128xbf16>
    %40 = vector.shape_cast %39 : vector<2x8x8x128xbf16> to vector<128x128xbf16>
    %c2 = arith.constant 2 : index
    %c0_15 = arith.constant 0 : index
    %c0_16 = arith.constant 0 : index
    %41 = vector.load %arg4[%c2, %c0_15, %c0_16] : memref<25x128x128xbf16, #tpu.memory_space<vmem>>, vector<1x128x128xbf16>
    %42 = vector.shape_cast %41 : vector<1x128x128xbf16> to vector<128x128xbf16>
    %cst_17 = arith.constant dense<0.000000e+00> : vector<128x128xf32>
    %43 = tpu.matmul %40, %42, %cst_17 {dimension_numbers = #tpu.dot_dimension_numbers<[1], [0], [0], [1], [0, 0, 1, 1], [], []>} : vector<128x128xbf16>, vector<128x128xbf16>, vector<128x128xf32> -> vector<128x128xf32>
    %44 = arith.addf %38, %43 : vector<128x128xf32>
    %45 = vector.extract_strided_slice %24 {offsets = [0, 0, 0, 0], sizes = [2, 8, 8, 128], strides = [1, 1, 1, 1]} : vector<2x12x8x128xbf16> to vector<2x8x8x128xbf16>
    %46 = vector.shape_cast %45 : vector<2x8x8x128xbf16> to vector<128x128xbf16>
    %c3 = arith.constant 3 : index
    %c0_18 = arith.constant 0 : index
    %c0_19 = arith.constant 0 : index
    %47 = vector.load %arg4[%c3, %c0_18, %c0_19] : memref<25x128x128xbf16, #tpu.memory_space<vmem>>, vector<1x128x128xbf16>
    %48 = vector.shape_cast %47 : vector<1x128x128xbf16> to vector<128x128xbf16>
    %cst_20 = arith.constant dense<0.000000e+00> : vector<128x128xf32>
    %49 = tpu.matmul %46, %48, %cst_20 {dimension_numbers = #tpu.dot_dimension_numbers<[1], [0], [0], [1], [0, 0, 1, 1], [], []>} : vector<128x128xbf16>, vector<128x128xbf16>, vector<128x128xf32> -> vector<128x128xf32>
    %50 = arith.addf %44, %49 : vector<128x128xf32>
    %51 = vector.extract_strided_slice %25 {offsets = [0, 0, 0, 0], sizes = [2, 8, 8, 128], strides = [1, 1, 1, 1]} : vector<2x12x8x128xbf16> to vector<2x8x8x128xbf16>
    %52 = vector.shape_cast %51 : vector<2x8x8x128xbf16> to vector<128x128xbf16>
    %c4 = arith.constant 4 : index
    %c0_21 = arith.constant 0 : index
    %c0_22 = arith.constant 0 : index
    %53 = vector.load %arg4[%c4, %c0_21, %c0_22] : memref<25x128x128xbf16, #tpu.memory_space<vmem>>, vector<1x128x128xbf16>
    %54 = vector.shape_cast %53 : vector<1x128x128xbf16> to vector<128x128xbf16>
    %cst_23 = arith.constant dense<0.000000e+00> : vector<128x128xf32>
    %55 = tpu.matmul %52, %54, %cst_23 {dimension_numbers = #tpu.dot_dimension_numbers<[1], [0], [0], [1], [0, 0, 1, 1], [], []>} : vector<128x128xbf16>, vector<128x128xbf16>, vector<128x128xf32> -> vector<128x128xf32>
    %56 = arith.addf %50, %55 : vector<128x128xf32>
    %57 = vector.extract_strided_slice %21 {offsets = [0, 1, 0, 0], sizes = [2, 8, 8, 128], strides = [1, 1, 1, 1]} : vector<2x12x8x128xbf16> to vector<2x8x8x128xbf16>
    %58 = vector.shape_cast %57 : vector<2x8x8x128xbf16> to vector<128x128xbf16>
    %c5 = arith.constant 5 : index
    %c0_24 = arith.constant 0 : index
    %c0_25 = arith.constant 0 : index
    %59 = vector.load %arg4[%c5, %c0_24, %c0_25] : memref<25x128x128xbf16, #tpu.memory_space<vmem>>, vector<1x128x128xbf16>
    %60 = vector.shape_cast %59 : vector<1x128x128xbf16> to vector<128x128xbf16>
    %cst_26 = arith.constant dense<0.000000e+00> : vector<128x128xf32>
    %61 = tpu.matmul %58, %60, %cst_26 {dimension_numbers = #tpu.dot_dimension_numbers<[1], [0], [0], [1], [0, 0, 1, 1], [], []>} : vector<128x128xbf16>, vector<128x128xbf16>, vector<128x128xf32> -> vector<128x128xf32>
    %62 = arith.addf %56, %61 : vector<128x128xf32>
    %63 = vector.extract_strided_slice %22 {offsets = [0, 1, 0, 0], sizes = [2, 8, 8, 128], strides = [1, 1, 1, 1]} : vector<2x12x8x128xbf16> to vector<2x8x8x128xbf16>
    %64 = vector.shape_cast %63 : vector<2x8x8x128xbf16> to vector<128x128xbf16>
    %c6 = arith.constant 6 : index
    %c0_27 = arith.constant 0 : index
    %c0_28 = arith.constant 0 : index
    %65 = vector.load %arg4[%c6, %c0_27, %c0_28] : memref<25x128x128xbf16, #tpu.memory_space<vmem>>, vector<1x128x128xbf16>
    %66 = vector.shape_cast %65 : vector<1x128x128xbf16> to vector<128x128xbf16>
    %cst_29 = arith.constant dense<0.000000e+00> : vector<128x128xf32>
    %67 = tpu.matmul %64, %66, %cst_29 {dimension_numbers = #tpu.dot_dimension_numbers<[1], [0], [0], [1], [0, 0, 1, 1], [], []>} : vector<128x128xbf16>, vector<128x128xbf16>, vector<128x128xf32> -> vector<128x128xf32>
    %68 = arith.addf %62, %67 : vector<128x128xf32>
    %69 = vector.extract_strided_slice %23 {offsets = [0, 1, 0, 0], sizes = [2, 8, 8, 128], strides = [1, 1, 1, 1]} : vector<2x12x8x128xbf16> to vector<2x8x8x128xbf16>
    %70 = vector.shape_cast %69 : vector<2x8x8x128xbf16> to vector<128x128xbf16>
    %c7 = arith.constant 7 : index
    %c0_30 = arith.constant 0 : index
    %c0_31 = arith.constant 0 : index
    %71 = vector.load %arg4[%c7, %c0_30, %c0_31] : memref<25x128x128xbf16, #tpu.memory_space<vmem>>, vector<1x128x128xbf16>
    %72 = vector.shape_cast %71 : vector<1x128x128xbf16> to vector<128x128xbf16>
    %cst_32 = arith.constant dense<0.000000e+00> : vector<128x128xf32>
    %73 = tpu.matmul %70, %72, %cst_32 {dimension_numbers = #tpu.dot_dimension_numbers<[1], [0], [0], [1], [0, 0, 1, 1], [], []>} : vector<128x128xbf16>, vector<128x128xbf16>, vector<128x128xf32> -> vector<128x128xf32>
    %74 = arith.addf %68, %73 : vector<128x128xf32>
    %75 = vector.extract_strided_slice %24 {offsets = [0, 1, 0, 0], sizes = [2, 8, 8, 128], strides = [1, 1, 1, 1]} : vector<2x12x8x128xbf16> to vector<2x8x8x128xbf16>
    %76 = vector.shape_cast %75 : vector<2x8x8x128xbf16> to vector<128x128xbf16>
    %c8 = arith.constant 8 : index
    %c0_33 = arith.constant 0 : index
    %c0_34 = arith.constant 0 : index
    %77 = vector.load %arg4[%c8, %c0_33, %c0_34] : memref<25x128x128xbf16, #tpu.memory_space<vmem>>, vector<1x128x128xbf16>
    %78 = vector.shape_cast %77 : vector<1x128x128xbf16> to vector<128x128xbf16>
    %cst_35 = arith.constant dense<0.000000e+00> : vector<128x128xf32>
    %79 = tpu.matmul %76, %78, %cst_35 {dimension_numbers = #tpu.dot_dimension_numbers<[1], [0], [0], [1], [0, 0, 1, 1], [], []>} : vector<128x128xbf16>, vector<128x128xbf16>, vector<128x128xf32> -> vector<128x128xf32>
    %80 = arith.addf %74, %79 : vector<128x128xf32>
    %81 = vector.extract_strided_slice %25 {offsets = [0, 1, 0, 0], sizes = [2, 8, 8, 128], strides = [1, 1, 1, 1]} : vector<2x12x8x128xbf16> to vector<2x8x8x128xbf16>
    %82 = vector.shape_cast %81 : vector<2x8x8x128xbf16> to vector<128x128xbf16>
    %c9 = arith.constant 9 : index
    %c0_36 = arith.constant 0 : index
    %c0_37 = arith.constant 0 : index
    %83 = vector.load %arg4[%c9, %c0_36, %c0_37] : memref<25x128x128xbf16, #tpu.memory_space<vmem>>, vector<1x128x128xbf16>
    %84 = vector.shape_cast %83 : vector<1x128x128xbf16> to vector<128x128xbf16>
    %cst_38 = arith.constant dense<0.000000e+00> : vector<128x128xf32>
    %85 = tpu.matmul %82, %84, %cst_38 {dimension_numbers = #tpu.dot_dimension_numbers<[1], [0], [0], [1], [0, 0, 1, 1], [], []>} : vector<128x128xbf16>, vector<128x128xbf16>, vector<128x128xf32> -> vector<128x128xf32>
    %86 = arith.addf %80, %85 : vector<128x128xf32>
    %87 = vector.extract_strided_slice %21 {offsets = [0, 2, 0, 0], sizes = [2, 8, 8, 128], strides = [1, 1, 1, 1]} : vector<2x12x8x128xbf16> to vector<2x8x8x128xbf16>
    %88 = vector.shape_cast %87 : vector<2x8x8x128xbf16> to vector<128x128xbf16>
    %c10 = arith.constant 10 : index
    %c0_39 = arith.constant 0 : index
    %c0_40 = arith.constant 0 : index
    %89 = vector.load %arg4[%c10, %c0_39, %c0_40] : memref<25x128x128xbf16, #tpu.memory_space<vmem>>, vector<1x128x128xbf16>
    %90 = vector.shape_cast %89 : vector<1x128x128xbf16> to vector<128x128xbf16>
    %cst_41 = arith.constant dense<0.000000e+00> : vector<128x128xf32>
    %91 = tpu.matmul %88, %90, %cst_41 {dimension_numbers = #tpu.dot_dimension_numbers<[1], [0], [0], [1], [0, 0, 1, 1], [], []>} : vector<128x128xbf16>, vector<128x128xbf16>, vector<128x128xf32> -> vector<128x128xf32>
    %92 = arith.addf %86, %91 : vector<128x128xf32>
    %93 = vector.extract_strided_slice %22 {offsets = [0, 2, 0, 0], sizes = [2, 8, 8, 128], strides = [1, 1, 1, 1]} : vector<2x12x8x128xbf16> to vector<2x8x8x128xbf16>
    %94 = vector.shape_cast %93 : vector<2x8x8x128xbf16> to vector<128x128xbf16>
    %c11 = arith.constant 11 : index
    %c0_42 = arith.constant 0 : index
    %c0_43 = arith.constant 0 : index
    %95 = vector.load %arg4[%c11, %c0_42, %c0_43] : memref<25x128x128xbf16, #tpu.memory_space<vmem>>, vector<1x128x128xbf16>
    %96 = vector.shape_cast %95 : vector<1x128x128xbf16> to vector<128x128xbf16>
    %cst_44 = arith.constant dense<0.000000e+00> : vector<128x128xf32>
    %97 = tpu.matmul %94, %96, %cst_44 {dimension_numbers = #tpu.dot_dimension_numbers<[1], [0], [0], [1], [0, 0, 1, 1], [], []>} : vector<128x128xbf16>, vector<128x128xbf16>, vector<128x128xf32> -> vector<128x128xf32>
    %98 = arith.addf %92, %97 : vector<128x128xf32>
    %99 = vector.extract_strided_slice %23 {offsets = [0, 2, 0, 0], sizes = [2, 8, 8, 128], strides = [1, 1, 1, 1]} : vector<2x12x8x128xbf16> to vector<2x8x8x128xbf16>
    %100 = vector.shape_cast %99 : vector<2x8x8x128xbf16> to vector<128x128xbf16>
    %c12 = arith.constant 12 : index
    %c0_45 = arith.constant 0 : index
    %c0_46 = arith.constant 0 : index
    %101 = vector.load %arg4[%c12, %c0_45, %c0_46] : memref<25x128x128xbf16, #tpu.memory_space<vmem>>, vector<1x128x128xbf16>
    %102 = vector.shape_cast %101 : vector<1x128x128xbf16> to vector<128x128xbf16>
    %cst_47 = arith.constant dense<0.000000e+00> : vector<128x128xf32>
    %103 = tpu.matmul %100, %102, %cst_47 {dimension_numbers = #tpu.dot_dimension_numbers<[1], [0], [0], [1], [0, 0, 1, 1], [], []>} : vector<128x128xbf16>, vector<128x128xbf16>, vector<128x128xf32> -> vector<128x128xf32>
    %104 = arith.addf %98, %103 : vector<128x128xf32>
    %105 = vector.extract_strided_slice %24 {offsets = [0, 2, 0, 0], sizes = [2, 8, 8, 128], strides = [1, 1, 1, 1]} : vector<2x12x8x128xbf16> to vector<2x8x8x128xbf16>
    %106 = vector.shape_cast %105 : vector<2x8x8x128xbf16> to vector<128x128xbf16>
    %c13 = arith.constant 13 : index
    %c0_48 = arith.constant 0 : index
    %c0_49 = arith.constant 0 : index
    %107 = vector.load %arg4[%c13, %c0_48, %c0_49] : memref<25x128x128xbf16, #tpu.memory_space<vmem>>, vector<1x128x128xbf16>
    %108 = vector.shape_cast %107 : vector<1x128x128xbf16> to vector<128x128xbf16>
    %cst_50 = arith.constant dense<0.000000e+00> : vector<128x128xf32>
    %109 = tpu.matmul %106, %108, %cst_50 {dimension_numbers = #tpu.dot_dimension_numbers<[1], [0], [0], [1], [0, 0, 1, 1], [], []>} : vector<128x128xbf16>, vector<128x128xbf16>, vector<128x128xf32> -> vector<128x128xf32>
    %110 = arith.addf %104, %109 : vector<128x128xf32>
    %111 = vector.extract_strided_slice %25 {offsets = [0, 2, 0, 0], sizes = [2, 8, 8, 128], strides = [1, 1, 1, 1]} : vector<2x12x8x128xbf16> to vector<2x8x8x128xbf16>
    %112 = vector.shape_cast %111 : vector<2x8x8x128xbf16> to vector<128x128xbf16>
    %c14 = arith.constant 14 : index
    %c0_51 = arith.constant 0 : index
    %c0_52 = arith.constant 0 : index
    %113 = vector.load %arg4[%c14, %c0_51, %c0_52] : memref<25x128x128xbf16, #tpu.memory_space<vmem>>, vector<1x128x128xbf16>
    %114 = vector.shape_cast %113 : vector<1x128x128xbf16> to vector<128x128xbf16>
    %cst_53 = arith.constant dense<0.000000e+00> : vector<128x128xf32>
    %115 = tpu.matmul %112, %114, %cst_53 {dimension_numbers = #tpu.dot_dimension_numbers<[1], [0], [0], [1], [0, 0, 1, 1], [], []>} : vector<128x128xbf16>, vector<128x128xbf16>, vector<128x128xf32> -> vector<128x128xf32>
    %116 = arith.addf %110, %115 : vector<128x128xf32>
    %117 = vector.extract_strided_slice %21 {offsets = [0, 3, 0, 0], sizes = [2, 8, 8, 128], strides = [1, 1, 1, 1]} : vector<2x12x8x128xbf16> to vector<2x8x8x128xbf16>
    %118 = vector.shape_cast %117 : vector<2x8x8x128xbf16> to vector<128x128xbf16>
    %c15 = arith.constant 15 : index
    %c0_54 = arith.constant 0 : index
    %c0_55 = arith.constant 0 : index
    %119 = vector.load %arg4[%c15, %c0_54, %c0_55] : memref<25x128x128xbf16, #tpu.memory_space<vmem>>, vector<1x128x128xbf16>
    %120 = vector.shape_cast %119 : vector<1x128x128xbf16> to vector<128x128xbf16>
    %cst_56 = arith.constant dense<0.000000e+00> : vector<128x128xf32>
    %121 = tpu.matmul %118, %120, %cst_56 {dimension_numbers = #tpu.dot_dimension_numbers<[1], [0], [0], [1], [0, 0, 1, 1], [], []>} : vector<128x128xbf16>, vector<128x128xbf16>, vector<128x128xf32> -> vector<128x128xf32>
    %122 = arith.addf %116, %121 : vector<128x128xf32>
    %123 = vector.extract_strided_slice %22 {offsets = [0, 3, 0, 0], sizes = [2, 8, 8, 128], strides = [1, 1, 1, 1]} : vector<2x12x8x128xbf16> to vector<2x8x8x128xbf16>
    %124 = vector.shape_cast %123 : vector<2x8x8x128xbf16> to vector<128x128xbf16>
    %c16 = arith.constant 16 : index
    %c0_57 = arith.constant 0 : index
    %c0_58 = arith.constant 0 : index
    %125 = vector.load %arg4[%c16, %c0_57, %c0_58] : memref<25x128x128xbf16, #tpu.memory_space<vmem>>, vector<1x128x128xbf16>
    %126 = vector.shape_cast %125 : vector<1x128x128xbf16> to vector<128x128xbf16>
    %cst_59 = arith.constant dense<0.000000e+00> : vector<128x128xf32>
    %127 = tpu.matmul %124, %126, %cst_59 {dimension_numbers = #tpu.dot_dimension_numbers<[1], [0], [0], [1], [0, 0, 1, 1], [], []>} : vector<128x128xbf16>, vector<128x128xbf16>, vector<128x128xf32> -> vector<128x128xf32>
    %128 = arith.addf %122, %127 : vector<128x128xf32>
    %129 = vector.extract_strided_slice %23 {offsets = [0, 3, 0, 0], sizes = [2, 8, 8, 128], strides = [1, 1, 1, 1]} : vector<2x12x8x128xbf16> to vector<2x8x8x128xbf16>
    %130 = vector.shape_cast %129 : vector<2x8x8x128xbf16> to vector<128x128xbf16>
    %c17 = arith.constant 17 : index
    %c0_60 = arith.constant 0 : index
    %c0_61 = arith.constant 0 : index
    %131 = vector.load %arg4[%c17, %c0_60, %c0_61] : memref<25x128x128xbf16, #tpu.memory_space<vmem>>, vector<1x128x128xbf16>
    %132 = vector.shape_cast %131 : vector<1x128x128xbf16> to vector<128x128xbf16>
    %cst_62 = arith.constant dense<0.000000e+00> : vector<128x128xf32>
    %133 = tpu.matmul %130, %132, %cst_62 {dimension_numbers = #tpu.dot_dimension_numbers<[1], [0], [0], [1], [0, 0, 1, 1], [], []>} : vector<128x128xbf16>, vector<128x128xbf16>, vector<128x128xf32> -> vector<128x128xf32>
    %134 = arith.addf %128, %133 : vector<128x128xf32>
    %135 = vector.extract_strided_slice %24 {offsets = [0, 3, 0, 0], sizes = [2, 8, 8, 128], strides = [1, 1, 1, 1]} : vector<2x12x8x128xbf16> to vector<2x8x8x128xbf16>
    %136 = vector.shape_cast %135 : vector<2x8x8x128xbf16> to vector<128x128xbf16>
    %c18 = arith.constant 18 : index
    %c0_63 = arith.constant 0 : index
    %c0_64 = arith.constant 0 : index
    %137 = vector.load %arg4[%c18, %c0_63, %c0_64] : memref<25x128x128xbf16, #tpu.memory_space<vmem>>, vector<1x128x128xbf16>
    %138 = vector.shape_cast %137 : vector<1x128x128xbf16> to vector<128x128xbf16>
    %cst_65 = arith.constant dense<0.000000e+00> : vector<128x128xf32>
    %139 = tpu.matmul %136, %138, %cst_65 {dimension_numbers = #tpu.dot_dimension_numbers<[1], [0], [0], [1], [0, 0, 1, 1], [], []>} : vector<128x128xbf16>, vector<128x128xbf16>, vector<128x128xf32> -> vector<128x128xf32>
    %140 = arith.addf %134, %139 : vector<128x128xf32>
    %141 = vector.extract_strided_slice %25 {offsets = [0, 3, 0, 0], sizes = [2, 8, 8, 128], strides = [1, 1, 1, 1]} : vector<2x12x8x128xbf16> to vector<2x8x8x128xbf16>
    %142 = vector.shape_cast %141 : vector<2x8x8x128xbf16> to vector<128x128xbf16>
    %c19 = arith.constant 19 : index
    %c0_66 = arith.constant 0 : index
    %c0_67 = arith.constant 0 : index
    %143 = vector.load %arg4[%c19, %c0_66, %c0_67] : memref<25x128x128xbf16, #tpu.memory_space<vmem>>, vector<1x128x128xbf16>
    %144 = vector.shape_cast %143 : vector<1x128x128xbf16> to vector<128x128xbf16>
    %cst_68 = arith.constant dense<0.000000e+00> : vector<128x128xf32>
    %145 = tpu.matmul %142, %144, %cst_68 {dimension_numbers = #tpu.dot_dimension_numbers<[1], [0], [0], [1], [0, 0, 1, 1], [], []>} : vector<128x128xbf16>, vector<128x128xbf16>, vector<128x128xf32> -> vector<128x128xf32>
    %146 = arith.addf %140, %145 : vector<128x128xf32>
    %147 = vector.extract_strided_slice %21 {offsets = [0, 4, 0, 0], sizes = [2, 8, 8, 128], strides = [1, 1, 1, 1]} : vector<2x12x8x128xbf16> to vector<2x8x8x128xbf16>
    %148 = vector.shape_cast %147 : vector<2x8x8x128xbf16> to vector<128x128xbf16>
    %c20 = arith.constant 20 : index
    %c0_69 = arith.constant 0 : index
    %c0_70 = arith.constant 0 : index
    %149 = vector.load %arg4[%c20, %c0_69, %c0_70] : memref<25x128x128xbf16, #tpu.memory_space<vmem>>, vector<1x128x128xbf16>
    %150 = vector.shape_cast %149 : vector<1x128x128xbf16> to vector<128x128xbf16>
    %cst_71 = arith.constant dense<0.000000e+00> : vector<128x128xf32>
    %151 = tpu.matmul %148, %150, %cst_71 {dimension_numbers = #tpu.dot_dimension_numbers<[1], [0], [0], [1], [0, 0, 1, 1], [], []>} : vector<128x128xbf16>, vector<128x128xbf16>, vector<128x128xf32> -> vector<128x128xf32>
    %152 = arith.addf %146, %151 : vector<128x128xf32>
    %153 = vector.extract_strided_slice %22 {offsets = [0, 4, 0, 0], sizes = [2, 8, 8, 128], strides = [1, 1, 1, 1]} : vector<2x12x8x128xbf16> to vector<2x8x8x128xbf16>
    %154 = vector.shape_cast %153 : vector<2x8x8x128xbf16> to vector<128x128xbf16>
    %c21 = arith.constant 21 : index
    %c0_72 = arith.constant 0 : index
    %c0_73 = arith.constant 0 : index
    %155 = vector.load %arg4[%c21, %c0_72, %c0_73] : memref<25x128x128xbf16, #tpu.memory_space<vmem>>, vector<1x128x128xbf16>
    %156 = vector.shape_cast %155 : vector<1x128x128xbf16> to vector<128x128xbf16>
    %cst_74 = arith.constant dense<0.000000e+00> : vector<128x128xf32>
    %157 = tpu.matmul %154, %156, %cst_74 {dimension_numbers = #tpu.dot_dimension_numbers<[1], [0], [0], [1], [0, 0, 1, 1], [], []>} : vector<128x128xbf16>, vector<128x128xbf16>, vector<128x128xf32> -> vector<128x128xf32>
    %158 = arith.addf %152, %157 : vector<128x128xf32>
    %159 = vector.extract_strided_slice %23 {offsets = [0, 4, 0, 0], sizes = [2, 8, 8, 128], strides = [1, 1, 1, 1]} : vector<2x12x8x128xbf16> to vector<2x8x8x128xbf16>
    %160 = vector.shape_cast %159 : vector<2x8x8x128xbf16> to vector<128x128xbf16>
    %c22 = arith.constant 22 : index
    %c0_75 = arith.constant 0 : index
    %c0_76 = arith.constant 0 : index
    %161 = vector.load %arg4[%c22, %c0_75, %c0_76] : memref<25x128x128xbf16, #tpu.memory_space<vmem>>, vector<1x128x128xbf16>
    %162 = vector.shape_cast %161 : vector<1x128x128xbf16> to vector<128x128xbf16>
    %cst_77 = arith.constant dense<0.000000e+00> : vector<128x128xf32>
    %163 = tpu.matmul %160, %162, %cst_77 {dimension_numbers = #tpu.dot_dimension_numbers<[1], [0], [0], [1], [0, 0, 1, 1], [], []>} : vector<128x128xbf16>, vector<128x128xbf16>, vector<128x128xf32> -> vector<128x128xf32>
    %164 = arith.addf %158, %163 : vector<128x128xf32>
    %165 = vector.extract_strided_slice %24 {offsets = [0, 4, 0, 0], sizes = [2, 8, 8, 128], strides = [1, 1, 1, 1]} : vector<2x12x8x128xbf16> to vector<2x8x8x128xbf16>
    %166 = vector.shape_cast %165 : vector<2x8x8x128xbf16> to vector<128x128xbf16>
    %c23 = arith.constant 23 : index
    %c0_78 = arith.constant 0 : index
    %c0_79 = arith.constant 0 : index
    %167 = vector.load %arg4[%c23, %c0_78, %c0_79] : memref<25x128x128xbf16, #tpu.memory_space<vmem>>, vector<1x128x128xbf16>
    %168 = vector.shape_cast %167 : vector<1x128x128xbf16> to vector<128x128xbf16>
    %cst_80 = arith.constant dense<0.000000e+00> : vector<128x128xf32>
    %169 = tpu.matmul %166, %168, %cst_80 {dimension_numbers = #tpu.dot_dimension_numbers<[1], [0], [0], [1], [0, 0, 1, 1], [], []>} : vector<128x128xbf16>, vector<128x128xbf16>, vector<128x128xf32> -> vector<128x128xf32>
    %170 = arith.addf %164, %169 : vector<128x128xf32>
    %171 = vector.extract_strided_slice %25 {offsets = [0, 4, 0, 0], sizes = [2, 8, 8, 128], strides = [1, 1, 1, 1]} : vector<2x12x8x128xbf16> to vector<2x8x8x128xbf16>
    %172 = vector.shape_cast %171 : vector<2x8x8x128xbf16> to vector<128x128xbf16>
    %c24 = arith.constant 24 : index
    %c0_81 = arith.constant 0 : index
    %c0_82 = arith.constant 0 : index
    %173 = vector.load %arg4[%c24, %c0_81, %c0_82] : memref<25x128x128xbf16, #tpu.memory_space<vmem>>, vector<1x128x128xbf16>
    %174 = vector.shape_cast %173 : vector<1x128x128xbf16> to vector<128x128xbf16>
    %cst_83 = arith.constant dense<0.000000e+00> : vector<128x128xf32>
    %175 = tpu.matmul %172, %174, %cst_83 {dimension_numbers = #tpu.dot_dimension_numbers<[1], [0], [0], [1], [0, 0, 1, 1], [], []>} : vector<128x128xbf16>, vector<128x128xbf16>, vector<128x128xf32> -> vector<128x128xf32>
    %176 = arith.addf %170, %175 : vector<128x128xf32>
    %c0_84 = arith.constant 0 : index
    %c0_85 = arith.constant 0 : index
    %177 = vector.load %arg5[%c0_84, %c0_85] : memref<1x128xf32, #tpu.memory_space<vmem>>, vector<1x128xf32>
    %178 = vector.broadcast %177 : vector<1x128xf32> to vector<128x128xf32>
    %179 = arith.addf %176, %178 : vector<128x128xf32>
    %cst_86 = arith.constant 0.000000e+00 : f32
    %180 = vector.broadcast %cst_86 : f32 to vector<128x128xf32>
    %181 = arith.maximumf %179, %180 : vector<128x128xf32>
    %182 = vector.shape_cast %181 : vector<128x128xf32> to vector<8x16x128xf32>
    %183 = vector.extract_strided_slice %182 {offsets = [0, 0, 0], sizes = [8, 8, 128], strides = [1, 1, 1]} : vector<8x16x128xf32> to vector<8x8x128xf32>
    %184 = vector.extract_strided_slice %182 {offsets = [0, 8, 0], sizes = [8, 8, 128], strides = [1, 1, 1]} : vector<8x16x128xf32> to vector<8x8x128xf32>
    %185 = arith.maximumf %183, %184 : vector<8x8x128xf32>
    %186 = vector.shape_cast %185 : vector<8x8x128xf32> to vector<2x4x8x128xf32>
    %187 = vector.extract_strided_slice %186 {offsets = [0, 0, 0, 0], sizes = [2, 4, 1, 128], strides = [1, 1, 1, 1]} : vector<2x4x8x128xf32> to vector<2x4x1x128xf32>
    %188 = vector.extract_strided_slice %186 {offsets = [0, 0, 1, 0], sizes = [2, 4, 1, 128], strides = [1, 1, 1, 1]} : vector<2x4x8x128xf32> to vector<2x4x1x128xf32>
    %189 = arith.maximumf %187, %188 : vector<2x4x1x128xf32>
    %190 = arith.truncf %189 : vector<2x4x1x128xf32> to vector<2x4x1x128xbf16>
    %c0_87 = arith.constant 0 : index
    %c0_88 = arith.constant 0 : index
    %c0_89 = arith.constant 0 : index
    %c0_90 = arith.constant 0 : index
    %191 = vector.load %arg6[%c0_87, %c0_88, %c0_89, %c0_90] : memref<2x4x4x128xbf16, #tpu.memory_space<vmem>>, vector<2x4x1x128xbf16>
    tpu.vector_store %arg6[%c0_87, %c0_88, %c0_89, %c0_90], %190 {strides = array<i32>} : memref<2x4x4x128xbf16, #tpu.memory_space<vmem>>, vector<2x4x1x128xbf16>,
    %192 = vector.extract_strided_slice %186 {offsets = [0, 0, 2, 0], sizes = [2, 4, 1, 128], strides = [1, 1, 1, 1]} : vector<2x4x8x128xf32> to vector<2x4x1x128xf32>
    %193 = vector.extract_strided_slice %186 {offsets = [0, 0, 3, 0], sizes = [2, 4, 1, 128], strides = [1, 1, 1, 1]} : vector<2x4x8x128xf32> to vector<2x4x1x128xf32>
    %194 = arith.maximumf %192, %193 : vector<2x4x1x128xf32>
    %195 = arith.truncf %194 : vector<2x4x1x128xf32> to vector<2x4x1x128xbf16>
    %c0_91 = arith.constant 0 : index
    %c0_92 = arith.constant 0 : index
    %c1_93 = arith.constant 1 : index
    %c0_94 = arith.constant 0 : index
    %196 = vector.load %arg6[%c0_91, %c0_92, %c1_93, %c0_94] : memref<2x4x4x128xbf16, #tpu.memory_space<vmem>>, vector<2x4x1x128xbf16>
    tpu.vector_store %arg6[%c0_91, %c0_92, %c1_93, %c0_94], %195 {strides = array<i32>} : memref<2x4x4x128xbf16, #tpu.memory_space<vmem>>, vector<2x4x1x128xbf16>,
    %197 = vector.extract_strided_slice %186 {offsets = [0, 0, 4, 0], sizes = [2, 4, 1, 128], strides = [1, 1, 1, 1]} : vector<2x4x8x128xf32> to vector<2x4x1x128xf32>
    %198 = vector.extract_strided_slice %186 {offsets = [0, 0, 5, 0], sizes = [2, 4, 1, 128], strides = [1, 1, 1, 1]} : vector<2x4x8x128xf32> to vector<2x4x1x128xf32>
    %199 = arith.maximumf %197, %198 : vector<2x4x1x128xf32>
    %200 = arith.truncf %199 : vector<2x4x1x128xf32> to vector<2x4x1x128xbf16>
    %c0_95 = arith.constant 0 : index
    %c0_96 = arith.constant 0 : index
    %c2_97 = arith.constant 2 : index
    %c0_98 = arith.constant 0 : index
    %201 = vector.load %arg6[%c0_95, %c0_96, %c2_97, %c0_98] : memref<2x4x4x128xbf16, #tpu.memory_space<vmem>>, vector<2x4x1x128xbf16>
    tpu.vector_store %arg6[%c0_95, %c0_96, %c2_97, %c0_98], %200 {strides = array<i32>} : memref<2x4x4x128xbf16, #tpu.memory_space<vmem>>, vector<2x4x1x128xbf16>,
    %202 = vector.extract_strided_slice %186 {offsets = [0, 0, 6, 0], sizes = [2, 4, 1, 128], strides = [1, 1, 1, 1]} : vector<2x4x8x128xf32> to vector<2x4x1x128xf32>
    %203 = vector.extract_strided_slice %186 {offsets = [0, 0, 7, 0], sizes = [2, 4, 1, 128], strides = [1, 1, 1, 1]} : vector<2x4x8x128xf32> to vector<2x4x1x128xf32>
    %204 = arith.maximumf %202, %203 : vector<2x4x1x128xf32>
    %205 = arith.truncf %204 : vector<2x4x1x128xf32> to vector<2x4x1x128xbf16>
    %c0_99 = arith.constant 0 : index
    %c0_100 = arith.constant 0 : index
    %c3_101 = arith.constant 3 : index
    %c0_102 = arith.constant 0 : index
    %206 = vector.load %arg6[%c0_99, %c0_100, %c3_101, %c0_102] : memref<2x4x4x128xbf16, #tpu.memory_space<vmem>>, vector<2x4x1x128xbf16>
    tpu.vector_store %arg6[%c0_99, %c0_100, %c3_101, %c0_102], %205 {strides = array<i32>} : memref<2x4x4x128xbf16, #tpu.memory_space<vmem>>, vector<2x4x1x128xbf16>,
    return
  }
  func.func @transform_0(%arg0: i32) -> (i32, i32, i32) {
    %c0_i32 = arith.constant 0 : i32
    %c0_i32_0 = arith.constant 0 : i32
    %c0_i32_1 = arith.constant 0 : i32
    return %arg0, %c0_i32, %c0_i32_0 : i32, i32, i32
  }
  func.func @transform_1(%arg0: i32) -> (i32, i32) {
    %c0_i32 = arith.constant 0 : i32
    %c0_i32_0 = arith.constant 0 : i32
    %c0_i32_1 = arith.constant 0 : i32
    return %c0_i32, %c0_i32_0 : i32, i32
  }
  func.func @transform_2(%arg0: i32) -> (i32, i32) {
    %c0_i32 = arith.constant 0 : i32
    %c0_i32_0 = arith.constant 0 : i32
    %c0_i32_1 = arith.constant 0 : i32
    return %c0_i32, %c0_i32_0 : i32, i32
  }
  func.func @transform_3(%arg0: i32) -> (i32, i32, i32) {
    %c0_i32 = arith.constant 0 : i32
    %c0_i32_0 = arith.constant 0 : i32
    %c0_i32_1 = arith.constant 0 : i32
    %c0_i32_2 = arith.constant 0 : i32
    return %c0_i32, %c0_i32_0, %c0_i32_1 : i32, i32, i32
  }
  func.func @transform_4(%arg0: i32) -> (i32, i32) {
    %c0_i32 = arith.constant 0 : i32
    %c0_i32_0 = arith.constant 0 : i32
    %c0_i32_1 = arith.constant 0 : i32
    return %c0_i32, %c0_i32_0 : i32, i32
  }
  func.func @transform_5(%arg0: i32) -> (i32, i32, i32, i32) {
    %c0_i32 = arith.constant 0 : i32
    %c0_i32_0 = arith.constant 0 : i32
    %c0_i32_1 = arith.constant 0 : i32
    %c0_i32_2 = arith.constant 0 : i32
    return %arg0, %c0_i32, %c0_i32_0, %c0_i32_1 : i32, i32, i32, i32
  }
}

module attributes {stable_mosaic.version = 11 : i64} {
  func.func @_head_kernel(%arg0: i32, %arg1: memref<16x16x128xbf16, #tpu.memory_space<vmem>>, %arg2: memref<16x128x512xbf16, #tpu.memory_space<vmem>>, %arg3: memref<1x512xf32, #tpu.memory_space<vmem>>, %arg4: memref<512x128xbf16, #tpu.memory_space<vmem>>, %arg5: memref<1x128xf32, #tpu.memory_space<vmem>>, %arg6: memref<1x128xf32, #tpu.memory_space<vmem>>, %arg7: memref<1x1xf32, #tpu.memory_space<vmem>>, %arg8: memref<512x4xf32, #tpu.memory_space<vmem>>, %arg9: memref<1x4xf32, #tpu.memory_space<vmem>>, %arg10: memref<2x4xf32, #tpu.memory_space<vmem>>, %arg11: memref<16x1xf32, #tpu.memory_space<vmem>>) attributes {dimension_semantics = [#tpu.dimension_semantics<arbitrary>], iteration_bounds = array<i64: 1>, scalar_prefetch = 0 : i64, scratch_operands = 0 : i64, tpu.core_type = #tpu.core_type<tc>, window_params = [{pipeline_mode = #tpu.pipeline_mode<synchronous>, transform_indices = @transform_0, window_bounds = array<i64: 16, 16, 128>}, {pipeline_mode = #tpu.pipeline_mode<synchronous>, transform_indices = @transform_1, window_bounds = array<i64: 16, 128, 512>}, {pipeline_mode = #tpu.pipeline_mode<synchronous>, transform_indices = @transform_2, window_bounds = array<i64: 1, 512>}, {pipeline_mode = #tpu.pipeline_mode<synchronous>, transform_indices = @transform_3, window_bounds = array<i64: 512, 128>}, {pipeline_mode = #tpu.pipeline_mode<synchronous>, transform_indices = @transform_4, window_bounds = array<i64: 1, 128>}, {pipeline_mode = #tpu.pipeline_mode<synchronous>, transform_indices = @transform_5, window_bounds = array<i64: 1, 128>}, {pipeline_mode = #tpu.pipeline_mode<synchronous>, transform_indices = @transform_6, window_bounds = array<i64: 1, 1>}, {pipeline_mode = #tpu.pipeline_mode<synchronous>, transform_indices = @transform_7, window_bounds = array<i64: 512, 4>}, {pipeline_mode = #tpu.pipeline_mode<synchronous>, transform_indices = @transform_8, window_bounds = array<i64: 1, 4>}, {pipeline_mode = #tpu.pipeline_mode<synchronous>, transform_indices = @transform_9, window_bounds = array<i64: 2, 4>}, {pipeline_mode = #tpu.pipeline_mode<synchronous>, transform_indices = @transform_10, window_bounds = array<i64: 16, 1>}]} {
    %cst = arith.constant 0.000000e+00 : f32
    %0 = vector.broadcast %cst : f32 to vector<16x512xf32>
    %c0 = arith.constant 0 : index
    %c0_0 = arith.constant 0 : index
    %c0_1 = arith.constant 0 : index
    %1 = vector.load %arg1[%c0, %c0_0, %c0_1] : memref<16x16x128xbf16, #tpu.memory_space<vmem>>, vector<1x16x128xbf16>
    %2 = vector.shape_cast %1 : vector<1x16x128xbf16> to vector<16x128xbf16>
    %c0_2 = arith.constant 0 : index
    %c0_3 = arith.constant 0 : index
    %c0_4 = arith.constant 0 : index
    %3 = vector.load %arg2[%c0_2, %c0_3, %c0_4] : memref<16x128x512xbf16, #tpu.memory_space<vmem>>, vector<1x128x512xbf16>
    %4 = vector.shape_cast %3 : vector<1x128x512xbf16> to vector<128x512xbf16>
    %cst_5 = arith.constant dense<0.000000e+00> : vector<16x512xf32>
    %5 = tpu.matmul %2, %4, %cst_5 {dimension_numbers = #tpu.dot_dimension_numbers<[1], [0], [0], [1], [0, 0, 1, 1], [], []>} : vector<16x128xbf16>, vector<128x512xbf16>, vector<16x512xf32> -> vector<16x512xf32>
    %6 = arith.addf %0, %5 : vector<16x512xf32>
    %c1 = arith.constant 1 : index
    %c0_6 = arith.constant 0 : index
    %c0_7 = arith.constant 0 : index
    %7 = vector.load %arg1[%c1, %c0_6, %c0_7] : memref<16x16x128xbf16, #tpu.memory_space<vmem>>, vector<1x16x128xbf16>
    %8 = vector.shape_cast %7 : vector<1x16x128xbf16> to vector<16x128xbf16>
    %c1_8 = arith.constant 1 : index
    %c0_9 = arith.constant 0 : index
    %c0_10 = arith.constant 0 : index
    %9 = vector.load %arg2[%c1_8, %c0_9, %c0_10] : memref<16x128x512xbf16, #tpu.memory_space<vmem>>, vector<1x128x512xbf16>
    %10 = vector.shape_cast %9 : vector<1x128x512xbf16> to vector<128x512xbf16>
    %cst_11 = arith.constant dense<0.000000e+00> : vector<16x512xf32>
    %11 = tpu.matmul %8, %10, %cst_11 {dimension_numbers = #tpu.dot_dimension_numbers<[1], [0], [0], [1], [0, 0, 1, 1], [], []>} : vector<16x128xbf16>, vector<128x512xbf16>, vector<16x512xf32> -> vector<16x512xf32>
    %12 = arith.addf %6, %11 : vector<16x512xf32>
    %c2 = arith.constant 2 : index
    %c0_12 = arith.constant 0 : index
    %c0_13 = arith.constant 0 : index
    %13 = vector.load %arg1[%c2, %c0_12, %c0_13] : memref<16x16x128xbf16, #tpu.memory_space<vmem>>, vector<1x16x128xbf16>
    %14 = vector.shape_cast %13 : vector<1x16x128xbf16> to vector<16x128xbf16>
    %c2_14 = arith.constant 2 : index
    %c0_15 = arith.constant 0 : index
    %c0_16 = arith.constant 0 : index
    %15 = vector.load %arg2[%c2_14, %c0_15, %c0_16] : memref<16x128x512xbf16, #tpu.memory_space<vmem>>, vector<1x128x512xbf16>
    %16 = vector.shape_cast %15 : vector<1x128x512xbf16> to vector<128x512xbf16>
    %cst_17 = arith.constant dense<0.000000e+00> : vector<16x512xf32>
    %17 = tpu.matmul %14, %16, %cst_17 {dimension_numbers = #tpu.dot_dimension_numbers<[1], [0], [0], [1], [0, 0, 1, 1], [], []>} : vector<16x128xbf16>, vector<128x512xbf16>, vector<16x512xf32> -> vector<16x512xf32>
    %18 = arith.addf %12, %17 : vector<16x512xf32>
    %c3 = arith.constant 3 : index
    %c0_18 = arith.constant 0 : index
    %c0_19 = arith.constant 0 : index
    %19 = vector.load %arg1[%c3, %c0_18, %c0_19] : memref<16x16x128xbf16, #tpu.memory_space<vmem>>, vector<1x16x128xbf16>
    %20 = vector.shape_cast %19 : vector<1x16x128xbf16> to vector<16x128xbf16>
    %c3_20 = arith.constant 3 : index
    %c0_21 = arith.constant 0 : index
    %c0_22 = arith.constant 0 : index
    %21 = vector.load %arg2[%c3_20, %c0_21, %c0_22] : memref<16x128x512xbf16, #tpu.memory_space<vmem>>, vector<1x128x512xbf16>
    %22 = vector.shape_cast %21 : vector<1x128x512xbf16> to vector<128x512xbf16>
    %cst_23 = arith.constant dense<0.000000e+00> : vector<16x512xf32>
    %23 = tpu.matmul %20, %22, %cst_23 {dimension_numbers = #tpu.dot_dimension_numbers<[1], [0], [0], [1], [0, 0, 1, 1], [], []>} : vector<16x128xbf16>, vector<128x512xbf16>, vector<16x512xf32> -> vector<16x512xf32>
    %24 = arith.addf %18, %23 : vector<16x512xf32>
    %c4 = arith.constant 4 : index
    %c0_24 = arith.constant 0 : index
    %c0_25 = arith.constant 0 : index
    %25 = vector.load %arg1[%c4, %c0_24, %c0_25] : memref<16x16x128xbf16, #tpu.memory_space<vmem>>, vector<1x16x128xbf16>
    %26 = vector.shape_cast %25 : vector<1x16x128xbf16> to vector<16x128xbf16>
    %c4_26 = arith.constant 4 : index
    %c0_27 = arith.constant 0 : index
    %c0_28 = arith.constant 0 : index
    %27 = vector.load %arg2[%c4_26, %c0_27, %c0_28] : memref<16x128x512xbf16, #tpu.memory_space<vmem>>, vector<1x128x512xbf16>
    %28 = vector.shape_cast %27 : vector<1x128x512xbf16> to vector<128x512xbf16>
    %cst_29 = arith.constant dense<0.000000e+00> : vector<16x512xf32>
    %29 = tpu.matmul %26, %28, %cst_29 {dimension_numbers = #tpu.dot_dimension_numbers<[1], [0], [0], [1], [0, 0, 1, 1], [], []>} : vector<16x128xbf16>, vector<128x512xbf16>, vector<16x512xf32> -> vector<16x512xf32>
    %30 = arith.addf %24, %29 : vector<16x512xf32>
    %c5 = arith.constant 5 : index
    %c0_30 = arith.constant 0 : index
    %c0_31 = arith.constant 0 : index
    %31 = vector.load %arg1[%c5, %c0_30, %c0_31] : memref<16x16x128xbf16, #tpu.memory_space<vmem>>, vector<1x16x128xbf16>
    %32 = vector.shape_cast %31 : vector<1x16x128xbf16> to vector<16x128xbf16>
    %c5_32 = arith.constant 5 : index
    %c0_33 = arith.constant 0 : index
    %c0_34 = arith.constant 0 : index
    %33 = vector.load %arg2[%c5_32, %c0_33, %c0_34] : memref<16x128x512xbf16, #tpu.memory_space<vmem>>, vector<1x128x512xbf16>
    %34 = vector.shape_cast %33 : vector<1x128x512xbf16> to vector<128x512xbf16>
    %cst_35 = arith.constant dense<0.000000e+00> : vector<16x512xf32>
    %35 = tpu.matmul %32, %34, %cst_35 {dimension_numbers = #tpu.dot_dimension_numbers<[1], [0], [0], [1], [0, 0, 1, 1], [], []>} : vector<16x128xbf16>, vector<128x512xbf16>, vector<16x512xf32> -> vector<16x512xf32>
    %36 = arith.addf %30, %35 : vector<16x512xf32>
    %c6 = arith.constant 6 : index
    %c0_36 = arith.constant 0 : index
    %c0_37 = arith.constant 0 : index
    %37 = vector.load %arg1[%c6, %c0_36, %c0_37] : memref<16x16x128xbf16, #tpu.memory_space<vmem>>, vector<1x16x128xbf16>
    %38 = vector.shape_cast %37 : vector<1x16x128xbf16> to vector<16x128xbf16>
    %c6_38 = arith.constant 6 : index
    %c0_39 = arith.constant 0 : index
    %c0_40 = arith.constant 0 : index
    %39 = vector.load %arg2[%c6_38, %c0_39, %c0_40] : memref<16x128x512xbf16, #tpu.memory_space<vmem>>, vector<1x128x512xbf16>
    %40 = vector.shape_cast %39 : vector<1x128x512xbf16> to vector<128x512xbf16>
    %cst_41 = arith.constant dense<0.000000e+00> : vector<16x512xf32>
    %41 = tpu.matmul %38, %40, %cst_41 {dimension_numbers = #tpu.dot_dimension_numbers<[1], [0], [0], [1], [0, 0, 1, 1], [], []>} : vector<16x128xbf16>, vector<128x512xbf16>, vector<16x512xf32> -> vector<16x512xf32>
    %42 = arith.addf %36, %41 : vector<16x512xf32>
    %c7 = arith.constant 7 : index
    %c0_42 = arith.constant 0 : index
    %c0_43 = arith.constant 0 : index
    %43 = vector.load %arg1[%c7, %c0_42, %c0_43] : memref<16x16x128xbf16, #tpu.memory_space<vmem>>, vector<1x16x128xbf16>
    %44 = vector.shape_cast %43 : vector<1x16x128xbf16> to vector<16x128xbf16>
    %c7_44 = arith.constant 7 : index
    %c0_45 = arith.constant 0 : index
    %c0_46 = arith.constant 0 : index
    %45 = vector.load %arg2[%c7_44, %c0_45, %c0_46] : memref<16x128x512xbf16, #tpu.memory_space<vmem>>, vector<1x128x512xbf16>
    %46 = vector.shape_cast %45 : vector<1x128x512xbf16> to vector<128x512xbf16>
    %cst_47 = arith.constant dense<0.000000e+00> : vector<16x512xf32>
    %47 = tpu.matmul %44, %46, %cst_47 {dimension_numbers = #tpu.dot_dimension_numbers<[1], [0], [0], [1], [0, 0, 1, 1], [], []>} : vector<16x128xbf16>, vector<128x512xbf16>, vector<16x512xf32> -> vector<16x512xf32>
    %48 = arith.addf %42, %47 : vector<16x512xf32>
    %c8 = arith.constant 8 : index
    %c0_48 = arith.constant 0 : index
    %c0_49 = arith.constant 0 : index
    %49 = vector.load %arg1[%c8, %c0_48, %c0_49] : memref<16x16x128xbf16, #tpu.memory_space<vmem>>, vector<1x16x128xbf16>
    %50 = vector.shape_cast %49 : vector<1x16x128xbf16> to vector<16x128xbf16>
    %c8_50 = arith.constant 8 : index
    %c0_51 = arith.constant 0 : index
    %c0_52 = arith.constant 0 : index
    %51 = vector.load %arg2[%c8_50, %c0_51, %c0_52] : memref<16x128x512xbf16, #tpu.memory_space<vmem>>, vector<1x128x512xbf16>
    %52 = vector.shape_cast %51 : vector<1x128x512xbf16> to vector<128x512xbf16>
    %cst_53 = arith.constant dense<0.000000e+00> : vector<16x512xf32>
    %53 = tpu.matmul %50, %52, %cst_53 {dimension_numbers = #tpu.dot_dimension_numbers<[1], [0], [0], [1], [0, 0, 1, 1], [], []>} : vector<16x128xbf16>, vector<128x512xbf16>, vector<16x512xf32> -> vector<16x512xf32>
    %54 = arith.addf %48, %53 : vector<16x512xf32>
    %c9 = arith.constant 9 : index
    %c0_54 = arith.constant 0 : index
    %c0_55 = arith.constant 0 : index
    %55 = vector.load %arg1[%c9, %c0_54, %c0_55] : memref<16x16x128xbf16, #tpu.memory_space<vmem>>, vector<1x16x128xbf16>
    %56 = vector.shape_cast %55 : vector<1x16x128xbf16> to vector<16x128xbf16>
    %c9_56 = arith.constant 9 : index
    %c0_57 = arith.constant 0 : index
    %c0_58 = arith.constant 0 : index
    %57 = vector.load %arg2[%c9_56, %c0_57, %c0_58] : memref<16x128x512xbf16, #tpu.memory_space<vmem>>, vector<1x128x512xbf16>
    %58 = vector.shape_cast %57 : vector<1x128x512xbf16> to vector<128x512xbf16>
    %cst_59 = arith.constant dense<0.000000e+00> : vector<16x512xf32>
    %59 = tpu.matmul %56, %58, %cst_59 {dimension_numbers = #tpu.dot_dimension_numbers<[1], [0], [0], [1], [0, 0, 1, 1], [], []>} : vector<16x128xbf16>, vector<128x512xbf16>, vector<16x512xf32> -> vector<16x512xf32>
    %60 = arith.addf %54, %59 : vector<16x512xf32>
    %c10 = arith.constant 10 : index
    %c0_60 = arith.constant 0 : index
    %c0_61 = arith.constant 0 : index
    %61 = vector.load %arg1[%c10, %c0_60, %c0_61] : memref<16x16x128xbf16, #tpu.memory_space<vmem>>, vector<1x16x128xbf16>
    %62 = vector.shape_cast %61 : vector<1x16x128xbf16> to vector<16x128xbf16>
    %c10_62 = arith.constant 10 : index
    %c0_63 = arith.constant 0 : index
    %c0_64 = arith.constant 0 : index
    %63 = vector.load %arg2[%c10_62, %c0_63, %c0_64] : memref<16x128x512xbf16, #tpu.memory_space<vmem>>, vector<1x128x512xbf16>
    %64 = vector.shape_cast %63 : vector<1x128x512xbf16> to vector<128x512xbf16>
    %cst_65 = arith.constant dense<0.000000e+00> : vector<16x512xf32>
    %65 = tpu.matmul %62, %64, %cst_65 {dimension_numbers = #tpu.dot_dimension_numbers<[1], [0], [0], [1], [0, 0, 1, 1], [], []>} : vector<16x128xbf16>, vector<128x512xbf16>, vector<16x512xf32> -> vector<16x512xf32>
    %66 = arith.addf %60, %65 : vector<16x512xf32>
    %c11 = arith.constant 11 : index
    %c0_66 = arith.constant 0 : index
    %c0_67 = arith.constant 0 : index
    %67 = vector.load %arg1[%c11, %c0_66, %c0_67] : memref<16x16x128xbf16, #tpu.memory_space<vmem>>, vector<1x16x128xbf16>
    %68 = vector.shape_cast %67 : vector<1x16x128xbf16> to vector<16x128xbf16>
    %c11_68 = arith.constant 11 : index
    %c0_69 = arith.constant 0 : index
    %c0_70 = arith.constant 0 : index
    %69 = vector.load %arg2[%c11_68, %c0_69, %c0_70] : memref<16x128x512xbf16, #tpu.memory_space<vmem>>, vector<1x128x512xbf16>
    %70 = vector.shape_cast %69 : vector<1x128x512xbf16> to vector<128x512xbf16>
    %cst_71 = arith.constant dense<0.000000e+00> : vector<16x512xf32>
    %71 = tpu.matmul %68, %70, %cst_71 {dimension_numbers = #tpu.dot_dimension_numbers<[1], [0], [0], [1], [0, 0, 1, 1], [], []>} : vector<16x128xbf16>, vector<128x512xbf16>, vector<16x512xf32> -> vector<16x512xf32>
    %72 = arith.addf %66, %71 : vector<16x512xf32>
    %c12 = arith.constant 12 : index
    %c0_72 = arith.constant 0 : index
    %c0_73 = arith.constant 0 : index
    %73 = vector.load %arg1[%c12, %c0_72, %c0_73] : memref<16x16x128xbf16, #tpu.memory_space<vmem>>, vector<1x16x128xbf16>
    %74 = vector.shape_cast %73 : vector<1x16x128xbf16> to vector<16x128xbf16>
    %c12_74 = arith.constant 12 : index
    %c0_75 = arith.constant 0 : index
    %c0_76 = arith.constant 0 : index
    %75 = vector.load %arg2[%c12_74, %c0_75, %c0_76] : memref<16x128x512xbf16, #tpu.memory_space<vmem>>, vector<1x128x512xbf16>
    %76 = vector.shape_cast %75 : vector<1x128x512xbf16> to vector<128x512xbf16>
    %cst_77 = arith.constant dense<0.000000e+00> : vector<16x512xf32>
    %77 = tpu.matmul %74, %76, %cst_77 {dimension_numbers = #tpu.dot_dimension_numbers<[1], [0], [0], [1], [0, 0, 1, 1], [], []>} : vector<16x128xbf16>, vector<128x512xbf16>, vector<16x512xf32> -> vector<16x512xf32>
    %78 = arith.addf %72, %77 : vector<16x512xf32>
    %c13 = arith.constant 13 : index
    %c0_78 = arith.constant 0 : index
    %c0_79 = arith.constant 0 : index
    %79 = vector.load %arg1[%c13, %c0_78, %c0_79] : memref<16x16x128xbf16, #tpu.memory_space<vmem>>, vector<1x16x128xbf16>
    %80 = vector.shape_cast %79 : vector<1x16x128xbf16> to vector<16x128xbf16>
    %c13_80 = arith.constant 13 : index
    %c0_81 = arith.constant 0 : index
    %c0_82 = arith.constant 0 : index
    %81 = vector.load %arg2[%c13_80, %c0_81, %c0_82] : memref<16x128x512xbf16, #tpu.memory_space<vmem>>, vector<1x128x512xbf16>
    %82 = vector.shape_cast %81 : vector<1x128x512xbf16> to vector<128x512xbf16>
    %cst_83 = arith.constant dense<0.000000e+00> : vector<16x512xf32>
    %83 = tpu.matmul %80, %82, %cst_83 {dimension_numbers = #tpu.dot_dimension_numbers<[1], [0], [0], [1], [0, 0, 1, 1], [], []>} : vector<16x128xbf16>, vector<128x512xbf16>, vector<16x512xf32> -> vector<16x512xf32>
    %84 = arith.addf %78, %83 : vector<16x512xf32>
    %c14 = arith.constant 14 : index
    %c0_84 = arith.constant 0 : index
    %c0_85 = arith.constant 0 : index
    %85 = vector.load %arg1[%c14, %c0_84, %c0_85] : memref<16x16x128xbf16, #tpu.memory_space<vmem>>, vector<1x16x128xbf16>
    %86 = vector.shape_cast %85 : vector<1x16x128xbf16> to vector<16x128xbf16>
    %c14_86 = arith.constant 14 : index
    %c0_87 = arith.constant 0 : index
    %c0_88 = arith.constant 0 : index
    %87 = vector.load %arg2[%c14_86, %c0_87, %c0_88] : memref<16x128x512xbf16, #tpu.memory_space<vmem>>, vector<1x128x512xbf16>
    %88 = vector.shape_cast %87 : vector<1x128x512xbf16> to vector<128x512xbf16>
    %cst_89 = arith.constant dense<0.000000e+00> : vector<16x512xf32>
    %89 = tpu.matmul %86, %88, %cst_89 {dimension_numbers = #tpu.dot_dimension_numbers<[1], [0], [0], [1], [0, 0, 1, 1], [], []>} : vector<16x128xbf16>, vector<128x512xbf16>, vector<16x512xf32> -> vector<16x512xf32>
    %90 = arith.addf %84, %89 : vector<16x512xf32>
    %c15 = arith.constant 15 : index
    %c0_90 = arith.constant 0 : index
    %c0_91 = arith.constant 0 : index
    %91 = vector.load %arg1[%c15, %c0_90, %c0_91] : memref<16x16x128xbf16, #tpu.memory_space<vmem>>, vector<1x16x128xbf16>
    %92 = vector.shape_cast %91 : vector<1x16x128xbf16> to vector<16x128xbf16>
    %c15_92 = arith.constant 15 : index
    %c0_93 = arith.constant 0 : index
    %c0_94 = arith.constant 0 : index
    %93 = vector.load %arg2[%c15_92, %c0_93, %c0_94] : memref<16x128x512xbf16, #tpu.memory_space<vmem>>, vector<1x128x512xbf16>
    %94 = vector.shape_cast %93 : vector<1x128x512xbf16> to vector<128x512xbf16>
    %cst_95 = arith.constant dense<0.000000e+00> : vector<16x512xf32>
    %95 = tpu.matmul %92, %94, %cst_95 {dimension_numbers = #tpu.dot_dimension_numbers<[1], [0], [0], [1], [0, 0, 1, 1], [], []>} : vector<16x128xbf16>, vector<128x512xbf16>, vector<16x512xf32> -> vector<16x512xf32>
    %96 = arith.addf %90, %95 : vector<16x512xf32>
    %c0_96 = arith.constant 0 : index
    %c0_97 = arith.constant 0 : index
    %97 = vector.load %arg3[%c0_96, %c0_97] : memref<1x512xf32, #tpu.memory_space<vmem>>, vector<1x512xf32>
    %98 = vector.broadcast %97 : vector<1x512xf32> to vector<16x512xf32>
    %99 = arith.addf %96, %98 : vector<16x512xf32>
    %cst_98 = arith.constant 0.000000e+00 : f32
    %100 = vector.broadcast %cst_98 : f32 to vector<16x512xf32>
    %101 = arith.maximumf %99, %100 : vector<16x512xf32>
    %102 = arith.truncf %101 : vector<16x512xf32> to vector<16x512xbf16>
    %c0_99 = arith.constant 0 : index
    %c0_100 = arith.constant 0 : index
    %103 = vector.load %arg4[%c0_99, %c0_100] : memref<512x128xbf16, #tpu.memory_space<vmem>>, vector<512x128xbf16>
    %cst_101 = arith.constant dense<0.000000e+00> : vector<16x128xf32>
    %104 = tpu.matmul %102, %103, %cst_101 {dimension_numbers = #tpu.dot_dimension_numbers<[1], [0], [0], [1], [0, 0, 1, 1], [], []>} : vector<16x512xbf16>, vector<512x128xbf16>, vector<16x128xf32> -> vector<16x128xf32>
    %c0_102 = arith.constant 0 : index
    %c0_103 = arith.constant 0 : index
    %105 = vector.load %arg5[%c0_102, %c0_103] : memref<1x128xf32, #tpu.memory_space<vmem>>, vector<1x128xf32>
    %106 = vector.broadcast %105 : vector<1x128xf32> to vector<16x128xf32>
    %107 = arith.addf %104, %106 : vector<16x128xf32>
    %108 = math.tanh %107 : vector<16x128xf32>
    %c0_104 = arith.constant 0 : index
    %c0_105 = arith.constant 0 : index
    %109 = vector.load %arg6[%c0_104, %c0_105] : memref<1x128xf32, #tpu.memory_space<vmem>>, vector<1x128xf32>
    %110 = vector.broadcast %109 : vector<1x128xf32> to vector<16x128xf32>
    %111 = arith.mulf %108, %110 : vector<16x128xf32>
    %cst_106 = arith.constant dense<0.000000e+00> : vector<16xf32>
    %112 = vector.multi_reduction <add>, %111, %cst_106 [1] : vector<16x128xf32> to vector<16xf32>
    %113 = vector.shape_cast %112 : vector<16xf32> to vector<16x1xf32>
    %c0_107 = arith.constant 0 : index
    %c0_108 = arith.constant 0 : index
    %114 = vector.load %arg7[%c0_107, %c0_108] : memref<1x1xf32, #tpu.memory_space<vmem>>, vector<1x1xf32>
    %115 = vector.broadcast %114 : vector<1x1xf32> to vector<16x1xf32>
    %116 = arith.addf %113, %115 : vector<16x1xf32>
    %117 = vector.extract_strided_slice %116 {offsets = [0, 0], sizes = [8, 1], strides = [1, 1]} : vector<16x1xf32> to vector<8x1xf32>
    %cst_109 = arith.constant dense<0xFF800000> : vector<1xf32>
    %118 = vector.multi_reduction <maximumf>, %117, %cst_109 [0] : vector<8x1xf32> to vector<1xf32>
    %119 = vector.shape_cast %118 : vector<1xf32> to vector<1x1xf32>
    %120 = vector.broadcast %119 : vector<1x1xf32> to vector<8x1xf32>
    %121 = arith.subf %117, %120 : vector<8x1xf32>
    %122 = math.exp %121 : vector<8x1xf32>
    %cst_110 = arith.constant dense<0.000000e+00> : vector<1xf32>
    %123 = vector.multi_reduction <add>, %122, %cst_110 [0] : vector<8x1xf32> to vector<1xf32>
    %124 = vector.shape_cast %123 : vector<1xf32> to vector<1x1xf32>
    %125 = vector.broadcast %124 : vector<1x1xf32> to vector<8x1xf32>
    %126 = arith.divf %122, %125 : vector<8x1xf32>
    %127 = vector.extract_strided_slice %101 {offsets = [0, 0], sizes = [8, 512], strides = [1, 1]} : vector<16x512xf32> to vector<8x512xf32>
    %128 = vector.broadcast %126 : vector<8x1xf32> to vector<8x512xf32>
    %129 = arith.mulf %127, %128 : vector<8x512xf32>
    %cst_111 = arith.constant dense<0.000000e+00> : vector<512xf32>
    %130 = vector.multi_reduction <add>, %129, %cst_111 [0] : vector<8x512xf32> to vector<512xf32>
    %131 = vector.shape_cast %130 : vector<512xf32> to vector<1x512xf32>
    %c0_112 = arith.constant 0 : index
    %c0_113 = arith.constant 0 : index
    %132 = vector.load %arg8[%c0_112, %c0_113] : memref<512x4xf32, #tpu.memory_space<vmem>>, vector<512x4xf32>
    %cst_114 = arith.constant dense<0.000000e+00> : vector<1x4xf32>
    %133 = tpu.matmul %131, %132, %cst_114 {dimension_numbers = #tpu.dot_dimension_numbers<[1], [0], [0], [1], [0, 0, 1, 1], [], []>} : vector<1x512xf32>, vector<512x4xf32>, vector<1x4xf32> -> vector<1x4xf32>
    %c0_115 = arith.constant 0 : index
    %c0_116 = arith.constant 0 : index
    %134 = vector.load %arg9[%c0_115, %c0_116] : memref<1x4xf32, #tpu.memory_space<vmem>>, vector<1x4xf32>
    %135 = arith.addf %133, %134 : vector<1x4xf32>
    %cst_117 = arith.constant dense<0xFF800000> : vector<1xf32>
    %136 = vector.multi_reduction <maximumf>, %135, %cst_117 [1] : vector<1x4xf32> to vector<1xf32>
    %137 = vector.shape_cast %136 : vector<1xf32> to vector<1x1xf32>
    %138 = vector.broadcast %137 : vector<1x1xf32> to vector<1x4xf32>
    %139 = arith.subf %135, %138 : vector<1x4xf32>
    %140 = math.exp %139 : vector<1x4xf32>
    %cst_118 = arith.constant dense<0.000000e+00> : vector<1xf32>
    %141 = vector.multi_reduction <add>, %140, %cst_118 [1] : vector<1x4xf32> to vector<1xf32>
    %142 = vector.shape_cast %141 : vector<1xf32> to vector<1x1xf32>
    %143 = vector.broadcast %142 : vector<1x1xf32> to vector<1x4xf32>
    %144 = arith.divf %140, %143 : vector<1x4xf32>
    %c0_119 = arith.constant 0 : index
    %c0_120 = arith.constant 0 : index
    %145 = vector.load %arg10[%c0_119, %c0_120] : memref<2x4xf32, #tpu.memory_space<vmem>>, vector<1x4xf32>
    tpu.vector_store %arg10[%c0_119, %c0_120], %144 {strides = array<i32>} : memref<2x4xf32, #tpu.memory_space<vmem>>, vector<1x4xf32>,
    %c0_121 = arith.constant 0 : index
    %c0_122 = arith.constant 0 : index
    %146 = vector.load %arg11[%c0_121, %c0_122] : memref<16x1xf32, #tpu.memory_space<vmem>>, vector<8x1xf32>
    tpu.vector_store %arg11[%c0_121, %c0_122], %126 {strides = array<i32>} : memref<16x1xf32, #tpu.memory_space<vmem>>, vector<8x1xf32>,
    %147 = vector.extract_strided_slice %116 {offsets = [8, 0], sizes = [8, 1], strides = [1, 1]} : vector<16x1xf32> to vector<8x1xf32>
    %cst_123 = arith.constant dense<0xFF800000> : vector<1xf32>
    %148 = vector.multi_reduction <maximumf>, %147, %cst_123 [0] : vector<8x1xf32> to vector<1xf32>
    %149 = vector.shape_cast %148 : vector<1xf32> to vector<1x1xf32>
    %150 = vector.broadcast %149 : vector<1x1xf32> to vector<8x1xf32>
    %151 = arith.subf %147, %150 : vector<8x1xf32>
    %152 = math.exp %151 : vector<8x1xf32>
    %cst_124 = arith.constant dense<0.000000e+00> : vector<1xf32>
    %153 = vector.multi_reduction <add>, %152, %cst_124 [0] : vector<8x1xf32> to vector<1xf32>
    %154 = vector.shape_cast %153 : vector<1xf32> to vector<1x1xf32>
    %155 = vector.broadcast %154 : vector<1x1xf32> to vector<8x1xf32>
    %156 = arith.divf %152, %155 : vector<8x1xf32>
    %157 = vector.extract_strided_slice %101 {offsets = [8, 0], sizes = [8, 512], strides = [1, 1]} : vector<16x512xf32> to vector<8x512xf32>
    %158 = vector.broadcast %156 : vector<8x1xf32> to vector<8x512xf32>
    %159 = arith.mulf %157, %158 : vector<8x512xf32>
    %cst_125 = arith.constant dense<0.000000e+00> : vector<512xf32>
    %160 = vector.multi_reduction <add>, %159, %cst_125 [0] : vector<8x512xf32> to vector<512xf32>
    %161 = vector.shape_cast %160 : vector<512xf32> to vector<1x512xf32>
    %c0_126 = arith.constant 0 : index
    %c0_127 = arith.constant 0 : index
    %162 = vector.load %arg8[%c0_126, %c0_127] : memref<512x4xf32, #tpu.memory_space<vmem>>, vector<512x4xf32>
    %cst_128 = arith.constant dense<0.000000e+00> : vector<1x4xf32>
    %163 = tpu.matmul %161, %162, %cst_128 {dimension_numbers = #tpu.dot_dimension_numbers<[1], [0], [0], [1], [0, 0, 1, 1], [], []>} : vector<1x512xf32>, vector<512x4xf32>, vector<1x4xf32> -> vector<1x4xf32>
    %c0_129 = arith.constant 0 : index
    %c0_130 = arith.constant 0 : index
    %164 = vector.load %arg9[%c0_129, %c0_130] : memref<1x4xf32, #tpu.memory_space<vmem>>, vector<1x4xf32>
    %165 = arith.addf %163, %164 : vector<1x4xf32>
    %cst_131 = arith.constant dense<0xFF800000> : vector<1xf32>
    %166 = vector.multi_reduction <maximumf>, %165, %cst_131 [1] : vector<1x4xf32> to vector<1xf32>
    %167 = vector.shape_cast %166 : vector<1xf32> to vector<1x1xf32>
    %168 = vector.broadcast %167 : vector<1x1xf32> to vector<1x4xf32>
    %169 = arith.subf %165, %168 : vector<1x4xf32>
    %170 = math.exp %169 : vector<1x4xf32>
    %cst_132 = arith.constant dense<0.000000e+00> : vector<1xf32>
    %171 = vector.multi_reduction <add>, %170, %cst_132 [1] : vector<1x4xf32> to vector<1xf32>
    %172 = vector.shape_cast %171 : vector<1xf32> to vector<1x1xf32>
    %173 = vector.broadcast %172 : vector<1x1xf32> to vector<1x4xf32>
    %174 = arith.divf %170, %173 : vector<1x4xf32>
    %c1_133 = arith.constant 1 : index
    %c0_134 = arith.constant 0 : index
    %175 = vector.load %arg10[%c1_133, %c0_134] : memref<2x4xf32, #tpu.memory_space<vmem>>, vector<1x4xf32>
    tpu.vector_store %arg10[%c1_133, %c0_134], %174 {strides = array<i32>} : memref<2x4xf32, #tpu.memory_space<vmem>>, vector<1x4xf32>,
    %c8_135 = arith.constant 8 : index
    %c0_136 = arith.constant 0 : index
    %176 = vector.load %arg11[%c8_135, %c0_136] : memref<16x1xf32, #tpu.memory_space<vmem>>, vector<8x1xf32>
    tpu.vector_store %arg11[%c8_135, %c0_136], %156 {strides = array<i32>} : memref<16x1xf32, #tpu.memory_space<vmem>>, vector<8x1xf32>,
    return
  }
  func.func @transform_0(%arg0: i32) -> (i32, i32, i32) {
    %c0_i32 = arith.constant 0 : i32
    %c0_i32_0 = arith.constant 0 : i32
    %c0_i32_1 = arith.constant 0 : i32
    %c0_i32_2 = arith.constant 0 : i32
    return %c0_i32, %c0_i32_0, %c0_i32_1 : i32, i32, i32
  }
  func.func @transform_1(%arg0: i32) -> (i32, i32, i32) {
    %c0_i32 = arith.constant 0 : i32
    %c0_i32_0 = arith.constant 0 : i32
    %c0_i32_1 = arith.constant 0 : i32
    %c0_i32_2 = arith.constant 0 : i32
    return %c0_i32, %c0_i32_0, %c0_i32_1 : i32, i32, i32
  }
  func.func @transform_2(%arg0: i32) -> (i32, i32) {
    %c0_i32 = arith.constant 0 : i32
    %c0_i32_0 = arith.constant 0 : i32
    %c0_i32_1 = arith.constant 0 : i32
    return %c0_i32, %c0_i32_0 : i32, i32
  }
  func.func @transform_3(%arg0: i32) -> (i32, i32) {
    %c0_i32 = arith.constant 0 : i32
    %c0_i32_0 = arith.constant 0 : i32
    %c0_i32_1 = arith.constant 0 : i32
    return %c0_i32, %c0_i32_0 : i32, i32
  }
  func.func @transform_4(%arg0: i32) -> (i32, i32) {
    %c0_i32 = arith.constant 0 : i32
    %c0_i32_0 = arith.constant 0 : i32
    %c0_i32_1 = arith.constant 0 : i32
    return %c0_i32, %c0_i32_0 : i32, i32
  }
  func.func @transform_5(%arg0: i32) -> (i32, i32) {
    %c0_i32 = arith.constant 0 : i32
    %c0_i32_0 = arith.constant 0 : i32
    %c0_i32_1 = arith.constant 0 : i32
    return %c0_i32, %c0_i32_0 : i32, i32
  }
  func.func @transform_6(%arg0: i32) -> (i32, i32) {
    %c0_i32 = arith.constant 0 : i32
    %c0_i32_0 = arith.constant 0 : i32
    %c0_i32_1 = arith.constant 0 : i32
    return %c0_i32, %c0_i32_0 : i32, i32
  }
  func.func @transform_7(%arg0: i32) -> (i32, i32) {
    %c0_i32 = arith.constant 0 : i32
    %c0_i32_0 = arith.constant 0 : i32
    %c0_i32_1 = arith.constant 0 : i32
    return %c0_i32, %c0_i32_0 : i32, i32
  }
  func.func @transform_8(%arg0: i32) -> (i32, i32) {
    %c0_i32 = arith.constant 0 : i32
    %c0_i32_0 = arith.constant 0 : i32
    %c0_i32_1 = arith.constant 0 : i32
    return %c0_i32, %c0_i32_0 : i32, i32
  }
  func.func @transform_9(%arg0: i32) -> (i32, i32) {
    %c0_i32 = arith.constant 0 : i32
    %c0_i32_0 = arith.constant 0 : i32
    %c0_i32_1 = arith.constant 0 : i32
    return %c0_i32, %c0_i32_0 : i32, i32
  }
  func.func @transform_10(%arg0: i32) -> (i32, i32) {
    %c0_i32 = arith.constant 0 : i32
    %c0_i32_0 = arith.constant 0 : i32
    %c0_i32_1 = arith.constant 0 : i32
    return %c0_i32, %c0_i32_0 : i32, i32
  }
}

</mosaic_0001>

<bundles_post_ra>
// kernel: attention_forward.2
= control target key start
LH: loop header
LB: loop body
LE: loop exit
PB: predicated region body
PF: predicated region fallthrough
CT: control target
= control target key end

     0   :  { %s8592_s18 = smov 0   ;;  %s12076_s0 = inlined_call_operand.vmem [shape: bf16[16,576,32], index: 0, kind: input, shape index: {}]   ;;  %s12077_s1 = inlined_call_operand.vmem [shape: bf16[32,128], index: 1, kind: input, shape index: {}]   ;;  %s12078_s2 = inlined_call_operand.vmem [shape: f32[1,128], index: 2, kind: input, shape index: {}]   ;;  %s12079_s3 = inlined_call_operand.vmem [shape: bf16[25,128,128], index: 3, kind: input, shape index: {}]   ;;  %s12080_s4 = inlined_call_operand.vmem [shape: f32[1,128], index: 4, kind: input, shape index: {}]   ;;  %s12081_s5 = inlined_call_operand.vmem [shape: bf16[16,4,4,128], index: 5, kind: output, shape index: {}]  }
   0x1 LB: > { %s6627_s19 = sadd.s32 4294967295, %s8560_s18   ;;  %p6631_p0 = scmp.ge.s32.totalorder %s8560_s18, 1  ;;  %s8560_s18 = sphi %s8592_s18, %s15_s18  }
   0x2   : > { %p189_p1 = scmp.lt.s32.totalorder %s8560_s18, 9 }
   0x4   : > { %p190_p2 = pnand %p6631_p0, %p189_p1 }
   0x6   : > { %193 = sbr.rel (%p190_p2) target bundleno = 2431 (0x97f), region = 40 }
   0xb   : > { %v8321_v0 = vld [vmem:[%s12077_s1 + $0x8] sm:$0xff]  ;;  %s6632_s22 = sshll.u32 %s6627_s19, 1  ;;  %v8320_v1 = vld [vmem:[%s12077_s1] sm:$0xff]  ;;  %vm758_vm0 = vcmask 261120   ;;  %vm1608_vm1 = vcmask 1043456   ;;  %vm2375_vm2 = vcmask 1042432  }
   0xc   : > { %p220_p3 = scmp.lt.s32.totalorder %s6632_s22, 15  ;;  %981 = vmatpush.bf16.msra.mxu0 %v8321_v0  ;;  %8522 = vmatpush.bf16.msra.mxu3 %v8321_v0  ;;  %vm2376_vm3 = vcmask 1046532   ;;  %vm2929_vm4 = vcmask 1041408   ;;  %vm2930_vm5 = vcmask 1045508   ;;  %vm1841_vm6 = vsmask.f32 3328 }
   0xd   : > { %vm1842_vm7 = vsmask.f32 7440  ;;  %vm8780_vm8 = vmor %vm2375_vm2, %vm2376_vm3  ;;  %vm2604_vm9 = vsmask.f32 2304  ;;  %vm2605_vm11 = vsmask.f32 6416 }
   0xe   : > { %s12606_s22 = smov (!%p220_p3, %s6632_s22), 15  ;;  %vm8791_vm10 = vmor %vm2929_vm4, %vm2930_vm5  ;;  %vm6294_vm14 = vcmask 1040384   ;;  %vm6295_vm15 = vsmask.f32 256  ;;  %vm6472_vm2 = vcmask 1041409  }
   0xf   : > { %s8540_s25 = smul.u32 288, %s12606_s22  ;;  %vm8808_vm12 = vmor %vm1841_vm6, %vm1842_vm7  ;;  %s8247_s26 = sshll.u32 %s12606_s22, 3  ;;  %vm6473_vm3 = vsmask.f32 1280  ;;  %vm6543_vm7 = vsmask.f32 7942 }
  0x10   : > { %982 = vmatpush.bf16.msra.mxu0 %v8320_v1  ;;  %8523 = vmatpush.bf16.msra.mxu3 %v8320_v1  ;;  %vm8816_vm13 = vmor %vm2604_vm9, %vm2605_vm11  ;;  %s11839_s30 = scalar_lea.vmem %s12081_s5, %s8247_s26 }
  0x11   : > { %s8612_s28 = scalar_lea.vmem %s12076_s0, %s8540_s25  ;;  %vm11869_vm6 = vmand %vm6472_vm2, %vm6473_vm3 }
  0x12   : > { %v8248_v2 = vld [vmem:[%s8612_s28] sm:$0xff]  ;;  %v8249_v3 = vld [vmem:[%s8612_s28 + $0x8] sm:$0xff]  ;;  %v8250_v4 = vld [vmem:[%s8612_s28 + $0x10] sm:$0xff] }
  0x13   : > { %6933 = vmatmul.msk.bf16.vlgmr.msra.gmra.mxu0 %vm758_vm0, %v8248_v2  ;;  %v8251_v5 = vld [vmem:[%s8612_s28 + $0x18] sm:$0xff]  ;;  %v8252_v6 = vld [vmem:[%s8612_s28 + $0x20] sm:$0xff]  ;;  %v8253_v7 = vld [vmem:[%s8612_s28 + $0x28] sm:$0xff] }
  0x14   : > { %v8254_v8 = vld [vmem:[%s8612_s28 + $0x30] sm:$0xff]  ;;  %v8255_v9 = vld [vmem:[%s8612_s28 + $0x38] sm:$0xff]  ;;  %v8256_v10 = vld [vmem:[%s8612_s28 + $0x40] sm:$0xff] }
  0x15   : > { %v8257_v13 = vld [vmem:[%s8612_s28 + $0x48] sm:$0xff]  ;;  %v8258_v16 = vld [vmem:[%s8612_s28 + $0x50] sm:$0xff]  ;;  %v8259_v19 = vld [vmem:[%s8612_s28 + $0x58] sm:$0xff] }
  0x16   : > { %v8260_v22 = vld [vmem:[%s8612_s28 + $0x60] sm:$0xff]  ;;  %v8261_v25 = vld [vmem:[%s8612_s28 + $0x68] sm:$0xff]  ;;  %v8262_v28 = vld [vmem:[%s8612_s28 + $0x70] sm:$0xff] }
  0x17   : > { %v8263_v31 = vld [vmem:[%s8612_s28 + $0x78] sm:$0xff]  ;;  %v8264_v34 = vld [vmem:[%s8612_s28 + $0x80] sm:$0xff]  ;;  %v8265_v37 = vld [vmem:[%s8612_s28 + $0x88] sm:$0xff] }
  0x18   : > { %v8266_v40 = vld [vmem:[%s8612_s28 + $0x90] sm:$0xff]  ;;  %v8267_v43 = vld [vmem:[%s8612_s28 + $0x98] sm:$0xff]  ;;  %v8268_v46 = vld [vmem:[%s8612_s28 + $0xa0] sm:$0xff] }
  0x19   : > { %v8269_v49 = vld [vmem:[%s8612_s28 + $0xa8] sm:$0xff]  ;;  %v8270_v52 = vld [vmem:[%s8612_s28 + $0xb0] sm:$0xff]  ;;  %v8271_v55 = vld [vmem:[%s8612_s28 + $0xb8] sm:$0xff] }
  0x1a   : > { %v8272_v58 = vld [vmem:[%s8612_s28 + $0xc0] sm:$0xff]  ;;  %v8273_v61 = vld [vmem:[%s8612_s28 + $0xc8] sm:$0xff]  ;;  %v8274_v0 = vld [vmem:[%s8612_s28 + $0xd0] sm:$0xff] }
  0x1b   : > { %v8337_v2 = vld [vmem:[%s12079_s3 + $0x78] sm:$0xff] }
  0x1c   : > { %2165 = vmatpush.bf16.msra.mxu1 %v8337_v2  ;;  %8524 = vmatpush.bf16.msra.mxu2 %v8337_v2 }
  0x1d   : > { %8525 = vmatpush.bf16.msrb.mxu3 %v8337_v2  ;;  %v8331_v2 = vld [vmem:[%s12079_s3 + $0x48] sm:$0xff] }
  0x23   : > { %6934 = vmatmul.msk.bf16.gmra.mxu0 %vm758_vm0, %v8249_v3  ;;  %v8336_v3 = vld [vmem:[%s12079_s3 + $0x70] sm:$0xff] }
  0x24   : > { %2166 = vmatpush.bf16.msra.mxu1 %v8336_v3  ;;  %8526 = vmatpush.bf16.msra.mxu2 %v8336_v3 }
  0x25   : > { %8527 = vmatpush.bf16.msrb.mxu3 %v8336_v3 }
  0x33   : > { %6935 = vmatmul.msk.bf16.gmra.mxu0 %vm758_vm0, %v8250_v4 }
  0x43   : > { %6936 = vmatmul.msk.bf16.gmra.mxu0 %vm758_vm0, %v8251_v5  ;;  %v8749_v5 = vld [vmem:[%s12078_s2] ss:$0 sm:$0xff] }
  0x53   : > { %6937 = vmatmul.msk.bf16.gmra.mxu0 %vm758_vm0, %v8252_v6  ;;  %v8335_v6 = vld [vmem:[%s12079_s3 + $0x68] sm:$0xff] }
  0x54   : > { %2167 = vmatpush.bf16.msra.mxu1 %v8335_v6  ;;  %8528 = vmatpush.bf16.msra.mxu2 %v8335_v6 }
  0x55   : > { %8529 = vmatpush.bf16.msrb.mxu3 %v8335_v6 }
  0x63   : > { %6938 = vmatmul.msk.bf16.gmra.mxu0 %vm758_vm0, %v8253_v7 }
  0x73   : > { %6939 = vmatmul.msk.bf16.gmra.mxu0 %vm758_vm0, %v8254_v8 }
  0x83   : > { %6940 = vmatmul.msk.bf16.gmra.mxu0 %vm758_vm0, %v8255_v9  ;;  %v8334_v9 = vld [vmem:[%s12079_s3 + $0x60] sm:$0xff] }
  0x84   : > { %2168 = vmatpush.bf16.msra.mxu1 %v8334_v9  ;;  %8530 = vmatpush.bf16.msra.mxu2 %v8334_v9 }
  0x85   : > { %8531 = vmatpush.bf16.msrb.mxu3 %v8334_v9 }
  0x90   : > { %v8631_v11 = vpop.f32.mrf.mxu0 }
  0x93   : > { %6941 = vmatmul.msk.bf16.gmra.mxu0 %vm758_vm0, %v8256_v10 }
  0x98   : > { %v8634_v12 = vpop.f32.mrf.mxu0 }
  0x99   : > { %v987_v8 = vadd.f32 %v8749_v5, %v8634_v12  ;;  %v985_v12 = vadd.f32 %v8749_v5, %v8631_v11  ;;  %v8332_v11 = vld [vmem:[%s12079_s3 + $0x50] sm:$0xff] }
  0xa0   : > { %v8637_v14 = vpop.f32.mrf.mxu0 }
  0xa1   : > { %v990_v10 = vadd.f32 %v8749_v5, %v8637_v14 }
  0xa3   : > { %6942 = vmatmul.msk.bf16.gmra.mxu0 %vm758_vm0, %v8257_v13 }
  0xa8   : > { %v8640_v15 = vpop.f32.mrf.mxu0 }
  0xb0   : > { %v8643_v17 = vpop.f32.mrf.mxu0 }
  0xb3   : > { %6943 = vmatmul.msk.bf16.gmra.mxu0 %vm758_vm0, %v8258_v16  ;;  %v8275_v16 = vld [vmem:[%s8612_s28 + $0xd8] sm:$0xff] }
  0xb8   : > { %v8646_v18 = vpop.f32.mrf.mxu0 }
  0xc0   : > { %v8649_v20 = vpop.f32.mrf.mxu0 }
  0xc3   : > { %6944 = vmatmul.msk.bf16.gmra.mxu0 %vm758_vm0, %v8259_v19 }
  0xc8   : > { %v8652_v21 = vpop.f32.mrf.mxu0 }
  0xd0   : > { %v8655_v23 = vpop.f32.mrf.mxu0 }
  0xd3   : > { %6945 = vmatmul.msk.bf16.gmra.mxu0 %vm758_vm0, %v8260_v22 }
  0xd8   : > { %v8658_v24 = vpop.f32.mrf.mxu0 }
  0xe0   : > { %v8661_v26 = vpop.f32.mrf.mxu0 }
  0xe3   : > { %6946 = vmatmul.msk.bf16.gmra.mxu0 %vm758_vm0, %v8261_v25  ;;  %v1345_v25 = vmax.f32 %v987_v8, 0.0 }
  0xe8   : > { %v8664_v27 = vpop.f32.mrf.mxu0 }
  0xf0   : > { %v8667_v29 = vpop.f32.mrf.mxu0 }
  0xf3   : > { %6947 = vmatmul.msk.bf16.gmra.mxu0 %vm758_vm0, %v8262_v28 }
  0xf8   : > { %v8670_v30 = vpop.f32.mrf.mxu0 }
 0x100   : > { %v8673_v32 = vpop.f32.mrf.mxu0 }
 0x103   : > { %6948 = vmatmul.msk.bf16.gmra.mxu0 %vm758_vm0, %v8263_v31  ;;  %v8333_v31 = vld [vmem:[%s12079_s3 + $0x58] sm:$0xff] }
 0x104   : > { %2169 = vmatpush.bf16.msra.mxu1 %v8333_v31  ;;  %8532 = vmatpush.bf16.msra.mxu2 %v8333_v31 }
 0x105   : > { %8533 = vmatpush.bf16.msrb.mxu3 %v8333_v31 }
 0x108   : > { %v8676_v33 = vpop.f32.mrf.mxu0  ;;  %2170 = vmatpush.bf16.msra.mxu1 %v8332_v11  ;;  %8534 = vmatpush.bf16.msra.mxu2 %v8332_v11 }
 0x109   : > { %8535 = vmatpush.bf16.msrb.mxu3 %v8332_v11 }
 0x10c   : > { %2171 = vmatpush.bf16.msra.mxu1 %v8331_v2  ;;  %8536 = vmatpush.bf16.msra.mxu2 %v8331_v2 }
 0x10d   : > { %8537 = vmatpush.bf16.msrb.mxu3 %v8331_v2 }
 0x110   : > { %v8679_v35 = vpop.f32.mrf.mxu0 }
 0x113   : > { %6949 = vmatmul.msk.bf16.gmra.mxu0 %vm758_vm0, %v8264_v34  ;;  %v1346_v34 = vmax.f32 %v990_v10, 0.0  ;;  %v8330_v10 = vld [vmem:[%s12079_s3 + $0x40] sm:$0xff] }
 0x114   : > { %2172 = vmatpush.bf16.msra.mxu1 %v8330_v10  ;;  %8538 = vmatpush.bf16.msra.mxu2 %v8330_v10 }
 0x115   : > { %8539 = vmatpush.bf16.msrb.mxu3 %v8330_v10  ;;  %v995_v10 = vadd.f32 %v8749_v5, %v8643_v17 }
 0x118   : > { %v8682_v36 = vpop.f32.mrf.mxu0 }
 0x120   : > { %v8685_v38 = vpop.f32.mrf.mxu0 }
 0x123   : > { %6950 = vmatmul.msk.bf16.gmra.mxu0 %vm758_vm0, %v8265_v37 }
 0x128   : > { %v8688_v39 = vpop.f32.mrf.mxu0 }
 0x130   : > { %v8691_v41 = vpop.f32.mrf.mxu0 }
 0x133   : > { %6951 = vmatmul.msk.bf16.gmra.mxu0 %vm758_vm0, %v8266_v40 }
 0x138   : > { %v8694_v42 = vpop.f32.mrf.mxu0 }
 0x140   : > { %v8697_v44 = vpop.f32.mrf.mxu0 }
 0x143   : > { %6952 = vmatmul.msk.bf16.gmra.mxu0 %vm758_vm0, %v8267_v43 }
 0x148   : > { %v8700_v45 = vpop.f32.mrf.mxu0 }
 0x150   : > { %v8703_v47 = vpop.f32.mrf.mxu0 }
 0x153   : > { %6953 = vmatmul.msk.bf16.gmra.mxu0 %vm758_vm0, %v8268_v46  ;;  %v1344_v46 = vmax.f32 %v985_v12, 0.0 }
 0x158   : > { %v8706_v48 = vpop.f32.mrf.mxu0 }
 0x160   : > { %v8709_v50 = vpop.f32.mrf.mxu0 }
 0x163   : > { %6954 = vmatmul.msk.bf16.gmra.mxu0 %vm758_vm0, %v8269_v49 }
 0x168   : > { %v8712_v51 = vpop.f32.mrf.mxu0 }
 0x170   : > { %v8715_v53 = vpop.f32.mrf.mxu0 }
 0x173   : > { %6955 = vmatmul.msk.bf16.gmra.mxu0 %vm758_vm0, %v8270_v52 }
 0x178   : > { %v8718_v54 = vpop.f32.mrf.mxu0 }
 0x180   : > { %v8721_v56 = vpop.f32.mrf.mxu0 }
 0x183   : > { %6956 = vmatmul.msk.bf16.gmra.mxu0 %vm758_vm0, %v8271_v55 }
 0x188   : > { %v8724_v57 = vpop.f32.mrf.mxu0 }
 0x190   : > { %v8727_v59 = vpop.f32.mrf.mxu0 }
 0x193   : > { %6957 = vmatmul.msk.bf16.gmra.mxu0 %vm758_vm0, %v8272_v58 }
 0x198   : > { %v8730_v60 = vpop.f32.mrf.mxu0 }
 0x1a0   : > { %v8733_v62 = vpop.f32.mrf.mxu0 }
 0x1a3   : > { %6958 = vmatmul.msk.bf16.gmra.mxu0 %vm758_vm0, %v8273_v61 }
 0x1a8   : > { %v8736_v63 = vpop.f32.mrf.mxu0 }
 0x1a9   : > { %12254 = vst [vmem:[#allocation2_spill] sm:$0xff] %v8736_v63 }
 0x1b0   : > { %v1074_v1 = vpop.f32.mrf.mxu0 }
 0x1b1   : > { %v1075_v19 = vadd.f32 %v8749_v5, %v1074_v1 }
 0x1b3   : > { %6959 = vmatmul.msk.bf16.gmra.mxu0 %vm758_vm0, %v8274_v0  ;;  %v1380_v40 = vmax.f32 %v1075_v19, 0.0 }
 0x1b5   : > { %v1488_v55 = vmax.f32 %v1344_v46, %v1380_v40 }
 0x1b8   : > { %v1076_v4 = vpop.f32.mrf.mxu0 }
 0x1b9   : > { %v1077_v7 = vadd.f32 %v8749_v5, %v1076_v4 }
 0x1bb   : > { %v1381_v13 = vmax.f32 %v1077_v7, 0.0 }
 0x1bd   : > { %v1489_v14 = vmax.f32 %v1345_v25, %v1381_v13  ;;  %v8276_v25 = vld [vmem:[%s8612_s28 + $0xe0] sm:$0xff] }
 0x1bf   : > { %v1609_v49 = vrot.slane %v1489_v14, 4 }
 0x1c0   : > { %v1079_v22 = vpop.f32.mrf.mxu0 }
 0x1c1   : > { %v1080_v28 = vadd.f32 %v8749_v5, %v1079_v22 }
 0x1c3   : > { %v1382_v37 = vmax.f32 %v1080_v28, 0.0  ;;  %6960 = vmatmul.msk.bf16.gmra.mxu0 %vm758_vm0, %v8275_v16 }
 0x1c5   : > { %v1490_v43 = vmax.f32 %v1346_v34, %v1382_v37 }
 0x1c7   : > { %v1610_v52 = vrot.slane %v1490_v43, 4 }
 0x1c8   : > { %v1081_v58 = vpop.f32.mrf.mxu0 }
 0x1c9   : > { %v1611_v61 = vsel %vm1608_vm1, %v1609_v49, %v1610_v52  ;;  %v1730_v0 = vmax.f32 %v1489_v14, %v1610_v52  ;;  %v12259_v52 = vmov 0 }
 0x1ca   : > { %v1729_v1 = vmax.f32 %v1488_v55, %v1611_v61  ;;  %v12260_v52 = vsel %vm8808_vm12, 4294967295, %v12259_v52 }
 0x1cb   : > { %v1778_v3 = vpack.c.bf16 %v1730_v0, %v1730_v0  ;;  %12261 = vst [vmem:[#allocation3_spill] sm:$0xff] %v12260_v52  ;;  %v8395_v52 = vld [vmem:[%s12079_s3 + $0x248] sm:$0xff] }
 0x1cc   : > { %v8778_v4 = vpack.c.bf16 %v1729_v1, %v1729_v1  ;;  %v8365_v1 = vld [vmem:[%s12079_s3 + $0x158] sm:$0xff] }
 0x1cd   : > { %v2380_v6 = vrot.slane %v1778_v3, 5  ;;  %v2934_v7 = vrot.slane %v1778_v3, 6  ;;  %v1854_v8 = vshll.u32 %v1778_v3, 16  ;;  %v2611_v19 = vshrl.u32 %v1778_v3, 16 }
 0x1ce   : > { %v1845_v13 = vshrl.u32 %v8778_v4, 16  ;;  %v1848_v16 = vshll.u32 %v8778_v4, 16  ;;  %v7085_v12 = vrot.slane %v8778_v4, 9  ;;  %v7197_v31 = vrot.slane %v8778_v4, 10 }
 0x1cf   : > { %v2614_v28 = vrot.slane %v1854_v8, 6  ;;  %v2613_v46 = vrot.slane %v2611_v19, 5  ;;  %v8822_v3 = vrot.slane %v1854_v8, 5  ;;  %v997_v19 = vadd.f32 %v8749_v5, %v8646_v18 }
 0x1d0   : > { %v1084_v34 = vpop.f32.mrf.mxu0  ;;  %v1847_v14 = vrot.slane %v1845_v13, 4  ;;  %v1850_v37 = vrot.slane %v1848_v16, 5  ;;  %v2607_v40 = vrot.slane %v1845_v13, 5  ;;  %v2608_v43 = vrot.slane %v1848_v16, 6 }
 0x1d1   : > { %v8800_v11 = vsel %vm8780_vm8, %v7085_v12, %v2380_v6  ;;  %v8804_v49 = vsel %vm8791_vm10, %v7197_v31, %v2934_v7  ;;  %v1085_v0 = vadd.f32 %v8749_v5, %v1084_v34  ;;  %v2615_v7 = vor.u32 %v2614_v28, %v2613_v46 }
 0x1d2   : > { %v1851_v55 = vor.u32 %v1850_v37, %v1847_v14  ;;  %v2609_v61 = vor.u32 %v2608_v43, %v2607_v40  ;;  %v1348_v12 = vmax.f32 %v995_v10, 0.0  ;;  %v992_v31 = vadd.f32 %v8749_v5, %v8640_v15 }
 0x1d3   : > { %6961 = vmatmul.msk.bf16.gmra.mxu0 %vm758_vm0, %v8276_v25  ;;  %v1384_v8 = vmax.f32 %v1085_v0, 0.0  ;;  %v1082_v25 = vadd.f32 %v8749_v5, %v1081_v58  ;;  %v1349_v34 = vmax.f32 %v997_v19, 0.0 }
 0x1d4   : > { %v8820_v2 = vrot.slane %v1851_v55, 4  ;;  %v2610_v6 = vrot.slane %v2609_v61, 4  ;;  %v1347_v46 = vmax.f32 %v992_v31, 0.0 }
 0x1d5   : > { %v1492_v14 = vmax.f32 %v1348_v12, %v1384_v8  ;;  %v1383_v40 = vmax.f32 %v1082_v25, 0.0  ;;  %v2230_v8 = vunpack.c.l.b16 %v8778_v4 }
 0x1d6   : > { %v1857_v13 = vsel %vm8808_vm12, %v8820_v2, %v8822_v3  ;;  %v8832_v16 = vsel %vm8816_vm13, %v2610_v6, %v2615_v7  ;;  %v8277_v2 = vld [vmem:[%s8612_s28 + $0xe8] sm:$0xff] }
 0x1d7   : > { %v1612_v55 = vrot.slane %v1492_v14, 4  ;;  %v1491_v18 = vmax.f32 %v1347_v46, %v1383_v40 }
 0x1d8   : > { %v1086_v28 = vpop.f32.mrf.mxu0 }
 0x1d9   : > { %v1087_v17 = vadd.f32 %v8749_v5, %v1086_v28 }
 0x1db   : > { %v1385_v37 = vmax.f32 %v1087_v17, 0.0 }
 0x1dd   : > { %v1493_v43 = vmax.f32 %v1349_v34, %v1385_v37 }
 0x1df   : > { %v1613_v61 = vrot.slane %v1493_v43, 4 }
 0x1e0   : > { %v1089_v0 = vpop.f32.mrf.mxu0 }
 0x1e1   : > { %v1614_v58 = vsel %vm1608_vm1, %v1612_v55, %v1613_v61  ;;  %v1732_v3 = vmax.f32 %v1492_v14, %v1613_v61 }
 0x1e2   : > { %v1731_v6 = vmax.f32 %v1491_v18, %v1614_v58  ;;  %v2459_v18 = vunpack.c.l.b16 %v8800_v11 }
 0x1e3   : > { %v1780_v7 = vpack.c.bf16 %v1732_v3, %v1732_v3  ;;  %6962 = vmatmul.msk.bf16.gmra.mxu0 %vm758_vm0, %v8277_v2 }
 0x1e4   : > { %v8843_v10 = vpack.c.bf16 %v1731_v6, %v1731_v6 }
 0x1e5   : > { %v1868_v15 = vshll.u32 %v1780_v7, 16  ;;  %v2621_v19 = vshrl.u32 %v1780_v7, 16  ;;  %v2938_v31 = vrot.slane %v1780_v7, 6  ;;  %v2384_v37 = vrot.slane %v1780_v7, 5 }
 0x1e6   : > { %v1859_v25 = vshrl.u32 %v8843_v10, 16  ;;  %v1862_v28 = vshll.u32 %v8843_v10, 16  ;;  %v12082_v12 = vunpack.c.l.b16 %v8843_v10  ;;  %v7086_v17 = vrot.slane %v8843_v10, 9 }
 0x1e7   : > { %v2624_v34 = vrot.slane %v1868_v15, 6  ;;  %v2623_v14 = vrot.slane %v2621_v19, 5  ;;  %v7198_v7 = vrot.slane %v8843_v10, 10 }
 0x1e8   : > { %v1091_v40 = vpop.f32.mrf.mxu0  ;;  %v1861_v43 = vrot.slane %v1859_v25, 4  ;;  %v1864_v46 = vrot.slane %v1862_v28, 5  ;;  %v2617_v55 = vrot.slane %v1859_v25, 5  ;;  %v2618_v61 = vrot.slane %v1862_v28, 6 }
 0x1e9   : > { %v8852_v4 = vpack.c.b16 %v12082_v12, %v2230_v8  ;;  %v8856_v2 = vsel %vm8780_vm8, %v7086_v17, %v2384_v37  ;;  %v1092_v19 = vadd.f32 %v8749_v5, %v1091_v40  ;;  %v1870_v25 = vrot.slane %v1868_v15, 5 }
 0x1ea   : > { %v1865_v58 = vor.u32 %v1864_v46, %v1861_v43  ;;  %v2619_v3 = vor.u32 %v2618_v61, %v2617_v55  ;;  %v12085_v6 = vunpack.c.l.b16 %v8856_v2  ;;  %v2625_v28 = vor.u32 %v2624_v34, %v2623_v14  ;;  %v8278_v55 = vld [vmem:[%s8612_s28 + $0xf0] sm:$0xff] }
 0x1eb   : > { %v8868_v11 = vsel %vm8791_vm10, %v7198_v7, %v2938_v31  ;;  %v1002_v17 = vadd.f32 %v8749_v5, %v8652_v21  ;;  %v1005_v37 = vadd.f32 %v8749_v5, %v8655_v23  ;;  %v3013_v40 = vunpack.c.l.b16 %v8804_v49  ;;  %v8353_v7 = vld [vmem:[%s12079_s3 + $0xf8] sm:$0xff] }
 0x1ec   : > { %v1866_v63 = vrot.slane %v1865_v58, 4  ;;  %v2620_v8 = vrot.slane %v2619_v3, 4  ;;  %v8864_v12 = vpack.c.b16 %v12085_v6, %v2459_v18  ;;  %v12084_v15 = vunpack.c.l.b16 %v8868_v11  ;;  %2864 = vmatpush.bf16.msrb.mxu1 %v8353_v7  ;;  %v8350_v7 = vld [vmem:[%s12079_s3 + $0xe0] sm:$0xff]  ;;  %v8349_v6 = vld [vmem:[%s12079_s3 + $0xd8] sm:$0xff] }
 0x1ed   : > { %v2085_v14 = vunpack.c.l.b16 %v1857_v13  ;;  %v2784_v31 = vunpack.c.l.b16 %v8832_v16  ;;  %v1387_v46 = vmax.f32 %v1092_v19, 0.0  ;;  %v1090_v61 = vadd.f32 %v8749_v5, %v1089_v0 }
 0x1ee   : > { %12264 = vst [vmem:[#allocation4_spill] sm:$0xff] %v8864_v12  ;;  %v1871_v34 = vsel %vm8808_vm12, %v1866_v63, %v1870_v25  ;;  %v8880_v43 = vsel %vm8816_vm13, %v2620_v8, %v2625_v28  ;;  %v8889_v49 = vpack.c.b16 %v12084_v15, %v3013_v40  ;;  %v1351_v13 = vmax.f32 %v1002_v17, 0.0  ;;  %v8352_v40 = vld [vmem:[%s12079_s3 + $0xf0] sm:$0xff] }
 0x1ef   : > { %v8884_v21 = vunpack.c.l.b16 %v1871_v34  ;;  %v12083_v23 = vunpack.c.l.b16 %v8880_v43  ;;  %v1000_v3 = vadd.f32 %v8749_v5, %v8649_v20  ;;  %v1352_v19 = vmax.f32 %v1005_v37, 0.0 }
 0x1f0   : > { %12266 = vst [vmem:[#allocation6_spill] sm:$0xff] %v8889_v49  ;;  %v1094_v63 = vpop.f32.mrf.mxu0  ;;  %v1495_v25 = vmax.f32 %v1351_v13, %v1387_v46  ;;  %v1386_v28 = vmax.f32 %v1090_v61, 0.0  ;;  %2865 = vmatpush.bf16.msrb.mxu1 %v8352_v40 }
 0x1f1   : > { %12265 = vst [vmem:[#allocation5_spill] sm:$0xff] %v8884_v21  ;;  %v1095_v18 = vadd.f32 %v8749_v5, %v1094_v63  ;;  %v2101_v58 = vpack.c.b16 %v8884_v21, %v2085_v14  ;;  %v8896_v16 = vpack.c.b16 %v12083_v23, %v2784_v31  ;;  %v1350_v17 = vmax.f32 %v1000_v3, 0.0 }
 0x1f2   : > { %v1615_v34 = vrot.slane %v1495_v25, 4 }
 0x1f3   : > { %v1388_v0 = vmax.f32 %v1095_v18, 0.0  ;;  %6963 = vmatmul.msk.bf16.gmra.mxu0 %vm758_vm0, %v8278_v55  ;;  %2173 = vmatmul.bf16.vlgmr.msra.gmra.mxu1 %v2101_v58  ;;  %v1494_v14 = vmax.f32 %v1350_v17, %v1386_v28  ;;  %v8351_v55 = vld [vmem:[%s12079_s3 + $0xe8] sm:$0xff] }
 0x1f4   : > { %2866 = vmatpush.bf16.msrb.mxu1 %v8351_v55  ;;  %v12267_v55 = vunpack.c.l.b16 %v8843_v10 }
 0x1f5   : > { %v1496_v8 = vmax.f32 %v1352_v19, %v1388_v0 }
 0x1f7   : > { %v1616_v20 = vrot.slane %v1496_v8, 4  ;;  %v8279_v8 = vld [vmem:[%s8612_s28 + $0xf8] sm:$0xff] }
 0x1f8   : > { %v1096_v31 = vpop.f32.mrf.mxu0  ;;  %2867 = vmatpush.bf16.msrb.mxu1 %v8350_v7 }
 0x1f9   : > { %v1617_v37 = vsel %vm1608_vm1, %v1615_v34, %v1616_v20  ;;  %v1734_v46 = vmax.f32 %v1495_v25, %v1616_v20 }
 0x1fa   : > { %v1733_v63 = vmax.f32 %v1494_v14, %v1617_v37 }
 0x1fb   : > { %v1782_v61 = vpack.c.bf16 %v1734_v46, %v1734_v46 }
 0x1fc   : > { %v8911_v13 = vpack.c.bf16 %v1733_v63, %v1733_v63  ;;  %2868 = vmatpush.bf16.msrb.mxu1 %v8349_v6 }
 0x1fd   : > { %v1882_v18 = vshll.u32 %v1782_v61, 16  ;;  %v2631_v58 = vshrl.u32 %v1782_v61, 16  ;;  %v2388_v3 = vrot.slane %v1782_v61, 5 }
 0x1fe   : > { %v1873_v19 = vshrl.u32 %v8911_v13, 16  ;;  %v1876_v25 = vshll.u32 %v8911_v13, 16  ;;  %v12086_v0 = vunpack.c.l.b16 %v8911_v13  ;;  %v7087_v28 = vrot.slane %v8911_v13, 9 }
 0x1ff   : > { %v2633_v17 = vrot.slane %v2631_v58, 5  ;;  %v2634_v40 = vrot.slane %v1882_v18, 6  ;;  %v7199_v34 = vrot.slane %v8911_v13, 10  ;;  %v1884_v10 = vrot.slane %v1882_v18, 5 }
 0x200   : > { %v1099_v20 = vpop.f32.mrf.mxu0  ;;  %v1875_v14 = vrot.slane %v1873_v19, 4  ;;  %v1878_v37 = vrot.slane %v1876_v25, 5  ;;  %v2627_v46 = vrot.slane %v1873_v19, 5  ;;  %v2628_v63 = vrot.slane %v1876_v25, 6 }
 0x201   : > { %v8926_v23 = vpack.c.b16 %v12086_v0, %v12267_v55  ;;  %v8930_v15 = vsel %vm8780_vm8, %v7087_v28, %v2388_v3  ;;  %v2942_v19 = vrot.slane %v1782_v61, 6  ;;  %v1100_v25 = vadd.f32 %v8749_v5, %v1099_v20 }
 0x202   : > { %v1879_v58 = vor.u32 %v1878_v37, %v1875_v14  ;;  %v2629_v7 = vor.u32 %v2628_v63, %v2627_v46  ;;  %v12089_v49 = vunpack.c.l.b16 %v8930_v15  ;;  %v2635_v55 = vor.u32 %v2634_v40, %v2633_v17 }
 0x203   : > { %12268 = vst [vmem:[#allocation7_spill] sm:$0xff] %v8926_v23  ;;  %6964 = vmatmul.msk.bf16.gmra.mxu0 %vm758_vm0, %v8279_v8  ;;  %v12269_v3 = vunpack.c.l.b16 %v8856_v2  ;;  %v8946_v14 = vsel %vm8791_vm10, %v7199_v34, %v2942_v19  ;;  %v1010_v61 = vadd.f32 %v8749_v5, %v8661_v26  ;;  %v1012_v18 = vadd.f32 %v8749_v5, %v8664_v27  ;;  %v8348_v2 = vld [vmem:[%s12079_s3 + $0xd0] sm:$0xff] }
 0x204   : > { %v1880_v0 = vrot.slane %v1879_v58, 4  ;;  %v2630_v23 = vrot.slane %v2629_v7, 4  ;;  %v12088_v8 = vunpack.c.l.b16 %v8946_v14  ;;  %v1390_v40 = vmax.f32 %v1100_v25, 0.0  ;;  %2869 = vmatpush.bf16.msrb.mxu1 %v8348_v2 }
 0x205   : > { %v8942_v28 = vpack.c.b16 %v12089_v49, %v12269_v3  ;;  %v12272_v20 = vunpack.c.l.b16 %v8868_v11  ;;  %v1354_v46 = vmax.f32 %v1010_v61, 0.0  ;;  %v12274_v58 = vunpack.c.l.b16 %v8880_v43  ;;  %v8346_v43 = vld [vmem:[%s12079_s3 + $0xc0] sm:$0xff] }
 0x206   : > { %v1885_v6 = vsel %vm8808_vm12, %v1880_v0, %v1884_v10  ;;  %v8960_v17 = vsel %vm8816_vm13, %v2630_v23, %v2635_v55  ;;  %v1097_v0 = vadd.f32 %v8749_v5, %v1096_v31  ;;  %v1007_v7 = vadd.f32 %v8749_v5, %v8658_v24  ;;  %v8347_v31 = vld [vmem:[%s12079_s3 + $0xc8] sm:$0xff] }
 0x207   : > { %12270 = vst [vmem:[#allocation8_spill] sm:$0xff] %v8942_v28  ;;  %v8962_v34 = vunpack.c.l.b16 %v1885_v6  ;;  %v12087_v26 = vunpack.c.l.b16 %v8960_v17  ;;  %v8969_v27 = vpack.c.b16 %v12088_v8, %v12272_v20  ;;  %v1355_v19 = vmax.f32 %v1012_v18, 0.0  ;;  %v8280_v20 = vld [vmem:[%s8612_s28 + $0x100] sm:$0xff] }
 0x208   : > { %v1101_v37 = vpop.f32.mrf.mxu0  ;;  %v1498_v25 = vmax.f32 %v1354_v46, %v1390_v40  ;;  %v1389_v55 = vmax.f32 %v1097_v0, 0.0  ;;  %2870 = vmatpush.bf16.msrb.mxu1 %v8347_v31  ;;  %v1353_v61 = vmax.f32 %v1007_v7, 0.0 }
 0x209   : > { %12271 = vst [vmem:[#allocation9_spill] sm:$0xff] %v8962_v34  ;;  %v1102_v23 = vadd.f32 %v8749_v5, %v1101_v37  ;;  %v8979_v11 = vpack.c.b16 %v12087_v26, %v12274_v58 }
 0x20a   : > { %12273 = vst [vmem:[#allocation10_spill] sm:$0xff] %v8969_v27  ;;  %v1618_v6 = vrot.slane %v1498_v25, 4  ;;  %v1497_v37 = vmax.f32 %v1353_v61, %v1389_v55  ;;  %v12278_v27 = vunpack.c.l.b16 %v8930_v15 }
 0x20b   : > { %12275 = vst [vmem:[#allocation11_spill] sm:$0xff] %v8979_v11  ;;  %v1391_v10 = vmax.f32 %v1102_v23, 0.0 }
 0x20c   : > { %2871 = vmatpush.bf16.msrb.mxu1 %v8346_v43 }
 0x20d   : > { %v1499_v3 = vmax.f32 %v1355_v19, %v1391_v10 }
 0x20f   : > { %v1619_v2 = vrot.slane %v1499_v3, 4 }
 0x210   : > { %v1104_v24 = vpop.f32.mrf.mxu0 }
 0x211   : > { %v1620_v58 = vsel %vm1608_vm1, %v1618_v6, %v1619_v2  ;;  %v1736_v63 = vmax.f32 %v1498_v25, %v1619_v2 }
 0x212   : > { %v1735_v18 = vmax.f32 %v1497_v37, %v1620_v58  ;;  %v12276_v37 = vunpack.c.l.b16 %v8911_v13 }
 0x213   : > { %v1784_v40 = vpack.c.bf16 %v1736_v63, %v1736_v63  ;;  %6965 = vmatmul.msk.bf16.gmra.mxu0 %vm758_vm0, %v8280_v20 }
 0x214   : > { %v8992_v0 = vpack.c.bf16 %v1735_v18, %v1735_v18 }
 0x215   : > { %v1896_v46 = vshll.u32 %v1784_v40, 16  ;;  %v2641_v23 = vshrl.u32 %v1784_v40, 16  ;;  %v2392_v7 = vrot.slane %v1784_v40, 5  ;;  %v2946_v49 = vrot.slane %v1784_v40, 6 }
 0x216   : > { %v1887_v31 = vshrl.u32 %v8992_v0, 16  ;;  %v1890_v19 = vshll.u32 %v8992_v0, 16  ;;  %v2233_v10 = vunpack.c.l.b16 %v8992_v0  ;;  %v7088_v55 = vrot.slane %v8992_v0, 9 }
 0x217   : > { %v2643_v3 = vrot.slane %v2641_v23, 5  ;;  %v2644_v61 = vrot.slane %v1896_v46, 6  ;;  %v7200_v25 = vrot.slane %v8992_v0, 10 }
 0x218   : > { %v1106_v63 = vpop.f32.mrf.mxu0  ;;  %v1889_v43 = vrot.slane %v1887_v31, 4  ;;  %v1892_v6 = vrot.slane %v1890_v19, 5  ;;  %v2637_v2 = vrot.slane %v1887_v31, 5  ;;  %v2638_v20 = vrot.slane %v1890_v19, 6 }
 0x219   : > { %v9003_v58 = vpack.c.b16 %v2233_v10, %v12276_v37  ;;  %v9007_v18 = vsel %vm8780_vm8, %v7088_v55, %v2392_v7  ;;  %v1107_v11 = vadd.f32 %v8749_v5, %v1106_v63  ;;  %v1898_v31 = vrot.slane %v1896_v46, 5 }
 0x21a   : > { %v1893_v26 = vor.u32 %v1892_v6, %v1889_v43  ;;  %v2639_v23 = vor.u32 %v2638_v20, %v2637_v2  ;;  %v12092_v8 = vunpack.c.l.b16 %v9007_v18  ;;  %v2645_v19 = vor.u32 %v2644_v61, %v2643_v3  ;;  %v8281_v3 = vld [vmem:[%s8612_s28 + $0x108] sm:$0xff] }
 0x21b   : > { %12277 = vst [vmem:[#allocation12_spill] sm:$0xff] %v9003_v58  ;;  %v9019_v7 = vsel %vm8791_vm10, %v7200_v25, %v2946_v49  ;;  %v1017_v55 = vadd.f32 %v8749_v5, %v8670_v30  ;;  %v1020_v46 = vadd.f32 %v8749_v5, %v8673_v32  ;;  %v12280_v30 = vunpack.c.l.b16 %v8946_v14 }
 0x21c   : > { %v1894_v28 = vrot.slane %v1893_v26, 4  ;;  %v2640_v13 = vrot.slane %v2639_v23, 4  ;;  %v9015_v37 = vpack.c.b16 %v12092_v8, %v12278_v27  ;;  %v12091_v40 = vunpack.c.l.b16 %v9019_v7 }
 0x21d   : > { %v1393_v27 = vmax.f32 %v1107_v11, 0.0  ;;  %v1105_v32 = vadd.f32 %v8749_v5, %v1104_v24  ;;  %v12283_v6 = vunpack.c.l.b16 %v8960_v17  ;;  %v1015_v14 = vadd.f32 %v8749_v5, %v8667_v29 }
 0x21e   : > { %12279 = vst [vmem:[#allocation13_spill] sm:$0xff] %v9015_v37  ;;  %v1899_v26 = vsel %vm8808_vm12, %v1894_v28, %v1898_v31  ;;  %v9030_v15 = vsel %vm8816_vm13, %v2640_v13, %v2645_v19  ;;  %v9040_v25 = vpack.c.b16 %v12091_v40, %v12280_v30  ;;  %v1357_v28 = vmax.f32 %v1017_v55, 0.0 }
 0x21f   : > { %v9033_v61 = vunpack.c.l.b16 %v1899_v26  ;;  %v12090_v49 = vunpack.c.l.b16 %v9030_v15  ;;  %v1358_v20 = vmax.f32 %v1020_v46, 0.0  ;;  %v1392_v31 = vmax.f32 %v1105_v32, 0.0 }
 0x220   : > { %12281 = vst [vmem:[#allocation14_spill] sm:$0xff] %v9040_v25  ;;  %v1109_v63 = vpop.f32.mrf.mxu0  ;;  %v1501_v23 = vmax.f32 %v1357_v28, %v1393_v27  ;;  %v1356_v13 = vmax.f32 %v1015_v14, 0.0 }
 0x221   : > { %v1110_v43 = vadd.f32 %v8749_v5, %v1109_v63  ;;  %v9046_v11 = vpack.c.b16 %v9033_v61, %v8962_v34  ;;  %v9052_v2 = vpack.c.b16 %v12090_v49, %v12283_v6 }
 0x222   : > { %v1621_v55 = vrot.slane %v1501_v23, 4  ;;  %v1500_v26 = vmax.f32 %v1356_v13, %v1392_v31 }
 0x223   : > { %12282 = vst [vmem:[#allocation15_spill] sm:$0xff] %v9046_v11  ;;  %v1394_v24 = vmax.f32 %v1110_v43, 0.0  ;;  %6966 = vmatmul.msk.bf16.gmra.mxu0 %vm758_vm0, %v8281_v3  ;;  %2178 = vmatmul.bf16.gmra.mxu1 %v9046_v11 }
 0x224   : > { %12284 = vst [vmem:[#allocation16_spill] sm:$0xff] %v9052_v2 }
 0x225   : > { %v1502_v19 = vmax.f32 %v1358_v20, %v1394_v24  ;;  %v8282_v24 = vld [vmem:[%s8612_s28 + $0x110] sm:$0xff] }
 0x227   : > { %v1622_v17 = vrot.slane %v1502_v19, 4 }
 0x228   : > { %v1111_v30 = vpop.f32.mrf.mxu0 }
 0x229   : > { %v1623_v63 = vsel %vm1608_vm1, %v1621_v55, %v1622_v17  ;;  %v1738_v6 = vmax.f32 %v1501_v23, %v1622_v17 }
 0x22a   : > { %v1737_v49 = vmax.f32 %v1500_v26, %v1623_v63 }
 0x22b   : > { %v1786_v29 = vpack.c.bf16 %v1738_v6, %v1738_v6 }
 0x22c   : > { %v9059_v46 = vpack.c.bf16 %v1737_v49, %v1737_v49 }
 0x22d   : > { %v1910_v27 = vshll.u32 %v1786_v29, 16  ;;  %v2651_v28 = vshrl.u32 %v1786_v29, 16  ;;  %v2396_v3 = vrot.slane %v1786_v29, 5  ;;  %v2950_v6 = vrot.slane %v1786_v29, 6 }
 0x22e   : > { %v1901_v43 = vshrl.u32 %v9059_v46, 16  ;;  %v1904_v32 = vshll.u32 %v9059_v46, 16  ;;  %v7089_v20 = vrot.slane %v9059_v46, 9  ;;  %v7201_v23 = vrot.slane %v9059_v46, 10 }
 0x22f   : > { %v2653_v31 = vrot.slane %v2651_v28, 5  ;;  %v2654_v19 = vrot.slane %v1910_v27, 6  ;;  %v12285_v28 = vunpack.c.l.b16 %v9059_v46 }
 0x230   : > { %v1114_v13 = vpop.f32.mrf.mxu0  ;;  %v1903_v55 = vrot.slane %v1901_v43, 4  ;;  %v1906_v49 = vrot.slane %v1904_v32, 5  ;;  %v2647_v17 = vrot.slane %v1901_v43, 5  ;;  %v2648_v26 = vrot.slane %v1904_v32, 6 }
 0x231   : > { %v9069_v63 = vsel %vm8780_vm8, %v7089_v20, %v2396_v3  ;;  %v9076_v11 = vpack.c.b16 %v12285_v28, %v2233_v10  ;;  %v1115_v25 = vadd.f32 %v8749_v5, %v1114_v13  ;;  %v1912_v43 = vrot.slane %v1910_v27, 5 }
 0x232   : > { %v1907_v40 = vor.u32 %v1906_v49, %v1903_v55  ;;  %v2649_v8 = vor.u32 %v2648_v26, %v2647_v17  ;;  %v12097_v14 = vunpack.c.l.b16 %v9069_v63  ;;  %v2655_v3 = vor.u32 %v2654_v19, %v2653_v31 }
 0x233   : > { %12286 = vst [vmem:[#allocation17_spill] sm:$0xff] %v9076_v11  ;;  %6967 = vmatmul.msk.bf16.gmra.mxu0 %vm758_vm0, %v8282_v24  ;;  %2872 = vmatmul.bf16.vlgmr.msrb.gmra.mxu1 %v8896_v16  ;;  %v9083_v29 = vsel %vm8791_vm10, %v7201_v23, %v2950_v6  ;;  %v12287_v55 = vunpack.c.l.b16 %v9007_v18  ;;  %v1025_v24 = vadd.f32 %v8749_v5, %v8679_v35  ;;  %v1396_v31 = vmax.f32 %v1115_v25, 0.0 }
 0x234   : > { %v1908_v32 = vrot.slane %v1907_v40, 4  ;;  %v2650_v20 = vrot.slane %v2649_v8, 4  ;;  %v12096_v0 = vunpack.c.l.b16 %v9083_v29  ;;  %v12289_v8 = vunpack.c.l.b16 %v9019_v7 }
 0x235   : > { %v9090_v10 = vpack.c.b16 %v12097_v14, %v12287_v55  ;;  %v1027_v18 = vadd.f32 %v8749_v5, %v8682_v36  ;;  %v1112_v23 = vadd.f32 %v8749_v5, %v1111_v30  ;;  %v1360_v49 = vmax.f32 %v1025_v24, 0.0  ;;  %v8283_v24 = vld [vmem:[%s8612_s28 + $0x118] sm:$0xff] }
 0x236   : > { %v1913_v16 = vsel %vm8808_vm12, %v1908_v32, %v1912_v43  ;;  %v9098_v27 = vsel %vm8816_vm13, %v2650_v20, %v2655_v3  ;;  %v9104_v40 = vpack.c.b16 %v12096_v0, %v12289_v8  ;;  %v12292_v26 = vunpack.c.l.b16 %v9030_v15 }
 0x237   : > { %12288 = vst [vmem:[#allocation18_spill] sm:$0xff] %v9090_v10  ;;  %v9108_v19 = vunpack.c.l.b16 %v1913_v16  ;;  %v12095_v35 = vunpack.c.l.b16 %v9098_v27  ;;  %v1022_v25 = vadd.f32 %v8749_v5, %v8676_v33  ;;  %v1361_v6 = vmax.f32 %v1027_v18, 0.0 }
 0x238   : > { %12290 = vst [vmem:[#allocation19_spill] sm:$0xff] %v9104_v40  ;;  %v1116_v13 = vpop.f32.mrf.mxu0  ;;  %v1504_v28 = vmax.f32 %v1360_v49, %v1396_v31  ;;  %v1395_v43 = vmax.f32 %v1112_v23, 0.0 }
 0x239   : > { %v1117_v17 = vadd.f32 %v8749_v5, %v1116_v13  ;;  %v9115_v7 = vpack.c.b16 %v9108_v19, %v9033_v61  ;;  %v9121_v36 = vpack.c.b16 %v12095_v35, %v12292_v26  ;;  %v1359_v32 = vmax.f32 %v1022_v25, 0.0 }
 0x23a   : > { %v1624_v20 = vrot.slane %v1504_v28, 4 }
 0x23b   : > { %12291 = vst [vmem:[#allocation20_spill] sm:$0xff] %v9115_v7  ;;  %v1397_v30 = vmax.f32 %v1117_v17, 0.0  ;;  %v1503_v61 = vmax.f32 %v1359_v32, %v1395_v43 }
 0x23c   : > { %12293 = vst [vmem:[#allocation21_spill] sm:$0xff] %v9121_v36  ;;  %v12296_v36 = vunpack.c.l.b16 %v9069_v63 }
 0x23d   : > { %v1505_v3 = vmax.f32 %v1361_v6, %v1397_v30 }
 0x23f   : > { %v1625_v55 = vrot.slane %v1505_v3, 4 }
 0x240   : > { %v1119_v16 = vpop.f32.mrf.mxu0 }
 0x241   : > { %v1626_v15 = vsel %vm1608_vm1, %v1624_v20, %v1625_v55  ;;  %v1740_v8 = vmax.f32 %v1504_v28, %v1625_v55 }
 0x242   : > { %v1739_v13 = vmax.f32 %v1503_v61, %v1626_v15  ;;  %v12294_v61 = vunpack.c.l.b16 %v9059_v46 }
 0x243   : > { %v1788_v26 = vpack.c.bf16 %v1740_v8, %v1740_v8  ;;  %6968 = vmatmul.msk.bf16.gmra.mxu0 %vm758_vm0, %v8283_v24  ;;  %2877 = vmatmul.bf16.gmra.mxu1 %v9052_v2 }
 0x244   : > { %v9129_v33 = vpack.c.bf16 %v1739_v13, %v1739_v13 }
 0x245   : > { %v1924_v18 = vshll.u32 %v1788_v26, 16  ;;  %v2661_v31 = vshrl.u32 %v1788_v26, 16  ;;  %v2400_v23 = vrot.slane %v1788_v26, 5  ;;  %v2954_v0 = vrot.slane %v1788_v26, 6 }
 0x246   : > { %v1915_v49 = vshrl.u32 %v9129_v33, 16  ;;  %v1918_v17 = vshll.u32 %v9129_v33, 16  ;;  %v2235_v25 = vunpack.c.l.b16 %v9129_v33  ;;  %v7090_v6 = vrot.slane %v9129_v33, 9 }
 0x247   : > { %v2663_v28 = vrot.slane %v2661_v31, 5  ;;  %v2664_v30 = vrot.slane %v1924_v18, 6  ;;  %v7202_v43 = vrot.slane %v9129_v33, 10 }
 0x248   : > { %v1121_v3 = vpop.f32.mrf.mxu0  ;;  %v1917_v32 = vrot.slane %v1915_v49, 4  ;;  %v1920_v20 = vrot.slane %v1918_v17, 5  ;;  %v2657_v55 = vrot.slane %v1915_v49, 5  ;;  %v2658_v24 = vrot.slane %v1918_v17, 6 }
 0x249   : > { %v9140_v15 = vpack.c.b16 %v2235_v25, %v12294_v61  ;;  %v9144_v8 = vsel %vm8780_vm8, %v7090_v6, %v2400_v23  ;;  %v1122_v14 = vadd.f32 %v8749_v5, %v1121_v3  ;;  %v1926_v49 = vrot.slane %v1924_v18, 5 }
 0x24a   : > { %v1921_v13 = vor.u32 %v1920_v20, %v1917_v32  ;;  %v2659_v31 = vor.u32 %v2658_v24, %v2657_v55  ;;  %v12102_v35 = vunpack.c.l.b16 %v9144_v8  ;;  %v2665_v17 = vor.u32 %v2664_v30, %v2663_v28  ;;  %v8284_v30 = vld [vmem:[%s8612_s28 + $0x120] sm:$0xff] }
 0x24b   : > { %12295 = vst [vmem:[#allocation22_spill] sm:$0xff] %v9140_v15  ;;  %v9156_v23 = vsel %vm8791_vm10, %v7202_v43, %v2954_v0  ;;  %v1032_v6 = vadd.f32 %v8749_v5, %v8688_v39  ;;  %v1035_v18 = vadd.f32 %v8749_v5, %v8691_v41  ;;  %v12298_v39 = vunpack.c.l.b16 %v9083_v29 }
 0x24c   : > { %v1922_v2 = vrot.slane %v1921_v13, 4  ;;  %v2660_v46 = vrot.slane %v2659_v31, 4  ;;  %v9152_v61 = vpack.c.b16 %v12102_v35, %v12296_v36  ;;  %v12101_v26 = vunpack.c.l.b16 %v9156_v23 }
 0x24d   : > { %v1399_v36 = vmax.f32 %v1122_v14, 0.0  ;;  %v1120_v41 = vadd.f32 %v8749_v5, %v1119_v16  ;;  %v12301_v55 = vunpack.c.l.b16 %v9098_v27  ;;  %v1030_v29 = vadd.f32 %v8749_v5, %v8685_v38 }
 0x24e   : > { %12297 = vst [vmem:[#allocation23_spill] sm:$0xff] %v9152_v61  ;;  %v1927_v28 = vsel %vm8808_vm12, %v1922_v2, %v1926_v49  ;;  %v9167_v63 = vsel %vm8816_vm13, %v2660_v46, %v2665_v17  ;;  %v9177_v43 = vpack.c.b16 %v12101_v26, %v12298_v39  ;;  %v1363_v2 = vmax.f32 %v1032_v6, 0.0 }
 0x24f   : > { %v9170_v3 = vunpack.c.l.b16 %v1927_v28  ;;  %v12100_v0 = vunpack.c.l.b16 %v9167_v63  ;;  %v1364_v13 = vmax.f32 %v1035_v18, 0.0  ;;  %v1398_v49 = vmax.f32 %v1120_v41, 0.0 }
 0x250   : > { %12299 = vst [vmem:[#allocation24_spill] sm:$0xff] %v9177_v43  ;;  %v1124_v32 = vpop.f32.mrf.mxu0  ;;  %v1507_v31 = vmax.f32 %v1363_v2, %v1399_v36  ;;  %v1362_v17 = vmax.f32 %v1030_v29, 0.0  ;;  %v12304_v33 = vunpack.c.l.b16 %v9144_v8  ;;  %v1042_v8 = vadd.f32 %v8749_v5, %v8700_v45 }
 0x251   : > { %v1125_v20 = vadd.f32 %v8749_v5, %v1124_v32  ;;  %v9183_v14 = vpack.c.b16 %v9170_v3, %v9108_v19  ;;  %v9189_v24 = vpack.c.b16 %v12100_v0, %v12301_v55 }
 0x252   : > { %v1627_v27 = vrot.slane %v1507_v31, 4  ;;  %v1506_v6 = vmax.f32 %v1362_v17, %v1398_v49 }
 0x253   : > { %12300 = vst [vmem:[#allocation25_spill] sm:$0xff] %v9183_v14  ;;  %v1400_v16 = vmax.f32 %v1125_v20, 0.0  ;;  %6969 = vmatmul.msk.bf16.gmra.mxu0 %vm758_vm0, %v8284_v30  ;;  %2183 = vmatmul.bf16.vlgmr.msra.gmra.mxu2 %v9183_v14 }
 0x254   : > { %12302 = vst [vmem:[#allocation26_spill] sm:$0xff] %v9189_v24  ;;  %2882 = vmatmul.bf16.gmra.mxu1 %v9189_v24 }
 0x255   : > { %v1508_v19 = vmax.f32 %v1364_v13, %v1400_v16  ;;  %v8285_v16 = vld [vmem:[%s8612_s28 + $0x128] sm:$0xff] }
 0x257   : > { %v1628_v46 = vrot.slane %v1508_v19, 4 }
 0x258   : > { %v1126_v28 = vpop.f32.mrf.mxu0 }
 0x259   : > { %v1629_v39 = vsel %vm1608_vm1, %v1627_v27, %v1628_v46  ;;  %v1742_v38 = vmax.f32 %v1507_v31, %v1628_v46 }
 0x25a   : > { %v1741_v18 = vmax.f32 %v1506_v6, %v1629_v39 }
 0x25b   : > { %v1790_v36 = vpack.c.bf16 %v1742_v38, %v1742_v38 }
 0x25c   : > { %v9197_v32 = vpack.c.bf16 %v1741_v18, %v1741_v18 }
 0x25d   : > { %v1938_v30 = vshll.u32 %v1790_v36, 16  ;;  %v2671_v2 = vshrl.u32 %v1790_v36, 16  ;;  %v2404_v20 = vrot.slane %v1790_v36, 5  ;;  %v2958_v18 = vrot.slane %v1790_v36, 6 }
 0x25e   : > { %v1929_v41 = vshrl.u32 %v9197_v32, 16  ;;  %v1932_v55 = vshll.u32 %v9197_v32, 16  ;;  %v2236_v29 = vunpack.c.l.b16 %v9197_v32  ;;  %v7091_v13 = vrot.slane %v9197_v32, 9 }
 0x25f   : > { %v2673_v49 = vrot.slane %v2671_v2, 5  ;;  %v2674_v19 = vrot.slane %v1938_v30, 6  ;;  %v7203_v31 = vrot.slane %v9197_v32, 10 }
 0x260   : > { %v1129_v17 = vpop.f32.mrf.mxu0  ;;  %v1931_v27 = vrot.slane %v1929_v41, 4  ;;  %v1934_v46 = vrot.slane %v1932_v55, 5  ;;  %v2667_v6 = vrot.slane %v1929_v41, 5  ;;  %v2668_v39 = vrot.slane %v1932_v55, 6 }
 0x261   : > { %v9207_v38 = vsel %vm8780_vm8, %v7091_v13, %v2404_v20  ;;  %v9214_v2 = vpack.c.b16 %v2236_v29, %v2235_v25  ;;  %v1130_v24 = vadd.f32 %v8749_v5, %v1129_v17  ;;  %v1940_v41 = vrot.slane %v1938_v30, 5 }
 0x262   : > { %v1935_v0 = vor.u32 %v1934_v46, %v1931_v27  ;;  %v2669_v26 = vor.u32 %v2668_v39, %v2667_v6  ;;  %v12107_v35 = vunpack.c.l.b16 %v9207_v38  ;;  %v2675_v55 = vor.u32 %v2674_v19, %v2673_v49 }
 0x263   : > { %12303 = vst [vmem:[#allocation27_spill] sm:$0xff] %v9214_v2  ;;  %6970 = vmatmul.msk.bf16.gmra.mxu0 %vm758_vm0, %v8285_v16  ;;  %v9220_v20 = vsel %vm8791_vm10, %v7203_v31, %v2958_v18  ;;  %v1040_v17 = vadd.f32 %v8749_v5, %v8697_v44  ;;  %v1402_v49 = vmax.f32 %v1130_v24, 0.0  ;;  %v1127_v31 = vadd.f32 %v8749_v5, %v1126_v28 }
 0x264   : > { %v1936_v36 = vrot.slane %v1935_v0, 4  ;;  %v2670_v13 = vrot.slane %v2669_v26, 4  ;;  %v12106_v27 = vunpack.c.l.b16 %v9220_v20  ;;  %v9227_v25 = vpack.c.b16 %v12107_v35, %v12304_v33 }
 0x265   : > { %v12306_v26 = vunpack.c.l.b16 %v9156_v23  ;;  %v1366_v6 = vmax.f32 %v1040_v17, 0.0  ;;  %v12309_v18 = vunpack.c.l.b16 %v9167_v63  ;;  %v1037_v24 = vadd.f32 %v8749_v5, %v8694_v42  ;;  %v9269_v42 = vld [vmem:[%s12078_s2] ss:$0 sm:$0xff] }
 0x266   : > { %12305 = vst [vmem:[#allocation28_spill] sm:$0xff] %v9227_v25  ;;  %v1941_v30 = vsel %vm8808_vm12, %v1936_v36, %v1940_v41  ;;  %v9235_v16 = vsel %vm8816_vm13, %v2670_v13, %v2675_v55  ;;  %v1367_v41 = vmax.f32 %v1042_v8, 0.0  ;;  %v1401_v36 = vmax.f32 %v1127_v31, 0.0 }
 0x267   : > { %v9241_v0 = vpack.c.b16 %v12106_v27, %v12306_v26  ;;  %v9245_v19 = vunpack.c.l.b16 %v1941_v30  ;;  %v12105_v44 = vunpack.c.l.b16 %v9235_v16  ;;  %v1510_v28 = vmax.f32 %v1366_v6, %v1402_v49  ;;  %v8286_v26 = vld [vmem:[%s8612_s28 + $0x130] sm:$0xff] }
 0x268   : > { %v1131_v46 = vpop.f32.mrf.mxu0  ;;  %v1365_v33 = vmax.f32 %v1037_v24, 0.0  ;;  %v1045_v17 = vadd.f32 %v8749_v5, %v8703_v47  ;;  %v12312_v25 = vunpack.c.l.b16 %v9207_v38  ;;  %v1050_v38 = vadd.f32 %v9269_v42, %v8709_v50 }
 0x269   : > { %12307 = vst [vmem:[#allocation29_spill] sm:$0xff] %v9241_v0  ;;  %v1132_v39 = vadd.f32 %v8749_v5, %v1131_v46  ;;  %v9252_v23 = vpack.c.b16 %v9245_v19, %v9170_v3  ;;  %v9258_v45 = vpack.c.b16 %v12105_v44, %v12309_v18  ;;  %v1630_v3 = vrot.slane %v1510_v28, 4 }
 0x26a   : > { %v1509_v63 = vmax.f32 %v1365_v33, %v1401_v36  ;;  %v1368_v31 = vmax.f32 %v1045_v17, 0.0 }
 0x26b   : > { %12308 = vst [vmem:[#allocation30_spill] sm:$0xff] %v9252_v23  ;;  %v1403_v55 = vmax.f32 %v1132_v39, 0.0 }
 0x26c   : > { %12310 = vst [vmem:[#allocation31_spill] sm:$0xff] %v9258_v45 }
 0x26d   : > { %v1511_v13 = vmax.f32 %v1367_v41, %v1403_v55 }
 0x26f   : > { %v1631_v30 = vrot.slane %v1511_v13, 4 }
 0x270   : > { %v1134_v46 = vpop.f32.mrf.mxu0 }
 0x271   : > { %v1632_v18 = vsel %vm1608_vm1, %v1630_v3, %v1631_v30  ;;  %v1744_v44 = vmax.f32 %v1510_v28, %v1631_v30  ;;  %v1135_v8 = vadd.f32 %v9269_v42, %v1134_v46 }
 0x272   : > { %v1743_v49 = vmax.f32 %v1509_v63, %v1632_v18 }
 0x273   : > { %v1792_v6 = vpack.c.bf16 %v1744_v44, %v1744_v44  ;;  %v1404_v39 = vmax.f32 %v1135_v8, 0.0  ;;  %6971 = vmatmul.msk.bf16.gmra.mxu0 %vm758_vm0, %v8286_v26  ;;  %v1047_v44 = vadd.f32 %v9269_v42, %v8706_v48 }
 0x274   : > { %v9273_v47 = vpack.c.bf16 %v1743_v49, %v1743_v49 }
 0x275   : > { %v1512_v5 = vmax.f32 %v1368_v31, %v1404_v39  ;;  %v1952_v24 = vshll.u32 %v1792_v6, 16  ;;  %v2681_v41 = vshrl.u32 %v1792_v6, 16  ;;  %v2408_v55 = vrot.slane %v1792_v6, 5 }
 0x276   : > { %v1943_v28 = vshrl.u32 %v9273_v47, 16  ;;  %v1946_v36 = vshll.u32 %v9273_v47, 16  ;;  %v2237_v13 = vunpack.c.l.b16 %v9273_v47  ;;  %v7092_v33 = vrot.slane %v9273_v47, 9 }
 0x277   : > { %v2683_v17 = vrot.slane %v2681_v41, 5  ;;  %v2684_v3 = vrot.slane %v1952_v24, 6  ;;  %v7204_v30 = vrot.slane %v9273_v47, 10  ;;  %v2962_v35 = vrot.slane %v1792_v6, 6 }
 0x278   : > { %v1136_v26 = vpop.f32.mrf.mxu0  ;;  %v1945_v63 = vrot.slane %v1943_v28, 4  ;;  %v1948_v46 = vrot.slane %v1946_v36, 5  ;;  %v2677_v18 = vrot.slane %v1943_v28, 5  ;;  %v2678_v8 = vrot.slane %v1946_v36, 6 }
 0x279   : > { %v1137_v49 = vadd.f32 %v9269_v42, %v1136_v26  ;;  %v9287_v31 = vpack.c.b16 %v2237_v13, %v2236_v29  ;;  %v9291_v48 = vsel %vm8780_vm8, %v7092_v33, %v2408_v55  ;;  %v1369_v28 = vmax.f32 %v1047_v44, 0.0  ;;  %v8287_v44 = vld [vmem:[%s8612_s28 + $0x138] sm:$0xff] }
 0x27a   : > { %v1949_v39 = vor.u32 %v1948_v46, %v1945_v63  ;;  %v2679_v41 = vor.u32 %v2678_v8, %v2677_v18  ;;  %v12113_v27 = vunpack.c.l.b16 %v9291_v48  ;;  %v1954_v14 = vrot.slane %v1952_v24, 5 }
 0x27b   : > { %12311 = vst [vmem:[#allocation32_spill] sm:$0xff] %v9287_v31  ;;  %v1405_v36 = vmax.f32 %v1137_v49, 0.0  ;;  %v2685_v26 = vor.u32 %v2684_v3, %v2683_v17  ;;  %v9302_v55 = vsel %vm8791_vm10, %v7204_v30, %v2962_v35  ;;  %v12314_v35 = vunpack.c.l.b16 %v9220_v20 }
 0x27c   : > { %v1950_v45 = vrot.slane %v1949_v39, 4  ;;  %v2680_v32 = vrot.slane %v2679_v41, 4  ;;  %v9298_v29 = vpack.c.b16 %v12113_v27, %v12312_v25  ;;  %v3020_v63 = vunpack.c.l.b16 %v9302_v55 }
 0x27d   : > { %v1513_v33 = vmax.f32 %v1369_v28, %v1405_v36  ;;  %v1370_v18 = vmax.f32 %v1050_v38, 0.0  ;;  %v1052_v49 = vadd.f32 %v9269_v42, %v8712_v51 }
 0x27e   : > { %12313 = vst [vmem:[#allocation33_spill] sm:$0xff] %v9298_v29  ;;  %v1955_v6 = vsel %vm8808_vm12, %v1950_v45, %v1954_v14  ;;  %v9309_v24 = vsel %vm8816_vm13, %v2680_v32, %v2685_v26  ;;  %v9319_v3 = vpack.c.b16 %v3020_v63, %v12314_v35  ;;  %v12317_v45 = vunpack.c.l.b16 %v9235_v16 }
 0x27f   : > { %v9314_v25 = vunpack.c.l.b16 %v1955_v6  ;;  %v12112_v17 = vunpack.c.l.b16 %v9309_v24  ;;  %v1371_v32 = vmax.f32 %v1052_v49, 0.0 }
 0x280   : > { %12315 = vst [vmem:[#allocation34_spill] sm:$0xff] %v9319_v3  ;;  %v1139_v30 = vpop.f32.mrf.mxu0 }
 0x281   : > { %v1140_v46 = vadd.f32 %v9269_v42, %v1139_v30  ;;  %v9324_v14 = vpack.c.b16 %v9314_v25, %v9245_v19  ;;  %v9330_v50 = vpack.c.b16 %v12112_v17, %v12317_v45  ;;  %v1633_v19 = vrot.slane %v1513_v33, 4 }
 0x283   : > { %12316 = vst [vmem:[#allocation35_spill] sm:$0xff] %v9324_v14  ;;  %v1406_v8 = vmax.f32 %v1140_v46, 0.0  ;;  %6972 = vmatmul.msk.bf16.gmra.mxu0 %vm758_vm0, %v8287_v44  ;;  %2188 = vmatmul.bf16.gmra.mxu2 %v9324_v14 }
 0x284   : > { %12318 = vst [vmem:[#allocation36_spill] sm:$0xff] %v9330_v50  ;;  %2887 = vmatmul.bf16.gmra.mxu1 %v9330_v50  ;;  %v12321_v50 = vunpack.c.l.b16 %v9291_v48 }
 0x285   : > { %v1514_v20 = vmax.f32 %v1370_v18, %v1406_v8  ;;  %v8288_v8 = vld [vmem:[%s8612_s28 + $0x140] sm:$0xff] }
 0x287   : > { %v1634_v39 = vrot.slane %v1514_v20, 4 }
 0x288   : > { %v1141_v41 = vpop.f32.mrf.mxu0 }
 0x289   : > { %v1635_v16 = vsel %vm1608_vm1, %v1633_v19, %v1634_v39  ;;  %v1746_v28 = vmax.f32 %v1513_v33, %v1634_v39  ;;  %v1142_v36 = vadd.f32 %v9269_v42, %v1141_v41 }
 0x28a   : > { %v1745_v26 = vmax.f32 %v1512_v5, %v1635_v16  ;;  %v1055_v5 = vadd.f32 %v9269_v42, %v8715_v53 }
 0x28b   : > { %v1794_v55 = vpack.c.bf16 %v1746_v28, %v1746_v28  ;;  %v1407_v6 = vmax.f32 %v1142_v36, 0.0 }
 0x28c   : > { %v9339_v38 = vpack.c.bf16 %v1745_v26, %v1745_v26 }
 0x28d   : > { %v1515_v44 = vmax.f32 %v1371_v32, %v1407_v6  ;;  %v3318_v35 = vshll.u32 %v1794_v55, 16  ;;  %v3812_v30 = vrot.slane %v1794_v55, 6  ;;  %v3488_v46 = vrot.slane %v1794_v55, 5 }
 0x28e   : > { %v3309_v51 = vshrl.u32 %v9339_v38, 16  ;;  %v3312_v45 = vshll.u32 %v9339_v38, 16  ;;  %v12114_v18 = vunpack.c.l.b16 %v9339_v38  ;;  %v7455_v33 = vrot.slane %v9339_v38, 10 }
 0x28f   : > { %v7357_v20 = vrot.slane %v9339_v38, 9  ;;  %v3646_v49 = vshrl.u32 %v1794_v55, 16  ;;  %v3649_v19 = vrot.slane %v3318_v35, 6 }
 0x290   : > { %v1144_v39 = vpop.f32.mrf.mxu0  ;;  %v3311_v41 = vrot.slane %v3309_v51, 4  ;;  %v3314_v16 = vrot.slane %v3312_v45, 5  ;;  %v9353_v28 = vpack.c.b16 %v12114_v18, %v2237_v13  ;;  %v9357_v36 = vsel %vm8791_vm10, %v7455_v33, %v3812_v30 }
 0x291   : > { %v1145_v53 = vadd.f32 %v9269_v42, %v1144_v39  ;;  %v12118_v26 = vunpack.c.l.b16 %v9357_v36  ;;  %v9363_v32 = vsel %vm8780_vm8, %v7357_v20, %v3488_v46  ;;  %v3642_v55 = vrot.slane %v3309_v51, 5 }
 0x292   : > { %12319 = vst [vmem:[#allocation37_spill] sm:$0xff] %v9353_v28  ;;  %v3315_v6 = vor.u32 %v3314_v16, %v3311_v41  ;;  %v12119_v47 = vunpack.c.l.b16 %v9363_v32  ;;  %v3643_v17 = vrot.slane %v3312_v45, 6  ;;  %v3648_v27 = vrot.slane %v3646_v49, 5 }
 0x293   : > { %v1372_v13 = vmax.f32 %v1055_v5, 0.0  ;;  %v1408_v18 = vmax.f32 %v1145_v53, 0.0  ;;  %6973 = vmatmul.msk.bf16.gmra.mxu0 %vm758_vm0, %v8288_v8  ;;  %v3320_v30 = vrot.slane %v3318_v35, 5  ;;  %v9369_v33 = vpack.c.b16 %v12118_v26, %v3020_v63 }
 0x294   : > { %v3316_v39 = vrot.slane %v3315_v6, 4  ;;  %v9375_v46 = vpack.c.b16 %v12119_v47, %v12321_v50  ;;  %v3644_v51 = vor.u32 %v3643_v17, %v3642_v55  ;;  %v3650_v20 = vor.u32 %v3649_v19, %v3648_v27 }
 0x295   : > { %12320 = vst [vmem:[#allocation38_spill] sm:$0xff] %v9369_v33  ;;  %v1516_v45 = vmax.f32 %v1372_v13, %v1408_v18  ;;  %v1057_v35 = vadd.f32 %v9269_v42, %v8718_v54  ;;  %v12324_v41 = vunpack.c.l.b16 %v9309_v24  ;;  %v1060_v53 = vadd.f32 %v9269_v42, %v8721_v56  ;;  %v8289_v13 = vld [vmem:[%s8612_s28 + $0x148] sm:$0xff] }
 0x296   : > { %12322 = vst [vmem:[#allocation39_spill] sm:$0xff] %v9375_v46  ;;  %v3321_v5 = vsel %vm8808_vm12, %v3316_v39, %v3320_v30  ;;  %v3645_v8 = vrot.slane %v3644_v51, 4 }
 0x297   : > { %v9381_v63 = vunpack.c.l.b16 %v3321_v5  ;;  %v1373_v18 = vmax.f32 %v1057_v35, 0.0  ;;  %v1636_v55 = vrot.slane %v1516_v45, 4  ;;  %v1374_v5 = vmax.f32 %v1060_v53, 0.0 }
 0x298   : > { %v1146_v49 = vpop.f32.mrf.mxu0  ;;  %v9385_v48 = vsel %vm8816_vm13, %v3645_v8, %v3650_v20 }
 0x299   : > { %v1147_v50 = vadd.f32 %v9269_v42, %v1146_v49  ;;  %v9390_v27 = vpack.c.b16 %v9381_v63, %v9314_v25  ;;  %v12117_v17 = vunpack.c.l.b16 %v9385_v48 }
 0x29b   : > { %12323 = vst [vmem:[#allocation40_spill] sm:$0xff] %v9390_v27  ;;  %v1409_v19 = vmax.f32 %v1147_v50, 0.0  ;;  %v9397_v54 = vpack.c.b16 %v12117_v17, %v12324_v41  ;;  %v8308_v27 = vld [vmem:[%s8612_s28 + $0x1e0] sm:$0xff] }
 0x29d   : > { %12325 = vst [vmem:[#allocation41_spill] sm:$0xff] %v9397_v54  ;;  %v1517_v16 = vmax.f32 %v1373_v18, %v1409_v19  ;;  %v8307_v54 = vld [vmem:[%s8612_s28 + $0x1d8] sm:$0xff] }
 0x29f   : > { %v1637_v6 = vrot.slane %v1517_v16, 4 }
 0x2a0   : > { %v1149_v30 = vpop.f32.mrf.mxu0 }
 0x2a1   : > { %v1638_v25 = vsel %vm1608_vm1, %v1636_v55, %v1637_v6  ;;  %v1748_v39 = vmax.f32 %v1516_v45, %v1637_v6  ;;  %v1150_v51 = vadd.f32 %v9269_v42, %v1149_v30 }
 0x2a2   : > { %v1747_v20 = vmax.f32 %v1515_v44, %v1638_v25  ;;  %v1062_v44 = vadd.f32 %v9269_v42, %v8724_v57  ;;  %v12326_v25 = vunpack.c.l.b16 %v9339_v38 }
 0x2a3   : > { %v1796_v24 = vpack.c.bf16 %v1748_v39, %v1748_v39  ;;  %v1410_v8 = vmax.f32 %v1150_v51, 0.0  ;;  %6974 = vmatmul.msk.bf16.gmra.mxu0 %vm758_vm0, %v8289_v13 }
 0x2a4   : > { %v9405_v35 = vpack.c.bf16 %v1747_v20, %v1747_v20  ;;  %v1375_v47 = vmax.f32 %v1062_v44, 0.0 }
 0x2a5   : > { %v1518_v49 = vmax.f32 %v1374_v5, %v1410_v8  ;;  %v4272_v50 = vrot.slane %v1796_v24, 5  ;;  %v4114_v56 = vshll.u32 %v1796_v24, 16  ;;  %v4418_v18 = vshrl.u32 %v1796_v24, 16 }
 0x2a6   : > { %v7601_v19 = vrot.slane %v9405_v35, 9  ;;  %v12120_v41 = vunpack.c.l.b16 %v9405_v35  ;;  %v4105_v45 = vshrl.u32 %v9405_v35, 16  ;;  %v4108_v16 = vshll.u32 %v9405_v35, 16 }
 0x2a7   : > { %v4420_v53 = vrot.slane %v4418_v18, 5  ;;  %v4421_v55 = vrot.slane %v4114_v56, 6  ;;  %v7699_v6 = vrot.slane %v9405_v35, 10  ;;  %v4572_v26 = vrot.slane %v1796_v24, 6 }
 0x2a8   : > { %v1151_v13 = vpop.f32.mrf.mxu0  ;;  %v9416_v30 = vsel %vm8780_vm8, %v7601_v19, %v4272_v50  ;;  %v9422_v39 = vpack.c.b16 %v12120_v41, %v12326_v25  ;;  %v4107_v51 = vrot.slane %v4105_v45, 4  ;;  %v4110_v20 = vrot.slane %v4108_v16, 5 }
 0x2a9   : > { %v1152_v5 = vadd.f32 %v9269_v42, %v1151_v13  ;;  %v12126_v57 = vunpack.c.l.b16 %v9416_v30  ;;  %v4414_v8 = vrot.slane %v4105_v45, 5  ;;  %v4415_v18 = vrot.slane %v4108_v16, 6 }
 0x2aa   : > { %12327 = vst [vmem:[#allocation42_spill] sm:$0xff] %v9422_v39  ;;  %v4111_v17 = vor.u32 %v4110_v20, %v4107_v51  ;;  %v12328_v19 = vunpack.c.l.b16 %v9363_v32  ;;  %v4116_v14 = vrot.slane %v4114_v56, 5  ;;  %v9434_v13 = vsel %vm8791_vm10, %v7699_v6, %v4572_v26  ;;  %v8290_v51 = vld [vmem:[%s8612_s28 + $0x150] sm:$0xff] }
 0x2ab   : > { %v1411_v50 = vmax.f32 %v1152_v5, 0.0  ;;  %v4416_v25 = vor.u32 %v4415_v18, %v4414_v8  ;;  %v4422_v39 = vor.u32 %v4421_v55, %v4420_v53  ;;  %v12125_v24 = vunpack.c.l.b16 %v9434_v13 }
 0x2ac   : > { %v9430_v38 = vpack.c.b16 %v12126_v57, %v12328_v19  ;;  %v4112_v41 = vrot.slane %v4111_v17, 4  ;;  %v1065_v32 = vadd.f32 %v9269_v42, %v8727_v59  ;;  %v12331_v26 = vunpack.c.l.b16 %v9357_v36 }
 0x2ad   : > { %v1519_v45 = vmax.f32 %v1375_v47, %v1411_v50  ;;  %v4417_v16 = vrot.slane %v4416_v25, 4  ;;  %v1067_v5 = vadd.f32 %v9269_v42, %v8730_v60 }
 0x2ae   : > { %12329 = vst [vmem:[#allocation43_spill] sm:$0xff] %v9430_v38  ;;  %v4117_v44 = vsel %vm8808_vm12, %v4112_v41, %v4116_v14  ;;  %v9452_v47 = vpack.c.b16 %v12125_v24, %v12331_v26  ;;  %v12334_v41 = vunpack.c.l.b16 %v9385_v48  ;;  %v1376_v36 = vmax.f32 %v1065_v32, 0.0 }
 0x2af   : > { %v9442_v20 = vunpack.c.l.b16 %v4117_v44  ;;  %v9446_v17 = vsel %vm8816_vm13, %v4417_v16, %v4422_v39  ;;  %v1639_v8 = vrot.slane %v1519_v45, 4  ;;  %v1377_v16 = vmax.f32 %v1067_v5, 0.0 }
 0x2b0   : > { %12332 = vst [vmem:[#allocation45_spill] sm:$0xff] %v9452_v47  ;;  %v1154_v56 = vpop.f32.mrf.mxu0  ;;  %v12124_v53 = vunpack.c.l.b16 %v9446_v17 }
 0x2b1   : > { %12330 = vst [vmem:[#allocation44_spill] sm:$0xff] %v9442_v20  ;;  %v1155_v14 = vadd.f32 %v9269_v42, %v1154_v56  ;;  %v9458_v59 = vpack.c.b16 %v9442_v20, %v9381_v63 }
 0x2b2   : > { %v9464_v55 = vpack.c.b16 %v12124_v53, %v12334_v41 }
 0x2b3   : > { %12333 = vst [vmem:[#allocation46_spill] sm:$0xff] %v9458_v59  ;;  %v1412_v6 = vmax.f32 %v1155_v14, 0.0  ;;  %6975 = vmatmul.msk.bf16.gmra.mxu0 %vm758_vm0, %v8290_v51 }
 0x2b4   : > { %12335 = vst [vmem:[#allocation47_spill] sm:$0xff] %v9464_v55 }
 0x2b5   : > { %v1520_v39 = vmax.f32 %v1376_v36, %v1412_v6 }
 0x2b7   : > { %v1640_v18 = vrot.slane %v1520_v39, 4  ;;  %v8291_v39 = vld [vmem:[%s8612_s28 + $0x158] sm:$0xff] }
 0x2b8   : > { %v1156_v50 = vpop.f32.mrf.mxu0 }
 0x2b9   : > { %v1641_v63 = vsel %vm1608_vm1, %v1639_v8, %v1640_v18  ;;  %v1750_v19 = vmax.f32 %v1519_v45, %v1640_v18  ;;  %v1157_v48 = vadd.f32 %v9269_v42, %v1156_v50 }
 0x2ba   : > { %v1749_v25 = vmax.f32 %v1518_v49, %v1641_v63  ;;  %v1070_v49 = vadd.f32 %v9269_v42, %v8733_v62  ;;  %v12336_v63 = vunpack.c.l.b16 %v9405_v35 }
 0x2bb   : > { %v1798_v44 = vpack.c.bf16 %v1750_v19, %v1750_v19  ;;  %v1413_v32 = vmax.f32 %v1157_v48, 0.0 }
 0x2bc   : > { %v9471_v26 = vpack.c.bf16 %v1749_v25, %v1749_v25  ;;  %v1378_v47 = vmax.f32 %v1070_v49, 0.0 }
 0x2bd   : > { %v4862_v51 = vshll.u32 %v1798_v44, 16  ;;  %v1521_v56 = vmax.f32 %v1377_v16, %v1413_v32  ;;  %v5166_v14 = vshrl.u32 %v1798_v44, 16  ;;  %v5020_v41 = vrot.slane %v1798_v44, 5 }
 0x2be   : > { %v12128_v60 = vunpack.c.l.b16 %v9471_v26  ;;  %v4853_v36 = vshrl.u32 %v9471_v26, 16  ;;  %v4856_v6 = vshll.u32 %v9471_v26, 16  ;;  %v7845_v45 = vrot.slane %v9471_v26, 9 }
 0x2bf   : > { %v5168_v5 = vrot.slane %v5166_v14, 5  ;;  %v5169_v8 = vrot.slane %v4862_v51, 6  ;;  %v7943_v18 = vrot.slane %v9471_v26, 10  ;;  %v5320_v57 = vrot.slane %v1798_v44, 6 }
 0x2c0   : > { %v1159_v50 = vpop.f32.mrf.mxu0  ;;  %v9485_v19 = vpack.c.b16 %v12128_v60, %v12336_v63  ;;  %v5162_v48 = vrot.slane %v4853_v36, 5  ;;  %v5163_v25 = vrot.slane %v4856_v6, 6  ;;  %v4855_v16 = vrot.slane %v4853_v36, 4 }
 0x2c1   : > { %v1160_v32 = vadd.f32 %v9269_v42, %v1159_v50  ;;  %v4858_v53 = vrot.slane %v4856_v6, 5  ;;  %v9490_v62 = vsel %vm8780_vm8, %v7845_v45, %v5020_v41  ;;  %v5170_v55 = vor.u32 %v5169_v8, %v5168_v5 }
 0x2c2   : > { %12337 = vst [vmem:[#allocation48_spill] sm:$0xff] %v9485_v19  ;;  %v5164_v14 = vor.u32 %v5163_v25, %v5162_v48  ;;  %v12130_v24 = vunpack.c.l.b16 %v9490_v62  ;;  %v12338_v36 = vunpack.c.l.b16 %v9416_v30  ;;  %v5321_v41 = vsel %vm8791_vm10, %v7943_v18, %v5320_v57 }
 0x2c3   : > { %v1414_v35 = vmax.f32 %v1160_v32, 0.0  ;;  %6976 = vmatmul.msk.bf16.gmra.mxu0 %vm758_vm0, %v8291_v39  ;;  %v4859_v63 = vor.u32 %v4858_v53, %v4855_v16  ;;  %v4864_v48 = vrot.slane %v4862_v51, 5  ;;  %v5343_v44 = vunpack.c.l.b16 %v5321_v41  ;;  %v12340_v53 = vld [vmem:[#allocation2_spill] sm:$0xff] }
 0x2c4   : > { %v5165_v60 = vrot.slane %v5164_v14, 4  ;;  %v9498_v6 = vpack.c.b16 %v12130_v24, %v12338_v36  ;;  %v1072_v39 = vadd.f32 %v9269_v42, %v12340_v53  ;;  %v12341_v8 = vunpack.c.l.b16 %v9434_v13  ;;  %v8292_v13 = vld [vmem:[%s8612_s28 + $0x160] sm:$0xff] }
 0x2c5   : > { %v1522_v45 = vmax.f32 %v1378_v47, %v1414_v35  ;;  %v4860_v50 = vrot.slane %v4859_v63, 4  ;;  %v12344_v18 = vunpack.c.l.b16 %v9446_v17 }
 0x2c6   : > { %12339 = vst [vmem:[#allocation49_spill] sm:$0xff] %v9498_v6  ;;  %v5171_v49 = vsel %vm8816_vm13, %v5165_v60, %v5170_v55  ;;  %v9510_v25 = vpack.c.b16 %v5343_v44, %v12341_v8  ;;  %v1379_v60 = vmax.f32 %v1072_v39, 0.0 }
 0x2c7   : > { %v5199_v5 = vunpack.c.l.b16 %v5171_v49  ;;  %v4865_v30 = vsel %vm8808_vm12, %v4860_v50, %v4864_v48  ;;  %v1642_v35 = vrot.slane %v1522_v45, 4 }
 0x2c8   : > { %12342 = vst [vmem:[#allocation2_spill] sm:$0xff] %v9510_v25  ;;  %v1161_v57 = vpop.f32.mrf.mxu0  ;;  %v9512_v47 = vunpack.c.l.b16 %v4865_v30 }
 0x2c9   : > { %v1162_v51 = vadd.f32 %v9269_v42, %v1161_v57  ;;  %v9517_v16 = vpack.c.b16 %v5199_v5, %v12344_v18 }
 0x2ca   : > { %12343 = vst [vmem:[#allocation50_spill] sm:$0xff] %v9512_v47 }
 0x2cb   : > { %12345 = vst [vmem:[#allocation51_spill] sm:$0xff] %v9517_v16  ;;  %v1415_v32 = vmax.f32 %v1162_v51, 0.0  ;;  %v8306_v16 = vld [vmem:[%s8612_s28 + $0x1d0] sm:$0xff] }
 0x2cd   : > { %v1523_v14 = vmax.f32 %v1379_v60, %v1415_v32 }
 0x2cf   : > { %v1643_v63 = vrot.slane %v1523_v14, 4 }
 0x2d0   : > { %v9522_v36 = vpop.f32.mrf.mxu0 }
 0x2d1   : > { %v1644_v41 = vsel %vm1608_vm1, %v1642_v35, %v1643_v63  ;;  %v1752_v50 = vmax.f32 %v1522_v45, %v1643_v63 }
 0x2d2   : > { %v1751_v48 = vmax.f32 %v1521_v56, %v1644_v41  ;;  %v12346_v56 = vunpack.c.l.b16 %v9471_v26 }
 0x2d3   : > { %v1800_v49 = vpack.c.bf16 %v1752_v50, %v1752_v50  ;;  %6977 = vmatmul.msk.bf16.gmra.mxu0 %vm758_vm0, %v8292_v13 }
 0x2d4   : > { %v1799_v17 = vpack.c.bf16 %v1751_v48, %v1751_v48 }
 0x2d5   : > { %v5610_v53 = vshll.u32 %v1800_v49, 16  ;;  %v6068_v30 = vrot.slane %v1800_v49, 6  ;;  %v5768_v8 = vrot.slane %v1800_v49, 5  ;;  %v5914_v57 = vshrl.u32 %v1800_v49, 16 }
 0x2d6   : > { %v5601_v39 = vshrl.u32 %v1799_v17, 16  ;;  %v5604_v51 = vshll.u32 %v1799_v17, 16  ;;  %v5481_v18 = vunpack.c.l.b16 %v1799_v17  ;;  %v8187_v60 = vrot.slane %v1799_v17, 10 }
 0x2d7   : > { %v8089_v32 = vrot.slane %v1799_v17, 9  ;;  %v5916_v14 = vrot.slane %v5914_v57, 5  ;;  %v5917_v55 = vrot.slane %v5610_v53, 6  ;;  %v5612_v26 = vrot.slane %v5610_v53, 5 }
 0x2d8   : > { %v9526_v24 = vpop.f32.mrf.mxu0  ;;  %v5603_v35 = vrot.slane %v5601_v39, 4  ;;  %v5606_v45 = vrot.slane %v5604_v51, 5  ;;  %v9530_v63 = vpack.c.b16 %v5481_v18, %v12346_v56  ;;  %v6069_v13 = vsel %vm8791_vm10, %v8187_v60, %v6068_v30 }
 0x2d9   : > { %v6091_v41 = vunpack.c.l.b16 %v6069_v13  ;;  %v5769_v50 = vsel %vm8780_vm8, %v8089_v32, %v5768_v8  ;;  %v5910_v48 = vrot.slane %v5601_v39, 5  ;;  %v5911_v57 = vrot.slane %v5604_v51, 6  ;;  %v8293_v39 = vld [vmem:[%s8612_s28 + $0x168] sm:$0xff]  ;;  %v8294_v32 = vld [vmem:[%s8612_s28 + $0x170] sm:$0xff] }
 0x2da   : > { %12347 = vst [vmem:[#allocation52_spill] sm:$0xff] %v9530_v63  ;;  %v5607_v49 = vor.u32 %v5606_v45, %v5603_v35  ;;  %v5791_v17 = vunpack.c.l.b16 %v5769_v50  ;;  %v5918_v25 = vor.u32 %v5917_v55, %v5916_v14  ;;  %v12349_v18 = vunpack.c.l.b16 %v9490_v62  ;;  %v8317_v50 = vld [vmem:[%s8612_s28 + $0x228] sm:$0xff]  ;;  %v8303_v62 = vld [vmem:[%s8612_s28 + $0x1b8] sm:$0xff] }
 0x2db   : > { %v9536_v6 = vpack.c.b16 %v6091_v41, %v5343_v44  ;;  %v5912_v63 = vor.u32 %v5911_v57, %v5910_v48  ;;  %7002 = vmatmul.msk.bf16.vlgmr.msra.gmra.mxu3 %vm758_vm0, %v8317_v50  ;;  %v8297_v48 = vld [vmem:[%s8612_s28 + $0x188] sm:$0xff]  ;;  %v8318_v57 = vld [vmem:[%s8612_s28 + $0x230] sm:$0xff] }
 0x2dc   : > { %v5608_v20 = vrot.slane %v5607_v49, 4  ;;  %v9540_v56 = vpack.c.b16 %v5791_v17, %v12349_v18  ;;  %v8301_v50 = vld [vmem:[%s8612_s28 + $0x1a8] sm:$0xff] }
 0x2dd   : > { %12348 = vst [vmem:[#allocation53_spill] sm:$0xff] %v9536_v6  ;;  %v5913_v8 = vrot.slane %v5912_v63, 4 }
 0x2de   : > { %12350 = vst [vmem:[#allocation54_spill] sm:$0xff] %v9540_v56  ;;  %v5613_v30 = vsel %vm8808_vm12, %v5608_v20, %v5612_v26  ;;  %v8298_v26 = vld [vmem:[%s8612_s28 + $0x190] sm:$0xff]  ;;  %v8304_v56 = vld [vmem:[%s8612_s28 + $0x1c0] sm:$0xff] }
 0x2df   : > { %v9545_v60 = vunpack.c.l.b16 %v5613_v30  ;;  %v5919_v44 = vsel %vm8816_vm13, %v5913_v8, %v5918_v25  ;;  %v8295_v25 = vld [vmem:[%s8612_s28 + $0x178] sm:$0xff] }
 0x2e0   : > { %v9547_v55 = vpop.f32.mrf.mxu0  ;;  %v5947_v53 = vunpack.c.l.b16 %v5919_v44  ;;  %v8319_v8 = vld [vmem:[%s8612_s28 + $0x238] sm:$0xff] }
 0x2e1   : > { %12351 = vst [vmem:[#allocation55_spill] sm:$0xff] %v9545_v60  ;;  %v8305_v60 = vld [vmem:[%s8612_s28 + $0x1c8] sm:$0xff] }
 0x2e2   : > { %v9554_v51 = vpack.c.b16 %v5947_v53, %v5199_v5  ;;  %v8296_v5 = vld [vmem:[%s8612_s28 + $0x180] sm:$0xff] }
 0x2e3   : > { %6978 = vmatmul.msk.bf16.gmra.mxu0 %vm758_vm0, %v8293_v39  ;;  %v8299_v39 = vld [vmem:[%s8612_s28 + $0x198] sm:$0xff] }
 0x2e4   : > { %12352 = vst [vmem:[#allocation56_spill] sm:$0xff] %v9554_v51 }
 0x2e8   : > { %v9556_v20 = vpop.f32.mrf.mxu0 }
 0x2eb   : > { %7003 = vmatmul.msk.bf16.gmra.mxu3 %vm758_vm0, %v8318_v57 }
 0x2f0   : > { %v9559_v14 = vpop.f32.mrf.mxu0 }
 0x2f3   : > { %6979 = vmatmul.msk.bf16.gmra.mxu0 %vm758_vm0, %v8294_v32  ;;  %v8300_v32 = vld [vmem:[%s8612_s28 + $0x1a0] sm:$0xff] }
 0x2f8   : > { %v9562_v35 = vpop.f32.mrf.mxu0 }
 0x2fb   : > { %7004 = vmatmul.msk.bf16.gmra.mxu3 %vm758_vm0, %v8319_v8 }
 0x300   : > { %v9565_v45 = vpop.f32.mrf.mxu0 }
 0x303   : > { %6980 = vmatmul.msk.bf16.gmra.mxu0 %vm758_vm0, %v8295_v25 }
 0x308   : > { %v9568_v63 = vpop.f32.mrf.mxu0 }
 0x310   : > { %v9571_v13 = vpop.f32.mrf.mxu0 }
 0x313   : > { %6981 = vmatmul.msk.bf16.gmra.mxu0 %vm758_vm0, %v8296_v5 }
 0x318   : > { %v9574_v41 = vpop.f32.mrf.mxu0 }
 0x320   : > { %v9579_v49 = vpop.f32.mrf.mxu0 }
 0x323   : > { %6982 = vmatmul.msk.bf16.gmra.mxu0 %vm758_vm0, %v8297_v48 }
 0x328   : > { %v9582_v17 = vpop.f32.mrf.mxu0 }
 0x330   : > { %v9587_v18 = vpop.f32.mrf.mxu0 }
 0x333   : > { %6983 = vmatmul.msk.bf16.gmra.mxu0 %vm758_vm0, %v8298_v26  ;;  %v8302_v26 = vld [vmem:[%s8612_s28 + $0x1b0] sm:$0xff] }
 0x338   : > { %v9590_v30 = vpop.f32.mrf.mxu0 }
 0x340   : > { %v9595_v44 = vpop.f32.mrf.mxu0 }
 0x343   : > { %6984 = vmatmul.msk.bf16.gmra.mxu0 %vm758_vm0, %v8299_v39 }
 0x348   : > { %v9598_v53 = vpop.f32.mrf.mxu0 }
 0x350   : > { %v9601_v25 = vpop.f32.mrf.mxu0 }
 0x353   : > { %6985 = vmatmul.msk.bf16.gmra.mxu0 %vm758_vm0, %v8300_v32 }
 0x358   : > { %v9604_v5 = vpop.f32.mrf.mxu0 }
 0x360   : > { %v9607_v48 = vpop.f32.mrf.mxu0 }
 0x363   : > { %6986 = vmatmul.msk.bf16.gmra.mxu0 %vm758_vm0, %v8301_v50 }
 0x368   : > { %v9610_v57 = vpop.f32.mrf.mxu0 }
 0x370   : > { %v9613_v8 = vpop.f32.mrf.mxu0 }
 0x373   : > { %6987 = vmatmul.msk.bf16.gmra.mxu0 %vm758_vm0, %v8302_v26 }
 0x378   : > { %v9616_v39 = vpop.f32.mrf.mxu0 }
 0x380   : > { %v9619_v32 = vpop.f32.mrf.mxu0 }
 0x383   : > { %6988 = vmatmul.msk.bf16.gmra.mxu0 %vm758_vm0, %v8303_v62  ;;  %v1329_v62 = vpop.f32.mrf.mxu3 }
 0x388   : > { %v9622_v51 = vpop.f32.mrf.mxu0 }
 0x38b   : > { %v1331_v38 = vpop.f32.mrf.mxu3 }
 0x390   : > { %v9625_v50 = vpop.f32.mrf.mxu0 }
 0x393   : > { %6989 = vmatmul.msk.bf16.gmra.mxu0 %vm758_vm0, %v8304_v56  ;;  %v1330_v56 = vadd.f32 %v9269_v42, %v1329_v62  ;;  %v1334_v28 = vpop.f32.mrf.mxu3 }
 0x394   : > { %v1335_v11 = vadd.f32 %v9269_v42, %v1334_v28 }
 0x395   : > { %v1482_v10 = vmax.f32 %v1330_v56, 0.0 }
 0x396   : > { %v1484_v56 = vmax.f32 %v1335_v11, 0.0 }
 0x398   : > { %v9628_v6 = vpop.f32.mrf.mxu0 }
 0x39b   : > { %v1336_v3 = vpop.f32.mrf.mxu3 }
 0x3a0   : > { %v9631_v47 = vpop.f32.mrf.mxu0 }
 0x3a3   : > { %6990 = vmatmul.msk.bf16.gmra.mxu0 %vm758_vm0, %v8305_v60 }
 0x3a8   : > { %v9634_v26 = vpop.f32.mrf.mxu0 }
 0x3a9   : > { %12353 = vst [vmem:[#allocation57_spill] sm:$0xff] %v9634_v26 }
 0x3b0   : > { %v9637_v19 = vpop.f32.mrf.mxu0 }
 0x3b1   : > { %12354 = vst [vmem:[#allocation58_spill] sm:$0xff] %v9637_v19 }
 0x3b3   : > { %6991 = vmatmul.msk.bf16.gmra.mxu0 %vm758_vm0, %v8306_v16  ;;  %v1332_v16 = vadd.f32 %v9269_v42, %v1331_v38  ;;  %v1339_v38 = vpop.f32.mrf.mxu3 }
 0x3b4   : > { %v1340_v11 = vadd.f32 %v9269_v42, %v1339_v38 }
 0x3b5   : > { %v1483_v43 = vmax.f32 %v1332_v16, 0.0 }
 0x3b8   : > { %v9640_v59 = vpop.f32.mrf.mxu0 }
 0x3b9   : > { %12355 = vst [vmem:[#allocation59_spill] sm:$0xff] %v9640_v59 }
 0x3bb   : > { %v1341_v19 = vpop.f32.mrf.mxu3 }
 0x3c0   : > { %v1239_v46 = vpop.f32.mrf.mxu0 }
 0x3c1   : > { %v1240_v33 = vadd.f32 %v9269_v42, %v1239_v46 }
 0x3c3   : > { %v1446_v60 = vmax.f32 %v1240_v33, 0.0  ;;  %6992 = vmatmul.msk.bf16.gmra.mxu0 %vm758_vm0, %v8307_v54 }
 0x3c5   : > { %v1554_v0 = vmax.f32 %v1446_v60, %v1482_v10 }
 0x3c8   : > { %v1241_v2 = vpop.f32.mrf.mxu0 }
 0x3c9   : > { %v1242_v40 = vadd.f32 %v9269_v42, %v1241_v2 }
 0x3cb   : > { %v1447_v62 = vmax.f32 %v1242_v40, 0.0 }
 0x3cd   : > { %v1555_v33 = vmax.f32 %v1447_v62, %v1483_v43 }
 0x3cf   : > { %v1675_v54 = vrot.slane %v1555_v33, 4 }
 0x3d0   : > { %v1244_v29 = vpop.f32.mrf.mxu0 }
 0x3d1   : > { %v1245_v46 = vadd.f32 %v9269_v42, %v1244_v29 }
 0x3d3   : > { %v1448_v23 = vmax.f32 %v1245_v46, 0.0  ;;  %6993 = vmatmul.msk.bf16.gmra.mxu0 %vm758_vm0, %v8308_v27  ;;  %v8309_v46 = vld [vmem:[%s8612_s28 + $0x1e8] sm:$0xff] }
 0x3d5   : > { %v1556_v10 = vmax.f32 %v1448_v23, %v1484_v56 }
 0x3d7   : > { %v1676_v2 = vrot.slane %v1556_v10, 4 }
 0x3d8   : > { %v1246_v60 = vpop.f32.mrf.mxu0 }
 0x3d9   : > { %v1677_v28 = vsel %vm1608_vm1, %v1675_v54, %v1676_v2  ;;  %v1774_v61 = vmax.f32 %v1555_v33, %v1676_v2 }
 0x3da   : > { %v1773_v40 = vmax.f32 %v1554_v0, %v1677_v28 }
 0x3db   : > { %v1822_v16 = vpack.c.bf16 %v1774_v61, %v1774_v61 }
 0x3dc   : > { %v9653_v7 = vpack.c.bf16 %v1773_v40, %v1773_v40  ;;  %v1486_v40 = vmax.f32 %v1340_v11, 0.0 }
 0x3dd   : > { %v4876_v37 = vshll.u32 %v1822_v16, 16  ;;  %v5176_v43 = vshrl.u32 %v1822_v16, 16  ;;  %v5024_v29 = vrot.slane %v1822_v16, 5  ;;  %v5324_v59 = vrot.slane %v1822_v16, 6 }
 0x3de   : > { %12356 = vst [vmem:[#allocation60_spill] sm:$0xff] %v9653_v7  ;;  %v4867_v27 = vshrl.u32 %v9653_v7, 16  ;;  %v4870_v23 = vshll.u32 %v9653_v7, 16  ;;  %v7846_v62 = vrot.slane %v9653_v7, 9  ;;  %v7944_v33 = vrot.slane %v9653_v7, 10 }
 0x3df   : > { %v5178_v56 = vrot.slane %v5176_v43, 5  ;;  %v5179_v10 = vrot.slane %v4876_v37, 6  ;;  %v9673_v11 = vrot.slane %v4876_v37, 5  ;;  %v1342_v16 = vadd.f32 %v9269_v42, %v1341_v19 }
 0x3e0   : > { %v1249_v0 = vpop.f32.mrf.mxu0  ;;  %v5172_v61 = vrot.slane %v4867_v27, 5  ;;  %v5173_v54 = vrot.slane %v4870_v23, 6  ;;  %v4869_v2 = vrot.slane %v4867_v27, 4  ;;  %v4872_v28 = vrot.slane %v4870_v23, 5 }
 0x3e1   : > { %v1250_v38 = vadd.f32 %v9269_v42, %v1249_v0  ;;  %v9664_v26 = vsel %vm8780_vm8, %v7846_v62, %v5024_v29  ;;  %v9669_v7 = vsel %vm8791_vm10, %v7944_v33, %v5324_v59  ;;  %v5180_v23 = vor.u32 %v5179_v10, %v5178_v56  ;;  %12360 = vst [vmem:[#allocation64_spill] sm:$0xff] %v9673_v11 }
 0x3e2   : > { %12357 = vst [vmem:[#allocation61_spill] sm:$0xff] %v9664_v26  ;;  %v5174_v21 = vor.u32 %v5173_v54, %v5172_v61  ;;  %v4873_v34 = vor.u32 %v4872_v28, %v4869_v2  ;;  %v1487_v56 = vmax.f32 %v1342_v16, 0.0  ;;  %v8310_v2 = vld [vmem:[%s8612_s28 + $0x1f0] sm:$0xff] }
 0x3e3   : > { %v1450_v43 = vmax.f32 %v1250_v38, 0.0  ;;  %6994 = vmatmul.msk.bf16.gmra.mxu0 %vm758_vm0, %v8309_v46  ;;  %12358 = vst [vmem:[#allocation62_spill] sm:$0xff] %v9669_v7 }
 0x3e4   : > { %v5175_v27 = vrot.slane %v5174_v21, 4  ;;  %v9671_v12 = vrot.slane %v4873_v34, 4  ;;  %v1247_v21 = vadd.f32 %v9269_v42, %v1246_v60  ;;  %v1337_v34 = vadd.f32 %v9269_v42, %v1336_v3 }
 0x3e5   : > { %v1558_v29 = vmax.f32 %v1450_v43, %v1486_v40 }
 0x3e6   : > { %12359 = vst [vmem:[#allocation63_spill] sm:$0xff] %v9671_v12  ;;  %v9678_v62 = vsel %vm8816_vm13, %v5175_v27, %v5180_v23  ;;  %v1449_v33 = vmax.f32 %v1247_v21, 0.0  ;;  %v1485_v19 = vmax.f32 %v1337_v34, 0.0 }
 0x3e7   : > { %12361 = vst [vmem:[#allocation65_spill] sm:$0xff] %v9678_v62  ;;  %v1678_v61 = vrot.slane %v1558_v29, 4 }
 0x3e8   : > { %v1251_v46 = vpop.f32.mrf.mxu0  ;;  %v1557_v28 = vmax.f32 %v1449_v33, %v1485_v19 }
 0x3e9   : > { %v1252_v37 = vadd.f32 %v9269_v42, %v1251_v46 }
 0x3eb   : > { %v1451_v10 = vmax.f32 %v1252_v37, 0.0 }
 0x3ed   : > { %v1559_v0 = vmax.f32 %v1451_v10, %v1487_v56 }
 0x3ef   : > { %v1679_v54 = vrot.slane %v1559_v0, 4 }
 0x3f0   : > { %v1254_v38 = vpop.f32.mrf.mxu0 }
 0x3f1   : > { %v1680_v40 = vsel %vm1608_vm1, %v1678_v61, %v1679_v54  ;;  %v1776_v43 = vmax.f32 %v1558_v29, %v1679_v54 }
 0x3f2   : > { %v1775_v27 = vmax.f32 %v1557_v28, %v1680_v40 }
 0x3f3   : > { %v1824_v60 = vpack.c.bf16 %v1776_v43, %v1776_v43  ;;  %6995 = vmatmul.msk.bf16.gmra.mxu0 %vm758_vm0, %v8310_v2 }
 0x3f4   : > { %v9690_v3 = vpack.c.bf16 %v1775_v27, %v1775_v27 }
 0x3f5   : > { %v5624_v23 = vshll.u32 %v1824_v60, 16  ;;  %v6072_v16 = vrot.slane %v1824_v60, 6  ;;  %v5772_v46 = vrot.slane %v1824_v60, 5  ;;  %v5924_v10 = vshrl.u32 %v1824_v60, 16 }
 0x3f6   : > { %12362 = vst [vmem:[#allocation66_spill] sm:$0xff] %v9690_v3  ;;  %v5615_v21 = vshrl.u32 %v9690_v3, 16  ;;  %v5618_v34 = vshll.u32 %v9690_v3, 16  ;;  %v8188_v37 = vrot.slane %v9690_v3, 10  ;;  %v8090_v56 = vrot.slane %v9690_v3, 9 }
 0x3f7   : > { %v5927_v61 = vrot.slane %v5624_v23, 6  ;;  %v5926_v43 = vrot.slane %v5924_v10, 5  ;;  %v9707_v59 = vrot.slane %v5624_v23, 5  ;;  %v1255_v10 = vadd.f32 %v9269_v42, %v1254_v38 }
 0x3f8   : > { %v1256_v33 = vpop.f32.mrf.mxu0  ;;  %v5617_v29 = vrot.slane %v5615_v21, 4  ;;  %v5620_v19 = vrot.slane %v5618_v34, 5  ;;  %v9698_v0 = vsel %vm8791_vm10, %v8188_v37, %v6072_v16  ;;  %v9702_v54 = vsel %vm8780_vm8, %v8090_v56, %v5772_v46  ;;  %v8311_v56 = vld [vmem:[%s8612_s28 + $0x1f8] sm:$0xff] }
 0x3f9   : > { %12363 = vst [vmem:[#allocation67_spill] sm:$0xff] %v9698_v0  ;;  %v5920_v2 = vrot.slane %v5615_v21, 5  ;;  %v5921_v40 = vrot.slane %v5618_v34, 6  ;;  %v1257_v27 = vadd.f32 %v9269_v42, %v1256_v33  ;;  %v5928_v7 = vor.u32 %v5927_v61, %v5926_v43 }
 0x3fa   : > { %12364 = vst [vmem:[#allocation68_spill] sm:$0xff] %v9702_v54  ;;  %v5621_v28 = vor.u32 %v5620_v19, %v5617_v29  ;;  %v1167_v16 = vadd.f32 %v9269_v42, %v9526_v24  ;;  %v1170_v34 = vadd.f32 %v9269_v42, %v9547_v55  ;;  %v1165_v19 = vadd.f32 %v9269_v42, %v9522_v36 }
 0x3fb   : > { %12366 = vst [vmem:[#allocation70_spill] sm:$0xff] %v9707_v59  ;;  %v5922_v3 = vor.u32 %v5921_v40, %v5920_v2  ;;  %v1453_v37 = vmax.f32 %v1257_v27, 0.0  ;;  %v1452_v55 = vmax.f32 %v1255_v10, 0.0 }
 0x3fc   : > { %v9705_v60 = vrot.slane %v5621_v28, 4  ;;  %v1417_v29 = vmax.f32 %v1167_v16, 0.0  ;;  %v1418_v61 = vmax.f32 %v1170_v34, 0.0  ;;  %v1416_v40 = vmax.f32 %v1165_v19, 0.0 }
 0x3fd   : > { %v5923_v21 = vrot.slane %v5922_v3, 4 }
 0x3fe   : > { %12365 = vst [vmem:[#allocation69_spill] sm:$0xff] %v9705_v60  ;;  %v1525_v3 = vmax.f32 %v1417_v29, %v1453_v37  ;;  %v1524_v27 = vmax.f32 %v1416_v40, %v1452_v55 }
 0x3ff   : > { %v9721_v33 = vsel %vm8816_vm13, %v5923_v21, %v5928_v7 }
 0x400   : > { %v1259_v23 = vpop.f32.mrf.mxu0  ;;  %12367 = vst [vmem:[#allocation71_spill] sm:$0xff] %v9721_v33  ;;  %v1645_v38 = vrot.slane %v1525_v3, 4 }
 0x401   : > { %v1260_v24 = vadd.f32 %v9269_v42, %v1259_v23 }
 0x403   : > { %v1454_v2 = vmax.f32 %v1260_v24, 0.0  ;;  %6996 = vmatmul.msk.bf16.gmra.mxu0 %vm758_vm0, %v8311_v56  ;;  %v8312_v24 = vld [vmem:[%s8612_s28 + $0x200] sm:$0xff] }
 0x405   : > { %v1526_v28 = vmax.f32 %v1418_v61, %v1454_v2 }
 0x407   : > { %v1646_v43 = vrot.slane %v1526_v28, 4 }
 0x408   : > { %v1261_v7 = vpop.f32.mrf.mxu0 }
 0x409   : > { %v1647_v16 = vsel %vm1608_vm1, %v1645_v38, %v1646_v43  ;;  %v1754_v21 = vmax.f32 %v1525_v3, %v1646_v43 }
 0x40a   : > { %v1753_v23 = vmax.f32 %v1524_v27, %v1647_v16 }
 0x40b   : > { %v1802_v46 = vpack.c.bf16 %v1754_v21, %v1754_v21 }
 0x40c   : > { %v9728_v33 = vpack.c.bf16 %v1753_v23, %v1753_v23 }
 0x40d   : > { %v1966_v36 = vshll.u32 %v1802_v46, 16  ;;  %v2691_v34 = vshrl.u32 %v1802_v46, 16  ;;  %v2412_v37 = vrot.slane %v1802_v46, 5  ;;  %v2966_v27 = vrot.slane %v1802_v46, 6  ;;  %v9752_v46 = vld [vmem:[%s12078_s2] ss:$0 sm:$0xff] }
 0x40e   : > { %v1957_v56 = vshrl.u32 %v9728_v33, 16  ;;  %v1960_v10 = vshll.u32 %v9728_v33, 16  ;;  %v7093_v29 = vrot.slane %v9728_v33, 9  ;;  %v7205_v2 = vrot.slane %v9728_v33, 10 }
 0x40f   : > { %v2693_v19 = vrot.slane %v2691_v34, 5  ;;  %v2694_v61 = vrot.slane %v1966_v36, 6  ;;  %v9747_v0 = vrot.slane %v1966_v36, 5  ;;  %v1177_v36 = vadd.f32 %v9752_v46, %v9562_v35 }
 0x410   : > { %v1264_v55 = vpop.f32.mrf.mxu0  ;;  %v1959_v3 = vrot.slane %v1957_v56, 4  ;;  %v1962_v28 = vrot.slane %v1960_v10, 5  ;;  %v2687_v40 = vrot.slane %v1957_v56, 5  ;;  %v2688_v38 = vrot.slane %v1960_v10, 6 }
 0x411   : > { %v9737_v43 = vsel %vm8780_vm8, %v7093_v29, %v2412_v37  ;;  %v1265_v23 = vadd.f32 %v9269_v42, %v1264_v55  ;;  %v9743_v34 = vsel %vm8791_vm10, %v7205_v2, %v2966_v27  ;;  %v2695_v10 = vor.u32 %v2694_v61, %v2693_v19 }
 0x412   : > { %v1963_v16 = vor.u32 %v1962_v28, %v1959_v3  ;;  %v2689_v21 = vor.u32 %v2688_v38, %v2687_v40  ;;  %v1175_v42 = vadd.f32 %v9752_v46, %v9559_v14  ;;  %v1262_v19 = vadd.f32 %v9752_v46, %v1261_v7 }
 0x413   : > { %6997 = vmatmul.msk.bf16.gmra.mxu0 %vm758_vm0, %v8312_v24  ;;  %v1456_v24 = vmax.f32 %v1265_v23, 0.0  ;;  %v1172_v55 = vadd.f32 %v9752_v46, %v9556_v20  ;;  %v1421_v3 = vmax.f32 %v1177_v36, 0.0 }
 0x414   : > { %v9745_v54 = vrot.slane %v1963_v16, 4  ;;  %v2690_v56 = vrot.slane %v2689_v21, 4  ;;  %v1420_v2 = vmax.f32 %v1175_v42, 0.0  ;;  %v1455_v28 = vmax.f32 %v1262_v19, 0.0  ;;  %v8313_v21 = vld [vmem:[%s8612_s28 + $0x208] sm:$0xff] }
 0x415   : > { %v1419_v38 = vmax.f32 %v1172_v55, 0.0 }
 0x416   : > { %v1969_v37 = vsel %vm8808_vm12, %v9745_v54, %v9747_v0  ;;  %v9762_v29 = vsel %vm8816_vm13, %v2690_v56, %v2695_v10  ;;  %v1528_v0 = vmax.f32 %v1420_v2, %v1456_v24 }
 0x417   : > { %v1527_v35 = vmax.f32 %v1419_v38, %v1455_v28 }
 0x418   : > { %v1266_v61 = vpop.f32.mrf.mxu0  ;;  %v1648_v27 = vrot.slane %v1528_v0, 4 }
 0x419   : > { %v1267_v14 = vadd.f32 %v9752_v46, %v1266_v61 }
 0x41b   : > { %v1457_v54 = vmax.f32 %v1267_v14, 0.0 }
 0x41d   : > { %v1529_v40 = vmax.f32 %v1421_v3, %v1457_v54 }
 0x41f   : > { %v1649_v16 = vrot.slane %v1529_v40, 4 }
 0x420   : > { %v1269_v23 = vpop.f32.mrf.mxu0 }
 0x421   : > { %v1650_v7 = vsel %vm1608_vm1, %v1648_v27, %v1649_v16  ;;  %v1756_v56 = vmax.f32 %v1528_v0, %v1649_v16  ;;  %v2238_v0 = vunpack.c.l.b16 %v9728_v33 }
 0x422   : > { %v1755_v10 = vmax.f32 %v1527_v35, %v1650_v7 }
 0x423   : > { %v1804_v42 = vpack.c.bf16 %v1756_v56, %v1756_v56  ;;  %6998 = vmatmul.msk.bf16.gmra.mxu0 %vm758_vm0, %v8313_v21  ;;  %v2467_v56 = vunpack.c.l.b16 %v9737_v43  ;;  %v1182_v43 = vadd.f32 %v9752_v46, %v9568_v63 }
 0x424   : > { %v9773_v61 = vpack.c.bf16 %v1755_v10, %v1755_v10 }
 0x425   : > { %v1980_v20 = vshll.u32 %v1804_v42, 16  ;;  %v2701_v36 = vshrl.u32 %v1804_v42, 16  ;;  %v2416_v24 = vrot.slane %v1804_v42, 5  ;;  %v2970_v26 = vrot.slane %v1804_v42, 6 }
 0x426   : > { %v1971_v19 = vshrl.u32 %v9773_v61, 16  ;;  %v1974_v2 = vshll.u32 %v9773_v61, 16  ;;  %v2239_v14 = vunpack.c.l.b16 %v9773_v61  ;;  %v7094_v55 = vrot.slane %v9773_v61, 9 }
 0x427   : > { %v2703_v3 = vrot.slane %v2701_v36, 5  ;;  %v2704_v54 = vrot.slane %v1980_v20, 6  ;;  %v7206_v28 = vrot.slane %v9773_v61, 10  ;;  %v1185_v42 = vadd.f32 %v9752_v46, %v9571_v13  ;;  %v8325_v61 = vld [vmem:[%s12079_s3 + $0x18] sm:$0xff] }
 0x428   : > { %v1271_v40 = vpop.f32.mrf.mxu0  ;;  %v1973_v38 = vrot.slane %v1971_v19, 4  ;;  %v1976_v27 = vrot.slane %v1974_v2, 5  ;;  %v2697_v16 = vrot.slane %v1971_v19, 5  ;;  %v2698_v21 = vrot.slane %v1974_v2, 6 }
 0x429   : > { %v9783_v35 = vpack.c.b16 %v2239_v14, %v2238_v0  ;;  %v9787_v7 = vsel %vm8780_vm8, %v7094_v55, %v2416_v24  ;;  %v1272_v59 = vadd.f32 %v9752_v46, %v1271_v40  ;;  %v1982_v19 = vrot.slane %v1980_v20, 5 }
 0x42a   : > { %v1977_v10 = vor.u32 %v1976_v27, %v1973_v38  ;;  %v2699_v36 = vor.u32 %v2698_v21, %v2697_v16  ;;  %v12166_v33 = vunpack.c.l.b16 %v9787_v7  ;;  %v2705_v2 = vor.u32 %v2704_v54, %v2703_v3  ;;  %v8314_v38 = vld [vmem:[%s8612_s28 + $0x210] sm:$0xff] }
 0x42b   : > { %v9798_v24 = vsel %vm8791_vm10, %v7206_v28, %v2970_v26  ;;  %v3021_v55 = vunpack.c.l.b16 %v9743_v34  ;;  %v2093_v54 = vunpack.c.l.b16 %v1969_v37  ;;  %v2792_v26 = vunpack.c.l.b16 %v9762_v29 }
 0x42c   : > { %v1978_v60 = vrot.slane %v1977_v10, 4  ;;  %v2700_v11 = vrot.slane %v2699_v36, 4  ;;  %v9794_v0 = vpack.c.b16 %v12166_v33, %v2467_v56  ;;  %v12165_v20 = vunpack.c.l.b16 %v9798_v24 }
 0x42d   : > { %v1459_v28 = vmax.f32 %v1272_v59, 0.0  ;;  %v1270_v27 = vadd.f32 %v9752_v46, %v1269_v23  ;;  %v1423_v37 = vmax.f32 %v1182_v43, 0.0  ;;  %v1180_v29 = vadd.f32 %v9752_v46, %v9565_v45  ;;  %v8329_v23 = vld [vmem:[%s12079_s3 + $0x38] sm:$0xff]  ;;  %v8328_v45 = vld [vmem:[%s12079_s3 + $0x30] sm:$0xff] }
 0x42e   : > { %v1983_v3 = vsel %vm8808_vm12, %v1978_v60, %v1982_v19  ;;  %v9810_v40 = vsel %vm8816_vm13, %v2700_v11, %v2705_v2  ;;  %v9819_v34 = vpack.c.b16 %v12165_v20, %v3021_v55  ;;  %v1424_v21 = vmax.f32 %v1185_v42, 0.0  ;;  %2310 = vmatpush.bf16.msrb.mxu2 %v8329_v23 }
 0x42f   : > { %v9814_v63 = vunpack.c.l.b16 %v1983_v3  ;;  %v12164_v13 = vunpack.c.l.b16 %v9810_v40  ;;  %v1531_v56 = vmax.f32 %v1423_v37, %v1459_v28  ;;  %v1458_v36 = vmax.f32 %v1270_v27, 0.0 }
 0x430   : > { %v1274_v60 = vpop.f32.mrf.mxu0  ;;  %v1422_v2 = vmax.f32 %v1180_v29, 0.0 }
 0x431   : > { %v1275_v16 = vadd.f32 %v9752_v46, %v1274_v60  ;;  %v2105_v11 = vpack.c.b16 %v9814_v63, %v2093_v54  ;;  %v2804_v59 = vpack.c.b16 %v12164_v13, %v2792_v26  ;;  %v1651_v43 = vrot.slane %v1531_v56, 4  ;;  %v8327_v60 = vld [vmem:[%s12079_s3 + $0x28] sm:$0xff] }
 0x432   : > { %v1530_v3 = vmax.f32 %v1422_v2, %v1458_v36  ;;  %2311 = vmatpush.bf16.msrb.mxu2 %v8328_v45 }
 0x433   : > { %v1460_v10 = vmax.f32 %v1275_v16, 0.0  ;;  %6999 = vmatmul.msk.bf16.gmra.mxu0 %vm758_vm0, %v8314_v38  ;;  %2193 = vmatmul.bf16.gmra.mxu2 %v2105_v11 }
 0x434   : > { %2892 = vmatmul.bf16.gmra.mxu1 %v2804_v59 }
 0x435   : > { %v1532_v19 = vmax.f32 %v1424_v21, %v1460_v10  ;;  %v8315_v10 = vld [vmem:[%s8612_s28 + $0x218] sm:$0xff] }
 0x436   : > { %2312 = vmatpush.bf16.msrb.mxu2 %v8327_v60 }
 0x437   : > { %v1652_v55 = vrot.slane %v1532_v19, 4 }
 0x438   : > { %v1276_v54 = vpop.f32.mrf.mxu0 }
 0x439   : > { %v1653_v42 = vsel %vm1608_vm1, %v1651_v43, %v1652_v55  ;;  %v1758_v26 = vmax.f32 %v1531_v56, %v1652_v55  ;;  %v8326_v43 = vld [vmem:[%s12079_s3 + $0x20] sm:$0xff] }
 0x43a   : > { %v1757_v28 = vmax.f32 %v1530_v3, %v1653_v42  ;;  %2313 = vmatpush.bf16.msrb.mxu2 %v8326_v43 }
 0x43b   : > { %v1806_v38 = vpack.c.bf16 %v1758_v26, %v1758_v26 }
 0x43c   : > { %v9836_v27 = vpack.c.bf16 %v1757_v28, %v1757_v28 }
 0x43d   : > { %v1994_v37 = vshll.u32 %v1806_v38, 16  ;;  %v2711_v16 = vshrl.u32 %v1806_v38, 16  ;;  %v2420_v11 = vrot.slane %v1806_v38, 5  ;;  %v2974_v28 = vrot.slane %v1806_v38, 6 }
 0x43e   : > { %v1985_v59 = vshrl.u32 %v9836_v27, 16  ;;  %v1988_v29 = vshll.u32 %v9836_v27, 16  ;;  %v2240_v21 = vunpack.c.l.b16 %v9836_v27  ;;  %v7095_v56 = vrot.slane %v9836_v27, 9  ;;  %2314 = vmatpush.bf16.msrb.mxu2 %v8325_v61  ;;  %v8323_v61 = vld [vmem:[%s12079_s3 + $0x8] sm:$0xff] }
 0x43f   : > { %v2713_v36 = vrot.slane %v2711_v16, 5  ;;  %v2714_v23 = vrot.slane %v1994_v37, 6  ;;  %v7207_v19 = vrot.slane %v9836_v27, 10 }
 0x440   : > { %v1279_v2 = vpop.f32.mrf.mxu0  ;;  %v1987_v55 = vrot.slane %v1985_v59, 4  ;;  %v1990_v3 = vrot.slane %v1988_v29, 5  ;;  %v2707_v45 = vrot.slane %v1985_v59, 5  ;;  %v2708_v42 = vrot.slane %v1988_v29, 6 }
 0x441   : > { %v9852_v26 = vsel %vm8780_vm8, %v7095_v56, %v2420_v11  ;;  %v9859_v20 = vpack.c.b16 %v2240_v21, %v2239_v14  ;;  %v1280_v33 = vadd.f32 %v9752_v46, %v1279_v2  ;;  %v1996_v59 = vrot.slane %v1994_v37, 5 }
 0x442   : > { %v1991_v60 = vor.u32 %v1990_v3, %v1987_v55  ;;  %v2709_v16 = vor.u32 %v2708_v42, %v2707_v45  ;;  %v12169_v13 = vunpack.c.l.b16 %v9852_v26  ;;  %v2715_v29 = vor.u32 %v2714_v23, %v2713_v36 }
 0x443   : > { %7000 = vmatmul.msk.bf16.gmra.mxu0 %vm758_vm0, %v8315_v10  ;;  %v9865_v38 = vsel %vm8791_vm10, %v7207_v19, %v2974_v28  ;;  %v12368_v14 = vunpack.c.l.b16 %v9787_v7  ;;  %v1190_v37 = vadd.f32 %v9752_v46, %v9579_v49  ;;  %v12370_v23 = vunpack.c.l.b16 %v9798_v24  ;;  %v8324_v28 = vld [vmem:[%s12079_s3 + $0x10] sm:$0xff] }
 0x444   : > { %v1992_v11 = vrot.slane %v1991_v60, 4  ;;  %v2710_v56 = vrot.slane %v2709_v16, 4  ;;  %v12168_v43 = vunpack.c.l.b16 %v9865_v38  ;;  %v1192_v19 = vadd.f32 %v9752_v46, %v9582_v17  ;;  %2315 = vmatpush.bf16.msrb.mxu2 %v8324_v28 }
 0x445   : > { %v9875_v2 = vpack.c.b16 %v12169_v13, %v12368_v14  ;;  %v1462_v55 = vmax.f32 %v1280_v33, 0.0  ;;  %v1277_v45 = vadd.f32 %v9752_v46, %v1276_v54  ;;  %v1426_v24 = vmax.f32 %v1190_v37, 0.0 }
 0x446   : > { %v1997_v10 = vsel %vm8808_vm12, %v1992_v11, %v1996_v59  ;;  %v9883_v36 = vsel %vm8816_vm13, %v2710_v56, %v2715_v29  ;;  %v9889_v7 = vpack.c.b16 %v12168_v43, %v12370_v23  ;;  %v12371_v17 = vunpack.c.l.b16 %v9810_v40  ;;  %v8316_v23 = vld [vmem:[%s8612_s28 + $0x220] sm:$0xff] }
 0x447   : > { %12369 = vst [vmem:[#allocation72_spill] sm:$0xff] %v9875_v2  ;;  %v9893_v3 = vunpack.c.l.b16 %v1997_v10  ;;  %v12167_v49 = vunpack.c.l.b16 %v9883_v36  ;;  %v1187_v54 = vadd.f32 %v9752_v46, %v9574_v41  ;;  %v1427_v59 = vmax.f32 %v1192_v19, 0.0  ;;  %v8322_v41 = vld [vmem:[%s12079_s3] sm:$0xff] }
 0x448   : > { %v1281_v42 = vpop.f32.mrf.mxu0  ;;  %v1534_v29 = vmax.f32 %v1426_v24, %v1462_v55  ;;  %v1461_v56 = vmax.f32 %v1277_v45, 0.0  ;;  %2316 = vmatpush.bf16.msrb.mxu2 %v8323_v61  ;;  %v12374_v27 = vunpack.c.l.b16 %v9852_v26 }
 0x449   : > { %v1282_v60 = vadd.f32 %v9752_v46, %v1281_v42  ;;  %v9907_v33 = vpack.c.b16 %v12167_v49, %v12371_v17  ;;  %v1425_v37 = vmax.f32 %v1187_v54, 0.0 }
 0x44a   : > { %v1654_v40 = vrot.slane %v1534_v29, 4 }
 0x44b   : > { %12372 = vst [vmem:[#allocation73_spill] sm:$0xff] %v9907_v33  ;;  %v1463_v11 = vmax.f32 %v1282_v60, 0.0  ;;  %v1533_v42 = vmax.f32 %v1425_v37, %v1461_v56 }
 0x44c   : > { %2317 = vmatpush.bf16.msrb.mxu2 %v8322_v41 }
 0x44d   : > { %v1535_v14 = vmax.f32 %v1427_v59, %v1463_v11 }
 0x44f   : > { %v1655_v10 = vrot.slane %v1535_v14, 4 }
 0x450   : > { %v1284_v17 = vpop.f32.mrf.mxu0 }
 0x451   : > { %v1656_v19 = vsel %vm1608_vm1, %v1654_v40, %v1655_v10  ;;  %v1760_v55 = vmax.f32 %v1534_v29, %v1655_v10 }
 0x452   : > { %v1759_v45 = vmax.f32 %v1533_v42, %v1656_v19 }
 0x453   : > { %v1808_v28 = vpack.c.bf16 %v1760_v55, %v1760_v55  ;;  %7001 = vmatmul.msk.bf16.gmra.mxu0 %vm758_vm0, %v8316_v23  ;;  %vm11844_vm0 = vmand %vm6294_vm14, %vm6295_vm15 }
 0x454   : > { %v9920_v24 = vpack.c.bf16 %v1759_v45, %v1759_v45 }
 0x455   : > { %v2008_v60 = vshll.u32 %v1808_v28, 16  ;;  %v2721_v54 = vshrl.u32 %v1808_v28, 16  ;;  %v2424_v59 = vrot.slane %v1808_v28, 5  ;;  %v2978_v43 = vrot.slane %v1808_v28, 6 }
 0x456   : > { %v1999_v11 = vshrl.u32 %v9920_v24, 16  ;;  %v2002_v56 = vshll.u32 %v9920_v24, 16  ;;  %v2241_v61 = vunpack.c.l.b16 %v9920_v24  ;;  %v7096_v14 = vrot.slane %v9920_v24, 9 }
 0x457   : > { %v2723_v37 = vrot.slane %v2721_v54, 5  ;;  %v2724_v29 = vrot.slane %v2008_v60, 6  ;;  %v7208_v40 = vrot.slane %v9920_v24, 10  ;;  %v2010_v12 = vrot.slane %v2008_v60, 5 }
 0x458   : > { %v1286_v10 = vpop.f32.mrf.mxu0  ;;  %v2001_v42 = vrot.slane %v1999_v11, 4  ;;  %v2004_v23 = vrot.slane %v2002_v56, 5  ;;  %v2717_v41 = vrot.slane %v1999_v11, 5  ;;  %v2718_v19 = vrot.slane %v2002_v56, 6 }
 0x459   : > { %v9931_v55 = vpack.c.b16 %v2241_v61, %v2240_v21  ;;  %v9935_v45 = vsel %vm8780_vm8, %v7096_v14, %v2424_v59  ;;  %v1287_v13 = vadd.f32 %v9752_v46, %v1286_v10  ;;  %v2725_v11 = vor.u32 %v2724_v29, %v2723_v37 }
 0x45a   : > { %v2005_v16 = vor.u32 %v2004_v23, %v2001_v42  ;;  %v2719_v54 = vor.u32 %v2718_v19, %v2717_v41  ;;  %v12174_v49 = vunpack.c.l.b16 %v9935_v45  ;;  %v9947_v59 = vsel %vm8791_vm10, %v7208_v40, %v2978_v43 }
 0x45b   : > { %12373 = vst [vmem:[#allocation74_spill] sm:$0xff] %v9931_v55  ;;  %v1197_v14 = vadd.f32 %v9752_v46, %v9590_v30  ;;  %v12173_v28 = vunpack.c.l.b16 %v9947_v59  ;;  %v1200_v60 = vadd.f32 %v9752_v46, %v9595_v44  ;;  %v1465_v37 = vmax.f32 %v1287_v13, 0.0 }
 0x45c   : > { %v2006_v56 = vrot.slane %v2005_v16, 4  ;;  %v2720_v62 = vrot.slane %v2719_v54, 4  ;;  %v9943_v21 = vpack.c.b16 %v12174_v49, %v12374_v27  ;;  %v12376_v40 = vunpack.c.l.b16 %v9865_v38 }
 0x45d   : > { %v1285_v44 = vadd.f32 %v9752_v46, %v1284_v17  ;;  %v1429_v42 = vmax.f32 %v1197_v14, 0.0  ;;  %v12379_v13 = vunpack.c.l.b16 %v9883_v36  ;;  %v1195_v38 = vadd.f32 %v9752_v46, %v9587_v18 }
 0x45e   : > { %12375 = vst [vmem:[#allocation75_spill] sm:$0xff] %v9943_v21  ;;  %v2011_v16 = vsel %vm8808_vm12, %v2006_v56, %v2010_v12  ;;  %v9958_v26 = vsel %vm8816_vm13, %v2720_v62, %v2725_v11  ;;  %v9967_v30 = vpack.c.b16 %v12173_v28, %v12376_v40  ;;  %v1430_v41 = vmax.f32 %v1200_v60, 0.0 }
 0x45f   : > { %v9960_v29 = vunpack.c.l.b16 %v2011_v16  ;;  %v12172_v43 = vunpack.c.l.b16 %v9958_v26  ;;  %v1537_v19 = vmax.f32 %v1429_v42, %v1465_v37  ;;  %v1464_v54 = vmax.f32 %v1285_v44, 0.0 }
 0x460   : > { %12377 = vst [vmem:[#allocation76_spill] sm:$0xff] %v9967_v30  ;;  %v1289_v10 = vpop.f32.mrf.mxu0  ;;  %v1428_v56 = vmax.f32 %v1195_v38, 0.0  ;;  %v12381_v24 = vunpack.c.l.b16 %v9935_v45  ;;  %v1207_v45 = vadd.f32 %v9752_v46, %v9604_v5 }
 0x461   : > { %v1290_v12 = vadd.f32 %v9752_v46, %v1289_v10  ;;  %v9973_v62 = vpack.c.b16 %v9960_v29, %v9893_v3  ;;  %v9979_v23 = vpack.c.b16 %v12172_v43, %v12379_v13  ;;  %v1657_v27 = vrot.slane %v1537_v19, 4 }
 0x462   : > { %v1536_v36 = vmax.f32 %v1428_v56, %v1464_v54 }
 0x463   : > { %12378 = vst [vmem:[#allocation77_spill] sm:$0xff] %v9973_v62  ;;  %v1466_v17 = vmax.f32 %v1290_v12, 0.0  ;;  %2198 = vmatmul.bf16.gmra.mxu2 %v9973_v62  ;;  %2897 = vmatmul.bf16.gmra.mxu1 %v9979_v23 }
 0x464   : > { %12380 = vst [vmem:[#allocation78_spill] sm:$0xff] %v9979_v23 }
 0x465   : > { %v1538_v11 = vmax.f32 %v1430_v41, %v1466_v17 }
 0x467   : > { %v1658_v14 = vrot.slane %v1538_v11, 4 }
 0x468   : > { %v1291_v16 = vpop.f32.mrf.mxu0 }
 0x469   : > { %v1659_v40 = vsel %vm1608_vm1, %v1657_v27, %v1658_v14  ;;  %v1762_v10 = vmax.f32 %v1537_v19, %v1658_v14 }
 0x46a   : > { %v1761_v13 = vmax.f32 %v1536_v36, %v1659_v40 }
 0x46b   : > { %v1810_v43 = vpack.c.bf16 %v1762_v10, %v1762_v10 }
 0x46c   : > { %v9986_v18 = vpack.c.bf16 %v1761_v13, %v1761_v13 }
 0x46d   : > { %v2022_v60 = vshll.u32 %v1810_v43, 16  ;;  %v2731_v37 = vshrl.u32 %v1810_v43, 16  ;;  %v2428_v42 = vrot.slane %v1810_v43, 5  ;;  %v2982_v10 = vrot.slane %v1810_v43, 6 }
 0x46e   : > { %v2013_v12 = vshrl.u32 %v9986_v18, 16  ;;  %v2016_v44 = vshll.u32 %v9986_v18, 16  ;;  %v2242_v38 = vunpack.c.l.b16 %v9986_v18  ;;  %v7097_v41 = vrot.slane %v9986_v18, 9 }
 0x46f   : > { %v2733_v17 = vrot.slane %v2731_v37, 5  ;;  %v2734_v54 = vrot.slane %v2022_v60, 6  ;;  %v7209_v11 = vrot.slane %v9986_v18, 10 }
 0x470   : > { %v1294_v19 = vpop.f32.mrf.mxu0  ;;  %v2015_v56 = vrot.slane %v2013_v12, 4  ;;  %v2018_v27 = vrot.slane %v2016_v44, 5  ;;  %v2727_v14 = vrot.slane %v2013_v12, 5  ;;  %v2728_v36 = vrot.slane %v2016_v44, 6 }
 0x471   : > { %v9995_v40 = vsel %vm8780_vm8, %v7097_v41, %v2428_v42  ;;  %v10002_v37 = vpack.c.b16 %v2242_v38, %v2241_v61  ;;  %v1295_v23 = vadd.f32 %v9752_v46, %v1294_v19  ;;  %v2024_v12 = vrot.slane %v2022_v60, 5 }
 0x472   : > { %v2019_v13 = vor.u32 %v2018_v27, %v2015_v56  ;;  %v2729_v28 = vor.u32 %v2728_v36, %v2727_v14  ;;  %v12177_v49 = vunpack.c.l.b16 %v9995_v40  ;;  %v2735_v44 = vor.u32 %v2734_v54, %v2733_v17 }
 0x473   : > { %2318 = vmatmul.bf16.vlgmr.msrb.gmra.mxu2 %v8852_v4  ;;  %v10008_v42 = vsel %vm8791_vm10, %v7209_v11, %v2982_v10  ;;  %v1205_v19 = vadd.f32 %v9752_v46, %v9601_v25  ;;  %v1468_v54 = vmax.f32 %v1295_v23, 0.0  ;;  %v1292_v27 = vadd.f32 %v9752_v46, %v1291_v16 }
 0x474   : > { %v2020_v43 = vrot.slane %v2019_v13, 4  ;;  %v2730_v41 = vrot.slane %v2729_v28, 4  ;;  %v12176_v56 = vunpack.c.l.b16 %v10008_v42  ;;  %v10015_v61 = vpack.c.b16 %v12177_v49, %v12381_v24 }
 0x475   : > { %v12383_v28 = vunpack.c.l.b16 %v9947_v59  ;;  %v1432_v36 = vmax.f32 %v1205_v19, 0.0  ;;  %v12386_v13 = vunpack.c.l.b16 %v9958_v26  ;;  %v1202_v23 = vadd.f32 %v9752_v46, %v9598_v53 }
 0x476   : > { %12382 = vst [vmem:[#allocation79_spill] sm:$0xff] %v10015_v61  ;;  %v2025_v4 = vsel %vm8808_vm12, %v2020_v43, %v2024_v12  ;;  %v10023_v60 = vsel %vm8816_vm13, %v2730_v41, %v2735_v44  ;;  %v1433_v12 = vmax.f32 %v1207_v45, 0.0  ;;  %v1467_v43 = vmax.f32 %v1292_v27, 0.0 }
 0x477   : > { %v10029_v17 = vpack.c.b16 %v12176_v56, %v12383_v28  ;;  %v10033_v11 = vunpack.c.l.b16 %v2025_v4  ;;  %v12178_v25 = vunpack.c.l.b16 %v10023_v60  ;;  %v1540_v44 = vmax.f32 %v1432_v36, %v1468_v54 }
 0x478   : > { %v1296_v14 = vpop.f32.mrf.mxu0  ;;  %v1431_v24 = vmax.f32 %v1202_v23, 0.0  ;;  %v12389_v18 = vunpack.c.l.b16 %v9995_v40 }
 0x479   : > { %12384 = vst [vmem:[#allocation80_spill] sm:$0xff] %v10029_v17  ;;  %v1297_v10 = vadd.f32 %v9752_v46, %v1296_v14  ;;  %v10040_v59 = vpack.c.b16 %v10033_v11, %v9960_v29  ;;  %v10046_v5 = vpack.c.b16 %v12178_v25, %v12386_v13  ;;  %v1660_v19 = vrot.slane %v1540_v44, 4 }
 0x47a   : > { %v1539_v28 = vmax.f32 %v1431_v24, %v1467_v43 }
 0x47b   : > { %12385 = vst [vmem:[#allocation81_spill] sm:$0xff] %v10040_v59  ;;  %v1469_v16 = vmax.f32 %v1297_v10, 0.0 }
 0x47c   : > { %12387 = vst [vmem:[#allocation82_spill] sm:$0xff] %v10046_v5 }
 0x47d   : > { %v1541_v41 = vmax.f32 %v1433_v12, %v1469_v16 }
 0x47f   : > { %v1661_v4 = vrot.slane %v1541_v41, 4 }
 0x480   : > { %v1299_v29 = vpop.f32.mrf.mxu0 }
 0x481   : > { %v1662_v14 = vsel %vm1608_vm1, %v1660_v19, %v1661_v4  ;;  %v1764_v26 = vmax.f32 %v1540_v44, %v1661_v4 }
 0x482   : > { %v1763_v56 = vmax.f32 %v1539_v28, %v1662_v14 }
 0x483   : > { %v1812_v49 = vpack.c.bf16 %v1764_v26, %v1764_v26  ;;  %2323 = vmatmul.bf16.gmra.mxu2 %v9003_v58 }
 0x484   : > { %v10052_v13 = vpack.c.bf16 %v1763_v56, %v1763_v56 }
 0x485   : > { %v2036_v53 = vshll.u32 %v1812_v49, 16  ;;  %v2741_v45 = vshrl.u32 %v1812_v49, 16  ;;  %v2432_v54 = vrot.slane %v1812_v49, 5  ;;  %v2986_v25 = vrot.slane %v1812_v49, 6 }
 0x486   : > { %v2027_v27 = vshrl.u32 %v10052_v13, 16  ;;  %v2030_v36 = vshll.u32 %v10052_v13, 16  ;;  %v2243_v10 = vunpack.c.l.b16 %v10052_v13  ;;  %v7098_v23 = vrot.slane %v10052_v13, 9 }
 0x487   : > { %v2743_v12 = vrot.slane %v2741_v45, 5  ;;  %v2744_v16 = vrot.slane %v2036_v53, 6  ;;  %v7210_v44 = vrot.slane %v10052_v13, 10  ;;  %v2038_v5 = vrot.slane %v2036_v53, 5  ;;  %v8341_v13 = vld [vmem:[%s12079_s3 + $0x98] sm:$0xff] }
 0x488   : > { %v1301_v43 = vpop.f32.mrf.mxu0  ;;  %v2029_v41 = vrot.slane %v2027_v27, 4  ;;  %v2032_v24 = vrot.slane %v2030_v36, 5  ;;  %v2737_v56 = vrot.slane %v2027_v27, 5  ;;  %v2738_v19 = vrot.slane %v2030_v36, 6 }
 0x489   : > { %v10063_v4 = vpack.c.b16 %v2243_v10, %v2242_v38  ;;  %v10067_v28 = vsel %vm8780_vm8, %v7098_v23, %v2432_v54  ;;  %v1302_v62 = vadd.f32 %v9752_v46, %v1301_v43  ;;  %v2745_v27 = vor.u32 %v2744_v16, %v2743_v12 }
 0x48a   : > { %v2033_v14 = vor.u32 %v2032_v24, %v2029_v41  ;;  %v2739_v26 = vor.u32 %v2738_v19, %v2737_v56  ;;  %v12183_v45 = vunpack.c.l.b16 %v10067_v28  ;;  %v10079_v54 = vsel %vm8791_vm10, %v7210_v44, %v2986_v25 }
 0x48b   : > { %12388 = vst [vmem:[#allocation83_spill] sm:$0xff] %v10063_v4  ;;  %v1212_v23 = vadd.f32 %v9752_v46, %v9610_v57  ;;  %v12182_v49 = vunpack.c.l.b16 %v10079_v54  ;;  %v1215_v53 = vadd.f32 %v9752_v46, %v9613_v8  ;;  %v1471_v16 = vmax.f32 %v1302_v62, 0.0 }
 0x48c   : > { %v2034_v36 = vrot.slane %v2033_v14, 4  ;;  %v2740_v33 = vrot.slane %v2739_v26, 4  ;;  %v10075_v38 = vpack.c.b16 %v12183_v45, %v12389_v18  ;;  %v12391_v44 = vunpack.c.l.b16 %v10008_v42 }
 0x48d   : > { %v1300_v8 = vadd.f32 %v9752_v46, %v1299_v29  ;;  %v1435_v24 = vmax.f32 %v1212_v23, 0.0  ;;  %v12394_v62 = vunpack.c.l.b16 %v10023_v60  ;;  %v1210_v42 = vadd.f32 %v9752_v46, %v9607_v48  ;;  %v8345_v60 = vld [vmem:[%s12079_s3 + $0xb8] sm:$0xff] }
 0x48e   : > { %12390 = vst [vmem:[#allocation84_spill] sm:$0xff] %v10075_v38  ;;  %v2039_v12 = vsel %vm8808_vm12, %v2034_v36, %v2038_v5  ;;  %v10090_v40 = vsel %vm8816_vm13, %v2740_v33, %v2745_v27  ;;  %v10099_v57 = vpack.c.b16 %v12182_v49, %v12391_v44  ;;  %v1436_v19 = vmax.f32 %v1215_v53, 0.0  ;;  %2539 = vmatpush.bf16.msra.mxu3 %v8345_v60  ;;  %v8344_v36 = vld [vmem:[%s12079_s3 + $0xb0] sm:$0xff]  ;;  %v10130_v44 = vpop.f32.mrf.mxu1 }
 0x48f   : > { %v10092_v43 = vunpack.c.l.b16 %v2039_v12  ;;  %v12181_v25 = vunpack.c.l.b16 %v10090_v40  ;;  %v1543_v14 = vmax.f32 %v1435_v24, %v1471_v16  ;;  %v1470_v26 = vmax.f32 %v1300_v8, 0.0  ;;  %v8376_v16 = vld [vmem:[%s12079_s3 + $0x1b0] sm:$0xff] }
 0x490   : > { %12392 = vst [vmem:[#allocation85_spill] sm:$0xff] %v10099_v57  ;;  %v1304_v41 = vpop.f32.mrf.mxu0  ;;  %v1434_v48 = vmax.f32 %v1210_v42, 0.0  ;;  %v8343_v42 = vld [vmem:[%s12079_s3 + $0xa8] sm:$0xff] }
 0x491   : > { %v1305_v5 = vadd.f32 %v9752_v46, %v1304_v41  ;;  %v10105_v33 = vpack.c.b16 %v10092_v43, %v10033_v11  ;;  %v10111_v56 = vpack.c.b16 %v12181_v25, %v12394_v62  ;;  %v8377_v11 = vld [vmem:[%s12079_s3 + $0x1b8] sm:$0xff]  ;;  %v1663_v18 = vrot.slane %v1543_v14, 4 }
 0x492   : > { %3419 = vmatpush.bf16.msra.mxu1 %v8377_v11  ;;  %v1542_v53 = vmax.f32 %v1434_v48, %v1470_v26  ;;  %2540 = vmatpush.bf16.msra.mxu3 %v8344_v36  ;;  %v8342_v36 = vld [vmem:[%s12079_s3 + $0xa0] sm:$0xff] }
 0x493   : > { %12393 = vst [vmem:[#allocation86_spill] sm:$0xff] %v10105_v33  ;;  %v1472_v29 = vmax.f32 %v1305_v5, 0.0  ;;  %2203 = vmatmul.bf16.vlgmr.msrb.gmra.mxu3 %v10105_v33  ;;  %2328 = vmatmul.bf16.gmra.mxu2 %v9140_v15 }
 0x494   : > { %12395 = vst [vmem:[#allocation87_spill] sm:$0xff] %v10111_v56  ;;  %2902 = vmatmul.bf16.gmra.mxu1 %v10111_v56 }
 0x495   : > { %v1544_v27 = vmax.f32 %v1436_v19, %v1472_v29  ;;  %v8375_v19 = vld [vmem:[%s12079_s3 + $0x1a8] sm:$0xff] }
 0x496   : > { %3420 = vmatpush.bf16.msra.mxu1 %v8376_v16  ;;  %2541 = vmatpush.bf16.msra.mxu3 %v8343_v42  ;;  %v10163_v15 = vpop.f32.mrf.mxu1 }
 0x497   : > { %v1664_v23 = vrot.slane %v1544_v27, 4 }
 0x498   : > { %v1306_v12 = vpop.f32.mrf.mxu0 }
 0x499   : > { %v1665_v8 = vsel %vm1608_vm1, %v1663_v18, %v1664_v23  ;;  %v1766_v41 = vmax.f32 %v1543_v14, %v1664_v23 }
 0x49a   : > { %v1765_v24 = vmax.f32 %v1542_v53, %v1665_v8  ;;  %3421 = vmatpush.bf16.msra.mxu1 %v8375_v19  ;;  %v8374_v8 = vld [vmem:[%s12079_s3 + $0x1a0] sm:$0xff]  ;;  %2542 = vmatpush.bf16.msra.mxu3 %v8342_v36 }
 0x49b   : > { %v1814_v5 = vpack.c.bf16 %v1766_v41, %v1766_v41 }
 0x49c   : > { %v10133_v62 = vpack.c.bf16 %v1765_v24, %v1765_v24 }
 0x49d   : > { %v2050_v29 = vshll.u32 %v1814_v5, 16  ;;  %v2751_v26 = vshrl.u32 %v1814_v5, 16  ;;  %v2436_v60 = vrot.slane %v1814_v5, 5  ;;  %v2990_v49 = vrot.slane %v1814_v5, 6 }
 0x49e   : > { %v2041_v14 = vshrl.u32 %v10133_v62, 16  ;;  %v2044_v11 = vshll.u32 %v10133_v62, 16  ;;  %v7099_v48 = vrot.slane %v10133_v62, 9  ;;  %v7211_v53 = vrot.slane %v10133_v62, 10  ;;  %3422 = vmatpush.bf16.msra.mxu1 %v8374_v8  ;;  %2543 = vmatpush.bf16.msra.mxu3 %v8341_v13 }
 0x49f   : > { %v2753_v18 = vrot.slane %v2751_v26, 5  ;;  %v2754_v23 = vrot.slane %v2050_v29, 6  ;;  %v12396_v56 = vunpack.c.l.b16 %v10133_v62 }
 0x4a0   : > { %v1309_v16 = vpop.f32.mrf.mxu0  ;;  %v2043_v41 = vrot.slane %v2041_v14, 4  ;;  %v2046_v24 = vrot.slane %v2044_v11, 5  ;;  %v2747_v42 = vrot.slane %v2041_v14, 5  ;;  %v2748_v19 = vrot.slane %v2044_v11, 6 }
 0x4a1   : > { %v10154_v25 = vsel %vm8780_vm8, %v7099_v48, %v2436_v60  ;;  %v10161_v33 = vpack.c.b16 %v12396_v56, %v2243_v10  ;;  %v1310_v14 = vadd.f32 %v9752_v46, %v1309_v16  ;;  %v2052_v60 = vrot.slane %v2050_v29, 5  ;;  %v8373_v10 = vld [vmem:[%s12079_s3 + $0x198] sm:$0xff] }
 0x4a2   : > { %v2047_v26 = vor.u32 %v2046_v24, %v2043_v41  ;;  %v2749_v45 = vor.u32 %v2748_v19, %v2747_v42  ;;  %v12192_v27 = vunpack.c.l.b16 %v10154_v25  ;;  %v2755_v5 = vor.u32 %v2754_v23, %v2753_v18  ;;  %3423 = vmatpush.bf16.msra.mxu1 %v8373_v10  ;;  %v8340_v19 = vld [vmem:[%s12079_s3 + $0x90] sm:$0xff] }
 0x4a3   : > { %12397 = vst [vmem:[#allocation88_spill] sm:$0xff] %v10161_v33  ;;  %2333 = vmatmul.bf16.gmra.mxu2 %v9287_v31  ;;  %v10169_v11 = vsel %vm8791_vm10, %v7211_v53, %v2990_v49  ;;  %v12398_v16 = vunpack.c.l.b16 %v10067_v28  ;;  %v1220_v49 = vadd.f32 %v9752_v46, %v9619_v32  ;;  %v12400_v23 = vunpack.c.l.b16 %v10079_v54  ;;  %v8372_v54 = vld [vmem:[%s12079_s3 + $0x190] sm:$0xff]  ;;  %2544 = vmatpush.bf16.msra.mxu3 %v8340_v19  ;;  %v8370_v19 = vld [vmem:[%s12079_s3 + $0x180] sm:$0xff] }
 0x4a4   : > { %v2048_v48 = vrot.slane %v2047_v26, 4  ;;  %v2750_v36 = vrot.slane %v2749_v45, 4  ;;  %v12191_v56 = vunpack.c.l.b16 %v10169_v11  ;;  %v1222_v53 = vadd.f32 %v9752_v46, %v9622_v51 }
 0x4a5   : > { %v10182_v29 = vpack.c.b16 %v12192_v27, %v12398_v16  ;;  %v1474_v8 = vmax.f32 %v1310_v14, 0.0  ;;  %v1307_v24 = vadd.f32 %v9752_v46, %v1306_v12  ;;  %v1438_v26 = vmax.f32 %v1220_v49, 0.0 }
 0x4a6   : > { %v2053_v18 = vsel %vm8808_vm12, %v2048_v48, %v2052_v60  ;;  %v10190_v45 = vsel %vm8816_vm13, %v2750_v36, %v2755_v5  ;;  %v10196_v28 = vpack.c.b16 %v12191_v56, %v12400_v23  ;;  %v12403_v14 = vunpack.c.l.b16 %v10090_v40  ;;  %3424 = vmatpush.bf16.msra.mxu1 %v8372_v54  ;;  %v10223_v48 = vpop.f32.mrf.mxu1  ;;  %v8371_v40 = vld [vmem:[%s12079_s3 + $0x188] sm:$0xff] }
 0x4a7   : > { %12399 = vst [vmem:[#allocation89_spill] sm:$0xff] %v10182_v29  ;;  %v10200_v32 = vunpack.c.l.b16 %v2053_v18  ;;  %v12190_v41 = vunpack.c.l.b16 %v10190_v45  ;;  %v1217_v5 = vadd.f32 %v9752_v46, %v9616_v39  ;;  %v1439_v13 = vmax.f32 %v1222_v53, 0.0  ;;  %v8338_v39 = vld [vmem:[%s12079_s3 + $0x80] sm:$0xff] }
 0x4a8   : > { %12401 = vst [vmem:[#allocation90_spill] sm:$0xff] %v10196_v28  ;;  %v1311_v42 = vpop.f32.mrf.mxu0  ;;  %v1546_v36 = vmax.f32 %v1438_v26, %v1474_v8  ;;  %v1473_v16 = vmax.f32 %v1307_v24, 0.0  ;;  %v10234_v8 = vpop.f32.mrf.mxu2  ;;  %v12405_v56 = vunpack.c.l.b16 %v10133_v62 }
 0x4a9   : > { %v1312_v60 = vadd.f32 %v9752_v46, %v1311_v42  ;;  %v10213_v51 = vpack.c.b16 %v10200_v32, %v10092_v43  ;;  %v10219_v12 = vpack.c.b16 %v12190_v41, %v12403_v14  ;;  %v8339_v43 = vld [vmem:[%s12079_s3 + $0x88] sm:$0xff]  ;;  %v1437_v18 = vmax.f32 %v1217_v5, 0.0 }
 0x4aa   : > { %2545 = vmatpush.bf16.msra.mxu3 %v8339_v43  ;;  %3425 = vmatpush.bf16.msra.mxu1 %v8371_v40  ;;  %v1666_v23 = vrot.slane %v1546_v36, 4 }
 0x4ab   : > { %12402 = vst [vmem:[#allocation91_spill] sm:$0xff] %v10213_v51  ;;  %v1475_v10 = vmax.f32 %v1312_v60, 0.0  ;;  %v1545_v24 = vmax.f32 %v1437_v18, %v1473_v16 }
 0x4ac   : > { %12404 = vst [vmem:[#allocation92_spill] sm:$0xff] %v10219_v12 }
 0x4ad   : > { %v1547_v49 = vmax.f32 %v1439_v13, %v1475_v10  ;;  %v8361_v13 = vld [vmem:[%s12079_s3 + $0x138] sm:$0xff] }
 0x4ae   : > { %2546 = vmatpush.bf16.msra.mxu3 %v8338_v39  ;;  %3426 = vmatpush.bf16.msra.mxu1 %v8370_v19  ;;  %v10246_v10 = vpop.f32.mrf.mxu1 }
 0x4af   : > { %v1667_v53 = vrot.slane %v1547_v49, 4  ;;  %3093 = vmatpush.bf16.msra.mxu2 %v8361_v13  ;;  %v8360_v13 = vld [vmem:[%s12079_s3 + $0x130] sm:$0xff] }
 0x4b0   : > { %v1314_v42 = vpop.f32.mrf.mxu0  ;;  %v10269_v12 = vpop.f32.mrf.mxu2 }
 0x4b1   : > { %v1668_v54 = vsel %vm1608_vm1, %v1666_v23, %v1667_v53  ;;  %v1768_v26 = vmax.f32 %v1546_v36, %v1667_v53  ;;  %v8369_v53 = vld [vmem:[%s12079_s3 + $0x178] sm:$0xff] }
 0x4b2   : > { %v1767_v60 = vmax.f32 %v1545_v24, %v1668_v54  ;;  %3243 = vmatpush.bf16.msrb.mxu3 %v8369_v53 }
 0x4b3   : > { %v1816_v14 = vpack.c.bf16 %v1768_v26, %v1768_v26  ;;  %2338 = vmatmul.bf16.gmra.mxu2 %v9783_v35 }
 0x4b4   : > { %v10241_v5 = vpack.c.bf16 %v1767_v60, %v1767_v60  ;;  %3094 = vmatpush.bf16.msra.mxu2 %v8360_v13 }
 0x4b5   : > { %v2064_v16 = vshll.u32 %v1816_v14, 16  ;;  %v2761_v43 = vshrl.u32 %v1816_v14, 16  ;;  %v2440_v40 = vrot.slane %v1816_v14, 5  ;;  %v2994_v58 = vrot.slane %v1816_v14, 6 }
 0x4b6   : > { %v2055_v49 = vshrl.u32 %v10241_v5, 16  ;;  %v2058_v36 = vshll.u32 %v10241_v5, 16  ;;  %v2245_v18 = vunpack.c.l.b16 %v10241_v5  ;;  %v7100_v35 = vrot.slane %v10241_v5, 9 }
 0x4b7   : > { %v2763_v39 = vrot.slane %v2761_v43, 5  ;;  %v2764_v23 = vrot.slane %v2064_v16, 6  ;;  %v7212_v24 = vrot.slane %v10241_v5, 10  ;;  %v2066_v29 = vrot.slane %v2064_v16, 5 }
 0x4b8   : > { %v1316_v19 = vpop.f32.mrf.mxu0  ;;  %v2057_v54 = vrot.slane %v2055_v49, 4  ;;  %v2060_v26 = vrot.slane %v2058_v36, 5  ;;  %v2757_v60 = vrot.slane %v2055_v49, 5  ;;  %v2758_v41 = vrot.slane %v2058_v36, 6 }
 0x4b9   : > { %v10263_v43 = vpack.c.b16 %v2245_v18, %v12405_v56  ;;  %v10267_v27 = vsel %vm8780_vm8, %v7100_v35, %v2440_v40  ;;  %v1317_v53 = vadd.f32 %v9752_v46, %v1316_v19  ;;  %v2765_v62 = vor.u32 %v2764_v23, %v2763_v39  ;;  %v8359_v56 = vld [vmem:[%s12079_s3 + $0x128] sm:$0xff]  ;;  %v10297_v23 = vpop.f32.mrf.mxu1 }
 0x4ba   : > { %v2061_v31 = vor.u32 %v2060_v26, %v2057_v54  ;;  %v2759_v49 = vor.u32 %v2758_v41, %v2757_v60  ;;  %v12201_v36 = vunpack.c.l.b16 %v10267_v27  ;;  %v12407_v40 = vunpack.c.l.b16 %v10154_v25  ;;  %3095 = vmatpush.bf16.msra.mxu2 %v8359_v56 }
 0x4bb   : > { %12406 = vst [vmem:[#allocation93_spill] sm:$0xff] %v10263_v43  ;;  %v10284_v41 = vsel %vm8791_vm10, %v7212_v24, %v2994_v58  ;;  %v1227_v14 = vadd.f32 %v9752_v46, %v9628_v6  ;;  %v1230_v16 = vadd.f32 %v9752_v46, %v9631_v47  ;;  %v1477_v58 = vmax.f32 %v1317_v53, 0.0 }
 0x4bc   : > { %v2062_v61 = vrot.slane %v2061_v31, 4  ;;  %v2760_v28 = vrot.slane %v2759_v49, 4  ;;  %v10280_v35 = vpack.c.b16 %v12201_v36, %v12407_v40  ;;  %v12202_v31 = vunpack.c.l.b16 %v10284_v41  ;;  %v10323_v49 = vpop.f32.mrf.mxu2  ;;  %v8357_v40 = vld [vmem:[%s12079_s3 + $0x118] sm:$0xff] }
 0x4bd   : > { %v12409_v19 = vunpack.c.l.b16 %v10169_v11  ;;  %v1441_v54 = vmax.f32 %v1227_v14, 0.0  ;;  %v12412_v11 = vunpack.c.l.b16 %v10190_v45  ;;  %v1442_v53 = vmax.f32 %v1230_v16, 0.0  ;;  %v8368_v45 = vld [vmem:[%s12079_s3 + $0x170] sm:$0xff] }
 0x4be   : > { %12408 = vst [vmem:[#allocation94_spill] sm:$0xff] %v10280_v35  ;;  %v2067_v39 = vsel %vm8808_vm12, %v2062_v61, %v2066_v29  ;;  %v10295_v25 = vsel %vm8816_vm13, %v2760_v28, %v2765_v62  ;;  %v1315_v61 = vadd.f32 %v9752_v46, %v1314_v42  ;;  %v8358_v28 = vld [vmem:[%s12079_s3 + $0x120] sm:$0xff]  ;;  %v1225_v42 = vadd.f32 %v9752_v46, %v9625_v50 }
 0x4bf   : > { %v10299_v24 = vunpack.c.l.b16 %v2067_v39  ;;  %v12200_v6 = vunpack.c.l.b16 %v10295_v25  ;;  %v10306_v47 = vpack.c.b16 %v12202_v31, %v12409_v19  ;;  %3096 = vmatpush.bf16.msra.mxu2 %v8358_v28  ;;  %v1549_v62 = vmax.f32 %v1441_v54, %v1477_v58  ;;  %3244 = vmatpush.bf16.msrb.mxu3 %v8368_v45  ;;  %v8356_v19 = vld [vmem:[%s12079_s3 + $0x110] sm:$0xff] }
 0x4c0   : > { %v1319_v29 = vpop.f32.mrf.mxu0 }
 0x4c1   : > { %12410 = vst [vmem:[#allocation95_spill] sm:$0xff] %v10306_v47  ;;  %v1320_v26 = vadd.f32 %v9752_v46, %v1319_v29  ;;  %v10315_v60 = vpack.c.b16 %v10299_v24, %v10200_v32  ;;  %v10321_v13 = vpack.c.b16 %v12200_v6, %v12412_v11  ;;  %v1476_v32 = vmax.f32 %v1315_v61, 0.0  ;;  %v10339_v61 = vpop.f32.mrf.mxu1 }
 0x4c2   : > { %v1440_v46 = vmax.f32 %v1225_v42, 0.0  ;;  %v1669_v14 = vrot.slane %v1549_v62, 4 }
 0x4c3   : > { %12411 = vst [vmem:[#allocation96_spill] sm:$0xff] %v10315_v60  ;;  %v1478_v56 = vmax.f32 %v1320_v26, 0.0  ;;  %2208 = vmatmul.bf16.gmra.mxu3 %v10315_v60  ;;  %2343 = vmatmul.bf16.gmra.mxu2 %v9931_v55  ;;  %v8355_v26 = vld [vmem:[%s12079_s3 + $0x108] sm:$0xff] }
 0x4c4   : > { %12413 = vst [vmem:[#allocation97_spill] sm:$0xff] %v10321_v13  ;;  %2907 = vmatmul.bf16.gmra.mxu1 %v10321_v13  ;;  %3097 = vmatpush.bf16.msra.mxu2 %v8357_v40  ;;  %v1548_v39 = vmax.f32 %v1440_v46, %v1476_v32  ;;  %v10345_v42 = vpop.f32.mrf.mxu2  ;;  %v8354_v40 = vld [vmem:[%s12079_s3 + $0x100] sm:$0xff] }
 0x4c5   : > { %v1550_v50 = vmax.f32 %v1442_v53, %v1478_v56 }
 0x4c7   : > { %v1670_v16 = vrot.slane %v1550_v50, 4 }
 0x4c8   : > { %v1321_v58 = vpop.f32.mrf.mxu0  ;;  %3098 = vmatpush.bf16.msra.mxu2 %v8356_v19 }
 0x4c9   : > { %v1671_v29 = vsel %vm1608_vm1, %v1669_v14, %v1670_v16  ;;  %v1770_v28 = vmax.f32 %v1549_v62, %v1670_v16  ;;  %v10373_v2 = vpop.f32.mrf.mxu1 }
 0x4ca   : > { %v1769_v54 = vmax.f32 %v1548_v39, %v1671_v29 }
 0x4cb   : > { %v1818_v11 = vpack.c.bf16 %v1770_v28, %v1770_v28 }
 0x4cc   : > { %v10347_v53 = vpack.c.bf16 %v1769_v54, %v1769_v54  ;;  %3099 = vmatpush.bf16.msra.mxu2 %v8355_v26 }
 0x4cd   : > { %v3332_v56 = vshll.u32 %v1818_v11, 16  ;;  %v3816_v32 = vrot.slane %v1818_v11, 6  ;;  %v3492_v45 = vrot.slane %v1818_v11, 5  ;;  %v3656_v39 = vshrl.u32 %v1818_v11, 16 }
 0x4ce   : > { %v3323_v62 = vshrl.u32 %v10347_v53, 16  ;;  %v3326_v50 = vshll.u32 %v10347_v53, 16  ;;  %v12208_v46 = vunpack.c.l.b16 %v10347_v53  ;;  %v7456_v14 = vrot.slane %v10347_v53, 10 }
 0x4cf   : > { %v7358_v16 = vrot.slane %v10347_v53, 9  ;;  %v3659_v19 = vrot.slane %v3332_v56, 6  ;;  %v3658_v55 = vrot.slane %v3656_v39, 5  ;;  %v12418_v39 = vld [vmem:[#allocation9_spill] sm:$0xff] }
 0x4d0   : > { %v1324_v29 = vpop.f32.mrf.mxu0  ;;  %v3325_v28 = vrot.slane %v3323_v62, 4  ;;  %v3328_v54 = vrot.slane %v3326_v50, 5  ;;  %v10361_v26 = vpack.c.b16 %v12208_v46, %v2245_v18  ;;  %v10365_v6 = vsel %vm8791_vm10, %v7456_v14, %v3816_v32  ;;  %3100 = vmatpush.bf16.msra.mxu2 %v8354_v40  ;;  %v8553_v18 = vld [vmem:[%s12078_s2] ss:$0 sm:$0xff]  ;;  %v12415_v14 = vld [vmem:[#allocation4_spill] sm:$0xff] }
 0x4d1   : > { %v12212_v36 = vunpack.c.l.b16 %v10365_v6  ;;  %v10370_v31 = vsel %vm8780_vm8, %v7358_v16, %v3492_v45  ;;  %v3652_v11 = vrot.slane %v3323_v62, 5  ;;  %v3653_v5 = vrot.slane %v3326_v50, 6  ;;  %v8367_v45 = vld [vmem:[%s12079_s3 + $0x168] sm:$0xff]  ;;  %v10389_v16 = vpop.f32.mrf.mxu2 }
 0x4d2   : > { %12414 = vst [vmem:[#allocation98_spill] sm:$0xff] %v10361_v26  ;;  %v3329_v13 = vor.u32 %v3328_v54, %v3325_v28  ;;  %v12215_v60 = vunpack.c.l.b16 %v10370_v31  ;;  %v1325_v32 = vadd.f32 %v8553_v18, %v1324_v29  ;;  %v3334_v40 = vrot.slane %v3332_v56, 5  ;;  %v12419_v28 = vld [vmem:[#allocation5_spill] sm:$0xff]  ;;  %3245 = vmatpush.bf16.msrb.mxu3 %v8367_v45 }
 0x4d3   : > { %2348 = vmatmul.bf16.gmra.mxu2 %v10063_v4  ;;  %2547 = vmatmul.bf16.vlgmr.msra.gmra.mxu3 %v12415_v14  ;;  %v12416_v62 = vunpack.c.l.b16 %v10284_v41  ;;  %v12420_v29 = vpack.c.b16 %v12418_v39, %v12419_v28  ;;  %v12421_v14 = vunpack.c.l.b16 %v10267_v27  ;;  %v3654_v56 = vor.u32 %v3653_v5, %v3652_v11  ;;  %v12423_v41 = vld [vmem:[#allocation58_spill] sm:$0xff]  ;;  %v12426_v45 = vld [vmem:[#allocation57_spill] sm:$0xff] }
 0x4d4   : > { %v3330_v54 = vrot.slane %v3329_v13, 4  ;;  %v3660_v4 = vor.u32 %v3659_v19, %v3658_v55  ;;  %v1235_v26 = vadd.f32 %v8553_v18, %v12423_v41  ;;  %v1480_v39 = vmax.f32 %v1325_v32, 0.0 }
 0x4d5   : > { %v10387_v50 = vpack.c.b16 %v12212_v36, %v12416_v62  ;;  %3427 = vmatmul.bf16.vlgmr.msra.gmra.mxu1 %v12420_v29  ;;  %v10398_v46 = vpack.c.b16 %v12215_v60, %v12421_v14  ;;  %v3655_v36 = vrot.slane %v3654_v56, 4  ;;  %v1322_v13 = vadd.f32 %v8553_v18, %v1321_v58 }
 0x4d6   : > { %v3335_v62 = vsel %vm8808_vm12, %v3330_v54, %v3334_v40  ;;  %v1444_v11 = vmax.f32 %v1235_v26, 0.0  ;;  %v1232_v40 = vadd.f32 %v8553_v18, %v12426_v45  ;;  %v12427_v58 = vunpack.c.l.b16 %v10295_v25  ;;  %v12429_v25 = vld [vmem:[#allocation13_spill] sm:$0xff] }
 0x4d7   : > { %12417 = vst [vmem:[#allocation4_spill] sm:$0xff] %v10387_v50  ;;  %v12424_v50 = vld [vmem:[#allocation59_spill] sm:$0xff]  ;;  %v10404_v28 = vunpack.c.l.b16 %v3335_v62  ;;  %v10408_v29 = vsel %vm8816_vm13, %v3655_v36, %v3660_v4  ;;  %v1479_v56 = vmax.f32 %v1322_v13, 0.0  ;;  %v10420_v4 = vpop.f32.mrf.mxu1  ;;  %v8366_v13 = vld [vmem:[%s12079_s3 + $0x160] sm:$0xff]  ;;  %v12436_v9 = vunpack.c.l.b16 %v10370_v31 }
 0x4d8   : > { %12422 = vst [vmem:[#allocation9_spill] sm:$0xff] %v10398_v46  ;;  %v1237_v33 = vadd.f32 %v8553_v18, %v12424_v50  ;;  %v1326_v27 = vpop.f32.mrf.mxu0  ;;  %v3680_v5 = vunpack.c.l.b16 %v10408_v29  ;;  %v1552_v32 = vmax.f32 %v1444_v11, %v1480_v39  ;;  %v1443_v26 = vmax.f32 %v1232_v40, 0.0  ;;  %3246 = vmatpush.bf16.msrb.mxu3 %v8366_v13 }
 0x4d9   : > { %v1327_v55 = vadd.f32 %v8553_v18, %v1326_v27  ;;  %v10412_v19 = vpack.c.b16 %v10404_v28, %v10299_v24  ;;  %v10422_v41 = vpop.f32.mrf.mxu2 }
 0x4da   : > { %v1445_v50 = vmax.f32 %v1237_v33, 0.0  ;;  %v10418_v14 = vpack.c.b16 %v3680_v5, %v12427_v58  ;;  %v1672_v24 = vrot.slane %v1552_v32, 4  ;;  %v1551_v27 = vmax.f32 %v1443_v26, %v1479_v56 }
 0x4db   : > { %12425 = vst [vmem:[#allocation5_spill] sm:$0xff] %v10412_v19  ;;  %v1481_v54 = vmax.f32 %v1327_v55, 0.0  ;;  %v12431_v55 = vld [vmem:[#allocation20_spill] sm:$0xff] }
 0x4dc   : > { %12428 = vst [vmem:[#allocation58_spill] sm:$0xff] %v10418_v14  ;;  %3247 = vmatpush.bf16.msrb.mxu3 %v8365_v1  ;;  %v8363_v1 = vld [vmem:[%s12079_s3 + $0x148] sm:$0xff] }
 0x4dd   : > { %v1553_v36 = vmax.f32 %v1445_v50, %v1481_v54 }
 0x4df   : > { %v1673_v62 = vrot.slane %v1553_v36, 4 }
 0x4e1   : > { %v1674_v29 = vsel %vm1608_vm1, %v1672_v24, %v1673_v62  ;;  %v1772_v18 = vmax.f32 %v1552_v32, %v1673_v62  ;;  %v10439_v24 = vpop.f32.mrf.mxu1  ;;  %vm6402_vm1 = vsmask.f32 7938 }
 0x4e2   : > { %v1771_v33 = vmax.f32 %v1551_v27, %v1674_v29  ;;  %vm11864_vm5 = vmand %vm6294_vm14, %vm6402_vm1 }
 0x4e3   : > { %v1820_v39 = vpack.c.bf16 %v1772_v18, %v1772_v18  ;;  %2353 = vmatmul.bf16.gmra.mxu2 %v10263_v43  ;;  %2552 = vmatmul.bf16.gmra.mxu3 %v12429_v25  ;;  %v12433_v18 = vunpack.c.l.b16 %v10347_v53 }
 0x4e4   : > { %v10430_v11 = vpack.c.bf16 %v1771_v33, %v1771_v33 }
 0x4e5   : > { %3432 = vmatmul.bf16.gmra.mxu1 %v12431_v55  ;;  %v4276_v45 = vrot.slane %v1820_v39, 5  ;;  %v4128_v40 = vshll.u32 %v1820_v39, 16  ;;  %v4428_v50 = vshrl.u32 %v1820_v39, 16  ;;  %v4576_v54 = vrot.slane %v1820_v39, 6 }
 0x4e6   : > { %12430 = vst [vmem:[#allocation59_spill] sm:$0xff] %v10430_v11  ;;  %v10433_v32 = vpop.f32.mrf.mxu2  ;;  %v7602_v58 = vrot.slane %v10430_v11, 9  ;;  %v12220_v56 = vunpack.c.l.b16 %v10430_v11  ;;  %v4119_v36 = vshrl.u32 %v10430_v11, 16  ;;  %v4122_v26 = vshll.u32 %v10430_v11, 16 }
 0x4e7   : > { %v4430_v62 = vrot.slane %v4428_v50, 5  ;;  %v7700_v27 = vrot.slane %v10430_v11, 10  ;;  %v4431_v14 = vrot.slane %v4128_v40, 6 }
 0x4e8   : > { %v10444_v29 = vsel %vm8780_vm8, %v7602_v58, %v4276_v45  ;;  %v10450_v33 = vpack.c.b16 %v12220_v56, %v12433_v18  ;;  %v4121_v39 = vrot.slane %v4119_v36, 4  ;;  %v4124_v13 = vrot.slane %v4122_v26, 5  ;;  %vm11983_vm8 = vmand %vm6472_vm2, %vm6543_vm7 }
 0x4e9   : > { %12432 = vst [vmem:[#allocation57_spill] sm:$0xff] %v10444_v29  ;;  %v12223_v60 = vunpack.c.l.b16 %v10444_v29  ;;  %v4424_v55 = vrot.slane %v4119_v36, 5  ;;  %v4425_v43 = vrot.slane %v4122_v26, 6  ;;  %v10455_v46 = vsel %vm8791_vm10, %v7700_v27, %v4576_v54 }
 0x4ea   : > { %12434 = vst [vmem:[#allocation13_spill] sm:$0xff] %v10450_v33  ;;  %v4125_v50 = vor.u32 %v4124_v13, %v4121_v39  ;;  %v12222_v58 = vunpack.c.l.b16 %v10455_v46  ;;  %v4130_v56 = vrot.slane %v4128_v40, 5  ;;  %v4432_v36 = vor.u32 %v4431_v14, %v4430_v62  ;;  %v10481_v14 = vpop.f32.mrf.mxu1  ;;  %v12444_v62 = vld [vmem:[#allocation23_spill] sm:$0xff] }
 0x4eb   : > { %12435 = vst [vmem:[#allocation99_spill] sm:$0xff] %v10455_v46  ;;  %v10461_v53 = vpack.c.b16 %v12223_v60, %v12436_v9  ;;  %v4426_v45 = vor.u32 %v4425_v43, %v4424_v55  ;;  %v12438_v26 = vunpack.c.l.b16 %v10365_v6  ;;  %v12448_v9 = vld [vmem:[#allocation14_spill] sm:$0xff] }
 0x4ec   : > { %v4126_v18 = vrot.slane %v4125_v50, 4 }
 0x4ed   : > { %12437 = vst [vmem:[#allocation100_spill] sm:$0xff] %v10461_v53  ;;  %v4427_v11 = vrot.slane %v4426_v45, 4  ;;  %v10468_v22 = vpack.c.b16 %v12222_v58, %v12438_v26  ;;  %v8364_v45 = vld [vmem:[%s12079_s3 + $0x150] sm:$0xff]  ;;  %v12451_v58 = vpack.c.b16 %v9893_v3, %v9814_v63  ;;  %v8399_v63 = vld [vmem:[%s12079_s3 + $0x268] sm:$0xff] }
 0x4ee   : > { %v10470_v54 = vpop.f32.mrf.mxu2  ;;  %v4131_v31 = vsel %vm8808_vm12, %v4126_v18, %v4130_v56  ;;  %v12445_v56 = vld [vmem:[#allocation6_spill] sm:$0xff]  ;;  %v12449_v18 = vld [vmem:[#allocation40_spill] sm:$0xff]  ;;  %3248 = vmatpush.bf16.msrb.mxu3 %v8364_v45 }
 0x4ef   : > { %12439 = vst [vmem:[#allocation101_spill] sm:$0xff] %v10468_v22  ;;  %v10474_v27 = vunpack.c.l.b16 %v4131_v31  ;;  %v10478_v43 = vsel %vm8816_vm13, %v4427_v11, %v4432_v36  ;;  %v12446_v11 = vld [vmem:[#allocation30_spill] sm:$0xff]  ;;  %v8401_v45 = vld [vmem:[%s12079_s3 + $0x278] sm:$0xff]  ;;  %v8394_v22 = vld [vmem:[%s12079_s3 + $0x240] sm:$0xff] }
 0x4f0   : > { %12441 = vst [vmem:[#allocation103_spill] sm:$0xff] %v10478_v43  ;;  %v12224_v55 = vunpack.c.l.b16 %v10478_v43  ;;  %3901 = vmatpush.bf16.msrb.mxu1 %v8401_v45  ;;  %v12452_v45 = vld [vmem:[#allocation34_spill] sm:$0xff] }
 0x4f1   : > { %12440 = vst [vmem:[#allocation102_spill] sm:$0xff] %v10474_v27  ;;  %v10485_v6 = vpack.c.b16 %v10474_v27, %v10404_v28  ;;  %v8396_v27 = vld [vmem:[%s12079_s3 + $0x250] sm:$0xff] }
 0x4f2   : > { %v10489_v40 = vpack.c.b16 %v12224_v55, %v3680_v5  ;;  %v10499_v13 = vpop.f32.mrf.mxu1  ;;  %v12447_v5 = vld [vmem:[#allocation33_spill] sm:$0xff]  ;;  %3249 = vmatpush.bf16.msrb.mxu3 %v8363_v1 }
 0x4f3   : > { %12442 = vst [vmem:[#allocation104_spill] sm:$0xff] %v10485_v6  ;;  %2557 = vmatmul.bf16.gmra.mxu3 %v12444_v62  ;;  %3101 = vmatmul.bf16.vlgmr.msra.gmra.mxu2 %v12445_v56  ;;  %v12450_v56 = vld [vmem:[#allocation24_spill] sm:$0xff]  ;;  %v8398_v1 = vld [vmem:[%s12079_s3 + $0x260] sm:$0xff]  ;;  %v12455_v6 = vld [vmem:[#allocation10_spill] sm:$0xff] }
 0x4f4   : > { %12443 = vst [vmem:[#allocation105_spill] sm:$0xff] %v10489_v40 }
 0x4f5   : > { %3437 = vmatmul.bf16.gmra.mxu1 %v12446_v11 }
 0x4f6   : > { %v10497_v39 = vpop.f32.mrf.mxu2 }
 0x4fa   : > { %v10503_v50 = vpop.f32.mrf.mxu1 }
 0x4fe   : > { %v10501_v28 = vpop.f32.mrf.mxu2 }
 0x502   : > { %v10513_v26 = vpop.f32.mrf.mxu1 }
 0x503   : > { %2562 = vmatmul.bf16.gmra.mxu3 %v12447_v5  ;;  %3106 = vmatmul.bf16.gmra.mxu2 %v12448_v9  ;;  %v12454_v9 = vld [vmem:[#allocation7_spill] sm:$0xff] }
 0x505   : > { %3442 = vmatmul.bf16.gmra.mxu1 %v12449_v18  ;;  %v8384_v18 = vld [vmem:[%s12079_s3 + $0x1f0] sm:$0xff] }
 0x506   : > { %v10511_v36 = vpop.f32.mrf.mxu2 }
 0x50a   : > { %v10528_v60 = vpop.f32.mrf.mxu1 }
 0x50e   : > { %v10515_v31 = vpop.f32.mrf.mxu2 }
 0x512   : > { %v10538_v3 = vpop.f32.mrf.mxu1 }
 0x513   : > { %2567 = vmatmul.bf16.gmra.mxu3 %v9794_v0  ;;  %3111 = vmatmul.bf16.gmra.mxu2 %v12450_v56  ;;  %v8400_v0 = vld [vmem:[%s12079_s3 + $0x270] sm:$0xff] }
 0x514   : > { %3902 = vmatpush.bf16.msrb.mxu1 %v8400_v0  ;;  %v8362_v0 = vld [vmem:[%s12079_s3 + $0x140] sm:$0xff] }
 0x515   : > { %3447 = vmatmul.bf16.gmra.mxu1 %v12451_v58  ;;  %3250 = vmatpush.bf16.msrb.mxu3 %v8362_v0 }
 0x516   : > { %v10530_v55 = vpop.f32.mrf.mxu2  ;;  %v2204_v43 = vpop.f32.mrf.mxu3 }
 0x518   : > { %3903 = vmatpush.bf16.msrb.mxu1 %v8399_v63  ;;  %v8397_v63 = vld [vmem:[%s12079_s3 + $0x258] sm:$0xff] }
 0x51a   : > { %v10556_v29 = vpop.f32.mrf.mxu1 }
 0x51c   : > { %3904 = vmatpush.bf16.msrb.mxu1 %v8398_v1 }
 0x51e   : > { %v10540_v58 = vpop.f32.mrf.mxu2  ;;  %v2206_v11 = vpop.f32.mrf.mxu3 }
 0x520   : > { %3905 = vmatpush.bf16.msrb.mxu1 %v8397_v63  ;;  %v8385_v63 = vld [vmem:[%s12079_s3 + $0x1f8] sm:$0xff] }
 0x521   : > { %3577 = vmatpush.bf16.msrb.mxu2 %v8385_v63 }
 0x522   : > { %v10566_v0 = vpop.f32.mrf.mxu1 }
 0x523   : > { %2572 = vmatmul.bf16.gmra.mxu3 %v9943_v21  ;;  %3116 = vmatmul.bf16.gmra.mxu2 %v12452_v45 }
 0x524   : > { %3906 = vmatpush.bf16.msrb.mxu1 %v8396_v27  ;;  %v8393_v27 = vld [vmem:[%s12079_s3 + $0x238] sm:$0xff] }
 0x525   : > { %3452 = vmatmul.bf16.gmra.mxu1 %v10040_v59  ;;  %3745 = vmatpush.bf16.msra.mxu3 %v8393_v27  ;;  %v8381_v27 = vld [vmem:[%s12079_s3 + $0x1d8] sm:$0xff] }
 0x526   : > { %v10554_v46 = vpop.f32.mrf.mxu2  ;;  %3578 = vmatpush.bf16.msrb.mxu2 %v8384_v18  ;;  %v8392_v18 = vld [vmem:[%s12079_s3 + $0x230] sm:$0xff] }
 0x528   : > { %3907 = vmatpush.bf16.msrb.mxu1 %v8395_v52 }
 0x529   : > { %3746 = vmatpush.bf16.msra.mxu3 %v8392_v18 }
 0x52a   : > { %v10582_v59 = vpop.f32.mrf.mxu1 }
 0x52c   : > { %3908 = vmatpush.bf16.msrb.mxu1 %v8394_v22  ;;  %v8382_v22 = vld [vmem:[%s12079_s3 + $0x1e0] sm:$0xff] }
 0x52e   : > { %v10564_v1 = vpop.f32.mrf.mxu2 }
 0x533   : > { %2577 = vmatmul.bf16.gmra.mxu3 %v10075_v38  ;;  %3121 = vmatmul.bf16.gmra.mxu2 %v9819_v34  ;;  %v8383_v34 = vld [vmem:[%s12079_s3 + $0x1e8] sm:$0xff] }
 0x534   : > { %3579 = vmatpush.bf16.msrb.mxu2 %v8383_v34 }
 0x535   : > { %3457 = vmatmul.bf16.gmra.mxu1 %v10213_v51 }
 0x536   : > { %v10580_v52 = vpop.f32.mrf.mxu2 }
 0x538   : > { %3580 = vmatpush.bf16.msrb.mxu2 %v8382_v22  ;;  %v8379_v22 = vld [vmem:[%s12079_s3 + $0x1c8] sm:$0xff] }
 0x53c   : > { %3581 = vmatpush.bf16.msrb.mxu2 %v8381_v27  ;;  %v8378_v27 = vld [vmem:[%s12079_s3 + $0x1c0] sm:$0xff] }
 0x53e   : > { %v10590_v45 = vpop.f32.mrf.mxu2 }
 0x541   : > { %v10592_v63 = vpop.f32.mrf.mxu1 }
 0x543   : > { %2582 = vmatmul.bf16.gmra.mxu3 %v10280_v35  ;;  %3126 = vmatmul.bf16.gmra.mxu2 %v9967_v30  ;;  %v8380_v30 = vld [vmem:[%s12079_s3 + $0x1d0] sm:$0xff] }
 0x544   : > { %3582 = vmatpush.bf16.msrb.mxu2 %v8380_v30  ;;  %v8391_v30 = vld [vmem:[%s12079_s3 + $0x228] sm:$0xff] }
 0x545   : > { %3462 = vmatmul.bf16.gmra.mxu1 %v10412_v19  ;;  %3747 = vmatpush.bf16.msra.mxu3 %v8391_v30 }
 0x546   : > { %v2209_v34 = vpop.f32.mrf.mxu3  ;;  %v10606_v51 = vpop.f32.mrf.mxu2 }
 0x548   : > { %3583 = vmatpush.bf16.msrb.mxu2 %v8379_v22  ;;  %v2320_v22 = vadd.f32 %v10497_v39, %v10130_v44  ;;  %v12456_v44 = vld [vmem:[#allocation17_spill] sm:$0xff] }
 0x549   : > { %v10608_v56 = vpop.f32.mrf.mxu1 }
 0x54c   : > { %3584 = vmatpush.bf16.msrb.mxu2 %v8378_v27 }
 0x54e   : > { %v2211_v19 = vpop.f32.mrf.mxu3  ;;  %v10616_v40 = vpop.f32.mrf.mxu2 }
 0x552   : > { %v10618_v18 = vpop.f32.mrf.mxu1 }
 0x553   : > { %12453 = vst [vmem:[#allocation6_spill] sm:$0xff] %v10618_v18  ;;  %3131 = vmatmul.bf16.gmra.mxu2 %v10099_v57  ;;  %3251 = vmatmul.bf16.vlgmr.msrb.gmra.mxu3 %v12454_v9  ;;  %v2322_v9 = vadd.f32 %v10501_v28, %v10163_v15  ;;  %v2325_v15 = vadd.f32 %v10511_v36, %v10223_v48  ;;  %v12459_v48 = vld [vmem:[#allocation8_spill] sm:$0xff] }
 0x554   : > { %v8389_v36 = vld [vmem:[%s12079_s3 + $0x218] sm:$0xff] }
 0x555   : > { %3909 = vmatmul.bf16.vlgmr.msrb.gmra.mxu1 %v12455_v6 }
 0x556   : > { %v2349_v33 = vpop.f32.mrf.mxu2  ;;  %v2548_v53 = vpop.f32.mrf.mxu3 }
 0x557   : > { %v10631_v35 = vadd.f32 %v2349_v33, %v2204_v43  ;;  %v2588_v38 = vadd.f32 %v2548_v53, %v2320_v22  ;;  %v8390_v33 = vld [vmem:[%s12079_s3 + $0x220] sm:$0xff]  ;;  %v12457_v53 = vld [vmem:[#allocation19_spill] sm:$0xff] }
 0x558   : > { %3748 = vmatpush.bf16.msra.mxu3 %v8390_v33 }
 0x55a   : > { %v10633_v21 = vpop.f32.mrf.mxu1 }
 0x55c   : > { %3749 = vmatpush.bf16.msra.mxu3 %v8389_v36  ;;  %v12463_v36 = vld [vmem:[#allocation38_spill] sm:$0xff] }
 0x55e   : > { %v2351_v57 = vpop.f32.mrf.mxu2  ;;  %v2550_v18 = vpop.f32.mrf.mxu3 }
 0x55f   : > { %v10637_v5 = vadd.f32 %v2351_v57, %v2206_v11  ;;  %v2589_v6 = vadd.f32 %v2550_v18, %v2322_v9  ;;  %v2327_v18 = vadd.f32 %v10515_v31, %v10246_v10  ;;  %v2330_v10 = vadd.f32 %v10530_v55, %v10234_v8  ;;  %v8388_v55 = vld [vmem:[%s12079_s3 + $0x210] sm:$0xff] }
 0x560   : > { %v2913_v31 = vadd.f32 %v10297_v23, %v2588_v38  ;;  %v12461_v38 = vld [vmem:[#allocation37_spill] sm:$0xff]  ;;  %v12462_v23 = vld [vmem:[#allocation18_spill] sm:$0xff]  ;;  %3750 = vmatpush.bf16.msra.mxu3 %v8388_v55 }
 0x562   : > { %v10639_v27 = vpop.f32.mrf.mxu1 }
 0x563   : > { %3136 = vmatmul.bf16.gmra.mxu2 %v10306_v47  ;;  %3256 = vmatmul.bf16.gmra.mxu3 %v12456_v44  ;;  %v12458_v44 = vld [vmem:[#allocation27_spill] sm:$0xff] }
 0x565   : > { %3914 = vmatmul.bf16.gmra.mxu1 %v12457_v53 }
 0x566   : > { %v2354_v43 = vpop.f32.mrf.mxu2  ;;  %v2553_v57 = vpop.f32.mrf.mxu3 }
 0x567   : > { %v10649_v11 = vadd.f32 %v2354_v43, %v2209_v34  ;;  %v2590_v39 = vadd.f32 %v2553_v57, %v2325_v15  ;;  %v12460_v34 = vld [vmem:[#allocation29_spill] sm:$0xff] }
 0x56a   : > { %v10651_v28 = vpop.f32.mrf.mxu1 }
 0x56e   : > { %v2356_v30 = vpop.f32.mrf.mxu2  ;;  %v2555_v22 = vpop.f32.mrf.mxu3 }
 0x56f   : > { %v10655_v9 = vadd.f32 %v2356_v30, %v2211_v19  ;;  %v2591_v47 = vadd.f32 %v2555_v22, %v2327_v18  ;;  %v2332_v18 = vadd.f32 %v10540_v58, %v10269_v12  ;;  %v2914_v30 = vadd.f32 %v10339_v61, %v2589_v6 }
 0x570   : > { %v2335_v12 = vadd.f32 %v10554_v46, %v10323_v49  ;;  %v2915_v61 = vadd.f32 %v10373_v2, %v2590_v39  ;;  %v12464_v2 = vld [vmem:[#allocation28_spill] sm:$0xff]  ;;  %v8387_v46 = vld [vmem:[%s12079_s3 + $0x208] sm:$0xff] }
 0x571   : > { %3751 = vmatpush.bf16.msra.mxu3 %v8387_v46 }
 0x572   : > { %v10657_v53 = vpop.f32.mrf.mxu1 }
 0x573   : > { %3261 = vmatmul.bf16.gmra.mxu3 %v12458_v44  ;;  %3585 = vmatmul.bf16.vlgmr.msrb.gmra.mxu2 %v12459_v48 }
 0x575   : > { %3919 = vmatmul.bf16.gmra.mxu1 %v12460_v34 }
 0x576   : > { %v2558_v19 = vpop.f32.mrf.mxu3  ;;  %v3102_v33 = vpop.f32.mrf.mxu2 }
 0x577   : > { %v2592_v15 = vadd.f32 %v2558_v19, %v2330_v10  ;;  %v10668_v43 = vadd.f32 %v3102_v33, %v2913_v31  ;;  %v2337_v33 = vadd.f32 %v10564_v1, %v10345_v42  ;;  %v2340_v42 = vadd.f32 %v10580_v52, %v10389_v16  ;;  %v8423_v16 = vld [vmem:[%s12079_s3 + $0x328] sm:$0xff] }
 0x57a   : > { %v10670_v57 = vpop.f32.mrf.mxu1 }
 0x57e   : > { %v2560_v22 = vpop.f32.mrf.mxu3  ;;  %v3104_v48 = vpop.f32.mrf.mxu2 }
 0x57f   : > { %v2593_v34 = vadd.f32 %v2560_v22, %v2332_v18  ;;  %v10675_v44 = vadd.f32 %v3104_v48, %v2914_v30  ;;  %v2916_v18 = vadd.f32 %v10420_v4, %v2591_v47  ;;  %v8425_v47 = vld [vmem:[%s12079_s3 + $0x338] sm:$0xff]  ;;  %v2917_v4 = vadd.f32 %v10439_v24, %v2592_v15 }
 0x580   : > { %4349 = vmatpush.bf16.msra.mxu1 %v8425_v47  ;;  %v2342_v24 = vadd.f32 %v10590_v45, %v10422_v41  ;;  %v8386_v41 = vld [vmem:[%s12079_s3 + $0x200] sm:$0xff] }
 0x581   : > { %v2918_v52 = vadd.f32 %v10481_v14, %v2593_v34  ;;  %v2345_v14 = vadd.f32 %v10606_v51, %v10433_v32  ;;  %3752 = vmatpush.bf16.msra.mxu3 %v8386_v41  ;;  %v8421_v34 = vld [vmem:[%s12079_s3 + $0x318] sm:$0xff]  ;;  %v8420_v51 = vld [vmem:[%s12079_s3 + $0x310] sm:$0xff]  ;;  %v2347_v32 = vadd.f32 %v10616_v40, %v10470_v54 }
 0x582   : > { %v10677_v8 = vpop.f32.mrf.mxu1  ;;  %v8409_v54 = vld [vmem:[%s12079_s3 + $0x2b8] sm:$0xff] }
 0x583   : > { %3266 = vmatmul.bf16.gmra.mxu3 %v12461_v38  ;;  %3590 = vmatmul.bf16.gmra.mxu2 %v12462_v23  ;;  %v12466_v40 = vld [vmem:[#allocation88_spill] sm:$0xff] }
 0x584   : > { %4039 = vmatpush.bf16.msra.mxu2 %v8409_v54 }
 0x585   : > { %3924 = vmatmul.bf16.gmra.mxu1 %v12463_v36 }
 0x586   : > { %v2563_v58 = vpop.f32.mrf.mxu3  ;;  %v3107_v6 = vpop.f32.mrf.mxu2 }
 0x587   : > { %v2594_v10 = vadd.f32 %v2563_v58, %v2335_v12  ;;  %v10688_v31 = vadd.f32 %v3107_v6, %v2915_v61 }
 0x589   : > { %v2919_v45 = vadd.f32 %v10499_v13, %v2594_v10  ;;  %v8419_v10 = vld [vmem:[%s12079_s3 + $0x308] sm:$0xff] }
 0x58a   : > { %v10690_v19 = vpop.f32.mrf.mxu1 }
 0x58e   : > { %v2565_v30 = vpop.f32.mrf.mxu3  ;;  %v3109_v22 = vpop.f32.mrf.mxu2 }
 0x58f   : > { %v2595_v48 = vadd.f32 %v2565_v30, %v2337_v33  ;;  %v10695_v36 = vadd.f32 %v3109_v22, %v2916_v18  ;;  %v8422_v18 = vld [vmem:[%s12079_s3 + $0x320] sm:$0xff]  ;;  %v12465_v30 = vld [vmem:[#allocation39_spill] sm:$0xff] }
 0x591   : > { %v2920_v13 = vadd.f32 %v10503_v50, %v2595_v48  ;;  %v12467_v50 = vld [vmem:[#allocation72_spill] sm:$0xff] }
 0x592   : > { %v10697_v49 = vpop.f32.mrf.mxu1  ;;  %v8417_v48 = vld [vmem:[%s12079_s3 + $0x2f8] sm:$0xff] }
 0x593   : > { %3271 = vmatmul.bf16.gmra.mxu3 %v9859_v20  ;;  %3595 = vmatmul.bf16.gmra.mxu2 %v12464_v2 }
 0x594   : > { %4203 = vmatpush.bf16.msrb.mxu3 %v8417_v48 }
 0x595   : > { %3929 = vmatmul.bf16.gmra.mxu1 %v9889_v7  ;;  %v8424_v7 = vld [vmem:[%s12079_s3 + $0x330] sm:$0xff] }
 0x596   : > { %v2568_v1 = vpop.f32.mrf.mxu3  ;;  %v3112_v20 = vpop.f32.mrf.mxu2  ;;  %4350 = vmatpush.bf16.msra.mxu1 %v8424_v7 }
 0x597   : > { %v2596_v39 = vadd.f32 %v2568_v1, %v2340_v42  ;;  %v10711_v55 = vadd.f32 %v3112_v20, %v2917_v4 }
 0x59a   : > { %v10713_v12 = vpop.f32.mrf.mxu1  ;;  %4351 = vmatpush.bf16.msra.mxu1 %v8423_v16 }
 0x59e   : > { %v2570_v15 = vpop.f32.mrf.mxu3  ;;  %v3114_v61 = vpop.f32.mrf.mxu2  ;;  %4352 = vmatpush.bf16.msra.mxu1 %v8422_v18 }
 0x59f   : > { %v2597_v58 = vadd.f32 %v2570_v15, %v2342_v24  ;;  %v10724_v6 = vadd.f32 %v3114_v61, %v2918_v52  ;;  %v8418_v52 = vld [vmem:[%s12079_s3 + $0x300] sm:$0xff]  ;;  %v12468_v15 = vld [vmem:[#allocation90_spill] sm:$0xff]  ;;  %v2921_v61 = vadd.f32 %v10513_v26, %v2596_v39 }
 0x5a1   : > { %v2922_v26 = vadd.f32 %v10528_v60, %v2597_v58  ;;  %v8416_v60 = vld [vmem:[%s12079_s3 + $0x2f0] sm:$0xff]  ;;  %v12471_v58 = vld [vmem:[#allocation4_spill] sm:$0xff] }
 0x5a2   : > { %v10726_v33 = vpop.f32.mrf.mxu1  ;;  %4353 = vmatpush.bf16.msra.mxu1 %v8421_v34  ;;  %4204 = vmatpush.bf16.msrb.mxu3 %v8416_v60  ;;  %v12473_v60 = vld [vmem:[#allocation11_spill] sm:$0xff] }
 0x5a3   : > { %3276 = vmatmul.bf16.gmra.mxu3 %v10002_v37  ;;  %3600 = vmatmul.bf16.gmra.mxu2 %v12465_v30 }
 0x5a5   : > { %3934 = vmatmul.bf16.gmra.mxu1 %v10029_v17 }
 0x5a6   : > { %v2573_v22 = vpop.f32.mrf.mxu3  ;;  %v3117_v46 = vpop.f32.mrf.mxu2  ;;  %4354 = vmatpush.bf16.msra.mxu1 %v8420_v51 }
 0x5a7   : > { %v2598_v47 = vadd.f32 %v2573_v22, %v2345_v14  ;;  %v10743_v42 = vadd.f32 %v3117_v46, %v2919_v45  ;;  %v8408_v22 = vld [vmem:[%s12079_s3 + $0x2b0] sm:$0xff]  ;;  %v8407_v46 = vld [vmem:[%s12079_s3 + $0x2a8] sm:$0xff] }
 0x5a8   : > { %4040 = vmatpush.bf16.msra.mxu2 %v8408_v22  ;;  %v8403_v22 = vld [vmem:[%s12079_s3 + $0x288] sm:$0xff] }
 0x5aa   : > { %v10745_v4 = vpop.f32.mrf.mxu1  ;;  %4355 = vmatpush.bf16.msra.mxu1 %v8419_v10  ;;  %v8406_v10 = vld [vmem:[%s12079_s3 + $0x2a0] sm:$0xff] }
 0x5ac   : > { %4041 = vmatpush.bf16.msra.mxu2 %v8407_v46 }
 0x5ae   : > { %v2575_v1 = vpop.f32.mrf.mxu3  ;;  %v3119_v20 = vpop.f32.mrf.mxu2  ;;  %4356 = vmatpush.bf16.msra.mxu1 %v8418_v52  ;;  %v2923_v52 = vadd.f32 %v10538_v3, %v2598_v47 }
 0x5af   : > { %v2599_v7 = vadd.f32 %v2575_v1, %v2347_v32  ;;  %v10756_v16 = vadd.f32 %v3119_v20, %v2920_v13  ;;  %v12469_v1 = vld [vmem:[#allocation98_spill] sm:$0xff]  ;;  %v12470_v20 = vld [vmem:[#allocation79_spill] sm:$0xff] }
 0x5b0   : > { %4042 = vmatpush.bf16.msra.mxu2 %v8406_v10  ;;  %v12472_v10 = vld [vmem:[#allocation89_spill] sm:$0xff] }
 0x5b1   : > { %v2924_v3 = vadd.f32 %v10556_v29, %v2599_v7  ;;  %v8415_v29 = vld [vmem:[%s12079_s3 + $0x2e8] sm:$0xff] }
 0x5b2   : > { %v10758_v24 = vpop.f32.mrf.mxu1  ;;  %4205 = vmatpush.bf16.msrb.mxu3 %v8415_v29 }
 0x5b3   : > { %3281 = vmatmul.bf16.gmra.mxu3 %v12466_v40  ;;  %3605 = vmatmul.bf16.gmra.mxu2 %v12467_v50 }
 0x5b5   : > { %3939 = vmatmul.bf16.gmra.mxu1 %v12468_v15 }
 0x5b6   : > { %v2578_v18 = vpop.f32.mrf.mxu3  ;;  %v3122_v41 = vpop.f32.mrf.mxu2 }
 0x5b7   : > { %v2600_v14 = vadd.f32 %v2578_v18, %v10631_v35  ;;  %v10774_v45 = vadd.f32 %v3122_v41, %v2921_v61  ;;  %v8404_v41 = vld [vmem:[%s12079_s3 + $0x290] sm:$0xff] }
 0x5ba   : > { %v10776_v34 = vpop.f32.mrf.mxu1 }
 0x5be   : > { %v2580_v39 = vpop.f32.mrf.mxu3  ;;  %v3124_v51 = vpop.f32.mrf.mxu2 }
 0x5bf   : > { %v2601_v32 = vadd.f32 %v2580_v39, %v10637_v5  ;;  %v10786_v35 = vadd.f32 %v3124_v51, %v2922_v26  ;;  %v8405_v5 = vld [vmem:[%s12079_s3 + $0x298] sm:$0xff]  ;;  %v8402_v51 = vld [vmem:[%s12079_s3 + $0x280] sm:$0xff] }
 0x5c0   : > { %4043 = vmatpush.bf16.msra.mxu2 %v8405_v5 }
 0x5c2   : > { %v10788_v13 = vpop.f32.mrf.mxu1 }
 0x5c3   : > { %3286 = vmatmul.bf16.gmra.mxu3 %v12469_v1  ;;  %3610 = vmatmul.bf16.gmra.mxu2 %v12470_v20 }
 0x5c4   : > { %4044 = vmatpush.bf16.msra.mxu2 %v8404_v41  ;;  %v2926_v41 = vadd.f32 %v10582_v59, %v2601_v32 }
 0x5c5   : > { %3944 = vmatmul.bf16.gmra.mxu1 %v12471_v58 }
 0x5c6   : > { %v2583_v54 = vpop.f32.mrf.mxu3  ;;  %v3127_v50 = vpop.f32.mrf.mxu2 }
 0x5c7   : > { %v2602_v48 = vadd.f32 %v2583_v54, %v10649_v11  ;;  %v10804_v61 = vadd.f32 %v3127_v50, %v2923_v52 }
 0x5c8   : > { %4045 = vmatpush.bf16.msra.mxu2 %v8403_v22 }
 0x5c9   : > { %v2927_v59 = vadd.f32 %v10592_v63, %v2602_v48  ;;  %v12476_v63 = vld [vmem:[#allocation31_spill] sm:$0xff]  ;;  %v12477_v48 = vld [vmem:[#allocation12_spill] sm:$0xff] }
 0x5ca   : > { %v10806_v18 = vpop.f32.mrf.mxu1 }
 0x5cc   : > { %4046 = vmatpush.bf16.msra.mxu2 %v8402_v51 }
 0x5ce   : > { %v2585_v47 = vpop.f32.mrf.mxu3  ;;  %v3129_v46 = vpop.f32.mrf.mxu2 }
 0x5cf   : > { %v2603_v11 = vadd.f32 %v2585_v47, %v10655_v9  ;;  %v10816_v26 = vadd.f32 %v3129_v46, %v2924_v3  ;;  %v2925_v9 = vadd.f32 %v10566_v0, %v2600_v14  ;;  %v12474_v0 = vld [vmem:[#allocation9_spill] sm:$0xff] }
 0x5d0   : > { %v12475_v14 = vld [vmem:[#allocation21_spill] sm:$0xff] }
 0x5d2   : > { %v10818_v39 = vpop.f32.mrf.mxu1 }
 0x5d3   : > { %3615 = vmatmul.bf16.gmra.mxu2 %v12472_v10  ;;  %3753 = vmatmul.bf16.vlgmr.msra.gmra.mxu3 %v12473_v60 }
 0x5d5   : > { %4357 = vmatmul.bf16.vlgmr.msra.gmra.mxu1 %v12429_v25 }
 0x5d6   : > { %v3132_v7 = vpop.f32.mrf.mxu2  ;;  %v3252_v5 = vpop.f32.mrf.mxu3 }
 0x5d7   : > { %v10830_v52 = vadd.f32 %v3132_v7, %v2925_v9  ;;  %v3292_v54 = vadd.f32 %v3252_v5, %v10668_v43  ;;  %v8414_v43 = vld [vmem:[%s12079_s3 + $0x2e0] sm:$0xff]  ;;  %v2928_v9 = vadd.f32 %v10608_v56, %v2603_v11 }
 0x5d8   : > { %4206 = vmatpush.bf16.msrb.mxu3 %v8414_v43  ;;  %v12478_v43 = vld [vmem:[#allocation33_spill] sm:$0xff] }
 0x5da   : > { %v10833_v50 = vpop.f32.mrf.mxu1 }
 0x5de   : > { %v3134_v22 = vpop.f32.mrf.mxu2  ;;  %v3254_v3 = vpop.f32.mrf.mxu3 }
 0x5df   : > { %v10836_v47 = vadd.f32 %v3134_v22, %v2926_v41  ;;  %v3293_v25 = vadd.f32 %v3254_v3, %v10675_v44 }
 0x5e2   : > { %v10839_v46 = vpop.f32.mrf.mxu1 }
 0x5e3   : > { %3620 = vmatmul.bf16.gmra.mxu2 %v12474_v0  ;;  %3758 = vmatmul.bf16.gmra.mxu3 %v12475_v14 }
 0x5e5   : > { %4362 = vmatmul.bf16.gmra.mxu1 %v12444_v62 }
 0x5e6   : > { %v3137_v32 = vpop.f32.mrf.mxu2  ;;  %v3257_v51 = vpop.f32.mrf.mxu3 }
 0x5e7   : > { %v10848_v60 = vadd.f32 %v3137_v32, %v2927_v59  ;;  %v3294_v44 = vadd.f32 %v3257_v51, %v10688_v31  ;;  %v8413_v31 = vld [vmem:[%s12079_s3 + $0x2d8] sm:$0xff]  ;;  %v12479_v59 = vld [vmem:[#allocation6_spill] sm:$0xff] }
 0x5e8   : > { %v3468_v56 = vadd.f32 %v12479_v59, %v3292_v54  ;;  %4207 = vmatpush.bf16.msrb.mxu3 %v8413_v31  ;;  %v12480_v54 = vld [vmem:[#allocation41_spill] sm:$0xff]  ;;  %v12481_v31 = vld [vmem:[#allocation22_spill] sm:$0xff]  ;;  %v12482_v59 = vld [vmem:[#allocation43_spill] sm:$0xff] }
 0x5ea   : > { %v10851_v29 = vpop.f32.mrf.mxu1 }
 0x5ee   : > { %v3139_v7 = vpop.f32.mrf.mxu2  ;;  %v3259_v5 = vpop.f32.mrf.mxu3 }
 0x5ef   : > { %v10854_v41 = vadd.f32 %v3139_v7, %v2928_v9  ;;  %v3295_v22 = vadd.f32 %v3259_v5, %v10695_v36  ;;  %v3469_v7 = vadd.f32 %v10633_v21, %v3293_v25  ;;  %v3470_v21 = vadd.f32 %v10639_v27, %v3294_v44  ;;  %v12483_v27 = vld [vmem:[#allocation73_spill] sm:$0xff]  ;;  %v12484_v44 = vld [vmem:[#allocation32_spill] sm:$0xff] }
 0x5f2   : > { %v10857_v3 = vpop.f32.mrf.mxu1 }
 0x5f3   : > { %3763 = vmatmul.bf16.gmra.mxu3 %v12476_v63  ;;  %4047 = vmatmul.bf16.vlgmr.msra.gmra.mxu2 %v12477_v48 }
 0x5f5   : > { %4367 = vmatmul.bf16.gmra.mxu1 %v12478_v43 }
 0x5f6   : > { %v3262_v11 = vpop.f32.mrf.mxu3  ;;  %v3586_v32 = vpop.f32.mrf.mxu2 }
 0x5f7   : > { %v3296_v51 = vadd.f32 %v3262_v11, %v10711_v55  ;;  %v10867_v36 = vadd.f32 %v3586_v32, %v3468_v56  ;;  %v8412_v55 = vld [vmem:[%s12079_s3 + $0x2d0] sm:$0xff] }
 0x5f8   : > { %4208 = vmatpush.bf16.msrb.mxu3 %v8412_v55  ;;  %v12485_v55 = vld [vmem:[#allocation75_spill] sm:$0xff] }
 0x5fa   : > { %v10869_v9 = vpop.f32.mrf.mxu1 }
 0x5fe   : > { %v3264_v5 = vpop.f32.mrf.mxu3  ;;  %v3588_v48 = vpop.f32.mrf.mxu2 }
 0x5ff   : > { %v3297_v62 = vadd.f32 %v3264_v5, %v10724_v6  ;;  %v10873_v58 = vadd.f32 %v3588_v48, %v3469_v7  ;;  %v3471_v7 = vadd.f32 %v10651_v28, %v3295_v22  ;;  %v8449_v28 = vld [vmem:[%s12079_s3 + $0x3f8] sm:$0xff] }
 0x600   : > { %4787 = vmatpush.bf16.msrb.mxu1 %v8449_v28  ;;  %v8446_v28 = vld [vmem:[%s12079_s3 + $0x3e0] sm:$0xff] }
 0x602   : > { %v10875_v43 = vpop.f32.mrf.mxu1 }
 0x603   : > { %3768 = vmatmul.bf16.gmra.mxu3 %v12480_v54  ;;  %4052 = vmatmul.bf16.gmra.mxu2 %v12481_v31 }
 0x605   : > { %4372 = vmatmul.bf16.gmra.mxu1 %v12482_v59 }
 0x606   : > { %v3267_v25 = vpop.f32.mrf.mxu3  ;;  %v3591_v56 = vpop.f32.mrf.mxu2 }
 0x607   : > { %v3298_v6 = vadd.f32 %v3267_v25, %v10743_v42  ;;  %v10885_v11 = vadd.f32 %v3591_v56, %v3470_v21  ;;  %v8411_v42 = vld [vmem:[%s12079_s3 + $0x2c8] sm:$0xff] }
 0x608   : > { %4209 = vmatpush.bf16.msrb.mxu3 %v8411_v42 }
 0x60a   : > { %v10887_v32 = vpop.f32.mrf.mxu1 }
 0x60e   : > { %v3269_v5 = vpop.f32.mrf.mxu3  ;;  %v3593_v48 = vpop.f32.mrf.mxu2 }
 0x60f   : > { %v3299_v31 = vadd.f32 %v3269_v5, %v10756_v16  ;;  %v10891_v15 = vadd.f32 %v3593_v48, %v3471_v7  ;;  %v3472_v16 = vadd.f32 %v10657_v53, %v3296_v51  ;;  %v8448_v5 = vld [vmem:[%s12079_s3 + $0x3f0] sm:$0xff]  ;;  %v8447_v48 = vld [vmem:[%s12079_s3 + $0x3e8] sm:$0xff]  ;;  %v3473_v53 = vadd.f32 %v10670_v57, %v3297_v62  ;;  %v8410_v62 = vld [vmem:[%s12079_s3 + $0x2c0] sm:$0xff] }
 0x610   : > { %4788 = vmatpush.bf16.msrb.mxu1 %v8448_v5  ;;  %v12488_v57 = vld [vmem:[#allocation84_spill] sm:$0xff]  ;;  %4210 = vmatpush.bf16.msrb.mxu3 %v8410_v62 }
 0x612   : > { %v10893_v59 = vpop.f32.mrf.mxu1 }
 0x613   : > { %3773 = vmatmul.bf16.gmra.mxu3 %v12483_v27  ;;  %4057 = vmatmul.bf16.gmra.mxu2 %v12484_v44 }
 0x614   : > { %4789 = vmatpush.bf16.msrb.mxu1 %v8447_v48 }
 0x615   : > { %4377 = vmatmul.bf16.gmra.mxu1 %v12485_v55 }
 0x616   : > { %v3272_v22 = vpop.f32.mrf.mxu3  ;;  %v3596_v21 = vpop.f32.mrf.mxu2 }
 0x617   : > { %v3300_v25 = vadd.f32 %v3272_v22, %v10774_v45  ;;  %v10906_v56 = vadd.f32 %v3596_v21, %v3472_v16  ;;  %v12486_v16 = vld [vmem:[#allocation82_spill] sm:$0xff]  ;;  %v8445_v21 = vld [vmem:[%s12079_s3 + $0x3d8] sm:$0xff] }
 0x618   : > { %v12487_v22 = vld [vmem:[#allocation42_spill] sm:$0xff]  ;;  %4790 = vmatpush.bf16.msrb.mxu1 %v8446_v28 }
 0x61a   : > { %v10908_v7 = vpop.f32.mrf.mxu1 }
 0x61c   : > { %4791 = vmatpush.bf16.msrb.mxu1 %v8445_v21  ;;  %v8442_v21 = vld [vmem:[%s12079_s3 + $0x3c0] sm:$0xff] }
 0x61e   : > { %v3274_v51 = vpop.f32.mrf.mxu3  ;;  %v3598_v27 = vpop.f32.mrf.mxu2 }
 0x61f   : > { %v3301_v42 = vadd.f32 %v3274_v51, %v10786_v35  ;;  %v10918_v45 = vadd.f32 %v3598_v27, %v3473_v53  ;;  %v3474_v35 = vadd.f32 %v10677_v8, %v3298_v6  ;;  %v3475_v8 = vadd.f32 %v10690_v19, %v3299_v31  ;;  %v8443_v6 = vld [vmem:[%s12079_s3 + $0x3c8] sm:$0xff]  ;;  %v8433_v19 = vld [vmem:[%s12079_s3 + $0x378] sm:$0xff] }
 0x620   : > { %v12489_v31 = vld [vmem:[#allocation92_spill] sm:$0xff]  ;;  %4505 = vmatpush.bf16.msrb.mxu2 %v8433_v19  ;;  %v8431_v19 = vld [vmem:[%s12079_s3 + $0x368] sm:$0xff] }
 0x622   : > { %v10920_v55 = vpop.f32.mrf.mxu1 }
 0x623   : > { %3778 = vmatmul.bf16.gmra.mxu3 %v12486_v16  ;;  %4062 = vmatmul.bf16.gmra.mxu2 %v12487_v22 }
 0x625   : > { %4382 = vmatmul.bf16.gmra.mxu1 %v12488_v57  ;;  %v8444_v57 = vld [vmem:[%s12079_s3 + $0x3d0] sm:$0xff] }
 0x626   : > { %v3277_v5 = vpop.f32.mrf.mxu3  ;;  %v3601_v48 = vpop.f32.mrf.mxu2  ;;  %4792 = vmatpush.bf16.msrb.mxu1 %v8444_v57  ;;  %v12490_v57 = vld [vmem:[#allocation74_spill] sm:$0xff] }
 0x627   : > { %v3302_v53 = vadd.f32 %v3277_v5, %v10804_v61  ;;  %v10936_v51 = vadd.f32 %v3601_v48, %v3474_v35  ;;  %v12491_v48 = vld [vmem:[#allocation94_spill] sm:$0xff] }
 0x62a   : > { %v10938_v27 = vpop.f32.mrf.mxu1  ;;  %4793 = vmatpush.bf16.msrb.mxu1 %v8443_v6 }
 0x62e   : > { %v3279_v28 = vpop.f32.mrf.mxu3  ;;  %v3603_v62 = vpop.f32.mrf.mxu2  ;;  %4794 = vmatpush.bf16.msrb.mxu1 %v8442_v21 }
 0x62f   : > { %v3303_v61 = vadd.f32 %v3279_v28, %v10816_v26  ;;  %v10948_v35 = vadd.f32 %v3603_v62, %v3475_v8  ;;  %v8441_v26 = vld [vmem:[%s12079_s3 + $0x3b8] sm:$0xff]  ;;  %v3476_v8 = vadd.f32 %v10697_v49, %v3300_v25  ;;  %v3477_v49 = vadd.f32 %v10713_v12, %v3301_v42  ;;  %v8440_v12 = vld [vmem:[%s12079_s3 + $0x3b0] sm:$0xff] }
 0x630   : > { %4649 = vmatpush.bf16.msra.mxu3 %v8441_v26  ;;  %v12494_v42 = vld [vmem:[#allocation100_spill] sm:$0xff] }
 0x632   : > { %v10950_v5 = vpop.f32.mrf.mxu1 }
 0x633   : > { %3783 = vmatmul.bf16.gmra.mxu3 %v12489_v31  ;;  %4067 = vmatmul.bf16.gmra.mxu2 %v12490_v57  ;;  %v8432_v57 = vld [vmem:[%s12079_s3 + $0x370] sm:$0xff] }
 0x634   : > { %4506 = vmatpush.bf16.msrb.mxu2 %v8432_v57  ;;  %v12493_v57 = vld [vmem:[#allocation83_spill] sm:$0xff]  ;;  %4650 = vmatpush.bf16.msra.mxu3 %v8440_v12 }
 0x635   : > { %4387 = vmatmul.bf16.gmra.mxu1 %v12491_v48 }
 0x636   : > { %v3282_v6 = vpop.f32.mrf.mxu3  ;;  %v3606_v28 = vpop.f32.mrf.mxu2 }
 0x637   : > { %v3304_v62 = vadd.f32 %v3282_v6, %v10830_v52  ;;  %v10966_v22 = vadd.f32 %v3606_v28, %v3476_v8  ;;  %v8430_v6 = vld [vmem:[%s12079_s3 + $0x360] sm:$0xff]  ;;  %v12492_v28 = vld [vmem:[#allocation58_spill] sm:$0xff] }
 0x638   : > { %4507 = vmatpush.bf16.msrb.mxu2 %v8431_v19  ;;  %v3478_v19 = vadd.f32 %v10726_v33, %v3302_v53  ;;  %v3479_v33 = vadd.f32 %v10745_v4, %v3303_v61  ;;  %v8439_v4 = vld [vmem:[%s12079_s3 + $0x3a8] sm:$0xff]  ;;  %v12497_v61 = vld [vmem:[#allocation17_spill] sm:$0xff] }
 0x639   : > { %4651 = vmatpush.bf16.msra.mxu3 %v8439_v4  ;;  %v12500_v4 = vld [vmem:[#allocation27_spill] sm:$0xff] }
 0x63a   : > { %v10968_v44 = vpop.f32.mrf.mxu1 }
 0x63c   : > { %4508 = vmatpush.bf16.msrb.mxu2 %v8430_v6  ;;  %v8428_v6 = vld [vmem:[%s12079_s3 + $0x350] sm:$0xff] }
 0x63e   : > { %v3284_v25 = vpop.f32.mrf.mxu3  ;;  %v3608_v21 = vpop.f32.mrf.mxu2 }
 0x63f   : > { %v3305_v26 = vadd.f32 %v3284_v25, %v10836_v47  ;;  %v10978_v52 = vadd.f32 %v3608_v21, %v3477_v49  ;;  %v8429_v47 = vld [vmem:[%s12079_s3 + $0x358] sm:$0xff] }
 0x640   : > { %4509 = vmatpush.bf16.msrb.mxu2 %v8429_v47 }
 0x642   : > { %v10980_v8 = vpop.f32.mrf.mxu1 }
 0x643   : > { %3788 = vmatmul.bf16.gmra.mxu3 %v12492_v28  ;;  %4072 = vmatmul.bf16.gmra.mxu2 %v12493_v57 }
 0x644   : > { %4510 = vmatpush.bf16.msrb.mxu2 %v8428_v6  ;;  %v12496_v6 = vld [vmem:[#allocation15_spill] sm:$0xff] }
 0x645   : > { %4392 = vmatmul.bf16.gmra.mxu1 %v12494_v42  ;;  %v8427_v42 = vld [vmem:[%s12079_s3 + $0x348] sm:$0xff] }
 0x646   : > { %v3287_v49 = vpop.f32.mrf.mxu3  ;;  %v3611_v25 = vpop.f32.mrf.mxu2 }
 0x647   : > { %v3306_v21 = vadd.f32 %v3287_v49, %v10848_v60  ;;  %v10996_v48 = vadd.f32 %v3611_v25, %v3478_v19  ;;  %v8426_v49 = vld [vmem:[%s12079_s3 + $0x340] sm:$0xff] }
 0x648   : > { %4511 = vmatpush.bf16.msrb.mxu2 %v8427_v42  ;;  %v12495_v25 = vld [vmem:[#allocation93_spill] sm:$0xff] }
 0x64a   : > { %v10998_v57 = vpop.f32.mrf.mxu1 }
 0x64c   : > { %4512 = vmatpush.bf16.msrb.mxu2 %v8426_v49 }
 0x64e   : > { %v3289_v53 = vpop.f32.mrf.mxu3  ;;  %v3613_v12 = vpop.f32.mrf.mxu2 }
 0x64f   : > { %v3307_v60 = vadd.f32 %v3289_v53, %v10854_v41  ;;  %v11008_v19 = vadd.f32 %v3613_v12, %v3479_v33  ;;  %v3480_v41 = vadd.f32 %v10758_v24, %v3304_v62  ;;  %v12498_v24 = vld [vmem:[#allocation13_spill] sm:$0xff] }
 0x650   : > { %v12499_v62 = vld [vmem:[#allocation25_spill] sm:$0xff] }
 0x652   : > { %v11010_v47 = vpop.f32.mrf.mxu1 }
 0x653   : > { %4077 = vmatmul.bf16.gmra.mxu2 %v12495_v25  ;;  %4211 = vmatmul.bf16.vlgmr.msrb.gmra.mxu3 %v12496_v6  ;;  %v3481_v6 = vadd.f32 %v10776_v34, %v3305_v26  ;;  %v3482_v34 = vadd.f32 %v10788_v13, %v3306_v21  ;;  %v12501_v13 = vld [vmem:[#allocation35_spill] sm:$0xff]  ;;  %v12502_v21 = vld [vmem:[#allocation16_spill] sm:$0xff] }
 0x655   : > { %4795 = vmatmul.bf16.vlgmr.msrb.gmra.mxu1 %v12497_v61 }
 0x656   : > { %v3616_v42 = vpop.f32.mrf.mxu2  ;;  %v3754_v33 = vpop.f32.mrf.mxu3 }
 0x657   : > { %v11022_v53 = vadd.f32 %v3616_v42, %v3480_v41  ;;  %v3794_v12 = vadd.f32 %v3754_v33, %v10867_v36  ;;  %v8438_v36 = vld [vmem:[%s12079_s3 + $0x3a0] sm:$0xff]  ;;  %v3483_v42 = vadd.f32 %v10806_v18, %v3307_v60 }
 0x658   : > { %4652 = vmatpush.bf16.msra.mxu3 %v8438_v36 }
 0x659   : > { %v3950_v18 = vadd.f32 %v10818_v39, %v3794_v12  ;;  %v12503_v39 = vld [vmem:[#allocation46_spill] sm:$0xff] }
 0x65a   : > { %v11025_v17 = vpop.f32.mrf.mxu1  ;;  %v12504_v12 = vld [vmem:[#allocation26_spill] sm:$0xff] }
 0x65e   : > { %v3618_v25 = vpop.f32.mrf.mxu2  ;;  %v3756_v0 = vpop.f32.mrf.mxu3 }
 0x65f   : > { %v11028_v10 = vadd.f32 %v3618_v25, %v3481_v6  ;;  %v3795_v61 = vadd.f32 %v3756_v0, %v10873_v58 }
 0x662   : > { %v11031_v49 = vpop.f32.mrf.mxu1 }
 0x663   : > { %4082 = vmatmul.bf16.gmra.mxu2 %v12498_v24  ;;  %4216 = vmatmul.bf16.gmra.mxu3 %v12499_v62 }
 0x665   : > { %4800 = vmatmul.bf16.gmra.mxu1 %v12500_v4 }
 0x666   : > { %v3621_v26 = vpop.f32.mrf.mxu2  ;;  %v3759_v25 = vpop.f32.mrf.mxu3 }
 0x667   : > { %v11040_v41 = vadd.f32 %v3621_v26, %v3482_v34  ;;  %v3796_v58 = vadd.f32 %v3759_v25, %v10885_v11  ;;  %v8437_v11 = vld [vmem:[%s12079_s3 + $0x398] sm:$0xff]  ;;  %v3951_v25 = vadd.f32 %v10833_v50, %v3795_v61 }
 0x668   : > { %4653 = vmatpush.bf16.msra.mxu3 %v8437_v11  ;;  %v12505_v11 = vld [vmem:[#allocation48_spill] sm:$0xff] }
 0x669   : > { %v3952_v50 = vadd.f32 %v10839_v46, %v3796_v58  ;;  %v12506_v46 = vld [vmem:[#allocation77_spill] sm:$0xff]  ;;  %v12507_v58 = vld [vmem:[#allocation36_spill] sm:$0xff] }
 0x66a   : > { %v11043_v0 = vpop.f32.mrf.mxu1 }
 0x66e   : > { %v3623_v33 = vpop.f32.mrf.mxu2  ;;  %v3761_v6 = vpop.f32.mrf.mxu3 }
 0x66f   : > { %v11046_v24 = vadd.f32 %v3623_v33, %v3483_v42  ;;  %v3797_v20 = vadd.f32 %v3761_v6, %v10891_v15 }
 0x672   : > { %v11049_v4 = vpop.f32.mrf.mxu1 }
 0x673   : > { %4221 = vmatmul.bf16.gmra.mxu3 %v12501_v13  ;;  %4513 = vmatmul.bf16.vlgmr.msrb.gmra.mxu2 %v12502_v21 }
 0x675   : > { %4805 = vmatmul.bf16.gmra.mxu1 %v12461_v38 }
 0x676   : > { %v3764_v60 = vpop.f32.mrf.mxu3  ;;  %v4048_v36 = vpop.f32.mrf.mxu2 }
 0x677   : > { %v3798_v34 = vadd.f32 %v3764_v60, %v10906_v56  ;;  %v11059_v15 = vadd.f32 %v4048_v36, %v3950_v18  ;;  %v8436_v56 = vld [vmem:[%s12079_s3 + $0x390] sm:$0xff] }
 0x678   : > { %4654 = vmatpush.bf16.msra.mxu3 %v8436_v56 }
 0x67a   : > { %v11061_v26 = vpop.f32.mrf.mxu1 }
 0x67e   : > { %v3766_v42 = vpop.f32.mrf.mxu3  ;;  %v4050_v33 = vpop.f32.mrf.mxu2 }
 0x67f   : > { %v3799_v6 = vadd.f32 %v3766_v42, %v10918_v45  ;;  %v11065_v21 = vadd.f32 %v4050_v33, %v3951_v25  ;;  %v3953_v25 = vadd.f32 %v10851_v29, %v3797_v20  ;;  %v8473_v20 = vld [vmem:[%s12079_s3 + $0x4b8] sm:$0xff]  ;;  %v3954_v29 = vadd.f32 %v10857_v3, %v3798_v34 }
 0x680   : > { %5253 = vmatpush.bf16.msra.mxu1 %v8473_v20  ;;  %v12508_v20 = vld [vmem:[#allocation86_spill] sm:$0xff] }
 0x681   : > { %v3955_v3 = vadd.f32 %v10869_v9, %v3799_v6  ;;  %v8434_v9 = vld [vmem:[%s12079_s3 + $0x380] sm:$0xff]  ;;  %v8469_v6 = vld [vmem:[%s12079_s3 + $0x498] sm:$0xff] }
 0x682   : > { %v11067_v38 = vpop.f32.mrf.mxu1 }
 0x683   : > { %4226 = vmatmul.bf16.gmra.mxu3 %v12503_v39  ;;  %4518 = vmatmul.bf16.gmra.mxu2 %v12504_v12 }
 0x685   : > { %4810 = vmatmul.bf16.gmra.mxu1 %v12505_v11 }
 0x686   : > { %v3769_v61 = vpop.f32.mrf.mxu3  ;;  %v4053_v18 = vpop.f32.mrf.mxu2 }
 0x687   : > { %v3800_v45 = vadd.f32 %v3769_v61, %v10936_v51  ;;  %v11077_v60 = vadd.f32 %v4053_v18, %v3952_v50  ;;  %v8435_v51 = vld [vmem:[%s12079_s3 + $0x388] sm:$0xff] }
 0x688   : > { %4655 = vmatpush.bf16.msra.mxu3 %v8435_v51  ;;  %v8470_v51 = vld [vmem:[%s12079_s3 + $0x4a0] sm:$0xff] }
 0x68a   : > { %v11079_v36 = vpop.f32.mrf.mxu1 }
 0x68c   : > { %4656 = vmatpush.bf16.msra.mxu3 %v8434_v9 }
 0x68e   : > { %v3771_v42 = vpop.f32.mrf.mxu3  ;;  %v4055_v33 = vpop.f32.mrf.mxu2 }
 0x68f   : > { %v3801_v12 = vadd.f32 %v3771_v42, %v10948_v35  ;;  %v11083_v39 = vadd.f32 %v4055_v33, %v3953_v25  ;;  %v8471_v25 = vld [vmem:[%s12079_s3 + $0x4a8] sm:$0xff] }
 0x692   : > { %v11085_v11 = vpop.f32.mrf.mxu1 }
 0x693   : > { %4231 = vmatmul.bf16.gmra.mxu3 %v12506_v46  ;;  %4523 = vmatmul.bf16.gmra.mxu2 %v12507_v58 }
 0x695   : > { %4815 = vmatmul.bf16.gmra.mxu1 %v10002_v37  ;;  %v8472_v37 = vld [vmem:[%s12079_s3 + $0x4b0] sm:$0xff] }
 0x696   : > { %v3774_v35 = vpop.f32.mrf.mxu3  ;;  %v4058_v56 = vpop.f32.mrf.mxu2  ;;  %5254 = vmatpush.bf16.msra.mxu1 %v8472_v37 }
 0x697   : > { %v3802_v50 = vadd.f32 %v3774_v35, %v10966_v22  ;;  %v11098_v61 = vadd.f32 %v4058_v56, %v3954_v29  ;;  %v12509_v29 = vld [vmem:[#allocation47_spill] sm:$0xff] }
 0x69a   : > { %v11100_v18 = vpop.f32.mrf.mxu1  ;;  %5255 = vmatpush.bf16.msra.mxu1 %v8471_v25 }
 0x69e   : > { %v3776_v34 = vpop.f32.mrf.mxu3  ;;  %v4060_v42 = vpop.f32.mrf.mxu2  ;;  %5256 = vmatpush.bf16.msra.mxu1 %v8470_v51 }
 0x69f   : > { %v3803_v33 = vadd.f32 %v3776_v34, %v10978_v52  ;;  %v11110_v22 = vadd.f32 %v4060_v42, %v3955_v3  ;;  %v3956_v52 = vadd.f32 %v10875_v43, %v3800_v45  ;;  %v3957_v43 = vadd.f32 %v10887_v32, %v3801_v12  ;;  %v8467_v45 = vld [vmem:[%s12079_s3 + $0x488] sm:$0xff]  ;;  %v8457_v32 = vld [vmem:[%s12079_s3 + $0x438] sm:$0xff] }
 0x6a0   : > { %v12510_v12 = vld [vmem:[#allocation96_spill] sm:$0xff]  ;;  %4951 = vmatpush.bf16.msra.mxu2 %v8457_v32 }
 0x6a2   : > { %v11112_v46 = vpop.f32.mrf.mxu1  ;;  %5257 = vmatpush.bf16.msra.mxu1 %v8469_v6  ;;  %v12511_v6 = vld [vmem:[#allocation78_spill] sm:$0xff] }
 0x6a3   : > { %4236 = vmatmul.bf16.gmra.mxu3 %v12508_v20  ;;  %4528 = vmatmul.bf16.gmra.mxu2 %v12509_v29  ;;  %v12516_v29 = vld [vmem:[#allocation87_spill] sm:$0xff] }
 0x6a5   : > { %4820 = vmatmul.bf16.gmra.mxu1 %v12466_v40  ;;  %v8468_v40 = vld [vmem:[%s12079_s3 + $0x490] sm:$0xff] }
 0x6a6   : > { %v3779_v35 = vpop.f32.mrf.mxu3  ;;  %v4063_v56 = vpop.f32.mrf.mxu2  ;;  %5258 = vmatpush.bf16.msra.mxu1 %v8468_v40 }
 0x6a7   : > { %v3804_v37 = vadd.f32 %v3779_v35, %v10996_v48  ;;  %v11128_v25 = vadd.f32 %v4063_v56, %v3956_v52  ;;  %v8466_v52 = vld [vmem:[%s12079_s3 + $0x480] sm:$0xff]  ;;  %v3958_v35 = vadd.f32 %v10893_v59, %v3802_v50  ;;  %v3959_v59 = vadd.f32 %v10908_v7, %v3803_v33  ;;  %v12515_v33 = vld [vmem:[#allocation104_spill] sm:$0xff] }
 0x6aa   : > { %v11130_v3 = vpop.f32.mrf.mxu1  ;;  %5259 = vmatpush.bf16.msra.mxu1 %v8467_v45 }
 0x6ae   : > { %v3781_v34 = vpop.f32.mrf.mxu3  ;;  %v4065_v42 = vpop.f32.mrf.mxu2  ;;  %5260 = vmatpush.bf16.msra.mxu1 %v8466_v52 }
 0x6af   : > { %v3805_v48 = vadd.f32 %v3781_v34, %v11008_v19  ;;  %v11140_v51 = vadd.f32 %v4065_v42, %v3957_v43  ;;  %v8465_v19 = vld [vmem:[%s12079_s3 + $0x478] sm:$0xff]  ;;  %v8456_v42 = vld [vmem:[%s12079_s3 + $0x430] sm:$0xff] }
 0x6b0   : > { %5097 = vmatpush.bf16.msrb.mxu3 %v8465_v19  ;;  %4952 = vmatpush.bf16.msra.mxu2 %v8456_v42 }
 0x6b2   : > { %v11142_v9 = vpop.f32.mrf.mxu1 }
 0x6b3   : > { %4241 = vmatmul.bf16.gmra.mxu3 %v12510_v12  ;;  %4533 = vmatmul.bf16.gmra.mxu2 %v12511_v6  ;;  %v12512_v6 = vld [vmem:[#allocation60_spill] sm:$0xff] }
 0x6b4   : > { %v12251_v19 = vunpack.c.l.b16 %v12512_v6 }
 0x6b5   : > { %4825 = vmatmul.bf16.gmra.mxu1 %v12469_v1  ;;  %v8455_v1 = vld [vmem:[%s12079_s3 + $0x428] sm:$0xff] }
 0x6b6   : > { %v3784_v56 = vpop.f32.mrf.mxu3  ;;  %v4068_v40 = vpop.f32.mrf.mxu2  ;;  %4953 = vmatpush.bf16.msra.mxu2 %v8455_v1  ;;  %v8453_v1 = vld [vmem:[%s12079_s3 + $0x418] sm:$0xff] }
 0x6b7   : > { %v3806_v43 = vadd.f32 %v3784_v56, %v11022_v53  ;;  %v11158_v45 = vadd.f32 %v4068_v40, %v3958_v35  ;;  %v8454_v56 = vld [vmem:[%s12079_s3 + $0x420] sm:$0xff]  ;;  %v12513_v40 = vld [vmem:[#allocation59_spill] sm:$0xff] }
 0x6b8   : > { %v12514_v42 = vunpack.c.l.b16 %v12513_v40 }
 0x6ba   : > { %v11160_v34 = vpop.f32.mrf.mxu1  ;;  %v4736_v7 = vpack.c.b16 %v12251_v19, %v12514_v42  ;;  %4954 = vmatpush.bf16.msra.mxu2 %v8454_v56  ;;  %v8452_v56 = vld [vmem:[%s12079_s3 + $0x410] sm:$0xff] }
 0x6be   : > { %v3786_v50 = vpop.f32.mrf.mxu3  ;;  %v4070_v52 = vpop.f32.mrf.mxu2  ;;  %4955 = vmatpush.bf16.msra.mxu2 %v8453_v1 }
 0x6bf   : > { %v3807_v32 = vadd.f32 %v3786_v50, %v11028_v10  ;;  %v11170_v53 = vadd.f32 %v4070_v52, %v3959_v59  ;;  %v8464_v10 = vld [vmem:[%s12079_s3 + $0x470] sm:$0xff]  ;;  %v3960_v59 = vadd.f32 %v10920_v55, %v3804_v37  ;;  %v3961_v55 = vadd.f32 %v10938_v27, %v3805_v48  ;;  %v8463_v27 = vld [vmem:[%s12079_s3 + $0x468] sm:$0xff] }
 0x6c0   : > { %5098 = vmatpush.bf16.msrb.mxu3 %v8464_v10 }
 0x6c2   : > { %v11173_v35 = vpop.f32.mrf.mxu1  ;;  %4956 = vmatpush.bf16.msra.mxu2 %v8452_v56  ;;  %v12518_v56 = vld [vmem:[#allocation14_spill] sm:$0xff] }
 0x6c3   : > { %4246 = vmatmul.bf16.gmra.mxu3 %v12515_v33  ;;  %4538 = vmatmul.bf16.gmra.mxu2 %v12516_v29 }
 0x6c4   : > { %5099 = vmatpush.bf16.msrb.mxu3 %v8463_v27 }
 0x6c5   : > { %4830 = vmatmul.bf16.gmra.mxu1 %v4736_v7  ;;  %v8451_v7 = vld [vmem:[%s12079_s3 + $0x408] sm:$0xff] }
 0x6c6   : > { %v3789_v50 = vpop.f32.mrf.mxu3  ;;  %v4073_v52 = vpop.f32.mrf.mxu2  ;;  %4957 = vmatpush.bf16.msra.mxu2 %v8451_v7 }
 0x6c7   : > { %v3808_v40 = vadd.f32 %v3789_v50, %v11040_v41  ;;  %v11192_v42 = vadd.f32 %v4073_v52, %v3960_v59  ;;  %v8450_v50 = vld [vmem:[%s12079_s3 + $0x400] sm:$0xff] }
 0x6c8   : > { %v12517_v52 = vld [vmem:[#allocation97_spill] sm:$0xff] }
 0x6ca   : > { %v11194_v19 = vpop.f32.mrf.mxu1  ;;  %4958 = vmatpush.bf16.msra.mxu2 %v8450_v50 }
 0x6ce   : > { %v3791_v37 = vpop.f32.mrf.mxu3  ;;  %v4075_v10 = vpop.f32.mrf.mxu2 }
 0x6cf   : > { %v3809_v41 = vadd.f32 %v3791_v37, %v11046_v24  ;;  %v11204_v59 = vadd.f32 %v4075_v10, %v3961_v55  ;;  %v3962_v24 = vadd.f32 %v10950_v5, %v3806_v43  ;;  %v12519_v5 = vld [vmem:[#allocation105_spill] sm:$0xff]  ;;  %v12520_v43 = vld [vmem:[#allocation24_spill] sm:$0xff] }
 0x6d2   : > { %v11206_v1 = vpop.f32.mrf.mxu1 }
 0x6d3   : > { %4543 = vmatmul.bf16.gmra.mxu2 %v12517_v52  ;;  %4657 = vmatmul.bf16.vlgmr.msra.gmra.mxu3 %v12518_v56  ;;  %v3963_v56 = vadd.f32 %v10968_v44, %v3807_v32  ;;  %v3964_v44 = vadd.f32 %v10980_v8, %v3808_v40  ;;  %v12521_v8 = vld [vmem:[#allocation34_spill] sm:$0xff]  ;;  %v12522_v40 = vld [vmem:[#allocation20_spill] sm:$0xff] }
 0x6d5   : > { %5261 = vmatmul.bf16.vlgmr.msra.gmra.mxu1 %v12475_v14 }
 0x6d6   : > { %v4078_v48 = vpop.f32.mrf.mxu2  ;;  %v4212_v7 = vpop.f32.mrf.mxu3 }
 0x6d7   : > { %v11218_v55 = vadd.f32 %v4078_v48, %v3962_v24  ;;  %v4252_v37 = vadd.f32 %v4212_v7, %v11059_v15  ;;  %v8462_v15 = vld [vmem:[%s12079_s3 + $0x460] sm:$0xff]  ;;  %v3965_v24 = vadd.f32 %v10998_v57, %v3809_v41 }
 0x6d8   : > { %5100 = vmatpush.bf16.msrb.mxu3 %v8462_v15 }
 0x6d9   : > { %v4398_v57 = vadd.f32 %v11010_v47, %v4252_v37  ;;  %v12523_v47 = vld [vmem:[#allocation45_spill] sm:$0xff]  ;;  %v12524_v37 = vld [vmem:[#allocation30_spill] sm:$0xff] }
 0x6da   : > { %v11221_v10 = vpop.f32.mrf.mxu1 }
 0x6de   : > { %v4080_v52 = vpop.f32.mrf.mxu2  ;;  %v4214_v29 = vpop.f32.mrf.mxu3 }
 0x6df   : > { %v11224_v58 = vadd.f32 %v4080_v52, %v3963_v56  ;;  %v4253_v14 = vadd.f32 %v4214_v29, %v11065_v21 }
 0x6e2   : > { %v11227_v50 = vpop.f32.mrf.mxu1 }
 0x6e3   : > { %4548 = vmatmul.bf16.gmra.mxu2 %v12519_v5  ;;  %4662 = vmatmul.bf16.gmra.mxu3 %v12520_v43 }
 0x6e5   : > { %5266 = vmatmul.bf16.gmra.mxu1 %v12476_v63 }
 0x6e6   : > { %v4083_v32 = vpop.f32.mrf.mxu2  ;;  %v4217_v52 = vpop.f32.mrf.mxu3 }
 0x6e7   : > { %v11236_v27 = vadd.f32 %v4083_v32, %v3964_v44  ;;  %v4254_v21 = vadd.f32 %v4217_v52, %v11077_v60  ;;  %v8461_v60 = vld [vmem:[%s12079_s3 + $0x458] sm:$0xff]  ;;  %v4399_v52 = vadd.f32 %v11025_v17, %v4253_v14 }
 0x6e8   : > { %5101 = vmatpush.bf16.msrb.mxu3 %v8461_v60  ;;  %v12525_v60 = vld [vmem:[#allocation51_spill] sm:$0xff] }
 0x6e9   : > { %v4400_v17 = vadd.f32 %v11031_v49, %v4254_v21  ;;  %v12526_v49 = vld [vmem:[#allocation76_spill] sm:$0xff] }
 0x6ea   : > { %v11239_v29 = vpop.f32.mrf.mxu1  ;;  %v12527_v21 = vld [vmem:[#allocation40_spill] sm:$0xff] }
 0x6ee   : > { %v4085_v48 = vpop.f32.mrf.mxu2  ;;  %v4219_v7 = vpop.f32.mrf.mxu3 }
 0x6ef   : > { %v11242_v56 = vadd.f32 %v4085_v48, %v3965_v24  ;;  %v4255_v5 = vadd.f32 %v4219_v7, %v11083_v39 }
 0x6f2   : > { %v11245_v63 = vpop.f32.mrf.mxu1 }
 0x6f3   : > { %4667 = vmatmul.bf16.gmra.mxu3 %v12521_v8  ;;  %4959 = vmatmul.bf16.vlgmr.msra.gmra.mxu2 %v12522_v40 }
 0x6f5   : > { %5271 = vmatmul.bf16.gmra.mxu1 %v12480_v54 }
 0x6f6   : > { %v4222_v41 = vpop.f32.mrf.mxu3  ;;  %v4514_v15 = vpop.f32.mrf.mxu2 }
 0x6f7   : > { %v4256_v44 = vadd.f32 %v4222_v41, %v11098_v61  ;;  %v11255_v39 = vadd.f32 %v4514_v15, %v4398_v57  ;;  %v8460_v61 = vld [vmem:[%s12079_s3 + $0x450] sm:$0xff] }
 0x6f8   : > { %5102 = vmatpush.bf16.msrb.mxu3 %v8460_v61 }
 0x6fa   : > { %v11257_v32 = vpop.f32.mrf.mxu1 }
 0x6fe   : > { %v4224_v24 = vpop.f32.mrf.mxu3  ;;  %v4516_v48 = vpop.f32.mrf.mxu2 }
 0x6ff   : > { %v4257_v7 = vadd.f32 %v4224_v24, %v11110_v22  ;;  %v11261_v40 = vadd.f32 %v4516_v48, %v4399_v52  ;;  %v4401_v52 = vadd.f32 %v11043_v0, %v4255_v5  ;;  %v8497_v0 = vld [vmem:[%s12079_s3 + $0x578] sm:$0xff] }
 0x700   : > { %5699 = vmatpush.bf16.msrb.mxu1 %v8497_v0  ;;  %v12529_v0 = vld [vmem:[#allocation50_spill] sm:$0xff] }
 0x702   : > { %v11263_v54 = vpop.f32.mrf.mxu1 }
 0x703   : > { %4672 = vmatmul.bf16.gmra.mxu3 %v12523_v47  ;;  %4964 = vmatmul.bf16.gmra.mxu2 %v12524_v37 }
 0x705   : > { %5276 = vmatmul.bf16.gmra.mxu1 %v12525_v60 }
 0x706   : > { %v4227_v14 = vpop.f32.mrf.mxu3  ;;  %v4519_v57 = vpop.f32.mrf.mxu2 }
 0x707   : > { %v4258_v22 = vadd.f32 %v4227_v14, %v11128_v25  ;;  %v11273_v41 = vadd.f32 %v4519_v57, %v4400_v17  ;;  %v8459_v25 = vld [vmem:[%s12079_s3 + $0x448] sm:$0xff] }
 0x708   : > { %5103 = vmatpush.bf16.msrb.mxu3 %v8459_v25  ;;  %v12528_v25 = vld [vmem:[#allocation85_spill] sm:$0xff] }
 0x70a   : > { %v11275_v15 = vpop.f32.mrf.mxu1 }
 0x70e   : > { %v4229_v24 = vpop.f32.mrf.mxu3  ;;  %v4521_v48 = vpop.f32.mrf.mxu2 }
 0x70f   : > { %v4259_v37 = vadd.f32 %v4229_v24, %v11140_v51  ;;  %v11279_v6 = vadd.f32 %v4521_v48, %v4401_v52  ;;  %v4402_v51 = vadd.f32 %v11049_v4, %v4256_v44  ;;  %v8495_v52 = vld [vmem:[%s12079_s3 + $0x568] sm:$0xff]  ;;  %v4403_v4 = vadd.f32 %v11061_v26, %v4257_v7  ;;  %v8458_v26 = vld [vmem:[%s12079_s3 + $0x440] sm:$0xff]  ;;  %v8493_v7 = vld [vmem:[%s12079_s3 + $0x558] sm:$0xff] }
 0x710   : > { %5104 = vmatpush.bf16.msrb.mxu3 %v8458_v26  ;;  %v12533_v26 = vld [vmem:[#allocation81_spill] sm:$0xff] }
 0x712   : > { %v11281_v60 = vpop.f32.mrf.mxu1 }
 0x713   : > { %4677 = vmatmul.bf16.gmra.mxu3 %v12526_v49  ;;  %4969 = vmatmul.bf16.gmra.mxu2 %v12527_v21  ;;  %v8494_v21 = vld [vmem:[%s12079_s3 + $0x560] sm:$0xff] }
 0x715   : > { %5281 = vmatmul.bf16.gmra.mxu1 %v12486_v16  ;;  %v8496_v16 = vld [vmem:[%s12079_s3 + $0x570] sm:$0xff] }
 0x716   : > { %v4232_v5 = vpop.f32.mrf.mxu3  ;;  %v4524_v61 = vpop.f32.mrf.mxu2  ;;  %5700 = vmatpush.bf16.msrb.mxu1 %v8496_v16 }
 0x717   : > { %v4260_v17 = vadd.f32 %v4232_v5, %v11158_v45  ;;  %v11294_v14 = vadd.f32 %v4524_v61, %v4402_v51  ;;  %v12530_v51 = vld [vmem:[#allocation44_spill] sm:$0xff] }
 0x718   : > { %v12531_v5 = vpack.c.b16 %v12529_v0, %v12530_v51 }
 0x71a   : > { %v11296_v57 = vpop.f32.mrf.mxu1  ;;  %5701 = vmatpush.bf16.msrb.mxu1 %v8495_v52 }
 0x71e   : > { %v4234_v44 = vpop.f32.mrf.mxu3  ;;  %v4526_v24 = vpop.f32.mrf.mxu2  ;;  %5702 = vmatpush.bf16.msrb.mxu1 %v8494_v21 }
 0x71f   : > { %v4261_v48 = vadd.f32 %v4234_v44, %v11170_v53  ;;  %v11306_v45 = vadd.f32 %v4526_v24, %v4403_v4  ;;  %v4404_v53 = vadd.f32 %v11067_v38, %v4258_v22  ;;  %v8492_v44 = vld [vmem:[%s12079_s3 + $0x550] sm:$0xff]  ;;  %v4405_v38 = vadd.f32 %v11079_v36, %v4259_v37  ;;  %v8491_v22 = vld [vmem:[%s12079_s3 + $0x548] sm:$0xff]  ;;  %v8481_v36 = vld [vmem:[%s12079_s3 + $0x4f8] sm:$0xff] }
 0x720   : > { %v12532_v37 = vld [vmem:[#allocation95_spill] sm:$0xff]  ;;  %5397 = vmatpush.bf16.msrb.mxu2 %v8481_v36  ;;  %v12534_v36 = vld [vmem:[#allocation65_spill] sm:$0xff] }
 0x722   : > { %v11308_v49 = vpop.f32.mrf.mxu1  ;;  %5703 = vmatpush.bf16.msrb.mxu1 %v8493_v7  ;;  %v4406_v7 = vadd.f32 %v11085_v11, %v4260_v17 }
 0x723   : > { %4682 = vmatmul.bf16.gmra.mxu3 %v12528_v25  ;;  %4974 = vmatmul.bf16.gmra.mxu2 %v12531_v5  ;;  %v8490_v5 = vld [vmem:[%s12079_s3 + $0x540] sm:$0xff] }
 0x725   : > { %5286 = vmatmul.bf16.gmra.mxu1 %v12489_v31 }
 0x726   : > { %v4237_v61 = vpop.f32.mrf.mxu3  ;;  %v4529_v16 = vpop.f32.mrf.mxu2  ;;  %5704 = vmatpush.bf16.msrb.mxu1 %v8492_v44 }
 0x727   : > { %v4262_v52 = vadd.f32 %v4237_v61, %v11192_v42  ;;  %v11326_v4 = vadd.f32 %v4529_v16, %v4404_v53  ;;  %v8489_v53 = vld [vmem:[%s12079_s3 + $0x538] sm:$0xff] }
 0x728   : > { %5535 = vmatpush.bf16.msra.mxu3 %v8489_v53  ;;  %v8478_v53 = vld [vmem:[%s12079_s3 + $0x4e0] sm:$0xff] }
 0x72a   : > { %v11331_v31 = vpop.f32.mrf.mxu1  ;;  %5705 = vmatpush.bf16.msrb.mxu1 %v8491_v22  ;;  %v8480_v22 = vld [vmem:[%s12079_s3 + $0x4f0] sm:$0xff] }
 0x72b   : > { %5398 = vmatpush.bf16.msrb.mxu2 %v8480_v22  ;;  %v8477_v22 = vld [vmem:[%s12079_s3 + $0x4d8] sm:$0xff] }
 0x72e   : > { %v4239_v24 = vpop.f32.mrf.mxu3  ;;  %v4531_v21 = vpop.f32.mrf.mxu2  ;;  %5706 = vmatpush.bf16.msrb.mxu1 %v8490_v5 }
 0x72f   : > { %v4263_v42 = vadd.f32 %v4239_v24, %v11204_v59  ;;  %v11338_v51 = vadd.f32 %v4531_v21, %v4405_v38  ;;  %v4407_v24 = vadd.f32 %v11100_v18, %v4261_v48  ;;  %v12537_v48 = vld [vmem:[#allocation101_spill] sm:$0xff] }
 0x732   : > { %v11352_v59 = vpop.f32.mrf.mxu1 }
 0x733   : > { %4687 = vmatmul.bf16.gmra.mxu3 %v12532_v37  ;;  %4979 = vmatmul.bf16.gmra.mxu2 %v12533_v26  ;;  %v12253_v26 = vunpack.c.l.b16 %v12534_v36 }
 0x735   : > { %5291 = vmatmul.bf16.gmra.mxu1 %v12492_v28  ;;  %v8479_v28 = vld [vmem:[%s12079_s3 + $0x4e8] sm:$0xff] }
 0x736   : > { %v4242_v61 = vpop.f32.mrf.mxu3  ;;  %v4534_v16 = vpop.f32.mrf.mxu2  ;;  %5399 = vmatpush.bf16.msrb.mxu2 %v8479_v28  ;;  %v4408_v28 = vadd.f32 %v11112_v46, %v4262_v52  ;;  %v4409_v46 = vadd.f32 %v11130_v3, %v4263_v42  ;;  %v8487_v3 = vld [vmem:[%s12079_s3 + $0x528] sm:$0xff] }
 0x737   : > { %v4264_v44 = vadd.f32 %v4242_v61, %v11218_v55  ;;  %v11356_v38 = vadd.f32 %v4534_v16, %v4406_v7  ;;  %v12535_v7 = vld [vmem:[#allocation103_spill] sm:$0xff] }
 0x738   : > { %v12536_v61 = vunpack.c.l.b16 %v12535_v7  ;;  %v12538_v16 = vld [vmem:[#allocation91_spill] sm:$0xff] }
 0x73a   : > { %v11365_v21 = vpop.f32.mrf.mxu1  ;;  %v5202_v18 = vpack.c.b16 %v12253_v26, %v12536_v61  ;;  %5400 = vmatpush.bf16.msrb.mxu2 %v8478_v53  ;;  %v8476_v53 = vld [vmem:[%s12079_s3 + $0x4d0] sm:$0xff] }
 0x73e   : > { %v4244_v11 = vpop.f32.mrf.mxu3  ;;  %v4536_v17 = vpop.f32.mrf.mxu2  ;;  %5401 = vmatpush.bf16.msrb.mxu2 %v8477_v22  ;;  %v8474_v22 = vld [vmem:[%s12079_s3 + $0x4c0] sm:$0xff] }
 0x73f   : > { %v4265_v5 = vadd.f32 %v4244_v11, %v11224_v58  ;;  %v11368_v55 = vadd.f32 %v4536_v17, %v4407_v24  ;;  %v8488_v58 = vld [vmem:[%s12079_s3 + $0x530] sm:$0xff] }
 0x740   : > { %5536 = vmatpush.bf16.msra.mxu3 %v8488_v58 }
 0x742   : > { %v11390_v61 = vpop.f32.mrf.mxu1  ;;  %5402 = vmatpush.bf16.msrb.mxu2 %v8476_v53 }
 0x743   : > { %4692 = vmatmul.bf16.gmra.mxu3 %v12537_v48  ;;  %4984 = vmatmul.bf16.gmra.mxu2 %v12538_v16 }
 0x744   : > { %5537 = vmatpush.bf16.msra.mxu3 %v8487_v3 }
 0x745   : > { %5296 = vmatmul.bf16.gmra.mxu1 %v5202_v18  ;;  %v8475_v18 = vld [vmem:[%s12079_s3 + $0x4c8] sm:$0xff] }
 0x746   : > { %v4247_v24 = vpop.f32.mrf.mxu3  ;;  %v4539_v11 = vpop.f32.mrf.mxu2  ;;  %5403 = vmatpush.bf16.msrb.mxu2 %v8475_v18 }
 0x747   : > { %v4266_v17 = vadd.f32 %v4247_v24, %v11236_v27  ;;  %v11388_v7 = vadd.f32 %v4539_v11, %v4408_v28  ;;  %v12539_v24 = vld [vmem:[#allocation5_spill] sm:$0xff] }
 0x74a   : > { %v11405_v28 = vpop.f32.mrf.mxu1  ;;  %5404 = vmatpush.bf16.msrb.mxu2 %v8474_v22  ;;  %v8502_v22 = vld [vmem:[%s12079_s3 + $0x5a0] sm:$0xff] }
 0x74e   : > { %v4249_v52 = vpop.f32.mrf.mxu3  ;;  %v4541_v16 = vpop.f32.mrf.mxu2 }
 0x74f   : > { %v4267_v27 = vadd.f32 %v4249_v52, %v11242_v56  ;;  %v11400_v58 = vadd.f32 %v4541_v16, %v4409_v46  ;;  %v4410_v56 = vadd.f32 %v11142_v9, %v4264_v44  ;;  %v12541_v9 = vld [vmem:[#allocation63_spill] sm:$0xff]  ;;  %v12542_v44 = vld [vmem:[#allocation64_spill] sm:$0xff] }
 0x750   : > { %v12543_v3 = vsel %vm8808_vm12, %v12541_v9, %v12542_v44 }
 0x751   : > { %v11428_v26 = vunpack.c.l.b16 %v12543_v3 }
 0x752   : > { %v11417_v46 = vpop.f32.mrf.mxu1 }
 0x753   : > { %4989 = vmatmul.bf16.gmra.mxu2 %v12539_v24  ;;  %5105 = vmatmul.bf16.vlgmr.msrb.gmra.mxu3 %v12462_v23  ;;  %v4411_v23 = vadd.f32 %v11160_v34, %v4265_v5  ;;  %v8486_v34 = vld [vmem:[%s12079_s3 + $0x520] sm:$0xff] }
 0x754   : > { %5538 = vmatpush.bf16.msra.mxu3 %v8486_v34 }
 0x755   : > { %5707 = vmatmul.bf16.vlgmr.msrb.gmra.mxu1 %v12499_v62 }
 0x756   : > { %v4544_v42 = vpop.f32.mrf.mxu2  ;;  %v4658_v11 = vpop.f32.mrf.mxu3 }
 0x757   : > { %v11414_v53 = vadd.f32 %v4544_v42, %v4410_v56  ;;  %v4698_v18 = vadd.f32 %v4658_v11, %v11255_v39  ;;  %v12544_v56 = vld [vmem:[#allocation102_spill] sm:$0xff] }
 0x758   : > { %v4900_v39 = vpack.c.b16 %v11428_v26, %v12544_v56  ;;  %v12546_v56 = vld [vmem:[#allocation46_spill] sm:$0xff] }
 0x75a   : > { %v11438_v11 = vpop.f32.mrf.mxu1 }
 0x75e   : > { %v4546_v52 = vpop.f32.mrf.mxu2  ;;  %v4660_v16 = vpop.f32.mrf.mxu3 }
 0x75f   : > { %v11420_v24 = vadd.f32 %v4546_v52, %v4411_v23  ;;  %v4699_v62 = vadd.f32 %v4660_v16, %v11261_v40  ;;  %v4412_v40 = vadd.f32 %v11173_v35, %v4266_v17  ;;  %v4413_v16 = vadd.f32 %v11194_v19, %v4267_v27  ;;  %v12545_v35 = vld [vmem:[#allocation19_spill] sm:$0xff]  ;;  %v8485_v17 = vld [vmem:[%s12079_s3 + $0x518] sm:$0xff] }
 0x760   : > { %v4836_v19 = vadd.f32 %v11206_v1, %v4698_v18  ;;  %5539 = vmatpush.bf16.msra.mxu3 %v8485_v17  ;;  %v12548_v1 = vld [vmem:[#allocation29_spill] sm:$0xff]  ;;  %v12549_v18 = vld [vmem:[#allocation55_spill] sm:$0xff] }
 0x763   : > { %4994 = vmatmul.bf16.gmra.mxu2 %v4900_v39  ;;  %5110 = vmatmul.bf16.gmra.mxu3 %v12464_v2 }
 0x765   : > { %5712 = vmatmul.bf16.gmra.mxu1 %v12501_v13  ;;  %v11447_v13 = vpop.f32.mrf.mxu1 }
 0x766   : > { %v4549_v5 = vpop.f32.mrf.mxu2  ;;  %v4663_v42 = vpop.f32.mrf.mxu3 }
 0x767   : > { %v11440_v23 = vadd.f32 %v4549_v5, %v4412_v40  ;;  %v4700_v52 = vadd.f32 %v4663_v42, %v11273_v41 }
 0x76d   : > { %v11459_v34 = vpop.f32.mrf.mxu1 }
 0x76e   : > { %v4551_v2 = vpop.f32.mrf.mxu2  ;;  %v4665_v9 = vpop.f32.mrf.mxu3 }
 0x76f   : > { %v11444_v44 = vadd.f32 %v4551_v2, %v4413_v16  ;;  %v4701_v3 = vadd.f32 %v4665_v9, %v11279_v6  ;;  %v12547_v2 = vld [vmem:[#allocation49_spill] sm:$0xff]  ;;  %v12550_v9 = vpack.c.b16 %v12549_v18, %v12529_v0  ;;  %v8519_v18 = vld [vmem:[%s12079_s3 + $0x628] sm:$0xff] }
 0x773   : > { %5115 = vmatmul.bf16.gmra.mxu3 %v12465_v30  ;;  %5405 = vmatmul.bf16.vlgmr.msrb.gmra.mxu2 %v12545_v35  ;;  %v4837_v30 = vadd.f32 %v11221_v10, %v4699_v62  ;;  %v4838_v10 = vadd.f32 %v11227_v50, %v4700_v52  ;;  %v12552_v50 = vld [vmem:[#allocation38_spill] sm:$0xff] }
 0x775   : > { %5717 = vmatmul.bf16.gmra.mxu1 %v12546_v56  ;;  %v11473_v35 = vpop.f32.mrf.mxu1 }
 0x776   : > { %v4668_v41 = vpop.f32.mrf.mxu3  ;;  %v4960_v27 = vpop.f32.mrf.mxu2 }
 0x777   : > { %v4702_v39 = vadd.f32 %v4668_v41, %v11294_v14  ;;  %v11457_v6 = vadd.f32 %v4960_v27, %v4836_v19  ;;  %v8484_v14 = vld [vmem:[%s12079_s3 + $0x510] sm:$0xff]  ;;  %v4839_v19 = vadd.f32 %v11239_v29, %v4701_v3  ;;  %v8521_v29 = vld [vmem:[%s12079_s3 + $0x638] sm:$0xff] }
 0x778   : > { %5540 = vmatpush.bf16.msra.mxu3 %v8484_v14  ;;  %6145 = vmatpush.bf16.msra.mxu1 %v8521_v29  ;;  %v8516_v29 = vld [vmem:[%s12079_s3 + $0x610] sm:$0xff] }
 0x779   : > { %v4840_v52 = vadd.f32 %v11245_v63, %v4702_v39 }
 0x77e   : > { %v4670_v40 = vpop.f32.mrf.mxu3  ;;  %v4962_v5 = vpop.f32.mrf.mxu2 }
 0x77f   : > { %v4703_v42 = vadd.f32 %v4670_v40, %v11306_v45  ;;  %v11463_v16 = vadd.f32 %v4962_v5, %v4837_v30  ;;  %v11480_v30 = vpop.f32.mrf.mxu1  ;;  %v12551_v5 = vld [vmem:[#allocation79_spill] sm:$0xff] }
 0x781   : > { %v4841_v63 = vadd.f32 %v11257_v32, %v4703_v42  ;;  %v8482_v32 = vld [vmem:[%s12079_s3 + $0x500] sm:$0xff]  ;;  %v8517_v42 = vld [vmem:[%s12079_s3 + $0x618] sm:$0xff] }
 0x783   : > { %5120 = vmatmul.bf16.gmra.mxu3 %v12547_v2  ;;  %5410 = vmatmul.bf16.gmra.mxu2 %v12548_v1 }
 0x785   : > { %5722 = vmatmul.bf16.gmra.mxu1 %v12550_v9 }
 0x786   : > { %v4673_v45 = vpop.f32.mrf.mxu3  ;;  %v4965_v62 = vpop.f32.mrf.mxu2 }
 0x787   : > { %v4704_v17 = vadd.f32 %v4673_v45, %v11326_v4  ;;  %v11477_v56 = vadd.f32 %v4965_v62, %v4838_v10  ;;  %v8483_v4 = vld [vmem:[%s12079_s3 + $0x508] sm:$0xff]  ;;  %v11498_v14 = vpop.f32.mrf.mxu1  ;;  %v8518_v45 = vld [vmem:[%s12079_s3 + $0x620] sm:$0xff] }
 0x788   : > { %5541 = vmatpush.bf16.msra.mxu3 %v8483_v4 }
 0x78c   : > { %5542 = vmatpush.bf16.msra.mxu3 %v8482_v32  ;;  %v8504_v32 = vld [vmem:[%s12079_s3 + $0x5b0] sm:$0xff] }
 0x78e   : > { %v4675_v41 = vpop.f32.mrf.mxu3  ;;  %v4967_v27 = vpop.f32.mrf.mxu2 }
 0x78f   : > { %v4705_v0 = vadd.f32 %v4675_v41, %v11338_v51  ;;  %v11483_v40 = vadd.f32 %v4967_v27, %v4839_v19  ;;  %v11513_v62 = vpop.f32.mrf.mxu1  ;;  %v12553_v19 = vld [vmem:[#allocation89_spill] sm:$0xff]  ;;  %v12554_v41 = vld [vmem:[#allocation2_spill] sm:$0xff] }
 0x793   : > { %5125 = vmatmul.bf16.gmra.mxu3 %v12551_v5  ;;  %5415 = vmatmul.bf16.gmra.mxu2 %v12552_v50 }
 0x795   : > { %5727 = vmatmul.bf16.gmra.mxu1 %v12508_v20  ;;  %v8520_v20 = vld [vmem:[%s12079_s3 + $0x630] sm:$0xff] }
 0x796   : > { %v4678_v51 = vpop.f32.mrf.mxu3  ;;  %v4970_v3 = vpop.f32.mrf.mxu2  ;;  %6146 = vmatpush.bf16.msra.mxu1 %v8520_v20  ;;  %v8514_v20 = vld [vmem:[%s12079_s3 + $0x600] sm:$0xff] }
 0x797   : > { %v4706_v2 = vadd.f32 %v4678_v51, %v11356_v38  ;;  %v11496_v1 = vadd.f32 %v4970_v3, %v4840_v52 }
 0x79a   : > { %6147 = vmatpush.bf16.msra.mxu1 %v8519_v18  ;;  %v12556_v18 = vld [vmem:[#allocation80_spill] sm:$0xff] }
 0x79e   : > { %v4680_v39 = vpop.f32.mrf.mxu3  ;;  %v4972_v9 = vpop.f32.mrf.mxu2  ;;  %6148 = vmatpush.bf16.msra.mxu1 %v8518_v45 }
 0x79f   : > { %v4707_v10 = vadd.f32 %v4680_v39, %v11368_v55  ;;  %v11508_v38 = vadd.f32 %v4972_v9, %v4841_v63  ;;  %v4842_v55 = vadd.f32 %v11263_v54, %v4704_v17  ;;  %v4843_v54 = vadd.f32 %v11275_v15, %v4705_v0  ;;  %v8515_v17 = vld [vmem:[%s12079_s3 + $0x608] sm:$0xff]  ;;  %v8505_v15 = vld [vmem:[%s12079_s3 + $0x5b8] sm:$0xff]  ;;  %v12555_v0 = vld [vmem:[#allocation9_spill] sm:$0xff] }
 0x7a0   : > { %v8513_v63 = vld [vmem:[%s12079_s3 + $0x5f8] sm:$0xff]  ;;  %5845 = vmatpush.bf16.msra.mxu2 %v8505_v15 }
 0x7a1   : > { %6001 = vmatpush.bf16.msrb.mxu3 %v8513_v63 }
 0x7a2   : > { %6149 = vmatpush.bf16.msra.mxu1 %v8517_v42  ;;  %v12557_v42 = vld [vmem:[#allocation69_spill] sm:$0xff] }
 0x7a3   : > { %5130 = vmatmul.bf16.gmra.mxu3 %v12553_v19  ;;  %5420 = vmatmul.bf16.gmra.mxu2 %v12554_v41 }
 0x7a4   : > { %5846 = vmatpush.bf16.msra.mxu2 %v8504_v32  ;;  %v8500_v32 = vld [vmem:[%s12079_s3 + $0x590] sm:$0xff] }
 0x7a5   : > { %5732 = vmatmul.bf16.gmra.mxu1 %v12510_v12  ;;  %v11531_v12 = vpop.f32.mrf.mxu1 }
 0x7a6   : > { %v4683_v27 = vpop.f32.mrf.mxu3  ;;  %v4975_v5 = vpop.f32.mrf.mxu2  ;;  %6150 = vmatpush.bf16.msra.mxu1 %v8516_v29 }
 0x7a7   : > { %v4708_v50 = vadd.f32 %v4683_v27, %v11388_v7  ;;  %v11526_v4 = vadd.f32 %v4975_v5, %v4842_v55  ;;  %v12558_v27 = vld [vmem:[#allocation70_spill] sm:$0xff] }
 0x7a9   : > { %v4846_v63 = vadd.f32 %v11308_v49, %v4708_v50 }
 0x7aa   : > { %6151 = vmatpush.bf16.msra.mxu1 %v8515_v17  ;;  %v12560_v17 = vld [vmem:[#allocation61_spill] sm:$0xff] }
 0x7ad   : > { %v11553_v45 = vpop.f32.mrf.mxu1 }
 0x7ae   : > { %v4685_v52 = vpop.f32.mrf.mxu3  ;;  %v4977_v51 = vpop.f32.mrf.mxu2  ;;  %6152 = vmatpush.bf16.msra.mxu1 %v8514_v20  ;;  %v12561_v20 = vld [vmem:[#allocation57_spill] sm:$0xff] }
 0x7af   : > { %v4709_v7 = vadd.f32 %v4685_v52, %v11400_v58  ;;  %v11538_v3 = vadd.f32 %v4977_v51, %v4843_v54  ;;  %v4844_v58 = vadd.f32 %v11281_v60, %v4706_v2  ;;  %v4845_v60 = vadd.f32 %v11296_v57, %v4707_v10 }
 0x7b0   : > { %v5044_v52 = vunpack.c.l.b16 %v12560_v17  ;;  %v12562_v15 = vunpack.c.l.b16 %v12561_v20 }
 0x7b1   : > { %v4847_v49 = vadd.f32 %v11331_v31, %v4709_v7 }
 0x7b2   : > { %v5046_v57 = vpack.c.b16 %v5044_v52, %v12562_v15 }
 0x7b3   : > { %5135 = vmatmul.bf16.gmra.mxu3 %v12555_v0  ;;  %5425 = vmatmul.bf16.gmra.mxu2 %v12556_v18  ;;  %v8512_v0 = vld [vmem:[%s12079_s3 + $0x5f0] sm:$0xff]  ;;  %v8501_v18 = vld [vmem:[%s12079_s3 + $0x598] sm:$0xff] }
 0x7b4   : > { %6002 = vmatpush.bf16.msrb.mxu3 %v8512_v0 }
 0x7b5   : > { %5737 = vmatmul.bf16.gmra.mxu1 %v12515_v33  ;;  %v8503_v33 = vld [vmem:[%s12079_s3 + $0x5a8] sm:$0xff]  ;;  %v11574_v51 = vpop.f32.mrf.mxu1 }
 0x7b6   : > { %v4688_v39 = vpop.f32.mrf.mxu3  ;;  %v4980_v9 = vpop.f32.mrf.mxu2  ;;  %5847 = vmatpush.bf16.msra.mxu2 %v8503_v33 }
 0x7b7   : > { %v4710_v19 = vadd.f32 %v4688_v39, %v11414_v53  ;;  %v11556_v41 = vadd.f32 %v4980_v9, %v4844_v58  ;;  %v12559_v53 = vsel %vm8808_vm12, %v12557_v42, %v12558_v27  ;;  %v8498_v42 = vld [vmem:[%s12079_s3 + $0x580] sm:$0xff]  ;;  %v12564_v27 = vld [vmem:[#allocation4_spill] sm:$0xff] }
 0x7b8   : > { %v5646_v5 = vunpack.c.l.b16 %v12559_v53  ;;  %v12565_v53 = vld [vmem:[#allocation22_spill] sm:$0xff] }
 0x7ba   : > { %v5648_v10 = vpack.c.b16 %v5646_v5, %v11428_v26  ;;  %5848 = vmatpush.bf16.msra.mxu2 %v8502_v22  ;;  %v8511_v5 = vld [vmem:[%s12079_s3 + $0x5e8] sm:$0xff] }
 0x7bb   : > { %6003 = vmatpush.bf16.msrb.mxu3 %v8511_v5 }
 0x7bd   : > { %v11598_v33 = vpop.f32.mrf.mxu1 }
 0x7be   : > { %v4690_v2 = vpop.f32.mrf.mxu3  ;;  %v4982_v55 = vpop.f32.mrf.mxu2  ;;  %5849 = vmatpush.bf16.msra.mxu2 %v8501_v18 }
 0x7bf   : > { %v4711_v29 = vadd.f32 %v4690_v2, %v11420_v24  ;;  %v11571_v54 = vadd.f32 %v4982_v55, %v4845_v60  ;;  %v12563_v24 = vld [vmem:[#allocation90_spill] sm:$0xff] }
 0x7c0   : > { %v8499_v60 = vld [vmem:[%s12079_s3 + $0x588] sm:$0xff] }
 0x7c1   : > { %v4849_v22 = vadd.f32 %v11365_v21, %v4711_v29  ;;  %v8510_v21 = vld [vmem:[%s12079_s3 + $0x5e0] sm:$0xff] }
 0x7c2   : > { %5850 = vmatpush.bf16.msra.mxu2 %v8500_v32  ;;  %v12569_v32 = vld [vmem:[#allocation32_spill] sm:$0xff]  ;;  %6004 = vmatpush.bf16.msrb.mxu3 %v8510_v21 }
 0x7c3   : > { %5140 = vmatmul.bf16.gmra.mxu3 %v5046_v57  ;;  %5430 = vmatmul.bf16.gmra.mxu2 %v12563_v24 }
 0x7c5   : > { %5742 = vmatmul.bf16.gmra.mxu1 %v5648_v10  ;;  %v11616_v31 = vpop.f32.mrf.mxu1 }
 0x7c6   : > { %v4693_v58 = vpop.f32.mrf.mxu3  ;;  %v4985_v39 = vpop.f32.mrf.mxu2  ;;  %5851 = vmatpush.bf16.msra.mxu2 %v8499_v60 }
 0x7c7   : > { %v4712_v26 = vadd.f32 %v4693_v58, %v11440_v23  ;;  %v11593_v9 = vadd.f32 %v4985_v39, %v4846_v63  ;;  %v12566_v63 = vld [vmem:[#allocation62_spill] sm:$0xff] }
 0x7c8   : > { %v5344_v58 = vunpack.c.l.b16 %v12566_v63 }
 0x7ca   : > { %5852 = vmatpush.bf16.msra.mxu2 %v8498_v42 }
 0x7cd   : > { %v11623_v0 = vpop.f32.mrf.mxu1 }
 0x7ce   : > { %v4695_v50 = vpop.f32.mrf.mxu3  ;;  %v4987_v2 = vpop.f32.mrf.mxu2 }
 0x7cf   : > { %v4713_v23 = vadd.f32 %v4695_v50, %v11444_v44  ;;  %v11605_v55 = vadd.f32 %v4987_v2, %v4847_v49  ;;  %v4848_v44 = vadd.f32 %v11352_v59, %v4710_v19  ;;  %v12567_v59 = vld [vmem:[#allocation99_spill] sm:$0xff] }
 0x7d0   : > { %v12568_v19 = vunpack.c.l.b16 %v12567_v59 }
 0x7d1   : > { %v4851_v2 = vadd.f32 %v11405_v28, %v4713_v23 }
 0x7d2   : > { %v5346_v39 = vpack.c.b16 %v5344_v58, %v12568_v19 }
 0x7d3   : > { %5435 = vmatmul.bf16.gmra.mxu2 %v12564_v27  ;;  %5543 = vmatmul.bf16.vlgmr.msra.gmra.mxu3 %v12565_v53 }
 0x7d5   : > { %6153 = vmatmul.bf16.vlgmr.msra.gmra.mxu1 %v12520_v43  ;;  %v11642_v50 = vpop.f32.mrf.mxu1 }
 0x7d6   : > { %v4990_v7 = vpop.f32.mrf.mxu2  ;;  %v5106_v20 = vpop.f32.mrf.mxu3 }
 0x7d7   : > { %v11619_v15 = vadd.f32 %v4990_v7, %v4848_v44  ;;  %v5146_v57 = vadd.f32 %v5106_v20, %v11457_v6  ;;  %v4850_v6 = vadd.f32 %v11390_v61, %v4712_v26  ;;  %v12570_v61 = vld [vmem:[#allocation42_spill] sm:$0xff]  ;;  %v12571_v26 = vld [vmem:[#allocation23_spill] sm:$0xff] }
 0x7d9   : > { %v5302_v28 = vadd.f32 %v11417_v46, %v5146_v57  ;;  %v12573_v46 = vld [vmem:[#allocation33_spill] sm:$0xff] }
 0x7da   : > { %v12574_v57 = vld [vmem:[#allocation53_spill] sm:$0xff] }
 0x7de   : > { %v4992_v10 = vpop.f32.mrf.mxu2  ;;  %v5108_v24 = vpop.f32.mrf.mxu3 }
 0x7df   : > { %v11625_v18 = vadd.f32 %v4992_v10, %v4849_v22  ;;  %v5147_v43 = vadd.f32 %v5108_v24, %v11463_v16 }
 0x7e1   : > { %v5303_v22 = vadd.f32 %v11438_v11, %v5147_v43 }
 0x7e3   : > { %5440 = vmatmul.bf16.gmra.mxu2 %v5346_v39  ;;  %5548 = vmatmul.bf16.gmra.mxu3 %v12569_v32 }
 0x7e5   : > { %6158 = vmatmul.bf16.gmra.mxu1 %v12521_v8  ;;  %v11648_v8 = vpop.f32.mrf.mxu1 }
 0x7e6   : > { %v4995_v16 = vpop.f32.mrf.mxu2  ;;  %v5111_v29 = vpop.f32.mrf.mxu3 }
 0x7e7   : > { %v11639_v60 = vadd.f32 %v4995_v16, %v4850_v6  ;;  %v5148_v49 = vadd.f32 %v5111_v29, %v11477_v56  ;;  %v8509_v56 = vld [vmem:[%s12079_s3 + $0x5d8] sm:$0xff] }
 0x7e8   : > { %6005 = vmatpush.bf16.msrb.mxu3 %v8509_v56 }
 0x7e9   : > { %v5304_v39 = vadd.f32 %v11447_v13, %v5148_v49  ;;  %v12575_v13 = vld [vmem:[#allocation83_spill] sm:$0xff] }
 0x7ea   : > { %v12576_v49 = vld [vmem:[#allocation43_spill] sm:$0xff] }
 0x7ed   : > { %v11660_v20 = vpop.f32.mrf.mxu1 }
 0x7ee   : > { %v4997_v42 = vpop.f32.mrf.mxu2  ;;  %v5113_v27 = vpop.f32.mrf.mxu3 }
 0x7ef   : > { %v11645_v53 = vadd.f32 %v4997_v42, %v4851_v2  ;;  %v5149_v5 = vadd.f32 %v5113_v27, %v11483_v40 }
 0x7f1   : > { %v5305_v6 = vadd.f32 %v11459_v34, %v5149_v5 }
 0x7f3   : > { %5553 = vmatmul.bf16.gmra.mxu3 %v12570_v61  ;;  %5853 = vmatmul.bf16.vlgmr.msra.gmra.mxu2 %v12571_v26 }
 0x7f5   : > { %6163 = vmatmul.bf16.gmra.mxu1 %v12523_v47  ;;  %v12572_v47 = vld [vmem:[#allocation52_spill] sm:$0xff]  ;;  %v11673_v32 = vpop.f32.mrf.mxu1 }
 0x7f6   : > { %v5116_v23 = vpop.f32.mrf.mxu3  ;;  %v5406_v44 = vpop.f32.mrf.mxu2 }
 0x7f7   : > { %v5150_v7 = vadd.f32 %v5116_v23, %v11496_v1  ;;  %v11658_v40 = vadd.f32 %v5406_v44, %v5302_v28  ;;  %v8508_v1 = vld [vmem:[%s12079_s3 + $0x5d0] sm:$0xff] }
 0x7f8   : > { %6006 = vmatpush.bf16.msrb.mxu3 %v8508_v1 }
 0x7f9   : > { %v5306_v34 = vadd.f32 %v11473_v35, %v5150_v7  ;;  %v12578_v35 = vld [vmem:[#allocation54_spill] sm:$0xff] }
 0x7fd   : > { %v11682_v27 = vpop.f32.mrf.mxu1 }
 0x7fe   : > { %v5118_v10 = vpop.f32.mrf.mxu3  ;;  %v5408_v24 = vpop.f32.mrf.mxu2 }
 0x7ff   : > { %v5151_v59 = vadd.f32 %v5118_v10, %v11508_v38  ;;  %v11664_v19 = vadd.f32 %v5408_v24, %v5303_v22 }
 0x801   : > { %v5307_v28 = vadd.f32 %v11480_v30, %v5151_v59 }
 0x803   : > { %5558 = vmatmul.bf16.gmra.mxu3 %v12572_v47  ;;  %5858 = vmatmul.bf16.gmra.mxu2 %v12573_v46 }
 0x805   : > { %6168 = vmatmul.bf16.gmra.mxu1 %v12574_v57  ;;  %v11694_v56 = vpop.f32.mrf.mxu1 }
 0x806   : > { %v5121_v11 = vpop.f32.mrf.mxu3  ;;  %v5411_v43 = vpop.f32.mrf.mxu2 }
 0x807   : > { %v5152_v38 = vadd.f32 %v5121_v11, %v11526_v4  ;;  %v11676_v21 = vadd.f32 %v5411_v43, %v5304_v39  ;;  %v8507_v4 = vld [vmem:[%s12079_s3 + $0x5c8] sm:$0xff]  ;;  %v12579_v43 = vld [vmem:[#allocation13_spill] sm:$0xff] }
 0x808   : > { %6007 = vmatpush.bf16.msrb.mxu3 %v8507_v4 }
 0x809   : > { %v5308_v30 = vadd.f32 %v11498_v14, %v5152_v38  ;;  %v12580_v14 = vld [vmem:[#allocation84_spill] sm:$0xff] }
 0x80d   : > { %v11706_v7 = vpop.f32.mrf.mxu1 }
 0x80e   : > { %v5123_v16 = vpop.f32.mrf.mxu3  ;;  %v5413_v29 = vpop.f32.mrf.mxu2 }
 0x80f   : > { %v5153_v2 = vadd.f32 %v5123_v16, %v11538_v3  ;;  %v11680_v42 = vadd.f32 %v5413_v29, %v5305_v6 }
 0x811   : > { %v5309_v46 = vadd.f32 %v11513_v62, %v5153_v2  ;;  %v12581_v2 = vld [vmem:[#allocation66_spill] sm:$0xff] }
 0x813   : > { %5563 = vmatmul.bf16.gmra.mxu3 %v12575_v13  ;;  %5863 = vmatmul.bf16.gmra.mxu2 %v12576_v49  ;;  %v5482_v13 = vunpack.c.l.b16 %v12581_v2 }
 0x815   : > { %6173 = vmatmul.bf16.gmra.mxu1 %v12528_v25  ;;  %v12577_v25 = vld [vmem:[#allocation93_spill] sm:$0xff] }
 0x816   : > { %v5126_v5 = vpop.f32.mrf.mxu3  ;;  %v5416_v61 = vpop.f32.mrf.mxu2 }
 0x817   : > { %v5154_v3 = vadd.f32 %v5126_v5, %v11556_v41  ;;  %v11692_v26 = vadd.f32 %v5416_v61, %v5306_v34  ;;  %v8506_v41 = vld [vmem:[%s12079_s3 + $0x5c0] sm:$0xff]  ;;  %v12582_v34 = vld [vmem:[#allocation67_spill] sm:$0xff] }
 0x818   : > { %6008 = vmatpush.bf16.msrb.mxu3 %v8506_v41  ;;  %v6092_v5 = vunpack.c.l.b16 %v12582_v34 }
 0x81e   : > { %v5128_v23 = vpop.f32.mrf.mxu3  ;;  %v5418_v44 = vpop.f32.mrf.mxu2 }
 0x81f   : > { %v5155_v22 = vadd.f32 %v5128_v23, %v11571_v54  ;;  %v11698_v10 = vadd.f32 %v5418_v44, %v5307_v28  ;;  %v12585_v23 = vld [vmem:[#allocation94_spill] sm:$0xff] }
 0x823   : > { %5568 = vmatmul.bf16.gmra.mxu3 %v12577_v25  ;;  %5868 = vmatmul.bf16.gmra.mxu2 %v12578_v35 }
 0x825   : > { %6178 = vmatmul.bf16.gmra.mxu1 %v12532_v37  ;;  %v11716_v37 = vpop.f32.mrf.mxu1 }
 0x826   : > { %v5131_v24 = vpop.f32.mrf.mxu3  ;;  %v5421_v59 = vpop.f32.mrf.mxu2 }
 0x827   : > { %v5156_v54 = vadd.f32 %v5131_v24, %v11593_v9  ;;  %v11710_v47 = vadd.f32 %v5421_v59, %v5308_v30  ;;  %v5310_v9 = vadd.f32 %v11531_v12, %v5154_v3  ;;  %v12583_v12 = vld [vmem:[#allocation60_spill] sm:$0xff] }
 0x828   : > { %v12584_v3 = vunpack.c.l.b16 %v12583_v12  ;;  %v12586_v59 = vld [vmem:[#allocation100_spill] sm:$0xff] }
 0x829   : > { %v5312_v44 = vadd.f32 %v11574_v51, %v5156_v54 }
 0x82a   : > { %v5484_v28 = vpack.c.b16 %v5482_v13, %v12584_v3 }
 0x82d   : > { %v11725_v29 = vpop.f32.mrf.mxu1 }
 0x82e   : > { %v5133_v1 = vpop.f32.mrf.mxu3  ;;  %v5423_v57 = vpop.f32.mrf.mxu2 }
 0x82f   : > { %v5157_v39 = vadd.f32 %v5133_v1, %v11605_v55  ;;  %v11714_v11 = vadd.f32 %v5423_v57, %v5309_v46  ;;  %v5311_v55 = vadd.f32 %v11553_v45, %v5155_v22  ;;  %v12587_v46 = vld [vmem:[#allocation26_spill] sm:$0xff] }
 0x831   : > { %v5313_v41 = vadd.f32 %v11598_v33, %v5157_v39  ;;  %v12588_v33 = vld [vmem:[#allocation68_spill] sm:$0xff] }
 0x832   : > { %v5792_v39 = vunpack.c.l.b16 %v12588_v33  ;;  %v12595_v33 = vld [vmem:[#allocation71_spill] sm:$0xff] }
 0x833   : > { %5573 = vmatmul.bf16.gmra.mxu3 %v12579_v43  ;;  %5873 = vmatmul.bf16.gmra.mxu2 %v12580_v14 }
 0x835   : > { %6183 = vmatmul.bf16.gmra.mxu1 %v12537_v48  ;;  %v11738_v45 = vpop.f32.mrf.mxu1 }
 0x836   : > { %v5136_v38 = vpop.f32.mrf.mxu3  ;;  %v5426_v6 = vpop.f32.mrf.mxu2 }
 0x837   : > { %v5158_v62 = vadd.f32 %v5136_v38, %v11619_v15  ;;  %v11723_v16 = vadd.f32 %v5426_v6, %v5310_v9  ;;  %v6094_v15 = vpack.c.b16 %v6092_v5, %v5344_v58  ;;  %v5794_v6 = vpack.c.b16 %v5792_v39, %v5044_v52  ;;  %v12590_v52 = vld [vmem:[#allocation47_spill] sm:$0xff] }
 0x838   : > { %v5948_v39 = vunpack.c.l.b16 %v12595_v33 }
 0x839   : > { %v5314_v1 = vadd.f32 %v11616_v31, %v5158_v62  ;;  %v12589_v31 = vld [vmem:[#allocation36_spill] sm:$0xff] }
 0x83d   : > { %v11762_v13 = vpop.f32.mrf.mxu1 }
 0x83e   : > { %v5138_v49 = vpop.f32.mrf.mxu3  ;;  %v5428_v4 = vpop.f32.mrf.mxu2 }
 0x83f   : > { %v5159_v48 = vadd.f32 %v5138_v49, %v11625_v18  ;;  %v11731_v61 = vadd.f32 %v5428_v4, %v5311_v55 }
 0x843   : > { %5578 = vmatmul.bf16.gmra.mxu3 %v5484_v28  ;;  %5878 = vmatmul.bf16.gmra.mxu2 %v12585_v23 }
 0x845   : > { %6188 = vmatmul.bf16.gmra.mxu1 %v6094_v15  ;;  %v11769_v5 = vpop.f32.mrf.mxu1 }
 0x846   : > { %v5141_v22 = vpop.f32.mrf.mxu3  ;;  %v5431_v25 = vpop.f32.mrf.mxu2 }
 0x847   : > { %v5160_v18 = vadd.f32 %v5141_v22, %v11639_v60  ;;  %v5456_v35 = vadd.f32 %v5431_v25, %v5312_v44  ;;  %v5315_v60 = vadd.f32 %v11623_v0, %v5159_v48  ;;  %v12592_v22 = vld [vmem:[#allocation87_spill] sm:$0xff] }
 0x849   : > { %v5316_v62 = vadd.f32 %v11642_v50, %v5160_v18 }
 0x84e   : > { %v5143_v30 = vpop.f32.mrf.mxu3  ;;  %v5433_v24 = vpop.f32.mrf.mxu2 }
 0x84f   : > { %v5161_v63 = vadd.f32 %v5143_v30, %v11645_v53  ;;  %v5457_v58 = vadd.f32 %v5433_v24, %v5313_v41  ;;  %v12593_v30 = vld [vmem:[#allocation97_spill] sm:$0xff] }
 0x851   : > { %v5317_v49 = vadd.f32 %v11648_v8, %v5161_v63  ;;  %v12591_v8 = vld [vmem:[#allocation56_spill] sm:$0xff] }
 0x853   : > { %5883 = vmatmul.bf16.gmra.mxu2 %v12586_v59  ;;  %6009 = vmatmul.bf16.vlgmr.msrb.gmra.mxu3 %v12587_v46 }
 0x856   : > { %v5436_v57 = vpop.f32.mrf.mxu2  ;;  %v5544_v51 = vpop.f32.mrf.mxu3 }
 0x857   : > { %v5458_v54 = vadd.f32 %v5436_v57, %v5314_v1  ;;  %v11748_v43 = vadd.f32 %v5544_v51, %v11658_v40 }
 0x85e   : > { %v5438_v14 = vpop.f32.mrf.mxu2  ;;  %v5546_v9 = vpop.f32.mrf.mxu3 }
 0x85f   : > { %v5459_v53 = vadd.f32 %v5438_v14, %v5315_v60  ;;  %v11753_v38 = vadd.f32 %v5546_v9, %v11664_v19 }
 0x863   : > { %5888 = vmatmul.bf16.gmra.mxu2 %v5794_v6  ;;  %6014 = vmatmul.bf16.gmra.mxu3 %v12589_v31 }
 0x866   : > { %v5441_v40 = vpop.f32.mrf.mxu2  ;;  %v5549_v55 = vpop.f32.mrf.mxu3 }
 0x867   : > { %v5460_v2 = vadd.f32 %v5441_v40, %v5316_v62  ;;  %v11760_v0 = vadd.f32 %v5549_v55, %v11676_v21  ;;  %v11774_v21 = vpop.f32.mrf.mxu1 }
 0x86e   : > { %v5443_v19 = vpop.f32.mrf.mxu2  ;;  %v5551_v4 = vpop.f32.mrf.mxu3 }
 0x86f   : > { %v5461_v34 = vadd.f32 %v5443_v19, %v5317_v49  ;;  %v11766_v17 = vadd.f32 %v5551_v4, %v11680_v42  ;;  %v11783_v15 = vpop.f32.mrf.mxu1 }
 0x873   : > { %6019 = vmatmul.bf16.gmra.mxu3 %v12590_v52  ;;  %v5748_v52 = vadd.f32 %v11660_v20, %v11748_v43 }
 0x876   : > { %v5554_v50 = vpop.f32.mrf.mxu3  ;;  %v5854_v57 = vpop.f32.mrf.mxu2 }
 0x877   : > { %v11772_v48 = vadd.f32 %v5554_v50, %v11692_v26  ;;  %v11788_v26 = vpop.f32.mrf.mxu1 }
 0x87e   : > { %v5556_v12 = vpop.f32.mrf.mxu3  ;;  %v5856_v14 = vpop.f32.mrf.mxu2 }
 0x87f   : > { %v11777_v3 = vadd.f32 %v5556_v12, %v11698_v10  ;;  %v11794_v18 = vpop.f32.mrf.mxu1 }
 0x883   : > { %6024 = vmatmul.bf16.gmra.mxu3 %v12591_v8 }
 0x886   : > { %v5559_v28 = vpop.f32.mrf.mxu3  ;;  %v5859_v55 = vpop.f32.mrf.mxu2 }
 0x887   : > { %v11781_v42 = vadd.f32 %v5559_v28, %v11710_v47  ;;  %v11800_v24 = vpop.f32.mrf.mxu1 }
 0x88e   : > { %v5561_v23 = vpop.f32.mrf.mxu3  ;;  %v5861_v4 = vpop.f32.mrf.mxu2 }
 0x88f   : > { %v11786_v44 = vadd.f32 %v5561_v23, %v11714_v11  ;;  %v11806_v1 = vpop.f32.mrf.mxu1 }
 0x893   : > { %6029 = vmatmul.bf16.gmra.mxu3 %v12592_v22 }
 0x896   : > { %v5564_v25 = vpop.f32.mrf.mxu3  ;;  %v5864_v28 = vpop.f32.mrf.mxu2 }
 0x897   : > { %v11792_v10 = vadd.f32 %v5564_v25, %v11723_v16  ;;  %v12594_v16 = vld [vmem:[#allocation105_spill] sm:$0xff] }
 0x89e   : > { %v5566_v41 = vpop.f32.mrf.mxu3 }
 0x89f   : > { %v11797_v47 = vadd.f32 %v5566_v41, %v11731_v61  ;;  %v6154_v61 = vpop.f32.mrf.mxu1 }
 0x8a3   : > { %6034 = vmatmul.bf16.gmra.mxu3 %v12593_v30 }
 0x8a6   : > { %v5569_v11 = vpop.f32.mrf.mxu3 }
 0x8a7   : > { %v11802_v63 = vadd.f32 %v5569_v11, %v5456_v35  ;;  %v12596_v35 = vunpack.c.l.b16 %v12534_v36  ;;  %v5749_v36 = vadd.f32 %v11673_v32, %v11753_v38  ;;  %v5750_v32 = vadd.f32 %v11682_v27, %v11760_v0 }
 0x8a8   : > { %v5751_v27 = vadd.f32 %v11694_v56, %v11766_v17 }
 0x8a9   : > { %v5950_v31 = vpack.c.b16 %v5948_v39, %v12596_v35 }
 0x8aa   : > { %v5897_v35 = vadd.f32 %v5861_v4, %v5751_v27 }
 0x8ae   : > { %v5571_v59 = vpop.f32.mrf.mxu3 }
 0x8af   : > { %v11804_v46 = vadd.f32 %v5571_v59, %v5457_v58  ;;  %v6156_v58 = vpop.f32.mrf.mxu1  ;;  %v5866_v59 = vpop.f32.mrf.mxu2 }
 0x8b3   : > { %6039 = vmatmul.bf16.gmra.mxu3 %v12594_v16 }
 0x8b6   : > { %v5574_v51 = vpop.f32.mrf.mxu3 }
 0x8b7   : > { %v11809_v60 = vadd.f32 %v5574_v51, %v5458_v54  ;;  %v6159_v49 = vpop.f32.mrf.mxu1  ;;  %v5869_v17 = vpop.f32.mrf.mxu2 }
 0x8be   : > { %v5576_v9 = vpop.f32.mrf.mxu3 }
 0x8bf   : > { %v11812_v6 = vadd.f32 %v5576_v9, %v5459_v53  ;;  %v5894_v53 = vadd.f32 %v5854_v57, %v5748_v52  ;;  %v6161_v12 = vpop.f32.mrf.mxu1  ;;  %v5896_v57 = vadd.f32 %v5859_v55, %v5750_v32  ;;  %v6297_v9 = vld [vmem:[%s11839_s30] sm:$0x1] }
 0x8c3   : > { %6044 = vmatmul.bf16.gmra.mxu3 %v5950_v31 }
 0x8c6   : > { %v5579_v62 = vpop.f32.mrf.mxu3 }
 0x8c7   : > { %v11816_v40 = vadd.f32 %v5579_v62, %v5460_v2  ;;  %v5895_v2 = vadd.f32 %v5856_v14, %v5749_v36  ;;  %v11830_v41 = vpop.f32.mrf.mxu1 }
 0x8ce   : > { %v5581_v19 = vpop.f32.mrf.mxu3 }
 0x8cf   : > { %v11818_v54 = vadd.f32 %v5581_v19, %v5461_v34  ;;  %v11827_v34 = vld [vmem:[%s12080_s4] ss:$0 sm:$0xff]  ;;  %v6166_v39 = vpop.f32.mrf.mxu1 }
 0x8d6   : > { %v6010_v50 = vpop.f32.mrf.mxu3 }
 0x8d7   : > { %v6050_v8 = vadd.f32 %v6010_v50, %v5894_v53 }
 0x8d9   : > { %v6194_v23 = vadd.f32 %v6154_v61, %v6050_v8  ;;  %v5752_v8 = vadd.f32 %v11706_v7, %v11772_v48 }
 0x8db   : > { %v6214_v20 = vadd.f32 %v11827_v34, %v6194_v23  ;;  %v5898_v7 = vadd.f32 %v5864_v28, %v5752_v8  ;;  %v6300_v28 = vld [vmem:[%s11839_s30 + $0x2] sm:$0x1] }
 0x8dd   : > { %v6230_v38 = vmax.f32 %v6214_v20, 0.0 }
 0x8de   : > { %v6012_v22 = vpop.f32.mrf.mxu3 }
 0x8df   : > { %v6051_v25 = vadd.f32 %v6012_v22, %v5895_v2  ;;  %v6169_v22 = vpop.f32.mrf.mxu1 }
 0x8e1   : > { %v6195_v43 = vadd.f32 %v6156_v58, %v6051_v25 }
 0x8e3   : > { %v6215_v30 = vadd.f32 %v11827_v34, %v6195_v43 }
 0x8e5   : > { %v6231_v11 = vmax.f32 %v6215_v30, 0.0  ;;  %v6475_v30 = vld [vmem:[%s11839_s30] sm:$0x2] }
 0x8e6   : > { %v6015_v16 = vpop.f32.mrf.mxu3 }
 0x8e7   : > { %v6246_v51 = vmax.f32 %v6230_v38, %v6231_v11  ;;  %v6052_v33 = vadd.f32 %v6015_v16, %v5896_v57 }
 0x8e9   : > { %v6262_v61 = vrot.slane %v6246_v51, 1  ;;  %v6196_v58 = vadd.f32 %v6159_v49, %v6052_v33  ;;  %v5753_v33 = vadd.f32 %v11716_v37, %v11777_v3 }
 0x8eb   : > { %v6278_v0 = vmax.f32 %v6246_v51, %v6262_v61  ;;  %v6216_v4 = vadd.f32 %v11827_v34, %v6196_v58  ;;  %v5871_v61 = vpop.f32.mrf.mxu2 }
 0x8ed   : > { %v11849_v31 = vpack.c.bf16 %v6278_v0, %v6278_v0  ;;  %v6232_v2 = vmax.f32 %v6216_v4, 0.0  ;;  %v5899_v0 = vadd.f32 %v5866_v59, %v5753_v33 }
 0x8ee   : > { %v6017_v62 = vpop.f32.mrf.mxu3 }
 0x8ef   : > { %v6298_v55 = vsel %vm11844_vm0, %v11849_v31, %v6297_v9  ;;  %v6329_v19 = vrot.slane %v11849_v31, 2  ;;  %6428 = vst.sshfl [vmem:[#allocation1] sm:$0xff pattern:$0x75643120] %v11849_v31  ;;  %v6053_v56 = vadd.f32 %v6017_v62, %v5897_v35 }
 0x8f0   : > { %6299 = vst [vmem:[%s11839_s30] sm:$0x1] %v6298_v55 }
 0x8f1   : > { %v6340_v52 = vsel %vm2929_vm4, %v11849_v31, %v6329_v19  ;;  %v6197_v50 = vadd.f32 %v6161_v12, %v6053_v56  ;;  %v6171_v56 = vpop.f32.mrf.mxu1 }
 0x8f2   : > { %v6362_v49 = vshll.u32 %v6340_v52, 16 }
 0x8f3   : > { %v6217_v53 = vadd.f32 %v11827_v34, %v6197_v50  ;;  %v5874_v4 = vpop.f32.mrf.mxu2  ;;  %v5754_v50 = vadd.f32 %v11725_v29, %v11781_v42 }
 0x8f4   : > { %v8237_v12 = vrot.slane %v6362_v49, 9 }
 0x8f5   : > { %v6233_v23 = vmax.f32 %v6217_v53, 0.0 }
 0x8f6   : > { %v6020_v25 = vpop.f32.mrf.mxu3  ;;  %v6430_v20 = vld [vmem:[#allocation1 + $0x1] ss:$2 sm:$0xff] }
 0x8f7   : > { %v6404_v48 = vld [vmem:[%s11839_s30] sm:$0x1]  ;;  %v6247_v32 = vmax.f32 %v6232_v2, %v6233_v23  ;;  %v6456_v38 = vrot.slane %v6430_v20, 7  ;;  %v6054_v57 = vadd.f32 %v6020_v25, %v5898_v7  ;;  %v5900_v25 = vadd.f32 %v5869_v17, %v5754_v50  ;;  %v6303_v17 = vld [vmem:[%s11839_s30 + $0x4] sm:$0x1] }
 0x8f8   : > { %v6405_v11 = vsel %vm11864_vm5, %v8237_v12, %v6404_v48  ;;  %v6478_v12 = vld [vmem:[%s11839_s30 + $0x2] sm:$0x2] }
 0x8f9   : > { %6406 = vst [vmem:[%s11839_s30] sm:$0x1] %v6405_v11  ;;  %v6263_v16 = vrot.slane %v6247_v32, 1  ;;  %v6476_v51 = vsel %vm11869_vm6, %v6456_v38, %v6475_v30  ;;  %v6198_v35 = vadd.f32 %v11830_v41, %v6054_v57  ;;  %v6174_v42 = vpop.f32.mrf.mxu1  ;;  %v5755_v38 = vadd.f32 %v11738_v45, %v11786_v44 }
 0x8fa   : > { %6477 = vst [vmem:[%s11839_s30] sm:$0x2] %v6476_v51 }
 0x8fb   : > { %v6279_v27 = vmax.f32 %v6247_v32, %v6263_v16  ;;  %v6218_v3 = vadd.f32 %v11827_v34, %v6198_v35  ;;  %v5901_v16 = vadd.f32 %v5871_v61, %v5755_v38  ;;  %v5876_v33 = vpop.f32.mrf.mxu2 }
 0x8fd   : > { %v11884_v9 = vpack.c.bf16 %v6279_v27, %v6279_v27  ;;  %v6234_v49 = vmax.f32 %v6218_v3, 0.0 }
 0x8fe   : > { %v6022_v58 = vpop.f32.mrf.mxu3 }
 0x8ff   : > { %v6301_v62 = vsel %vm11844_vm0, %v11884_v9, %v6300_v28  ;;  %v6330_v55 = vrot.slane %v11884_v9, 2  ;;  %6432 = vst.sshfl [vmem:[#allocation1 + $0x10] sm:$0xff pattern:$0x75643120] %v11884_v9  ;;  %v6055_v19 = vadd.f32 %v6022_v58, %v5899_v0 }
 0x900   : > { %6302 = vst [vmem:[%s11839_s30 + $0x2] sm:$0x1] %v6301_v62 }
 0x901   : > { %v6343_v37 = vsel %vm2929_vm4, %v11884_v9, %v6330_v55  ;;  %v6199_v41 = vadd.f32 %v6166_v39, %v6055_v19  ;;  %v6176_v62 = vpop.f32.mrf.mxu1  ;;  %v5756_v55 = vadd.f32 %v11762_v13, %v11792_v10 }
 0x902   : > { %v6366_v59 = vshll.u32 %v6343_v37, 16 }
 0x903   : > { %v6219_v52 = vadd.f32 %v11827_v34, %v6199_v41  ;;  %v5902_v50 = vadd.f32 %v5874_v4, %v5756_v55  ;;  %v6306_v4 = vld [vmem:[%s11839_s30 + $0x6] sm:$0x1] }
 0x904   : > { %v8238_v8 = vrot.slane %v6366_v59, 9 }
 0x905   : > { %v6235_v53 = vmax.f32 %v6219_v52, 0.0  ;;  %v6481_v52 = vld [vmem:[%s11839_s30 + $0x4] sm:$0x2] }
 0x906   : > { %v6025_v2 = vpop.f32.mrf.mxu3  ;;  %v6434_v23 = vld [vmem:[#allocation1 + $0x11] ss:$2 sm:$0xff] }
 0x907   : > { %v6407_v20 = vld [vmem:[%s11839_s30 + $0x2] sm:$0x1]  ;;  %v6248_v30 = vmax.f32 %v6234_v49, %v6235_v53  ;;  %v6457_v39 = vrot.slane %v6434_v23, 7  ;;  %v6056_v32 = vadd.f32 %v6025_v2, %v5900_v25 }
 0x908   : > { %v6408_v7 = vsel %vm11864_vm5, %v8238_v8, %v6407_v20  ;;  %v5879_v8 = vpop.f32.mrf.mxu2 }
 0x909   : > { %6409 = vst [vmem:[%s11839_s30 + $0x2] sm:$0x1] %v6408_v7  ;;  %v6264_v48 = vrot.slane %v6248_v30, 1  ;;  %v6479_v29 = vsel %vm11869_vm6, %v6457_v39, %v6478_v12  ;;  %v6200_v51 = vadd.f32 %v6169_v22, %v6056_v32  ;;  %v5757_v12 = vadd.f32 %v11769_v5, %v11797_v47  ;;  %v6179_v7 = vpop.f32.mrf.mxu1 }
 0x90a   : > { %6480 = vst [vmem:[%s11839_s30 + $0x2] sm:$0x2] %v6479_v29 }
 0x90b   : > { %v6280_v11 = vmax.f32 %v6248_v30, %v6264_v48  ;;  %v6220_v44 = vadd.f32 %v11827_v34, %v6200_v51  ;;  %v5903_v20 = vadd.f32 %v5876_v33, %v5757_v12  ;;  %v5758_v51 = vadd.f32 %v11774_v21, %v11802_v63 }
 0x90d   : > { %v11910_v57 = vpack.c.bf16 %v6280_v11, %v6280_v11  ;;  %v6236_v19 = vmax.f32 %v6220_v44, 0.0  ;;  %v5904_v44 = vadd.f32 %v5879_v8, %v5758_v51 }
 0x90e   : > { %v6027_v27 = vpop.f32.mrf.mxu3 }
 0x90f   : > { %v6304_v28 = vsel %vm11844_vm0, %v11910_v57, %v6303_v17  ;;  %v6331_v0 = vrot.slane %v11910_v57, 2  ;;  %6436 = vst.sshfl [vmem:[#allocation1 + $0x20] sm:$0xff pattern:$0x75643120] %v11910_v57  ;;  %v6057_v35 = vadd.f32 %v6027_v27, %v5901_v16 }
 0x910   : > { %6305 = vst [vmem:[%s11839_s30 + $0x4] sm:$0x1] %v6304_v28  ;;  %v5881_v11 = vpop.f32.mrf.mxu2 }
 0x911   : > { %v6346_v45 = vsel %vm2929_vm4, %v11910_v57, %v6331_v0  ;;  %v6201_v22 = vadd.f32 %v6171_v56, %v6057_v35 }
 0x912   : > { %v6370_v61 = vshll.u32 %v6346_v45, 16  ;;  %v6484_v45 = vld [vmem:[%s11839_s30 + $0x6] sm:$0x2] }
 0x913   : > { %v6221_v58 = vadd.f32 %v11827_v34, %v6201_v22 }
 0x914   : > { %v8239_v3 = vrot.slane %v6370_v61, 9 }
 0x915   : > { %v6237_v37 = vmax.f32 %v6221_v58, 0.0 }
 0x916   : > { %v6030_v41 = vpop.f32.mrf.mxu3  ;;  %v6438_v59 = vld [vmem:[#allocation1 + $0x21] ss:$2 sm:$0xff] }
 0x917   : > { %v6410_v49 = vld [vmem:[%s11839_s30 + $0x4] sm:$0x1]  ;;  %v6249_v53 = vmax.f32 %v6236_v19, %v6237_v37  ;;  %v6458_v56 = vrot.slane %v6438_v59, 7  ;;  %v6058_v13 = vadd.f32 %v6030_v41, %v5902_v50  ;;  %v5759_v37 = vadd.f32 %v11783_v15, %v11804_v46  ;;  %v6309_v59 = vld [vmem:[%s11839_s30 + $0x8] sm:$0x1] }
 0x918   : > { %v6411_v2 = vsel %vm11864_vm5, %v8239_v3, %v6410_v49  ;;  %v5884_v41 = vpop.f32.mrf.mxu2 }
 0x919   : > { %6412 = vst [vmem:[%s11839_s30 + $0x4] sm:$0x1] %v6411_v2  ;;  %v6265_v23 = vrot.slane %v6249_v53, 1  ;;  %v6482_v10 = vsel %vm11869_vm6, %v6458_v56, %v6481_v52  ;;  %v6202_v39 = vadd.f32 %v6174_v42, %v6058_v13  ;;  %v5905_v52 = vadd.f32 %v5881_v11, %v5759_v37 }
 0x91a   : > { %6483 = vst [vmem:[%s11839_s30 + $0x4] sm:$0x2] %v6482_v10 }
 0x91b   : > { %v6281_v25 = vmax.f32 %v6249_v53, %v6265_v23  ;;  %v6222_v47 = vadd.f32 %v11827_v34, %v6202_v39 }
 0x91d   : > { %v11935_v30 = vpack.c.bf16 %v6281_v25, %v6281_v25  ;;  %v6238_v33 = vmax.f32 %v6222_v47, 0.0  ;;  %v5760_v25 = vadd.f32 %v11788_v26, %v11809_v60 }
 0x91e   : > { %v6032_v48 = vpop.f32.mrf.mxu3 }
 0x91f   : > { %v6307_v32 = vsel %vm11844_vm0, %v11935_v30, %v6306_v4  ;;  %v6332_v29 = vrot.slane %v11935_v30, 2  ;;  %6440 = vst.sshfl [vmem:[#allocation1 + $0x30] sm:$0xff pattern:$0x75643120] %v11935_v30  ;;  %v6059_v38 = vadd.f32 %v6032_v48, %v5903_v20 }
 0x920   : > { %6308 = vst [vmem:[%s11839_s30 + $0x6] sm:$0x1] %v6307_v32  ;;  %v5886_v39 = vpop.f32.mrf.mxu2  ;;  %v6487_v32 = vld [vmem:[%s11839_s30 + $0x8] sm:$0x2] }
 0x921   : > { %v6349_v5 = vsel %vm2929_vm4, %v11935_v30, %v6332_v29  ;;  %v6203_v42 = vadd.f32 %v6176_v62, %v6059_v38  ;;  %v6181_v62 = vpop.f32.mrf.mxu1  ;;  %v5906_v38 = vadd.f32 %v5884_v41, %v5760_v25  ;;  %v5762_v41 = vadd.f32 %v11800_v24, %v11816_v40  ;;  %v6490_v24 = vld [vmem:[%s11839_s30 + $0xa] sm:$0x2] }
 0x922   : > { %v6374_v17 = vshll.u32 %v6349_v5, 16 }
 0x923   : > { %v6223_v16 = vadd.f32 %v11827_v34, %v6203_v42 }
 0x924   : > { %v8240_v28 = vrot.slane %v6374_v17, 9 }
 0x925   : > { %v6239_v27 = vmax.f32 %v6223_v16, 0.0  ;;  %v5761_v16 = vadd.f32 %v11794_v18, %v11812_v6 }
 0x926   : > { %v6035_v0 = vpop.f32.mrf.mxu3  ;;  %v6442_v35 = vld [vmem:[#allocation1 + $0x31] ss:$2 sm:$0xff] }
 0x927   : > { %v6413_v22 = vld [vmem:[%s11839_s30 + $0x6] sm:$0x1]  ;;  %v6250_v61 = vmax.f32 %v6238_v33, %v6239_v27  ;;  %v6459_v58 = vrot.slane %v6442_v35, 7  ;;  %v6060_v21 = vadd.f32 %v6035_v0, %v5904_v44  ;;  %v5907_v27 = vadd.f32 %v5886_v39, %v5761_v16 }
 0x928   : > { %v6414_v55 = vsel %vm11864_vm5, %v8240_v28, %v6413_v22  ;;  %v5763_v39 = vadd.f32 %v11806_v1, %v11818_v54 }
 0x929   : > { %6415 = vst [vmem:[%s11839_s30 + $0x6] sm:$0x1] %v6414_v55  ;;  %v6266_v19 = vrot.slane %v6250_v61, 1  ;;  %v6485_v63 = vsel %vm11869_vm6, %v6459_v58, %v6484_v45  ;;  %v6204_v49 = vadd.f32 %v6179_v7, %v6060_v21  ;;  %v6184_v13 = vpop.f32.mrf.mxu1  ;;  %v5889_v58 = vpop.f32.mrf.mxu2 }
 0x92a   : > { %6486 = vst [vmem:[%s11839_s30 + $0x6] sm:$0x2] %v6485_v63 }
 0x92b   : > { %v6282_v3 = vmax.f32 %v6250_v61, %v6266_v19  ;;  %v6224_v15 = vadd.f32 %v11827_v34, %v6204_v49 }
 0x92d   : > { %v6290_v50 = vpack.c.bf16 %v6282_v3, %v6282_v3  ;;  %v6240_v4 = vmax.f32 %v6224_v15, 0.0 }
 0x92e   : > { %v6037_v53 = vpop.f32.mrf.mxu3 }
 0x92f   : > { %v6310_v56 = vsel %vm11844_vm0, %v6290_v50, %v6309_v59  ;;  %v6333_v8 = vrot.slane %v6290_v50, 2  ;;  %6444 = vst.sshfl [vmem:[#allocation1] sm:$0xff pattern:$0x75643120] %v6290_v50  ;;  %v6061_v2 = vadd.f32 %v6037_v53, %v5905_v52 }
 0x930   : > { %6311 = vst [vmem:[%s11839_s30 + $0x8] sm:$0x1] %v6310_v56 }
 0x931   : > { %v6352_v23 = vsel %vm2929_vm4, %v6290_v50, %v6333_v8  ;;  %v6205_v46 = vadd.f32 %v6181_v62, %v6061_v2  ;;  %v6186_v33 = vpop.f32.mrf.mxu1  ;;  %v6545_v62 = vld [vmem:[%s11839_s30] sm:$0x2]  ;;  %v5908_v8 = vadd.f32 %v5889_v58, %v5762_v41 }
 0x932   : > { %v6378_v10 = vshll.u32 %v6352_v23, 16 }
 0x933   : > { %v6225_v12 = vadd.f32 %v11827_v34, %v6205_v46 }
 0x934   : > { %v8241_v7 = vrot.slane %v6378_v10, 9 }
 0x935   : > { %v6241_v20 = vmax.f32 %v6225_v12, 0.0 }
 0x936   : > { %v6445_v48 = vld [vmem:[#allocation1 + $0x1] ss:$2 sm:$0xff]  ;;  %v6040_v29 = vpop.f32.mrf.mxu3 }
 0x937   : > { %v6416_v5 = vld [vmem:[%s11839_s30 + $0x8] sm:$0x1]  ;;  %v6460_v47 = vrot.slane %v6445_v48, 7  ;;  %6499 = vst.sshfl [vmem:[#allocation1] sm:$0xff pattern:$0x75643120] %v11849_v31  ;;  %v6251_v42 = vmax.f32 %v6240_v4, %v6241_v20  ;;  %v6062_v17 = vadd.f32 %v6040_v29, %v5906_v38  ;;  %v5891_v20 = vpop.f32.mrf.mxu2 }
 0x938   : > { %v6417_v11 = vsel %vm11864_vm5, %v8241_v7, %v6416_v5  ;;  %v6312_v31 = vld [vmem:[%s11839_s30 + $0xa] sm:$0x1]  ;;  %v5909_v29 = vadd.f32 %v5891_v20, %v5763_v39  ;;  %v6554_v20 = vld [vmem:[%s11839_s30 + $0x6] sm:$0x2] }
 0x939   : > { %6418 = vst [vmem:[%s11839_s30 + $0x8] sm:$0x1] %v6417_v11  ;;  %v6488_v26 = vsel %vm11869_vm6, %v6460_v47, %v6487_v32  ;;  %v6267_v60 = vrot.slane %v6251_v42, 1  ;;  %v6206_v0 = vadd.f32 %v6184_v13, %v6062_v17  ;;  %v6315_v32 = vld [vmem:[%s11839_s30 + $0xc] sm:$0x1] }
 0x93a   : > { %6489 = vst [vmem:[%s11839_s30 + $0x8] sm:$0x2] %v6488_v26 }
 0x93b   : > { %v6283_v51 = vmax.f32 %v6251_v42, %v6267_v60  ;;  %v6226_v21 = vadd.f32 %v11827_v34, %v6206_v0  ;;  %v6493_v0 = vld [vmem:[%s11839_s30 + $0xc] sm:$0x2] }
 0x93d   : > { %v11980_v28 = vpack.c.bf16 %v6283_v51, %v6283_v51  ;;  %v6242_v59 = vmax.f32 %v6226_v21, 0.0 }
 0x93e   : > { %v6501_v35 = vld [vmem:[#allocation1 + $0x1] ss:$2 sm:$0xff]  ;;  %v6042_v44 = vpop.f32.mrf.mxu3 }
 0x93f   : > { %6511 = vst.sshfl [vmem:[#allocation1] sm:$0xff pattern:$0x75643120] %v6290_v50  ;;  %v6519_v18 = vshll.u32 %v6501_v35, 16  ;;  %v6313_v6 = vsel %vm11844_vm0, %v11980_v28, %v6312_v31  ;;  %v6334_v22 = vrot.slane %v11980_v28, 2  ;;  %v6063_v61 = vadd.f32 %v6042_v44, %v5907_v27  ;;  %v6189_v50 = vpop.f32.mrf.mxu1 }
 0x940   : > { %6314 = vst [vmem:[%s11839_s30 + $0xa] sm:$0x1] %v6313_v6  ;;  %v6548_v31 = vld [vmem:[%s11839_s30 + $0x2] sm:$0x2] }
 0x941   : > { %v6546_v55 = vsel %vm11983_vm8, %v6519_v18, %v6545_v62  ;;  %v6355_v19 = vsel %vm2929_vm4, %v11980_v28, %v6334_v22  ;;  %6447 = vst.sshfl [vmem:[#allocation1 + $0x10] sm:$0xff pattern:$0x75643120] %v11980_v28  ;;  %v6207_v63 = vadd.f32 %v6186_v33, %v6063_v61  ;;  %v6557_v46 = vld [vmem:[%s11839_s30 + $0x8] sm:$0x2] }
 0x942   : > { %6547 = vst [vmem:[%s11839_s30] sm:$0x2] %v6546_v55  ;;  %v6382_v37 = vshll.u32 %v6355_v19, 16 }
 0x943   : > { %v6227_v3 = vadd.f32 %v11827_v34, %v6207_v63 }
 0x944   : > { %v8242_v53 = vrot.slane %v6382_v37, 9  ;;  %v6318_v37 = vld [vmem:[%s11839_s30 + $0xe] sm:$0x1] }
 0x945   : > { %v6243_v52 = vmax.f32 %v6227_v3, 0.0 }
 0x946   : > { %v6512_v49 = vld [vmem:[#allocation1 + $0x1] ss:$2 sm:$0xff]  ;;  %v6045_v56 = vpop.f32.mrf.mxu3 }
 0x947   : > { %v6527_v2 = vshll.u32 %v6512_v49, 16  ;;  %v6419_v23 = vld [vmem:[%s11839_s30 + $0xa] sm:$0x1]  ;;  %v6252_v15 = vmax.f32 %v6242_v59, %v6243_v52  ;;  %v6064_v4 = vadd.f32 %v6045_v56, %v5908_v8  ;;  %v6191_v54 = vpop.f32.mrf.mxu1  ;;  %v6551_v49 = vld [vmem:[%s11839_s30 + $0x4] sm:$0x2] }
 0x948   : > { %v6420_v13 = vsel %vm11864_vm5, %v8242_v53, %v6419_v23  ;;  %v6448_v10 = vld [vmem:[#allocation1 + $0x11] ss:$2 sm:$0xff] }
 0x949   : > { %v6558_v40 = vsel %vm11983_vm8, %v6527_v2, %v6557_v46  ;;  %6421 = vst [vmem:[%s11839_s30 + $0xa] sm:$0x1] %v6420_v13  ;;  %v6461_v12 = vrot.slane %v6448_v10, 7  ;;  %v6268_v25 = vrot.slane %v6252_v15, 1  ;;  %v6208_v5 = vadd.f32 %v6189_v50, %v6064_v4 }
 0x94a   : > { %6559 = vst [vmem:[%s11839_s30 + $0x8] sm:$0x2] %v6558_v40 }
 0x94b   : > { %v6491_v7 = vsel %vm11869_vm6, %v6461_v12, %v6490_v24  ;;  %6502 = vst.sshfl [vmem:[#allocation1 + $0x10] sm:$0xff pattern:$0x75643120] %v11884_v9  ;;  %v6284_v48 = vmax.f32 %v6252_v15, %v6268_v25  ;;  %v6228_v26 = vadd.f32 %v11827_v34, %v6208_v5  ;;  %v6496_v24 = vld [vmem:[%s11839_s30 + $0xe] sm:$0x2] }
 0x94c   : > { %6492 = vst [vmem:[%s11839_s30 + $0xa] sm:$0x2] %v6491_v7 }
 0x94d   : > { %v6292_v38 = vpack.c.bf16 %v6284_v48, %v6284_v48  ;;  %v6244_v35 = vmax.f32 %v6228_v26, 0.0 }
 0x94e   : > { %v6047_v47 = vpop.f32.mrf.mxu3 }
 0x94f   : > { %v6316_v42 = vsel %vm11844_vm0, %v6292_v38, %v6315_v32  ;;  %v6335_v11 = vrot.slane %v6292_v38, 2  ;;  %6450 = vst.sshfl [vmem:[#allocation1 + $0x20] sm:$0xff pattern:$0x75643120] %v6292_v38  ;;  %v6065_v1 = vadd.f32 %v6047_v47, %v5909_v29 }
 0x950   : > { %6317 = vst [vmem:[%s11839_s30 + $0xc] sm:$0x1] %v6316_v42 }
 0x951   : > { %v6358_v9 = vsel %vm2929_vm4, %v6292_v38, %v6335_v11  ;;  %v6209_v60 = vadd.f32 %v6191_v54, %v6065_v1 }
 0x952   : > { %v6504_v17 = vld [vmem:[#allocation1 + $0x11] ss:$2 sm:$0xff]  ;;  %v6386_v16 = vshll.u32 %v6358_v9, 16 }
 0x953   : > { %6513 = vst.sshfl [vmem:[#allocation1 + $0x10] sm:$0xff pattern:$0x75643120] %v11980_v28  ;;  %v6521_v51 = vshll.u32 %v6504_v17, 16  ;;  %v6229_v33 = vadd.f32 %v11827_v34, %v6209_v60  ;;  %v6560_v63 = vld [vmem:[%s11839_s30 + $0xa] sm:$0x2] }
 0x954   : > { %v8243_v18 = vrot.slane %v6386_v16, 9 }
 0x955   : > { %v6549_v27 = vsel %vm11983_vm8, %v6521_v51, %v6548_v31  ;;  %v6245_v44 = vmax.f32 %v6229_v33, 0.0 }
 0x956   : > { %6550 = vst [vmem:[%s11839_s30 + $0x2] sm:$0x2] %v6549_v27  ;;  %v6451_v6 = vld [vmem:[#allocation1 + $0x21] ss:$2 sm:$0xff] }
 0x957   : > { %v6422_v22 = vld [vmem:[%s11839_s30 + $0xc] sm:$0x1]  ;;  %v6462_v28 = vrot.slane %v6451_v6, 7  ;;  %6505 = vst.sshfl [vmem:[#allocation1 + $0x20] sm:$0xff pattern:$0x75643120] %v11910_v57  ;;  %v6253_v61 = vmax.f32 %v6244_v35, %v6245_v44 }
 0x958   : > { %v6423_v34 = vsel %vm11864_vm5, %v8243_v18, %v6422_v22 }
 0x959   : > { %6424 = vst [vmem:[%s11839_s30 + $0xc] sm:$0x1] %v6423_v34  ;;  %v6494_v58 = vsel %vm11869_vm6, %v6462_v28, %v6493_v0  ;;  %v6269_v62 = vrot.slane %v6253_v61, 1 }
 0x95a   : > { %v6514_v55 = vld [vmem:[#allocation1 + $0x11] ss:$2 sm:$0xff]  ;;  %6495 = vst [vmem:[%s11839_s30 + $0xc] sm:$0x2] %v6494_v58 }
 0x95b   : > { %v6529_v19 = vshll.u32 %v6514_v55, 16  ;;  %v6285_v21 = vmax.f32 %v6253_v61, %v6269_v62 }
 0x95d   : > { %v6561_v57 = vsel %vm11983_vm8, %v6529_v19, %v6560_v63  ;;  %v6293_v3 = vpack.c.bf16 %v6285_v21, %v6285_v21 }
 0x95e   : > { %6562 = vst [vmem:[%s11839_s30 + $0xa] sm:$0x2] %v6561_v57  ;;  %v6507_v41 = vld [vmem:[#allocation1 + $0x21] ss:$2 sm:$0xff] }
 0x95f   : > { %6515 = vst.sshfl [vmem:[#allocation1 + $0x20] sm:$0xff pattern:$0x75643120] %v6292_v38  ;;  %v6523_v59 = vshll.u32 %v6507_v41, 16  ;;  %v6319_v52 = vsel %vm11844_vm0, %v6293_v3, %v6318_v37  ;;  %v6336_v50 = vrot.slane %v6293_v3, 2 }
 0x960   : > { %6320 = vst [vmem:[%s11839_s30 + $0xe] sm:$0x1] %v6319_v52 }
 0x961   : > { %v6552_v53 = vsel %vm11983_vm8, %v6523_v59, %v6551_v49  ;;  %v6361_v56 = vsel %vm2929_vm4, %v6293_v3, %v6336_v50  ;;  %6453 = vst.sshfl [vmem:[#allocation1 + $0x30] sm:$0xff pattern:$0x75643120] %v6293_v3  ;;  %v6563_v46 = vld [vmem:[%s11839_s30 + $0xc] sm:$0x2] }
 0x962   : > { %6553 = vst [vmem:[%s11839_s30 + $0x4] sm:$0x2] %v6552_v53  ;;  %v6390_v8 = vshll.u32 %v6361_v56, 16 }
 0x964   : > { %v8244_v23 = vrot.slane %v6390_v8, 9 }
 0x966   : > { %v6516_v2 = vld [vmem:[#allocation1 + $0x21] ss:$2 sm:$0xff] }
 0x967   : > { %v6531_v15 = vshll.u32 %v6516_v2, 16  ;;  %v6425_v14 = vld [vmem:[%s11839_s30 + $0xe] sm:$0x1] }
 0x968   : > { %v6426_v13 = vsel %vm11864_vm5, %v8244_v23, %v6425_v14  ;;  %v6454_v10 = vld [vmem:[#allocation1 + $0x31] ss:$2 sm:$0xff] }
 0x969   : > { %v6564_v40 = vsel %vm11983_vm8, %v6531_v15, %v6563_v46  ;;  %6427 = vst [vmem:[%s11839_s30 + $0xe] sm:$0x1] %v6426_v13  ;;  %v6463_v12 = vrot.slane %v6454_v10, 7 }
 0x96a   : > { %6565 = vst [vmem:[%s11839_s30 + $0xc] sm:$0x2] %v6564_v40 }
 0x96b   : > { %v6497_v25 = vsel %vm11869_vm6, %v6463_v12, %v6496_v24  ;;  %6508 = vst.sshfl [vmem:[#allocation1 + $0x30] sm:$0xff pattern:$0x75643120] %v11935_v30 }
 0x96c   : > { %6498 = vst [vmem:[%s11839_s30 + $0xe] sm:$0x2] %v6497_v25 }
 0x972   : > { %v6510_v4 = vld [vmem:[#allocation1 + $0x31] ss:$2 sm:$0xff] }
 0x973   : > { %6517 = vst.sshfl [vmem:[#allocation1 + $0x30] sm:$0xff pattern:$0x75643120] %v6293_v3  ;;  %v6525_v36 = vshll.u32 %v6510_v4, 16  ;;  %v6566_v32 = vld [vmem:[%s11839_s30 + $0xe] sm:$0x2] }
 0x975   : > { %v6555_v39 = vsel %vm11983_vm8, %v6525_v36, %v6554_v20 }
 0x976   : > { %6556 = vst [vmem:[%s11839_s30 + $0x6] sm:$0x2] %v6555_v39 }
 0x97a   : > { %v6518_v7 = vld [vmem:[#allocation1 + $0x31] ss:$2 sm:$0xff] }
 0x97b   : > { %v6533_v48 = vshll.u32 %v6518_v7, 16 }
 0x97d   : > { %v6567_v29 = vsel %vm11983_vm8, %v6533_v48, %v6566_v32 }
 0x97e   : > { %6568 = vst [vmem:[%s11839_s30 + $0xe] sm:$0x2] %v6567_v29 }
 0x97f PF: > { %s15_s18 = sadd.s32 1, %s8560_s18  }
 0x980   : > { %p12_p4 = scmp.ge.s32.totalorder %s15_s18, 10  }
 0x982   :  { %14 = sbr.rel (!%p12_p4) target bundleno = 1 (0x1), region = 102 }

// kernel: attention_forward.3
= control target key start
LH: loop header
LB: loop body
LE: loop exit
PB: predicated region body
PF: predicated region fallthrough
CT: control target
= control target key end

     0   :  { %vm4638_vm0 = vcmask 7168   ;;  %vm4849_vm9 = vcmask 24576   ;;  %s12628_s1 = inlined_call_operand.vmem [shape: bf16[16,128,512], index: 1, kind: input, shape index: {}]   ;;  %s12629_s0 = inlined_call_operand.vmem [shape: bf16[16,16,128], index: 0, kind: input, shape index: {}]   ;;  %s12630_s4 = inlined_call_operand.vmem [shape: f32[1,128], index: 4, kind: input, shape index: {}]   ;;  %s12631_s3 = inlined_call_operand.vmem [shape: bf16[512,128], index: 3, kind: input, shape index: {}]   ;;  %s12632_s2 = inlined_call_operand.vmem [shape: f32[1,512], index: 2, kind: input, shape index: {}]   ;;  %s12633_s5 = inlined_call_operand.vmem [shape: f32[1,128], index: 5, kind: input, shape index: {}]   ;;  %s12634_s6 = inlined_call_operand.<no memory space> [shape: f32[1,1], index: 6, kind: input, shape index: {}]   ;;  %s12635_s7 = inlined_call_operand.vmem [shape: f32[512,4], index: 7, kind: input, shape index: {}]   ;;  %s12636_s10 = inlined_call_operand.vmem [shape: f32[16,1], index: 10, kind: output, shape index: {1}]   ;;  %s12637_s8 = inlined_call_operand.vmem [shape: f32[1,4], index: 8, kind: input, shape index: {}]   ;;  %s12638_s9 = inlined_call_operand.vmem [shape: f32[2,4], index: 9, kind: output, shape index: {0}]  }
   0x1   :  { %v5272_v0 = vld [vmem:[%s12628_s1 + $0x1e0] sm:$0xf]  ;;  %v7934_v1 = vld [vmem:[%s12628_s1 + $0x1ec] sm:$0xf0]  ;;  %v7932_v2 = vld [vmem:[%s12628_s1 + $0x1e4] sm:$0xf] }
   0x2   :  { %v5273_v3 = vor.u32 %v7934_v1, %v5272_v0  ;;  %v5274_v4 = vld [vmem:[%s12628_s1 + $0x1f0] sm:$0xf0]  ;;  %v5280_v5 = vld [vmem:[%s12628_s1 + $0x1e8] sm:$0xf]  ;;  %v7935_v6 = vld [vmem:[%s12628_s1 + $0x1f4] sm:$0xf0] }
   0x3   :  { %v5277_v7 = vor.u32 %v7932_v2, %v5274_v4  ;;  %v5281_v8 = vor.u32 %v7935_v6, %v5280_v5  ;;  %v7933_v9 = vld [vmem:[%s12628_s1 + $0x1ec] sm:$0xf]  ;;  %v5282_v10 = vld [vmem:[%s12628_s1 + $0x1f8] sm:$0xf0]  ;;  %v5256_v11 = vld [vmem:[%s12628_s1 + $0x1c0] sm:$0xf] }
   0x4   :  { %272 = vmatpush.bf16.msra.mxu0 %v5273_v3  ;;  %v5285_v12 = vor.u32 %v7933_v9, %v5282_v10  ;;  %v7930_v13 = vld [vmem:[%s12628_s1 + $0x1cc] sm:$0xf0]  ;;  %v7928_v14 = vld [vmem:[%s12628_s1 + $0x1c4] sm:$0xf]  ;;  %v5258_v15 = vld [vmem:[%s12628_s1 + $0x1d0] sm:$0xf0] }
   0x5   :  { %286 = vmatpush.bf16.msra.mxu1 %v5277_v7  ;;  %300 = vmatpush.bf16.msra.mxu2 %v5281_v8  ;;  %v5257_v16 = vor.u32 %v7930_v13, %v5256_v11  ;;  %v5261_v17 = vor.u32 %v7928_v14, %v5258_v15  ;;  %v5264_v18 = vld [vmem:[%s12628_s1 + $0x1c8] sm:$0xf]  ;;  %v7931_v19 = vld [vmem:[%s12628_s1 + $0x1d4] sm:$0xf0]  ;;  %v7929_v20 = vld [vmem:[%s12628_s1 + $0x1cc] sm:$0xf] }
   0x6   :  { %314 = vmatpush.bf16.msra.mxu3 %v5285_v12  ;;  %v5265_v21 = vor.u32 %v7931_v19, %v5264_v18  ;;  %v5266_v22 = vld [vmem:[%s12628_s1 + $0x1d8] sm:$0xf0]  ;;  %v5240_v23 = vld [vmem:[%s12628_s1 + $0x1a0] sm:$0xf]  ;;  %v7926_v24 = vld [vmem:[%s12628_s1 + $0x1ac] sm:$0xf0] }
   0x7   :  { %v5269_v25 = vor.u32 %v7929_v20, %v5266_v22  ;;  %v7924_v26 = vld [vmem:[%s12628_s1 + $0x1a4] sm:$0xf]  ;;  %v5242_v27 = vld [vmem:[%s12628_s1 + $0x1b0] sm:$0xf0]  ;;  %v5248_v28 = vld [vmem:[%s12628_s1 + $0x1a8] sm:$0xf]  ;;  %v5241_v29 = vor.u32 %v7926_v24, %v5240_v23 }
   0x8   :  { %273 = vmatpush.bf16.msra.mxu0 %v5257_v16  ;;  %v7927_v30 = vld [vmem:[%s12628_s1 + $0x1b4] sm:$0xf0]  ;;  %v7925_v31 = vld [vmem:[%s12628_s1 + $0x1ac] sm:$0xf]  ;;  %v5250_v32 = vld [vmem:[%s12628_s1 + $0x1b8] sm:$0xf0]  ;;  %v5245_v33 = vor.u32 %v7924_v26, %v5242_v27 }
   0x9   :  { %287 = vmatpush.bf16.msra.mxu1 %v5261_v17  ;;  %301 = vmatpush.bf16.msra.mxu2 %v5265_v21  ;;  %v5249_v34 = vor.u32 %v7927_v30, %v5248_v28  ;;  %v5224_v35 = vld [vmem:[%s12628_s1 + $0x180] sm:$0xf]  ;;  %v7922_v36 = vld [vmem:[%s12628_s1 + $0x18c] sm:$0xf0]  ;;  %v7920_v37 = vld [vmem:[%s12628_s1 + $0x184] sm:$0xf]  ;;  %v5253_v38 = vor.u32 %v7925_v31, %v5250_v32 }
   0xa   :  { %315 = vmatpush.bf16.msra.mxu3 %v5269_v25  ;;  %v5226_v39 = vld [vmem:[%s12628_s1 + $0x190] sm:$0xf0]  ;;  %v5232_v40 = vld [vmem:[%s12628_s1 + $0x188] sm:$0xf]  ;;  %v7923_v41 = vld [vmem:[%s12628_s1 + $0x194] sm:$0xf0]  ;;  %v5225_v44 = vor.u32 %v7922_v36, %v5224_v35 }
   0xb   :  { %v7921_v42 = vld [vmem:[%s12628_s1 + $0x18c] sm:$0xf]  ;;  %v5234_v43 = vld [vmem:[%s12628_s1 + $0x198] sm:$0xf0]  ;;  %v5229_v45 = vor.u32 %v7920_v37, %v5226_v39  ;;  %v5233_v46 = vor.u32 %v7923_v41, %v5232_v40  ;;  %v5208_v47 = vld [vmem:[%s12628_s1 + $0x160] sm:$0xf] }
   0xc   :  { %274 = vmatpush.bf16.msra.mxu0 %v5241_v29  ;;  %v7918_v48 = vld [vmem:[%s12628_s1 + $0x16c] sm:$0xf0]  ;;  %v7916_v49 = vld [vmem:[%s12628_s1 + $0x164] sm:$0xf]  ;;  %v5237_v50 = vor.u32 %v7921_v42, %v5234_v43  ;;  %v5210_v51 = vld [vmem:[%s12628_s1 + $0x170] sm:$0xf0] }
   0xd   :  { %288 = vmatpush.bf16.msra.mxu1 %v5245_v33  ;;  %302 = vmatpush.bf16.msra.mxu2 %v5249_v34  ;;  %v5216_v52 = vld [vmem:[%s12628_s1 + $0x168] sm:$0xf]  ;;  %v7919_v53 = vld [vmem:[%s12628_s1 + $0x174] sm:$0xf0]  ;;  %v7917_v54 = vld [vmem:[%s12628_s1 + $0x16c] sm:$0xf]  ;;  %v5209_v56 = vor.u32 %v7918_v48, %v5208_v47  ;;  %v5213_v57 = vor.u32 %v7916_v49, %v5210_v51 }
   0xe   :  { %316 = vmatpush.bf16.msra.mxu3 %v5253_v38  ;;  %v5218_v55 = vld [vmem:[%s12628_s1 + $0x178] sm:$0xf0]  ;;  %v5217_v58 = vor.u32 %v7919_v53, %v5216_v52  ;;  %v5192_v59 = vld [vmem:[%s12628_s1 + $0x140] sm:$0xf]  ;;  %v7914_v60 = vld [vmem:[%s12628_s1 + $0x14c] sm:$0xf0] }
   0xf   :  { %v7912_v61 = vld [vmem:[%s12628_s1 + $0x144] sm:$0xf]  ;;  %v5221_v62 = vor.u32 %v7917_v54, %v5218_v55  ;;  %v5194_v63 = vld [vmem:[%s12628_s1 + $0x150] sm:$0xf0]  ;;  %v5200_v0 = vld [vmem:[%s12628_s1 + $0x148] sm:$0xf]  ;;  %v5193_v4 = vor.u32 %v7914_v60, %v5192_v59 }
  0x10   :  { %275 = vmatpush.bf16.msra.mxu0 %v5225_v44  ;;  %v7915_v1 = vld [vmem:[%s12628_s1 + $0x154] sm:$0xf0]  ;;  %v7913_v2 = vld [vmem:[%s12628_s1 + $0x14c] sm:$0xf]  ;;  %v5202_v3 = vld [vmem:[%s12628_s1 + $0x158] sm:$0xf0]  ;;  %v5197_v5 = vor.u32 %v7912_v61, %v5194_v63 }
  0x11   :  { %289 = vmatpush.bf16.msra.mxu1 %v5229_v45  ;;  %303 = vmatpush.bf16.msra.mxu2 %v5233_v46  ;;  %v5201_v6 = vor.u32 %v7915_v1, %v5200_v0  ;;  %v5176_v7 = vld [vmem:[%s12628_s1 + $0x120] sm:$0xf]  ;;  %v7910_v8 = vld [vmem:[%s12628_s1 + $0x12c] sm:$0xf0]  ;;  %v7908_v9 = vld [vmem:[%s12628_s1 + $0x124] sm:$0xf]  ;;  %v5205_v10 = vor.u32 %v7913_v2, %v5202_v3 }
  0x12   :  { %317 = vmatpush.bf16.msra.mxu3 %v5237_v50  ;;  %v5178_v11 = vld [vmem:[%s12628_s1 + $0x130] sm:$0xf0]  ;;  %v5184_v12 = vld [vmem:[%s12628_s1 + $0x128] sm:$0xf]  ;;  %v7911_v13 = vld [vmem:[%s12628_s1 + $0x134] sm:$0xf0]  ;;  %v5177_v16 = vor.u32 %v7910_v8, %v5176_v7 }
  0x13   :  { %v7909_v14 = vld [vmem:[%s12628_s1 + $0x12c] sm:$0xf]  ;;  %v5186_v15 = vld [vmem:[%s12628_s1 + $0x138] sm:$0xf0]  ;;  %v5160_v17 = vld [vmem:[%s12628_s1 + $0x100] sm:$0xf]  ;;  %v5181_v19 = vor.u32 %v7908_v9, %v5178_v11  ;;  %v5185_v20 = vor.u32 %v7911_v13, %v5184_v12 }
  0x14   :  { %276 = vmatpush.bf16.msra.mxu0 %v5209_v56  ;;  %v7906_v18 = vld [vmem:[%s12628_s1 + $0x10c] sm:$0xf0]  ;;  %v7904_v21 = vld [vmem:[%s12628_s1 + $0x104] sm:$0xf]  ;;  %v5162_v22 = vld [vmem:[%s12628_s1 + $0x110] sm:$0xf0]  ;;  %v5189_v24 = vor.u32 %v7909_v14, %v5186_v15 }
  0x15   :  { %290 = vmatpush.bf16.msra.mxu1 %v5213_v57  ;;  %304 = vmatpush.bf16.msra.mxu2 %v5217_v58  ;;  %v5168_v23 = vld [vmem:[%s12628_s1 + $0x108] sm:$0xf]  ;;  %v7907_v25 = vld [vmem:[%s12628_s1 + $0x114] sm:$0xf0]  ;;  %v7905_v26 = vld [vmem:[%s12628_s1 + $0x10c] sm:$0xf]  ;;  %v5161_v31 = vor.u32 %v7906_v18, %v5160_v17  ;;  %v5165_v35 = vor.u32 %v7904_v21, %v5162_v22 }
  0x16   :  { %318 = vmatpush.bf16.msra.mxu3 %v5221_v62  ;;  %v5170_v27 = vld [vmem:[%s12628_s1 + $0x118] sm:$0xf0]  ;;  %v5404_v28 = vld [vmem:[%s12628_s1 + $0xe0] sm:$0xf]  ;;  %v7901_v29 = vld [vmem:[%s12628_s1 + $0xec] sm:$0xf0]  ;;  %v5169_v36 = vor.u32 %v7907_v25, %v5168_v23 }
  0x17   :  { %v7899_v30 = vld [vmem:[%s12628_s1 + $0xe4] sm:$0xf]  ;;  %v5406_v32 = vld [vmem:[%s12628_s1 + $0xf0] sm:$0xf0]  ;;  %v5412_v33 = vld [vmem:[%s12628_s1 + $0xe8] sm:$0xf]  ;;  %v5173_v39 = vor.u32 %v7905_v26, %v5170_v27  ;;  %v5405_v40 = vor.u32 %v7901_v29, %v5404_v28 }
  0x18   :  { %277 = vmatpush.bf16.msra.mxu0 %v5193_v4  ;;  %v7902_v34 = vld [vmem:[%s12628_s1 + $0xf4] sm:$0xf0]  ;;  %v7900_v37 = vld [vmem:[%s12628_s1 + $0xec] sm:$0xf]  ;;  %v5414_v38 = vld [vmem:[%s12628_s1 + $0xf8] sm:$0xf0]  ;;  %v5409_v41 = vor.u32 %v7899_v30, %v5406_v32 }
  0x19   :  { %291 = vmatpush.bf16.msra.mxu1 %v5197_v5  ;;  %305 = vmatpush.bf16.msra.mxu2 %v5201_v6  ;;  %v5413_v42 = vor.u32 %v7902_v34, %v5412_v33  ;;  %v5388_v43 = vld [vmem:[%s12628_s1 + $0xc0] sm:$0xf]  ;;  %v7897_v44 = vld [vmem:[%s12628_s1 + $0xcc] sm:$0xf0]  ;;  %v7895_v45 = vld [vmem:[%s12628_s1 + $0xc4] sm:$0xf]  ;;  %v5417_v46 = vor.u32 %v7900_v37, %v5414_v38 }
  0x1a   :  { %319 = vmatpush.bf16.msra.mxu3 %v5205_v10  ;;  %v5390_v47 = vld [vmem:[%s12628_s1 + $0xd0] sm:$0xf0]  ;;  %v5396_v48 = vld [vmem:[%s12628_s1 + $0xc8] sm:$0xf]  ;;  %v7898_v49 = vld [vmem:[%s12628_s1 + $0xd4] sm:$0xf0]  ;;  %v5389_v53 = vor.u32 %v7897_v44, %v5388_v43 }
  0x1b   :  { %v7896_v50 = vld [vmem:[%s12628_s1 + $0xcc] sm:$0xf]  ;;  %v5398_v51 = vld [vmem:[%s12628_s1 + $0xd8] sm:$0xf0]  ;;  %v5393_v54 = vor.u32 %v7895_v45, %v5390_v47  ;;  %v5397_v55 = vor.u32 %v7898_v49, %v5396_v48  ;;  %v5372_v56 = vld [vmem:[%s12628_s1 + $0xa0] sm:$0xf] }
  0x1c   :  { %278 = vmatpush.bf16.msra.mxu0 %v5177_v16  ;;  %v7903_v52 = vld [vmem:[%s12629_s0 + $0x8] sm:$0xff]  ;;  %v7893_v57 = vld [vmem:[%s12628_s1 + $0xac] sm:$0xf0]  ;;  %v7891_v58 = vld [vmem:[%s12628_s1 + $0xa4] sm:$0xf]  ;;  %v5401_v59 = vor.u32 %v7896_v50, %v5398_v51 }
  0x1d   :  { %292 = vmatpush.bf16.msra.mxu1 %v5181_v19  ;;  %306 = vmatpush.bf16.msra.mxu2 %v5185_v20  ;;  %v5374_v60 = vld [vmem:[%s12628_s1 + $0xb0] sm:$0xf0]  ;;  %v5380_v61 = vld [vmem:[%s12628_s1 + $0xa8] sm:$0xf]  ;;  %v7894_v62 = vld [vmem:[%s12628_s1 + $0xb4] sm:$0xf0]  ;;  %v5373_v1 = vor.u32 %v7893_v57, %v5372_v56 }
  0x1e   :  { %320 = vmatpush.bf16.msra.mxu3 %v5189_v24  ;;  %v7892_v63 = vld [vmem:[%s12628_s1 + $0xac] sm:$0xf]  ;;  %v5382_v0 = vld [vmem:[%s12628_s1 + $0xb8] sm:$0xf0]  ;;  %v5377_v2 = vor.u32 %v7891_v58, %v5374_v60  ;;  %v5381_v3 = vor.u32 %v7894_v62, %v5380_v61  ;;  %v5356_v4 = vld [vmem:[%s12628_s1 + $0x80] sm:$0xf] }
  0x1f   :  { %v7889_v5 = vld [vmem:[%s12628_s1 + $0x8c] sm:$0xf0]  ;;  %v7887_v6 = vld [vmem:[%s12628_s1 + $0x84] sm:$0xf]  ;;  %v5385_v7 = vor.u32 %v7892_v63, %v5382_v0  ;;  %v5358_v8 = vld [vmem:[%s12628_s1 + $0x90] sm:$0xf0] }
  0x20   :  { %279 = vmatpush.bf16.msra.mxu0 %v5161_v31  ;;  %v5364_v9 = vld [vmem:[%s12628_s1 + $0x88] sm:$0xf]  ;;  %v7890_v10 = vld [vmem:[%s12628_s1 + $0x94] sm:$0xf0]  ;;  %v7888_v11 = vld [vmem:[%s12628_s1 + $0x8c] sm:$0xf]  ;;  %v5357_v13 = vor.u32 %v7889_v5, %v5356_v4  ;;  %v5361_v14 = vor.u32 %v7887_v6, %v5358_v8 }
  0x21   :  { %293 = vmatpush.bf16.msra.mxu1 %v5165_v35  ;;  %307 = vmatpush.bf16.msra.mxu2 %v5169_v36  ;;  %v5366_v12 = vld [vmem:[%s12628_s1 + $0x98] sm:$0xf0]  ;;  %v5365_v15 = vor.u32 %v7890_v10, %v5364_v9  ;;  %v5340_v16 = vld [vmem:[%s12628_s1 + $0x60] sm:$0xf]  ;;  %v7885_v17 = vld [vmem:[%s12628_s1 + $0x6c] sm:$0xf0] }
  0x22   :  { %321 = vmatpush.bf16.msra.mxu3 %v5173_v39  ;;  %v7883_v18 = vld [vmem:[%s12628_s1 + $0x64] sm:$0xf]  ;;  %v5369_v19 = vor.u32 %v7888_v11, %v5366_v12  ;;  %v5342_v20 = vld [vmem:[%s12628_s1 + $0x70] sm:$0xf0]  ;;  %v5348_v21 = vld [vmem:[%s12628_s1 + $0x68] sm:$0xf]  ;;  %v5341_v25 = vor.u32 %v7885_v17, %v5340_v16 }
  0x23   :  { %280 = vmatmul.bf16.vlgmr.msra.gmra.mxu0 %v7903_v52  ;;  %v7886_v22 = vld [vmem:[%s12628_s1 + $0x74] sm:$0xf0]  ;;  %v7884_v23 = vld [vmem:[%s12628_s1 + $0x6c] sm:$0xf]  ;;  %v5350_v24 = vld [vmem:[%s12628_s1 + $0x78] sm:$0xf0]  ;;  %v5345_v26 = vor.u32 %v7883_v18, %v5342_v20 }
  0x24   :  { %494 = vmatpush.bf16.msrb.mxu0 %v5405_v40  ;;  %294 = vmatmul.bf16.vlgmr.msra.gmra.mxu1 %v7903_v52  ;;  %v5349_v27 = vor.u32 %v7886_v22, %v5348_v21  ;;  %v5324_v28 = vld [vmem:[%s12628_s1 + $0x40] sm:$0xf]  ;;  %v7881_v29 = vld [vmem:[%s12628_s1 + $0x4c] sm:$0xf0]  ;;  %v7879_v30 = vld [vmem:[%s12628_s1 + $0x44] sm:$0xf]  ;;  %v5353_v31 = vor.u32 %v7884_v23, %v5350_v24 }
  0x25   :  { %508 = vmatpush.bf16.msrb.mxu1 %v5409_v41  ;;  %522 = vmatpush.bf16.msrb.mxu2 %v5413_v42  ;;  %v5326_v32 = vld [vmem:[%s12628_s1 + $0x50] sm:$0xf0]  ;;  %v5332_v33 = vld [vmem:[%s12628_s1 + $0x48] sm:$0xf]  ;;  %v7882_v34 = vld [vmem:[%s12628_s1 + $0x54] sm:$0xf0]  ;;  %v5325_v37 = vor.u32 %v7881_v29, %v5324_v28 }
  0x26   :  { %536 = vmatpush.bf16.msrb.mxu3 %v5417_v46  ;;  %308 = vmatmul.bf16.vlgmr.msra.gmra.mxu2 %v7903_v52  ;;  %v7880_v35 = vld [vmem:[%s12628_s1 + $0x4c] sm:$0xf]  ;;  %v5334_v36 = vld [vmem:[%s12628_s1 + $0x58] sm:$0xf0]  ;;  %v5329_v38 = vor.u32 %v7879_v30, %v5326_v32  ;;  %v5333_v39 = vor.u32 %v7882_v34, %v5332_v33  ;;  %v5308_v40 = vld [vmem:[%s12628_s1 + $0x20] sm:$0xf] }
  0x27   :  { %322 = vmatmul.bf16.vlgmr.msra.gmra.mxu3 %v7903_v52  ;;  %v7877_v41 = vld [vmem:[%s12628_s1 + $0x2c] sm:$0xf0]  ;;  %v7875_v42 = vld [vmem:[%s12628_s1 + $0x24] sm:$0xf]  ;;  %v5337_v43 = vor.u32 %v7880_v35, %v5334_v36  ;;  %v5310_v44 = vld [vmem:[%s12628_s1 + $0x30] sm:$0xf0] }
  0x28   :  { %495 = vmatpush.bf16.msrb.mxu0 %v5389_v53  ;;  %v5316_v45 = vld [vmem:[%s12628_s1 + $0x28] sm:$0xf]  ;;  %v7878_v46 = vld [vmem:[%s12628_s1 + $0x34] sm:$0xf0]  ;;  %v7876_v47 = vld [vmem:[%s12628_s1 + $0x2c] sm:$0xf]  ;;  %v5309_v49 = vor.u32 %v7877_v41, %v5308_v40  ;;  %v5313_v52 = vor.u32 %v7875_v42, %v5310_v44 }
  0x29   :  { %509 = vmatpush.bf16.msrb.mxu1 %v5393_v54  ;;  %523 = vmatpush.bf16.msrb.mxu2 %v5397_v55  ;;  %v5318_v48 = vld [vmem:[%s12628_s1 + $0x38] sm:$0xf0]  ;;  %v5292_v50 = vld [vmem:[%s12628_s1] sm:$0xf]  ;;  %v7873_v51 = vld [vmem:[%s12628_s1 + $0xc] sm:$0xf0]  ;;  %v5317_v53 = vor.u32 %v7878_v46, %v5316_v45 }
  0x2a   :  { %537 = vmatpush.bf16.msrb.mxu3 %v5401_v59  ;;  %v7871_v54 = vld [vmem:[%s12628_s1 + $0x4] sm:$0xf]  ;;  %v5294_v55 = vld [vmem:[%s12628_s1 + $0x10] sm:$0xf0]  ;;  %v5300_v56 = vld [vmem:[%s12628_s1 + $0x8] sm:$0xf]  ;;  %v5321_v57 = vor.u32 %v7876_v47, %v5318_v48  ;;  %v5293_v0 = vor.u32 %v7873_v51, %v5292_v50 }
  0x2b   :  { %v7874_v58 = vld [vmem:[%s12628_s1 + $0x14] sm:$0xf0]  ;;  %v7872_v59 = vld [vmem:[%s12628_s1 + $0xc] sm:$0xf]  ;;  %v5302_v60 = vld [vmem:[%s12628_s1 + $0x18] sm:$0xf0]  ;;  %v5297_v4 = vor.u32 %v7871_v54, %v5294_v55 }
  0x2c   :  { %496 = vmatpush.bf16.msrb.mxu0 %v5373_v1  ;;  %v5570_v61 = vld [vmem:[%s12628_s1 + $0x2e0] sm:$0xf]  ;;  %v7967_v62 = vld [vmem:[%s12628_s1 + $0x2ec] sm:$0xf0]  ;;  %v7965_v63 = vld [vmem:[%s12628_s1 + $0x2e4] sm:$0xf]  ;;  %v5301_v5 = vor.u32 %v7874_v58, %v5300_v56  ;;  %v5305_v8 = vor.u32 %v7872_v59, %v5302_v60 }
  0x2d   :  { %510 = vmatpush.bf16.msrb.mxu1 %v5377_v2  ;;  %524 = vmatpush.bf16.msrb.mxu2 %v5381_v3  ;;  %v5572_v1 = vld [vmem:[%s12628_s1 + $0x2f0] sm:$0xf0]  ;;  %v5578_v2 = vld [vmem:[%s12628_s1 + $0x2e8] sm:$0xf]  ;;  %v7968_v3 = vld [vmem:[%s12628_s1 + $0x2f4] sm:$0xf0]  ;;  %v5571_v9 = vor.u32 %v7967_v62, %v5570_v61 }
  0x2e   :  { %538 = vmatpush.bf16.msrb.mxu3 %v5385_v7  ;;  %v7966_v6 = vld [vmem:[%s12628_s1 + $0x2ec] sm:$0xf]  ;;  %v5580_v7 = vld [vmem:[%s12628_s1 + $0x2f8] sm:$0xf0]  ;;  %v7870_v10 = vld [vmem:[%s12629_s0] sm:$0xff]  ;;  %v5575_v11 = vor.u32 %v7965_v63, %v5572_v1  ;;  %v5579_v12 = vor.u32 %v7968_v3, %v5578_v2 }
  0x2f   :  { %v5583_v16 = vor.u32 %v7966_v6, %v5580_v7  ;;  %v5556_v17 = vld [vmem:[%s12628_s1 + $0x2d0] sm:$0xf0]  ;;  %v5562_v18 = vld [vmem:[%s12628_s1 + $0x2c8] sm:$0xf]  ;;  %v7962_v20 = vld [vmem:[%s12628_s1 + $0x2cc] sm:$0xf] }
  0x30   :  { %497 = vmatpush.bf16.msrb.mxu0 %v5357_v13  ;;  %v5554_v13 = vld [vmem:[%s12628_s1 + $0x2c0] sm:$0xf]  ;;  %v5564_v21 = vld [vmem:[%s12628_s1 + $0x2d8] sm:$0xf0]  ;;  %v5540_v29 = vld [vmem:[%s12628_s1 + $0x2b0] sm:$0xf0] }
  0x31   :  { %511 = vmatpush.bf16.msrb.mxu1 %v5361_v14  ;;  %525 = vmatpush.bf16.msrb.mxu2 %v5365_v15  ;;  %v7963_v14 = vld [vmem:[%s12628_s1 + $0x2cc] sm:$0xf0]  ;;  %v7961_v15 = vld [vmem:[%s12628_s1 + $0x2c4] sm:$0xf]  ;;  %v5567_v28 = vor.u32 %v7962_v20, %v5564_v21  ;;  %v5546_v30 = vld [vmem:[%s12628_s1 + $0x2a8] sm:$0xf] }
  0x32   :  { %539 = vmatpush.bf16.msrb.mxu3 %v5369_v19  ;;  %v7964_v19 = vld [vmem:[%s12628_s1 + $0x2d4] sm:$0xf0]  ;;  %v5555_v22 = vor.u32 %v7963_v14, %v5554_v13  ;;  %v5559_v23 = vor.u32 %v7961_v15, %v5556_v17  ;;  %v7958_v32 = vld [vmem:[%s12628_s1 + $0x2ac] sm:$0xf]  ;;  %v5548_v33 = vld [vmem:[%s12628_s1 + $0x2b8] sm:$0xf0] }
  0x33   :  { %v5563_v24 = vor.u32 %v7964_v19, %v5562_v18  ;;  %v5551_v40 = vor.u32 %v7958_v32, %v5548_v33  ;;  %v5524_v41 = vld [vmem:[%s12628_s1 + $0x290] sm:$0xf0]  ;;  %v5530_v42 = vld [vmem:[%s12628_s1 + $0x288] sm:$0xf]  ;;  %v7954_v44 = vld [vmem:[%s12628_s1 + $0x28c] sm:$0xf] }
  0x34   :  { %498 = vmatpush.bf16.msrb.mxu0 %v5341_v25  ;;  %v5538_v25 = vld [vmem:[%s12628_s1 + $0x2a0] sm:$0xf]  ;;  %v5532_v45 = vld [vmem:[%s12628_s1 + $0x298] sm:$0xf0]  ;;  %v7951_v50 = vld [vmem:[%s12628_s1 + $0x26c] sm:$0xf0] }
  0x35   :  { %512 = vmatpush.bf16.msrb.mxu1 %v5345_v26  ;;  %526 = vmatpush.bf16.msrb.mxu2 %v5349_v27  ;;  %v7959_v26 = vld [vmem:[%s12628_s1 + $0x2ac] sm:$0xf0]  ;;  %v7957_v27 = vld [vmem:[%s12628_s1 + $0x2a4] sm:$0xf]  ;;  %v5514_v54 = vld [vmem:[%s12628_s1 + $0x268] sm:$0xf] }
  0x36   :  { %540 = vmatpush.bf16.msrb.mxu3 %v5353_v31  ;;  %v7960_v31 = vld [vmem:[%s12628_s1 + $0x2b4] sm:$0xf0]  ;;  %v5539_v34 = vor.u32 %v7959_v26, %v5538_v25  ;;  %v5543_v35 = vor.u32 %v7957_v27, %v5540_v29  ;;  %v7949_v51 = vld [vmem:[%s12628_s1 + $0x264] sm:$0xf]  ;;  %v7950_v56 = vld [vmem:[%s12628_s1 + $0x26c] sm:$0xf] }
  0x37   :  { %v5547_v36 = vor.u32 %v7960_v31, %v5546_v30  ;;  %v7952_v55 = vld [vmem:[%s12628_s1 + $0x274] sm:$0xf0]  ;;  %v5490_v61 = vld [vmem:[%s12628_s1 + $0x240] sm:$0xf]  ;;  %v7947_v62 = vld [vmem:[%s12628_s1 + $0x24c] sm:$0xf0] }
  0x38   :  { %499 = vmatpush.bf16.msrb.mxu0 %v5325_v37  ;;  %v5522_v37 = vld [vmem:[%s12628_s1 + $0x280] sm:$0xf]  ;;  %v5515_v60 = vor.u32 %v7952_v55, %v5514_v54  ;;  %v7945_v63 = vld [vmem:[%s12628_s1 + $0x244] sm:$0xf]  ;;  %v5492_v1 = vld [vmem:[%s12628_s1 + $0x250] sm:$0xf0]  ;;  %v5491_v6 = vor.u32 %v7947_v62, %v5490_v61 }
  0x39   :  { %513 = vmatpush.bf16.msrb.mxu1 %v5329_v38  ;;  %527 = vmatpush.bf16.msrb.mxu2 %v5333_v39  ;;  %v7955_v38 = vld [vmem:[%s12628_s1 + $0x28c] sm:$0xf0]  ;;  %v7953_v39 = vld [vmem:[%s12628_s1 + $0x284] sm:$0xf]  ;;  %v5498_v2 = vld [vmem:[%s12628_s1 + $0x248] sm:$0xf]  ;;  %v5495_v7 = vor.u32 %v7945_v63, %v5492_v1 }
  0x3a   :  { %541 = vmatpush.bf16.msrb.mxu3 %v5337_v43  ;;  %v7956_v43 = vld [vmem:[%s12628_s1 + $0x294] sm:$0xf0]  ;;  %v5523_v46 = vor.u32 %v7955_v38, %v5522_v37  ;;  %v5527_v47 = vor.u32 %v7953_v39, %v5524_v41  ;;  %v5476_v13 = vld [vmem:[%s12628_s1 + $0x230] sm:$0xf0]  ;;  %v5482_v14 = vld [vmem:[%s12628_s1 + $0x228] sm:$0xf] }
  0x3b   :  { %v5531_v48 = vor.u32 %v7956_v43, %v5530_v42  ;;  %v7948_v3 = vld [vmem:[%s12628_s1 + $0x254] sm:$0xf0]  ;;  %v5484_v17 = vld [vmem:[%s12628_s1 + $0x238] sm:$0xf0]  ;;  %v5458_v19 = vld [vmem:[%s12628_s1 + $0x200] sm:$0xf] }
  0x3c   :  { %500 = vmatpush.bf16.msrb.mxu0 %v5309_v49  ;;  %v5506_v49 = vld [vmem:[%s12628_s1 + $0x260] sm:$0xf]  ;;  %v7944_v15 = vld [vmem:[%s12628_s1 + $0x234] sm:$0xf0]  ;;  %v7939_v20 = vld [vmem:[%s12628_s1 + $0x20c] sm:$0xf0] }
  0x3d   :  { %514 = vmatpush.bf16.msrb.mxu1 %v5313_v52  ;;  %528 = vmatpush.bf16.msrb.mxu2 %v5317_v53  ;;  %v5535_v52 = vor.u32 %v7954_v44, %v5532_v45  ;;  %v5508_v53 = vld [vmem:[%s12628_s1 + $0x270] sm:$0xf0]  ;;  %v5507_v58 = vor.u32 %v7951_v50, %v5506_v49  ;;  %v5466_v25 = vld [vmem:[%s12628_s1 + $0x208] sm:$0xf]  ;;  %v7940_v27 = vld [vmem:[%s12628_s1 + $0x214] sm:$0xf0]  ;;  %v5459_v33 = vor.u32 %v7939_v20, %v5458_v19 }
  0x3e   :  { %542 = vmatpush.bf16.msrb.mxu3 %v5321_v57  ;;  %v5516_v57 = vld [vmem:[%s12628_s1 + $0x278] sm:$0xf0]  ;;  %v5511_v59 = vor.u32 %v7949_v51, %v5508_v53  ;;  %v5736_v30 = vld [vmem:[%s12628_s1 + $0x3e0] sm:$0xf]  ;;  %v8000_v31 = vld [vmem:[%s12628_s1 + $0x3ec] sm:$0xf0]  ;;  %v5467_v38 = vor.u32 %v7940_v27, %v5466_v25 }
  0x3f   :  { %v5468_v29 = vld [vmem:[%s12628_s1 + $0x218] sm:$0xf0]  ;;  %v7998_v32 = vld [vmem:[%s12628_s1 + $0x3e4] sm:$0xf]  ;;  %v7999_v39 = vld [vmem:[%s12628_s1 + $0x3ec] sm:$0xf]  ;;  %v5737_v42 = vor.u32 %v8000_v31, %v5736_v30 }
  0x40   :  { %501 = vmatpush.bf16.msrb.mxu0 %v5293_v0  ;;  %v5519_v0 = vor.u32 %v7950_v56, %v5516_v57  ;;  %v7936_v43 = vld [vmem:[%s12629_s0 + $0x10] sm:$0xff]  ;;  %v5728_v51 = vld [vmem:[%s12628_s1 + $0x3c8] sm:$0xf]  ;;  %v7995_v53 = vld [vmem:[%s12628_s1 + $0x3cc] sm:$0xf] }
  0x41   :  { %515 = vmatpush.bf16.msrb.mxu1 %v5297_v4  ;;  %529 = vmatpush.bf16.msrb.mxu2 %v5301_v5  ;;  %v7946_v4 = vld [vmem:[%s12628_s1 + $0x24c] sm:$0xf]  ;;  %v5500_v5 = vld [vmem:[%s12628_s1 + $0x258] sm:$0xf0]  ;;  %v5722_v50 = vld [vmem:[%s12628_s1 + $0x3d0] sm:$0xf0] }
  0x42   :  { %543 = vmatpush.bf16.msrb.mxu3 %v5305_v8  ;;  %v5499_v8 = vor.u32 %v7948_v3, %v5498_v2  ;;  %v5730_v54 = vld [vmem:[%s12628_s1 + $0x3d8] sm:$0xf0]  ;;  %v5706_v62 = vld [vmem:[%s12628_s1 + $0x3b0] sm:$0xf0]  ;;  %v5712_v63 = vld [vmem:[%s12628_s1 + $0x3a8] sm:$0xf] }
  0x43   :  { %502 = vmatmul.bf16.vlgmr.msrb.gmra.mxu0 %v7870_v10  ;;  %v5733_v61 = vor.u32 %v7995_v53, %v5730_v54  ;;  %v7991_v1 = vld [vmem:[%s12628_s1 + $0x3ac] sm:$0xf]  ;;  %v5714_v2 = vld [vmem:[%s12628_s1 + $0x3b8] sm:$0xf0]  ;;  %v7984_v19 = vld [vmem:[%s12628_s1 + $0x36c] sm:$0xf0] }
  0x44   :  { %752 = vmatpush.bf16.msra.mxu0 %v5571_v9  ;;  %516 = vmatmul.bf16.vlgmr.msrb.gmra.mxu1 %v7870_v10  ;;  %v5474_v9 = vld [vmem:[%s12628_s1 + $0x220] sm:$0xf]  ;;  %v7982_v20 = vld [vmem:[%s12628_s1 + $0x364] sm:$0xf]  ;;  %v7983_v25 = vld [vmem:[%s12628_s1 + $0x36c] sm:$0xf] }
  0x45   :  { %766 = vmatpush.bf16.msra.mxu1 %v5575_v11  ;;  %780 = vmatpush.bf16.msra.mxu2 %v5579_v12  ;;  %v7941_v11 = vld [vmem:[%s12628_s1 + $0x224] sm:$0xf]  ;;  %v5503_v12 = vor.u32 %v7946_v4, %v5500_v5  ;;  %v5656_v30 = vld [vmem:[%s12628_s1 + $0x340] sm:$0xf]  ;;  %v7980_v31 = vld [vmem:[%s12628_s1 + $0x34c] sm:$0xf0] }
  0x46   :  { %794 = vmatpush.bf16.msra.mxu3 %v5583_v16  ;;  %530 = vmatmul.bf16.vlgmr.msrb.gmra.mxu2 %v7870_v10  ;;  %v7942_v16 = vld [vmem:[%s12628_s1 + $0x22c] sm:$0xf]  ;;  %v5479_v21 = vor.u32 %v7941_v11, %v5476_v13  ;;  %v5696_v11 = vld [vmem:[%s12628_s1 + $0x388] sm:$0xf]  ;;  %v7972_v53 = vld [vmem:[%s12628_s1 + $0x30c] sm:$0xf0] }
  0x47   :  { %544 = vmatmul.bf16.vlgmr.msrb.gmra.mxu3 %v7870_v10  ;;  %v7943_v10 = vld [vmem:[%s12628_s1 + $0x22c] sm:$0xf0]  ;;  %v5487_v26 = vor.u32 %v7942_v16, %v5484_v17  ;;  %v7987_v13 = vld [vmem:[%s12628_s1 + $0x38c] sm:$0xf] }
  0x48   :  { %753 = vmatpush.bf16.msra.mxu0 %v5555_v22  ;;  %v5475_v18 = vor.u32 %v7943_v10, %v5474_v9  ;;  %v5483_v22 = vor.u32 %v7944_v15, %v5482_v14  ;;  %v5717_v9 = vor.u32 %v7991_v1, %v5714_v2  ;;  %v5690_v10 = vld [vmem:[%s12628_s1 + $0x390] sm:$0xf0]  ;;  %v5698_v14 = vld [vmem:[%s12628_s1 + $0x398] sm:$0xf0]  ;;  %v8031_v1 = vld [vmem:[%s12628_s1 + $0x4e4] sm:$0xf] }
  0x49   :  { %767 = vmatpush.bf16.msra.mxu1 %v5559_v23  ;;  %781 = vmatpush.bf16.msra.mxu2 %v5563_v24  ;;  %v7937_v23 = vld [vmem:[%s12628_s1 + $0x204] sm:$0xf]  ;;  %v5460_v24 = vld [vmem:[%s12628_s1 + $0x210] sm:$0xf0] }
  0x4a   :  { %795 = vmatpush.bf16.msra.mxu3 %v5567_v28  ;;  %v7938_v28 = vld [vmem:[%s12628_s1 + $0x20c] sm:$0xf]  ;;  %v5463_v37 = vor.u32 %v7937_v23, %v5460_v24  ;;  %v5680_v23 = vld [vmem:[%s12628_s1 + $0x368] sm:$0xf]  ;;  %v7985_v24 = vld [vmem:[%s12628_s1 + $0x374] sm:$0xf0] }
  0x4b   :  { %v5471_v41 = vor.u32 %v7938_v28, %v5468_v29  ;;  %v5681_v29 = vor.u32 %v7985_v24, %v5680_v23  ;;  %v5896_v23 = vld [vmem:[%s12628_s1 + $0x4d8] sm:$0xf0] }
  0x4c   :  { %754 = vmatpush.bf16.msra.mxu0 %v5539_v34  ;;  %v5738_v34 = vld [vmem:[%s12628_s1 + $0x3f0] sm:$0xf0] }
  0x4d   :  { %768 = vmatpush.bf16.msra.mxu1 %v5543_v35  ;;  %782 = vmatpush.bf16.msra.mxu2 %v5547_v36  ;;  %v5744_v35 = vld [vmem:[%s12628_s1 + $0x3e8] sm:$0xf]  ;;  %v8001_v36 = vld [vmem:[%s12628_s1 + $0x3f4] sm:$0xf0]  ;;  %v5741_v44 = vor.u32 %v7998_v32, %v5738_v34  ;;  %v7978_v32 = vld [vmem:[%s12628_s1 + $0x344] sm:$0xf] }
  0x4e   :  { %796 = vmatpush.bf16.msra.mxu3 %v5551_v40  ;;  %v5746_v40 = vld [vmem:[%s12628_s1 + $0x3f8] sm:$0xf0]  ;;  %v5745_v45 = vor.u32 %v8001_v36, %v5744_v35  ;;  %v5658_v34 = vld [vmem:[%s12628_s1 + $0x350] sm:$0xf0]  ;;  %v5664_v35 = vld [vmem:[%s12628_s1 + $0x348] sm:$0xf] }
  0x4f   :  { %v5749_v49 = vor.u32 %v7999_v39, %v5746_v40  ;;  %v7981_v36 = vld [vmem:[%s12628_s1 + $0x354] sm:$0xf0]  ;;  %v5657_v39 = vor.u32 %v7980_v31, %v5656_v30  ;;  %v5661_v40 = vor.u32 %v7978_v32, %v5658_v34  ;;  %v5872_v31 = vld [vmem:[%s12628_s1 + $0x4b0] sm:$0xf0]  ;;  %v5878_v32 = vld [vmem:[%s12628_s1 + $0x4a8] sm:$0xf] }
  0x50   :  { %755 = vmatpush.bf16.msra.mxu0 %v5523_v46  ;;  %v5720_v46 = vld [vmem:[%s12628_s1 + $0x3c0] sm:$0xf]  ;;  %v8024_v34 = vld [vmem:[%s12628_s1 + $0x4ac] sm:$0xf] }
  0x51   :  { %769 = vmatpush.bf16.msra.mxu1 %v5527_v47  ;;  %783 = vmatpush.bf16.msra.mxu2 %v5531_v48  ;;  %v7996_v47 = vld [vmem:[%s12628_s1 + $0x3cc] sm:$0xf0]  ;;  %v7994_v48 = vld [vmem:[%s12628_s1 + $0x3c4] sm:$0xf] }
  0x52   :  { %797 = vmatpush.bf16.msra.mxu3 %v5535_v52  ;;  %v7997_v52 = vld [vmem:[%s12628_s1 + $0x3d4] sm:$0xf0]  ;;  %v5721_v55 = vor.u32 %v7996_v47, %v5720_v46  ;;  %v5725_v56 = vor.u32 %v7994_v48, %v5722_v50  ;;  %v5642_v46 = vld [vmem:[%s12628_s1 + $0x330] sm:$0xf0]  ;;  %v5648_v47 = vld [vmem:[%s12628_s1 + $0x328] sm:$0xf] }
  0x53   :  { %v5729_v57 = vor.u32 %v7997_v52, %v5728_v51  ;;  %v7977_v48 = vld [vmem:[%s12628_s1 + $0x334] sm:$0xf0]  ;;  %v5650_v50 = vld [vmem:[%s12628_s1 + $0x338] sm:$0xf0]  ;;  %v5624_v52 = vld [vmem:[%s12628_s1 + $0x300] sm:$0xf] }
  0x54   :  { %756 = vmatpush.bf16.msra.mxu0 %v5507_v58  ;;  %v5704_v58 = vld [vmem:[%s12628_s1 + $0x3a0] sm:$0xf]  ;;  %v5625_v2 = vor.u32 %v7972_v53, %v5624_v52  ;;  %v8017_v52 = vld [vmem:[%s12628_s1 + $0x46c] sm:$0xf0]  ;;  %v8015_v53 = vld [vmem:[%s12628_s1 + $0x464] sm:$0xf] }
  0x55   :  { %770 = vmatpush.bf16.msra.mxu1 %v5511_v59  ;;  %784 = vmatpush.bf16.msra.mxu2 %v5515_v60  ;;  %v7992_v59 = vld [vmem:[%s12628_s1 + $0x3ac] sm:$0xf0]  ;;  %v7990_v60 = vld [vmem:[%s12628_s1 + $0x3a4] sm:$0xf] }
  0x56   :  { %798 = vmatpush.bf16.msra.mxu3 %v5519_v0  ;;  %v7993_v0 = vld [vmem:[%s12628_s1 + $0x3b4] sm:$0xf0]  ;;  %v5705_v3 = vor.u32 %v7992_v59, %v5704_v58  ;;  %v5709_v4 = vor.u32 %v7990_v60, %v5706_v62  ;;  %v5632_v58 = vld [vmem:[%s12628_s1 + $0x308] sm:$0xf]  ;;  %v5634_v62 = vld [vmem:[%s12628_s1 + $0x318] sm:$0xf0] }
  0x57   :  { %v5713_v5 = vor.u32 %v7993_v0, %v5712_v63  ;;  %v7973_v60 = vld [vmem:[%s12628_s1 + $0x314] sm:$0xf0]  ;;  %v5902_v63 = vld [vmem:[%s12628_s1 + $0x4e0] sm:$0xf]  ;;  %v8033_v0 = vld [vmem:[%s12628_s1 + $0x4ec] sm:$0xf0] }
  0x58   :  { %757 = vmatpush.bf16.msra.mxu0 %v5491_v6  ;;  %v5688_v6 = vld [vmem:[%s12628_s1 + $0x380] sm:$0xf] }
  0x59   :  { %771 = vmatpush.bf16.msra.mxu1 %v5495_v7  ;;  %785 = vmatpush.bf16.msra.mxu2 %v5499_v8  ;;  %v7988_v7 = vld [vmem:[%s12628_s1 + $0x38c] sm:$0xf0]  ;;  %v7986_v8 = vld [vmem:[%s12628_s1 + $0x384] sm:$0xf] }
  0x5a   :  { %799 = vmatpush.bf16.msra.mxu3 %v5503_v12  ;;  %v7989_v12 = vld [vmem:[%s12628_s1 + $0x394] sm:$0xf0]  ;;  %v5689_v15 = vor.u32 %v7988_v7, %v5688_v6  ;;  %v5693_v16 = vor.u32 %v7986_v8, %v5690_v10  ;;  %v5633_v7 = vor.u32 %v7973_v60, %v5632_v58  ;;  %v8032_v8 = vld [vmem:[%s12628_s1 + $0x4ec] sm:$0xf] }
  0x5b   :  { %v5697_v17 = vor.u32 %v7989_v12, %v5696_v11  ;;  %v5903_v11 = vor.u32 %v8033_v0, %v5902_v63  ;;  %v7969_v12 = vld [vmem:[%s12629_s0 + $0x18] sm:$0xff]  ;;  %v8016_v58 = vld [vmem:[%s12628_s1 + $0x46c] sm:$0xf]  ;;  %v5822_v63 = vld [vmem:[%s12628_s1 + $0x440] sm:$0xf] }
  0x5c   :  { %758 = vmatpush.bf16.msra.mxu0 %v5475_v18  ;;  %v5672_v18 = vld [vmem:[%s12628_s1 + $0x360] sm:$0xf]  ;;  %v8013_v0 = vld [vmem:[%s12628_s1 + $0x44c] sm:$0xf0] }
  0x5d   :  { %772 = vmatpush.bf16.msra.mxu1 %v5479_v21  ;;  %786 = vmatpush.bf16.msra.mxu2 %v5483_v22  ;;  %v5701_v21 = vor.u32 %v7987_v13, %v5698_v14  ;;  %v5674_v22 = vld [vmem:[%s12628_s1 + $0x370] sm:$0xf0]  ;;  %v5673_v27 = vor.u32 %v7984_v19, %v5672_v18 }
  0x5e   :  { %800 = vmatpush.bf16.msra.mxu3 %v5487_v26  ;;  %v5682_v26 = vld [vmem:[%s12628_s1 + $0x378] sm:$0xf0]  ;;  %v5677_v28 = vor.u32 %v7982_v20, %v5674_v22  ;;  %v5888_v19 = vld [vmem:[%s12628_s1 + $0x4d0] sm:$0xf0]  ;;  %v5894_v20 = vld [vmem:[%s12628_s1 + $0x4c8] sm:$0xf] }
  0x5f   :  { %v8028_v22 = vld [vmem:[%s12628_s1 + $0x4cc] sm:$0xf] }
  0x60   :  { %759 = vmatpush.bf16.msra.mxu0 %v5459_v33  ;;  %v5685_v33 = vor.u32 %v7983_v25, %v5682_v26  ;;  %v5899_v30 = vor.u32 %v8028_v22, %v5896_v23  ;;  %v8005_v22 = vld [vmem:[%s12628_s1 + $0x40c] sm:$0xf0] }
  0x61   :  { %773 = vmatpush.bf16.msra.mxu1 %v5463_v37  ;;  %787 = vmatpush.bf16.msra.mxu2 %v5467_v38  ;;  %v7979_v37 = vld [vmem:[%s12628_s1 + $0x34c] sm:$0xf]  ;;  %v5666_v38 = vld [vmem:[%s12628_s1 + $0x358] sm:$0xf0] }
  0x62   :  { %801 = vmatpush.bf16.msra.mxu3 %v5471_v41  ;;  %v5665_v41 = vor.u32 %v7981_v36, %v5664_v35  ;;  %v5880_v35 = vld [vmem:[%s12628_s1 + $0x4b8] sm:$0xf0] }
  0x63   :  { %760 = vmatmul.bf16.vlgmr.msra.gmra.mxu0 %v7936_v43 }
  0x64   :  { %1018 = vmatpush.bf16.msrb.mxu0 %v5737_v42  ;;  %774 = vmatmul.bf16.vlgmr.msra.gmra.mxu1 %v7936_v43  ;;  %v5640_v42 = vld [vmem:[%s12628_s1 + $0x320] sm:$0xf] }
  0x65   :  { %1032 = vmatpush.bf16.msrb.mxu1 %v5741_v44  ;;  %1046 = vmatpush.bf16.msrb.mxu2 %v5745_v45  ;;  %v7974_v44 = vld [vmem:[%s12628_s1 + $0x324] sm:$0xf]  ;;  %v5669_v45 = vor.u32 %v7979_v37, %v5666_v38 }
  0x66   :  { %1060 = vmatpush.bf16.msrb.mxu3 %v5749_v49  ;;  %788 = vmatmul.bf16.vlgmr.msra.gmra.mxu2 %v7936_v43  ;;  %v7975_v49 = vld [vmem:[%s12628_s1 + $0x32c] sm:$0xf]  ;;  %v5645_v54 = vor.u32 %v7974_v44, %v5642_v46  ;;  %v5862_v44 = vld [vmem:[%s12628_s1 + $0x488] sm:$0xf] }
  0x67   :  { %802 = vmatmul.bf16.vlgmr.msra.gmra.mxu3 %v7936_v43  ;;  %v7976_v43 = vld [vmem:[%s12628_s1 + $0x32c] sm:$0xf0]  ;;  %v5653_v59 = vor.u32 %v7975_v49, %v5650_v50  ;;  %v8020_v46 = vld [vmem:[%s12628_s1 + $0x48c] sm:$0xf] }
  0x68   :  { %1019 = vmatpush.bf16.msrb.mxu0 %v5721_v55  ;;  %v5641_v51 = vor.u32 %v7976_v43, %v5640_v42  ;;  %v5649_v55 = vor.u32 %v7977_v48, %v5648_v47  ;;  %v5883_v42 = vor.u32 %v8024_v34, %v5880_v35  ;;  %v5856_v43 = vld [vmem:[%s12628_s1 + $0x490] sm:$0xf0]  ;;  %v5864_v47 = vld [vmem:[%s12628_s1 + $0x498] sm:$0xf0]  ;;  %v8064_v34 = vld [vmem:[%s12628_s1 + $0x5e4] sm:$0xf] }
  0x69   :  { %1033 = vmatpush.bf16.msrb.mxu1 %v5725_v56  ;;  %1047 = vmatpush.bf16.msrb.mxu2 %v5729_v57  ;;  %v7970_v56 = vld [vmem:[%s12628_s1 + $0x304] sm:$0xf]  ;;  %v5626_v57 = vld [vmem:[%s12628_s1 + $0x310] sm:$0xf0] }
  0x6a   :  { %1061 = vmatpush.bf16.msrb.mxu3 %v5733_v61  ;;  %v7971_v61 = vld [vmem:[%s12628_s1 + $0x30c] sm:$0xf]  ;;  %v5629_v6 = vor.u32 %v7970_v56, %v5626_v57  ;;  %v5846_v56 = vld [vmem:[%s12628_s1 + $0x468] sm:$0xf]  ;;  %v8018_v57 = vld [vmem:[%s12628_s1 + $0x474] sm:$0xf0] }
  0x6b   :  { %v5637_v10 = vor.u32 %v7971_v61, %v5634_v62  ;;  %v5847_v62 = vor.u32 %v8018_v57, %v5846_v56  ;;  %v6062_v56 = vld [vmem:[%s12628_s1 + $0x5d8] sm:$0xf0] }
  0x6c   :  { %1020 = vmatpush.bf16.msrb.mxu0 %v5705_v3  ;;  %v5904_v3 = vld [vmem:[%s12628_s1 + $0x4f0] sm:$0xf0] }
  0x6d   :  { %1034 = vmatpush.bf16.msrb.mxu1 %v5709_v4  ;;  %1048 = vmatpush.bf16.msrb.mxu2 %v5713_v5  ;;  %v5910_v4 = vld [vmem:[%s12628_s1 + $0x4e8] sm:$0xf]  ;;  %v8034_v5 = vld [vmem:[%s12628_s1 + $0x4f4] sm:$0xf0]  ;;  %v5907_v13 = vor.u32 %v8031_v1, %v5904_v3  ;;  %v8011_v1 = vld [vmem:[%s12628_s1 + $0x444] sm:$0xf] }
  0x6e   :  { %1062 = vmatpush.bf16.msrb.mxu3 %v5717_v9  ;;  %v5912_v9 = vld [vmem:[%s12628_s1 + $0x4f8] sm:$0xf0]  ;;  %v5911_v14 = vor.u32 %v8034_v5, %v5910_v4  ;;  %v5824_v3 = vld [vmem:[%s12628_s1 + $0x450] sm:$0xf0]  ;;  %v5830_v4 = vld [vmem:[%s12628_s1 + $0x448] sm:$0xf] }
  0x6f   :  { %v5915_v18 = vor.u32 %v8032_v8, %v5912_v9  ;;  %v8014_v5 = vld [vmem:[%s12628_s1 + $0x454] sm:$0xf0]  ;;  %v5823_v8 = vor.u32 %v8013_v0, %v5822_v63  ;;  %v5827_v9 = vor.u32 %v8011_v1, %v5824_v3  ;;  %v6038_v0 = vld [vmem:[%s12628_s1 + $0x5b0] sm:$0xf0]  ;;  %v6044_v1 = vld [vmem:[%s12628_s1 + $0x5a8] sm:$0xf] }
  0x70   :  { %1021 = vmatpush.bf16.msrb.mxu0 %v5689_v15  ;;  %v5886_v15 = vld [vmem:[%s12628_s1 + $0x4c0] sm:$0xf]  ;;  %v8057_v3 = vld [vmem:[%s12628_s1 + $0x5ac] sm:$0xf] }
  0x71   :  { %1035 = vmatpush.bf16.msrb.mxu1 %v5693_v16  ;;  %1049 = vmatpush.bf16.msrb.mxu2 %v5697_v17  ;;  %v8029_v16 = vld [vmem:[%s12628_s1 + $0x4cc] sm:$0xf0]  ;;  %v8027_v17 = vld [vmem:[%s12628_s1 + $0x4c4] sm:$0xf] }
  0x72   :  { %1063 = vmatpush.bf16.msrb.mxu3 %v5701_v21  ;;  %v8030_v21 = vld [vmem:[%s12628_s1 + $0x4d4] sm:$0xf0]  ;;  %v5887_v24 = vor.u32 %v8029_v16, %v5886_v15  ;;  %v5891_v25 = vor.u32 %v8027_v17, %v5888_v19  ;;  %v5808_v15 = vld [vmem:[%s12628_s1 + $0x430] sm:$0xf0]  ;;  %v5814_v16 = vld [vmem:[%s12628_s1 + $0x428] sm:$0xf] }
  0x73   :  { %v5895_v26 = vor.u32 %v8030_v21, %v5894_v20  ;;  %v8010_v17 = vld [vmem:[%s12628_s1 + $0x434] sm:$0xf0]  ;;  %v5816_v19 = vld [vmem:[%s12628_s1 + $0x438] sm:$0xf0]  ;;  %v5790_v21 = vld [vmem:[%s12628_s1 + $0x400] sm:$0xf] }
  0x74   :  { %1022 = vmatpush.bf16.msrb.mxu0 %v5673_v27  ;;  %v5870_v27 = vld [vmem:[%s12628_s1 + $0x4a0] sm:$0xf]  ;;  %v5791_v35 = vor.u32 %v8005_v22, %v5790_v21  ;;  %v8050_v21 = vld [vmem:[%s12628_s1 + $0x56c] sm:$0xf0]  ;;  %v8048_v22 = vld [vmem:[%s12628_s1 + $0x564] sm:$0xf] }
  0x75   :  { %1036 = vmatpush.bf16.msrb.mxu1 %v5677_v28  ;;  %1050 = vmatpush.bf16.msrb.mxu2 %v5681_v29  ;;  %v8025_v28 = vld [vmem:[%s12628_s1 + $0x4ac] sm:$0xf0]  ;;  %v8023_v29 = vld [vmem:[%s12628_s1 + $0x4a4] sm:$0xf] }
  0x76   :  { %1064 = vmatpush.bf16.msrb.mxu3 %v5685_v33  ;;  %v8026_v33 = vld [vmem:[%s12628_s1 + $0x4b4] sm:$0xf0]  ;;  %v5871_v36 = vor.u32 %v8025_v28, %v5870_v27  ;;  %v5875_v37 = vor.u32 %v8023_v29, %v5872_v31  ;;  %v5798_v27 = vld [vmem:[%s12628_s1 + $0x408] sm:$0xf]  ;;  %v5800_v31 = vld [vmem:[%s12628_s1 + $0x418] sm:$0xf0] }
  0x77   :  { %v5879_v38 = vor.u32 %v8026_v33, %v5878_v32  ;;  %v8006_v29 = vld [vmem:[%s12628_s1 + $0x414] sm:$0xf0]  ;;  %v6068_v32 = vld [vmem:[%s12628_s1 + $0x5e0] sm:$0xf]  ;;  %v8066_v33 = vld [vmem:[%s12628_s1 + $0x5ec] sm:$0xf0] }
  0x78   :  { %1023 = vmatpush.bf16.msrb.mxu0 %v5657_v39  ;;  %v5854_v39 = vld [vmem:[%s12628_s1 + $0x480] sm:$0xf] }
  0x79   :  { %1037 = vmatpush.bf16.msrb.mxu1 %v5661_v40  ;;  %1051 = vmatpush.bf16.msrb.mxu2 %v5665_v41  ;;  %v8021_v40 = vld [vmem:[%s12628_s1 + $0x48c] sm:$0xf0]  ;;  %v8019_v41 = vld [vmem:[%s12628_s1 + $0x484] sm:$0xf] }
  0x7a   :  { %1065 = vmatpush.bf16.msrb.mxu3 %v5669_v45  ;;  %v8022_v45 = vld [vmem:[%s12628_s1 + $0x494] sm:$0xf0]  ;;  %v5855_v48 = vor.u32 %v8021_v40, %v5854_v39  ;;  %v5859_v49 = vor.u32 %v8019_v41, %v5856_v43  ;;  %v5799_v40 = vor.u32 %v8006_v29, %v5798_v27  ;;  %v8065_v41 = vld [vmem:[%s12628_s1 + $0x5ec] sm:$0xf] }
  0x7b   :  { %v5863_v50 = vor.u32 %v8022_v45, %v5862_v44  ;;  %v6069_v44 = vor.u32 %v8066_v33, %v6068_v32  ;;  %v8002_v45 = vld [vmem:[%s12629_s0 + $0x20] sm:$0xff]  ;;  %v8049_v27 = vld [vmem:[%s12628_s1 + $0x56c] sm:$0xf]  ;;  %v8046_v33 = vld [vmem:[%s12628_s1 + $0x54c] sm:$0xf0] }
  0x7c   :  { %1024 = vmatpush.bf16.msrb.mxu0 %v5641_v51  ;;  %v5838_v51 = vld [vmem:[%s12628_s1 + $0x460] sm:$0xf] }
  0x7d   :  { %1038 = vmatpush.bf16.msrb.mxu1 %v5645_v54  ;;  %1052 = vmatpush.bf16.msrb.mxu2 %v5649_v55  ;;  %v5867_v54 = vor.u32 %v8020_v46, %v5864_v47  ;;  %v5840_v55 = vld [vmem:[%s12628_s1 + $0x470] sm:$0xf0]  ;;  %v5839_v60 = vor.u32 %v8017_v52, %v5838_v51  ;;  %v5988_v32 = vld [vmem:[%s12628_s1 + $0x540] sm:$0xf] }
  0x7e   :  { %1066 = vmatpush.bf16.msrb.mxu3 %v5653_v59  ;;  %v5848_v59 = vld [vmem:[%s12628_s1 + $0x478] sm:$0xf0]  ;;  %v5843_v61 = vor.u32 %v8015_v53, %v5840_v55  ;;  %v6054_v52 = vld [vmem:[%s12628_s1 + $0x5d0] sm:$0xf0]  ;;  %v6060_v53 = vld [vmem:[%s12628_s1 + $0x5c8] sm:$0xf] }
  0x7f   :  { %v8061_v55 = vld [vmem:[%s12628_s1 + $0x5cc] sm:$0xf] }
  0x80   :  { %1025 = vmatpush.bf16.msrb.mxu0 %v5625_v2  ;;  %v5851_v2 = vor.u32 %v8016_v58, %v5848_v59  ;;  %v6065_v63 = vor.u32 %v8061_v55, %v6062_v56  ;;  %v5956_v56 = vld [vmem:[%s12628_s1 + $0x500] sm:$0xf] }
  0x81   :  { %1039 = vmatpush.bf16.msrb.mxu1 %v5629_v6  ;;  %1053 = vmatpush.bf16.msrb.mxu2 %v5633_v7  ;;  %v8012_v6 = vld [vmem:[%s12628_s1 + $0x44c] sm:$0xf]  ;;  %v5832_v7 = vld [vmem:[%s12628_s1 + $0x458] sm:$0xf0] }
  0x82   :  { %1067 = vmatpush.bf16.msrb.mxu3 %v5637_v10  ;;  %v5831_v10 = vor.u32 %v8014_v5, %v5830_v4  ;;  %v6046_v4 = vld [vmem:[%s12628_s1 + $0x5b8] sm:$0xf0] }
  0x83   :  { %1026 = vmatmul.bf16.vlgmr.msrb.gmra.mxu0 %v7969_v12 }
  0x84   :  { %1284 = vmatpush.bf16.msra.mxu0 %v5903_v11  ;;  %1040 = vmatmul.bf16.vlgmr.msrb.gmra.mxu1 %v7969_v12  ;;  %v5806_v11 = vld [vmem:[%s12628_s1 + $0x420] sm:$0xf] }
  0x85   :  { %1298 = vmatpush.bf16.msra.mxu1 %v5907_v13  ;;  %1312 = vmatpush.bf16.msra.mxu2 %v5911_v14  ;;  %v8007_v13 = vld [vmem:[%s12628_s1 + $0x424] sm:$0xf]  ;;  %v5835_v14 = vor.u32 %v8012_v6, %v5832_v7 }
  0x86   :  { %1326 = vmatpush.bf16.msra.mxu3 %v5915_v18  ;;  %1054 = vmatmul.bf16.vlgmr.msrb.gmra.mxu2 %v7969_v12  ;;  %v8008_v18 = vld [vmem:[%s12628_s1 + $0x42c] sm:$0xf]  ;;  %v5811_v23 = vor.u32 %v8007_v13, %v5808_v15  ;;  %v6028_v13 = vld [vmem:[%s12628_s1 + $0x588] sm:$0xf] }
  0x87   :  { %1068 = vmatmul.bf16.vlgmr.msrb.gmra.mxu3 %v7969_v12  ;;  %v8009_v12 = vld [vmem:[%s12628_s1 + $0x42c] sm:$0xf0]  ;;  %v5819_v28 = vor.u32 %v8008_v18, %v5816_v19  ;;  %v8053_v15 = vld [vmem:[%s12628_s1 + $0x58c] sm:$0xf] }
  0x88   :  { %1285 = vmatpush.bf16.msra.mxu0 %v5887_v24  ;;  %v5807_v20 = vor.u32 %v8009_v12, %v5806_v11  ;;  %v5815_v24 = vor.u32 %v8010_v17, %v5814_v16  ;;  %v6049_v11 = vor.u32 %v8057_v3, %v6046_v4  ;;  %v6022_v12 = vld [vmem:[%s12628_s1 + $0x590] sm:$0xf0]  ;;  %v6030_v16 = vld [vmem:[%s12628_s1 + $0x598] sm:$0xf0]  ;;  %v6234_v3 = vld [vmem:[%s12628_s1 + $0x6e0] sm:$0xf] }
  0x89   :  { %1299 = vmatpush.bf16.msra.mxu1 %v5891_v25  ;;  %1313 = vmatpush.bf16.msra.mxu2 %v5895_v26  ;;  %v8003_v25 = vld [vmem:[%s12628_s1 + $0x404] sm:$0xf]  ;;  %v5792_v26 = vld [vmem:[%s12628_s1 + $0x410] sm:$0xf0]  ;;  %v8099_v4 = vld [vmem:[%s12628_s1 + $0x6ec] sm:$0xf0] }
  0x8a   :  { %1327 = vmatpush.bf16.msra.mxu3 %v5899_v30  ;;  %v8004_v30 = vld [vmem:[%s12628_s1 + $0x40c] sm:$0xf]  ;;  %v5795_v39 = vor.u32 %v8003_v25, %v5792_v26  ;;  %v6012_v25 = vld [vmem:[%s12628_s1 + $0x568] sm:$0xf]  ;;  %v8051_v26 = vld [vmem:[%s12628_s1 + $0x574] sm:$0xf0] }
  0x8b   :  { %v5803_v43 = vor.u32 %v8004_v30, %v5800_v31  ;;  %v6013_v31 = vor.u32 %v8051_v26, %v6012_v25 }
  0x8c   :  { %1286 = vmatpush.bf16.msra.mxu0 %v5871_v36  ;;  %v6070_v36 = vld [vmem:[%s12628_s1 + $0x5f0] sm:$0xf0] }
  0x8d   :  { %1300 = vmatpush.bf16.msra.mxu1 %v5875_v37  ;;  %1314 = vmatpush.bf16.msra.mxu2 %v5879_v38  ;;  %v6076_v37 = vld [vmem:[%s12628_s1 + $0x5e8] sm:$0xf]  ;;  %v8067_v38 = vld [vmem:[%s12628_s1 + $0x5f4] sm:$0xf0]  ;;  %v6073_v46 = vor.u32 %v8064_v34, %v6070_v36  ;;  %v8044_v34 = vld [vmem:[%s12628_s1 + $0x544] sm:$0xf] }
  0x8e   :  { %1328 = vmatpush.bf16.msra.mxu3 %v5883_v42  ;;  %v6078_v42 = vld [vmem:[%s12628_s1 + $0x5f8] sm:$0xf0]  ;;  %v6077_v47 = vor.u32 %v8067_v38, %v6076_v37  ;;  %v5990_v36 = vld [vmem:[%s12628_s1 + $0x550] sm:$0xf0]  ;;  %v5996_v37 = vld [vmem:[%s12628_s1 + $0x548] sm:$0xf] }
  0x8f   :  { %v6081_v51 = vor.u32 %v8065_v41, %v6078_v42  ;;  %v8047_v38 = vld [vmem:[%s12628_s1 + $0x554] sm:$0xf0]  ;;  %v5989_v41 = vor.u32 %v8046_v33, %v5988_v32  ;;  %v5993_v42 = vor.u32 %v8044_v34, %v5990_v36  ;;  %v8091_v36 = vld [vmem:[%s12628_s1 + $0x6ac] sm:$0xf0] }
  0x90   :  { %1287 = vmatpush.bf16.msra.mxu0 %v5855_v48  ;;  %v6052_v48 = vld [vmem:[%s12628_s1 + $0x5c0] sm:$0xf] }
  0x91   :  { %1301 = vmatpush.bf16.msra.mxu1 %v5859_v49  ;;  %1315 = vmatpush.bf16.msra.mxu2 %v5863_v50  ;;  %v8062_v49 = vld [vmem:[%s12628_s1 + $0x5cc] sm:$0xf0]  ;;  %v8060_v50 = vld [vmem:[%s12628_s1 + $0x5c4] sm:$0xf] }
  0x92   :  { %1329 = vmatpush.bf16.msra.mxu3 %v5867_v54  ;;  %v8063_v54 = vld [vmem:[%s12628_s1 + $0x5d4] sm:$0xf0]  ;;  %v6053_v57 = vor.u32 %v8062_v49, %v6052_v48  ;;  %v6057_v58 = vor.u32 %v8060_v50, %v6054_v52  ;;  %v5974_v50 = vld [vmem:[%s12628_s1 + $0x530] sm:$0xf0] }
  0x93   :  { %v6061_v59 = vor.u32 %v8063_v54, %v6060_v53  ;;  %v8043_v52 = vld [vmem:[%s12628_s1 + $0x534] sm:$0xf0]  ;;  %v8041_v53 = vld [vmem:[%s12628_s1 + $0x52c] sm:$0xf]  ;;  %v5982_v54 = vld [vmem:[%s12628_s1 + $0x538] sm:$0xf0] }
  0x94   :  { %1288 = vmatpush.bf16.msra.mxu0 %v5839_v60  ;;  %v6036_v60 = vld [vmem:[%s12628_s1 + $0x5a0] sm:$0xf] }
  0x95   :  { %1302 = vmatpush.bf16.msra.mxu1 %v5843_v61  ;;  %1316 = vmatpush.bf16.msra.mxu2 %v5847_v62  ;;  %v8058_v61 = vld [vmem:[%s12628_s1 + $0x5ac] sm:$0xf0]  ;;  %v8056_v62 = vld [vmem:[%s12628_s1 + $0x5a4] sm:$0xf] }
  0x96   :  { %1330 = vmatpush.bf16.msra.mxu3 %v5851_v2  ;;  %v8059_v2 = vld [vmem:[%s12628_s1 + $0x5b4] sm:$0xf0]  ;;  %v6037_v5 = vor.u32 %v8058_v61, %v6036_v60  ;;  %v6041_v6 = vor.u32 %v8056_v62, %v6038_v0  ;;  %v8036_v60 = vld [vmem:[%s12628_s1 + $0x504] sm:$0xf]  ;;  %v5958_v61 = vld [vmem:[%s12628_s1 + $0x510] sm:$0xf0] }
  0x97   :  { %v6045_v7 = vor.u32 %v8059_v2, %v6044_v1  ;;  %v5964_v62 = vld [vmem:[%s12628_s1 + $0x508] sm:$0xf]  ;;  %v8039_v0 = vld [vmem:[%s12628_s1 + $0x514] sm:$0xf0]  ;;  %v8037_v1 = vld [vmem:[%s12628_s1 + $0x50c] sm:$0xf] }
  0x98   :  { %1289 = vmatpush.bf16.msra.mxu0 %v5823_v8  ;;  %v6020_v8 = vld [vmem:[%s12628_s1 + $0x580] sm:$0xf]  ;;  %v5966_v2 = vld [vmem:[%s12628_s1 + $0x518] sm:$0xf0] }
  0x99   :  { %1303 = vmatpush.bf16.msra.mxu1 %v5827_v9  ;;  %1317 = vmatpush.bf16.msra.mxu2 %v5831_v10  ;;  %v8054_v9 = vld [vmem:[%s12628_s1 + $0x58c] sm:$0xf0]  ;;  %v8052_v10 = vld [vmem:[%s12628_s1 + $0x584] sm:$0xf] }
  0x9a   :  { %1331 = vmatpush.bf16.msra.mxu3 %v5835_v14  ;;  %v8055_v14 = vld [vmem:[%s12628_s1 + $0x594] sm:$0xf0]  ;;  %v6021_v17 = vor.u32 %v8054_v9, %v6020_v8  ;;  %v6025_v18 = vor.u32 %v8052_v10, %v6022_v12  ;;  %v6242_v8 = vld [vmem:[%s12628_s1 + $0x6e8] sm:$0xf]  ;;  %v5965_v12 = vor.u32 %v8039_v0, %v5964_v62 }
  0x9b   :  { %v6029_v19 = vor.u32 %v8055_v14, %v6028_v13  ;;  %v8100_v9 = vld [vmem:[%s12628_s1 + $0x6f4] sm:$0xf0]  ;;  %v8098_v13 = vld [vmem:[%s12628_s1 + $0x6ec] sm:$0xf]  ;;  %v6244_v14 = vld [vmem:[%s12628_s1 + $0x6f8] sm:$0xf0] }
  0x9c   :  { %1290 = vmatpush.bf16.msra.mxu0 %v5807_v20  ;;  %v6004_v20 = vld [vmem:[%s12628_s1 + $0x560] sm:$0xf]  ;;  %v6247_v25 = vor.u32 %v8098_v13, %v6244_v14 }
  0x9d   :  { %1304 = vmatpush.bf16.msra.mxu1 %v5811_v23  ;;  %1318 = vmatpush.bf16.msra.mxu2 %v5815_v24  ;;  %v6033_v23 = vor.u32 %v8053_v15, %v6030_v16  ;;  %v6006_v24 = vld [vmem:[%s12628_s1 + $0x570] sm:$0xf0]  ;;  %v6005_v29 = vor.u32 %v8050_v21, %v6004_v20  ;;  %v5969_v16 = vor.u32 %v8037_v1, %v5966_v2  ;;  %v6154_v14 = vld [vmem:[%s12628_s1 + $0x640] sm:$0xf] }
  0x9e   :  { %1332 = vmatpush.bf16.msra.mxu3 %v5819_v28  ;;  %v6014_v28 = vld [vmem:[%s12628_s1 + $0x578] sm:$0xf0]  ;;  %v6009_v30 = vor.u32 %v8048_v22, %v6006_v24  ;;  %v6243_v20 = vor.u32 %v8100_v9, %v6242_v8  ;;  %v6218_v22 = vld [vmem:[%s12628_s1 + $0x6c0] sm:$0xf]  ;;  %v8093_v24 = vld [vmem:[%s12628_s1 + $0x6c4] sm:$0xf] }
  0x9f   :  { %v8082_v8 = vld [vmem:[%s12628_s1 + $0x66c] sm:$0xf]  ;;  %v6180_v9 = vld [vmem:[%s12628_s1 + $0x678] sm:$0xf0] }
  0xa0   :  { %1291 = vmatpush.bf16.msra.mxu0 %v5791_v35  ;;  %v6017_v35 = vor.u32 %v8049_v27, %v6014_v28  ;;  %v6220_v27 = vld [vmem:[%s12628_s1 + $0x6d0] sm:$0xf0]  ;;  %v6226_v28 = vld [vmem:[%s12628_s1 + $0x6c8] sm:$0xf] }
  0xa1   :  { %1305 = vmatpush.bf16.msra.mxu1 %v5795_v39  ;;  %1319 = vmatpush.bf16.msra.mxu2 %v5799_v40  ;;  %v8045_v39 = vld [vmem:[%s12628_s1 + $0x54c] sm:$0xf]  ;;  %v5998_v40 = vld [vmem:[%s12628_s1 + $0x558] sm:$0xf0]  ;;  %v9642_v49 = vpop.f32.mrf.mxu1  ;;  %v6223_v33 = vor.u32 %v8093_v24, %v6220_v27 }
  0xa2   :  { %1333 = vmatpush.bf16.msra.mxu3 %v5803_v43  ;;  %v5997_v43 = vor.u32 %v8047_v38, %v5996_v37  ;;  %v6001_v48 = vor.u32 %v8045_v39, %v5998_v40  ;;  %v8089_v37 = vld [vmem:[%s12628_s1 + $0x6a4] sm:$0xf]  ;;  %v6204_v39 = vld [vmem:[%s12628_s1 + $0x6b0] sm:$0xf0]  ;;  %v6210_v40 = vld [vmem:[%s12628_s1 + $0x6a8] sm:$0xf] }
  0xa3   :  { %1292 = vmatmul.bf16.vlgmr.msra.gmra.mxu0 %v8002_v45  ;;  %v8078_v27 = vld [vmem:[%s12628_s1 + $0x64c] sm:$0xf] }
  0xa4   :  { %1550 = vmatpush.bf16.msrb.mxu0 %v6069_v44  ;;  %1306 = vmatmul.bf16.vlgmr.msra.gmra.mxu1 %v8002_v45  ;;  %v9631_v44 = vpop.f32.mrf.mxu0 }
  0xa5   :  { %1564 = vmatpush.bf16.msrb.mxu1 %v6073_v46  ;;  %1578 = vmatpush.bf16.msrb.mxu2 %v6077_v47  ;;  %v8042_v46 = vld [vmem:[%s12628_s1 + $0x52c] sm:$0xf0]  ;;  %v8040_v47 = vld [vmem:[%s12628_s1 + $0x524] sm:$0xf] }
  0xa6   :  { %1592 = vmatpush.bf16.msrb.mxu3 %v6081_v51  ;;  %1320 = vmatmul.bf16.vlgmr.msra.gmra.mxu2 %v8002_v45  ;;  %v5980_v51 = vld [vmem:[%s12628_s1 + $0x528] sm:$0xf] }
  0xa7   :  { %1334 = vmatmul.bf16.vlgmr.msra.gmra.mxu3 %v8002_v45  ;;  %v5972_v45 = vld [vmem:[%s12628_s1 + $0x520] sm:$0xf] }
  0xa8   :  { %1551 = vmatpush.bf16.msrb.mxu0 %v6053_v57  ;;  %v5973_v55 = vor.u32 %v8042_v46, %v5972_v45  ;;  %v8038_v57 = vld [vmem:[%s12628_s1 + $0x50c] sm:$0xf0] }
  0xa9   :  { %1565 = vmatpush.bf16.msrb.mxu1 %v6057_v58  ;;  %1579 = vmatpush.bf16.msrb.mxu2 %v6061_v59  ;;  %v5977_v58 = vor.u32 %v8040_v47, %v5974_v50  ;;  %v5981_v59 = vor.u32 %v8043_v52, %v5980_v51  ;;  %v9701_v10 = vpop.f32.mrf.mxu2  ;;  %v9725_v26 = vpop.f32.mrf.mxu1  ;;  %v6207_v47 = vor.u32 %v8089_v37, %v6204_v39  ;;  %v6186_v51 = vld [vmem:[%s12628_s1 + $0x680] sm:$0xf]  ;;  %v8087_v52 = vld [vmem:[%s12628_s1 + $0x68c] sm:$0xf0]  ;;  %v8076_v37 = vld [vmem:[%s12628_s1 + $0x634] sm:$0xf0] }
  0xaa   :  { %1593 = vmatpush.bf16.msrb.mxu3 %v6065_v63  ;;  %v5985_v63 = vor.u32 %v8041_v53, %v5982_v54  ;;  %v9709_v15 = vpop.f32.mrf.mxu3  ;;  %v8085_v53 = vld [vmem:[%s12628_s1 + $0x684] sm:$0xf]  ;;  %v6148_v39 = vld [vmem:[%s12628_s1 + $0x638] sm:$0xf0] }
  0xac   :  { %1552 = vmatpush.bf16.msrb.mxu0 %v6037_v5  ;;  %v8097_v5 = vld [vmem:[%s12628_s1 + $0x6e4] sm:$0xf]  ;;  %v9714_v21 = vpop.f32.mrf.mxu0 }
  0xad   :  { %1566 = vmatpush.bf16.msrb.mxu1 %v6041_v6  ;;  %1580 = vmatpush.bf16.msrb.mxu2 %v6045_v7  ;;  %v5957_v6 = vor.u32 %v8038_v57, %v5956_v56  ;;  %v6236_v7 = vld [vmem:[%s12628_s1 + $0x6f0] sm:$0xf0]  ;;  %v6194_v56 = vld [vmem:[%s12628_s1 + $0x688] sm:$0xf]  ;;  %v8088_v57 = vld [vmem:[%s12628_s1 + $0x694] sm:$0xf0] }
  0xae   :  { %1594 = vmatpush.bf16.msrb.mxu3 %v6049_v11  ;;  %v5961_v11 = vor.u32 %v8036_v60, %v5958_v61  ;;  %v6196_v60 = vld [vmem:[%s12628_s1 + $0x698] sm:$0xf0]  ;;  %v6195_v2 = vor.u32 %v8088_v57, %v6194_v56  ;;  %v6400_v56 = vld [vmem:[%s12628_s1 + $0x7e0] sm:$0xf]  ;;  %v8132_v57 = vld [vmem:[%s12628_s1 + $0x7ec] sm:$0xf0] }
  0xb0   :  { %1553 = vmatpush.bf16.msrb.mxu0 %v6021_v17  ;;  %v6235_v17 = vor.u32 %v8099_v4, %v6234_v3  ;;  %v6170_v3 = vld [vmem:[%s12628_s1 + $0x660] sm:$0xf]  ;;  %v8083_v4 = vld [vmem:[%s12628_s1 + $0x66c] sm:$0xf0] }
  0xb1   :  { %1567 = vmatpush.bf16.msrb.mxu1 %v6025_v18  ;;  %1581 = vmatpush.bf16.msrb.mxu2 %v6029_v19  ;;  %v8035_v18 = vld [vmem:[%s12629_s0 + $0x28] sm:$0xff]  ;;  %v6239_v19 = vor.u32 %v8097_v5, %v6236_v7  ;;  %v9766_v46 = vpop.f32.mrf.mxu2  ;;  %v8084_v7 = vld [vmem:[%s12628_s1 + $0x674] sm:$0xf0] }
  0xb2   :  { %1595 = vmatpush.bf16.msrb.mxu3 %v6033_v23  ;;  %v8095_v23 = vld [vmem:[%s12628_s1 + $0x6cc] sm:$0xf0]  ;;  %v9768_v50 = vpop.f32.mrf.mxu3 }
  0xb3   :  { %v6219_v32 = vor.u32 %v8095_v23, %v6218_v22  ;;  %v6162_v22 = vld [vmem:[%s12628_s1 + $0x648] sm:$0xf]  ;;  %v8080_v23 = vld [vmem:[%s12628_s1 + $0x654] sm:$0xf0] }
  0xb4   :  { %1554 = vmatpush.bf16.msrb.mxu0 %v6005_v29  ;;  %v8096_v29 = vld [vmem:[%s12628_s1 + $0x6d4] sm:$0xf0] }
  0xb5   :  { %1568 = vmatpush.bf16.msrb.mxu1 %v6009_v30  ;;  %1582 = vmatpush.bf16.msrb.mxu2 %v6013_v31  ;;  %v8094_v30 = vld [vmem:[%s12628_s1 + $0x6cc] sm:$0xf]  ;;  %v6228_v31 = vld [vmem:[%s12628_s1 + $0x6d8] sm:$0xf0]  ;;  %v6227_v34 = vor.u32 %v8096_v29, %v6226_v28 }
  0xb6   :  { %1596 = vmatpush.bf16.msrb.mxu3 %v6017_v35  ;;  %v6202_v35 = vld [vmem:[%s12628_s1 + $0x6a0] sm:$0xf]  ;;  %v6231_v38 = vor.u32 %v8094_v30, %v6228_v31  ;;  %v6164_v28 = vld [vmem:[%s12628_s1 + $0x658] sm:$0xf0] }
  0xb7   :  { %v6203_v45 = vor.u32 %v8091_v36, %v6202_v35  ;;  %v6140_v35 = vld [vmem:[%s12628_s1 + $0x630] sm:$0xf0]  ;;  %v6146_v36 = vld [vmem:[%s12628_s1 + $0x628] sm:$0xf] }
  0xb8   :  { %1555 = vmatpush.bf16.msrb.mxu0 %v5989_v41  ;;  %v8092_v41 = vld [vmem:[%s12628_s1 + $0x6b4] sm:$0xf0] }
  0xb9   :  { %1569 = vmatpush.bf16.msrb.mxu1 %v5993_v42  ;;  %1583 = vmatpush.bf16.msrb.mxu2 %v5997_v43  ;;  %v8090_v42 = vld [vmem:[%s12628_s1 + $0x6ac] sm:$0xf]  ;;  %v6212_v43 = vld [vmem:[%s12628_s1 + $0x6b8] sm:$0xf0] }
  0xba   :  { %1597 = vmatpush.bf16.msrb.mxu3 %v6001_v48  ;;  %v6211_v48 = vor.u32 %v8092_v41, %v6210_v40  ;;  %v6215_v54 = vor.u32 %v8090_v42, %v6212_v43  ;;  %v6122_v41 = vld [vmem:[%s12628_s1 + $0x600] sm:$0xf]  ;;  %v8071_v42 = vld [vmem:[%s12628_s1 + $0x60c] sm:$0xf0] }
  0xbc   :  { %1556 = vmatpush.bf16.msrb.mxu0 %v5973_v55  ;;  %v6188_v55 = vld [vmem:[%s12628_s1 + $0x690] sm:$0xf0] }
  0xbd   :  { %1570 = vmatpush.bf16.msrb.mxu1 %v5977_v58  ;;  %1584 = vmatpush.bf16.msrb.mxu2 %v5981_v59  ;;  %v8086_v59 = vld [vmem:[%s12628_s1 + $0x68c] sm:$0xf]  ;;  %v6191_v1 = vor.u32 %v8085_v53, %v6188_v55  ;;  %v8072_v53 = vld [vmem:[%s12628_s1 + $0x614] sm:$0xf0]  ;;  %v6132_v55 = vld [vmem:[%s12628_s1 + $0x618] sm:$0xf0] }
  0xbe   :  { %1598 = vmatpush.bf16.msrb.mxu3 %v5985_v63  ;;  %v6187_v63 = vor.u32 %v8087_v52, %v6186_v51  ;;  %v6199_v5 = vor.u32 %v8086_v59, %v6196_v60  ;;  %v6130_v51 = vld [vmem:[%s12628_s1 + $0x608] sm:$0xf]  ;;  %v6123_v59 = vor.u32 %v8071_v42, %v6122_v41  ;;  %v6402_v60 = vld [vmem:[%s12628_s1 + $0x7f0] sm:$0xf0] }
  0xc0   :  { %1557 = vmatpush.bf16.msrb.mxu0 %v5957_v6  ;;  %v503_v58 = vpop.f32.mrf.mxu0  ;;  %v6178_v6 = vld [vmem:[%s12628_s1 + $0x668] sm:$0xf] }
  0xc1   :  { %1571 = vmatpush.bf16.msrb.mxu1 %v5961_v11  ;;  %1585 = vmatpush.bf16.msrb.mxu2 %v5965_v12  ;;  %v9795_v61 = vadd.f32 %v503_v58, %v9631_v44  ;;  %v517_v62 = vpop.f32.mrf.mxu1  ;;  %v8081_v44 = vld [vmem:[%s12628_s1 + $0x664] sm:$0xf]  ;;  %v6171_v11 = vor.u32 %v8083_v4, %v6170_v3  ;;  %v6179_v13 = vor.u32 %v8084_v7, %v6178_v6  ;;  %v8131_v3 = vld [vmem:[%s12628_s1 + $0x7ec] sm:$0xf]  ;;  %v6410_v4 = vld [vmem:[%s12628_s1 + $0x7f8] sm:$0xf0] }
  0xc2   :  { %1599 = vmatpush.bf16.msrb.mxu3 %v5969_v16  ;;  %v9798_v0 = vadd.f32 %v517_v62, %v9642_v49  ;;  %v6172_v49 = vld [vmem:[%s12628_s1 + $0x670] sm:$0xf0]  ;;  %v8079_v16 = vld [vmem:[%s12628_s1 + $0x64c] sm:$0xf0]  ;;  %v8130_v58 = vld [vmem:[%s12628_s1 + $0x7e4] sm:$0xf] }
  0xc3   :  { %1558 = vmatmul.bf16.vlgmr.msrb.gmra.mxu0 %v8035_v18  ;;  %v6175_v12 = vor.u32 %v8081_v44, %v6172_v49  ;;  %v6155_v30 = vor.u32 %v8079_v16, %v6154_v14  ;;  %v6408_v62 = vld [vmem:[%s12628_s1 + $0x7e8] sm:$0xf]  ;;  %v8068_v49 = vld [vmem:[%s12629_s0 + $0x30] sm:$0xff]  ;;  %v6405_v6 = vor.u32 %v8130_v58, %v6402_v60  ;;  %v8129_v16 = vld [vmem:[%s12628_s1 + $0x7d4] sm:$0xf0] }
  0xc4   :  { %1816 = vmatpush.bf16.msra.mxu0 %v6235_v17  ;;  %1572 = vmatmul.bf16.vlgmr.msrb.gmra.mxu1 %v8035_v18  ;;  %v8077_v17 = vld [vmem:[%s12628_s1 + $0x644] sm:$0xf]  ;;  %v6392_v14 = vld [vmem:[%s12628_s1 + $0x7c8] sm:$0xf]  ;;  %v6336_v60 = vld [vmem:[%s12628_s1 + $0x760] sm:$0xf] }
  0xc5   :  { %1830 = vmatpush.bf16.msra.mxu1 %v6239_v19  ;;  %1844 = vmatpush.bf16.msra.mxu2 %v6243_v20  ;;  %v6156_v20 = vld [vmem:[%s12628_s1 + $0x650] sm:$0xf0] }
  0xc6   :  { %1858 = vmatpush.bf16.msra.mxu3 %v6247_v25  ;;  %1586 = vmatmul.bf16.vlgmr.msrb.gmra.mxu2 %v8035_v18  ;;  %v6159_v31 = vor.u32 %v8077_v17, %v6156_v20 }
  0xc7   :  { %1600 = vmatmul.bf16.vlgmr.msrb.gmra.mxu3 %v8035_v18  ;;  %v6183_v18 = vor.u32 %v8082_v8, %v6180_v9  ;;  %v6384_v8 = vld [vmem:[%s12628_s1 + $0x7c0] sm:$0xf]  ;;  %v8128_v9 = vld [vmem:[%s12628_s1 + $0x7cc] sm:$0xf0] }
  0xc8   :  { %1817 = vmatpush.bf16.msra.mxu0 %v6219_v32  ;;  %v6163_v32 = vor.u32 %v8080_v23, %v6162_v22  ;;  %v9947_v17 = vpop.f32.mrf.mxu0  ;;  %v6385_v22 = vor.u32 %v8128_v9, %v6384_v8  ;;  %v8110_v8 = vld [vmem:[%s12628_s1 + $0x744] sm:$0xf] }
  0xc9   :  { %1831 = vmatpush.bf16.msra.mxu1 %v6223_v33  ;;  %1845 = vmatpush.bf16.msra.mxu2 %v6227_v34  ;;  %v531_v19 = vpop.f32.mrf.mxu2  ;;  %v8075_v33 = vld [vmem:[%s12628_s1 + $0x62c] sm:$0xf0]  ;;  %v8073_v34 = vld [vmem:[%s12628_s1 + $0x624] sm:$0xf]  ;;  %v9955_v20 = vpop.f32.mrf.mxu1 }
  0xca   :  { %1859 = vmatpush.bf16.msra.mxu3 %v6231_v38  ;;  %v9843_v24 = vadd.f32 %v531_v19, %v9701_v10  ;;  %v545_v25 = vpop.f32.mrf.mxu3  ;;  %v6138_v10 = vld [vmem:[%s12628_s1 + $0x620] sm:$0xf]  ;;  %v8074_v38 = vld [vmem:[%s12628_s1 + $0x62c] sm:$0xf]  ;;  %v6143_v43 = vor.u32 %v8073_v34, %v6140_v35  ;;  %v6394_v19 = vld [vmem:[%s12628_s1 + $0x7d8] sm:$0xf0] }
  0xcb   :  { %v9852_v29 = vadd.f32 %v545_v25, %v9709_v15  ;;  %v6167_v15 = vor.u32 %v8078_v27, %v6164_v28  ;;  %v6139_v40 = vor.u32 %v8075_v33, %v6138_v10  ;;  %v6151_v52 = vor.u32 %v8074_v38, %v6148_v39  ;;  %v6368_v27 = vld [vmem:[%s12628_s1 + $0x7a0] sm:$0xf]  ;;  %v8124_v28 = vld [vmem:[%s12628_s1 + $0x7ac] sm:$0xf0]  ;;  %v6376_v10 = vld [vmem:[%s12628_s1 + $0x7a8] sm:$0xf] }
  0xcc   :  { %1818 = vmatpush.bf16.msra.mxu0 %v6203_v45  ;;  %v6147_v45 = vor.u32 %v8076_v37, %v6146_v36  ;;  %v6393_v25 = vor.u32 %v8129_v16, %v6392_v14  ;;  %v8125_v33 = vld [vmem:[%s12628_s1 + $0x7b4] sm:$0xf0]  ;;  %v8123_v34 = vld [vmem:[%s12628_s1 + $0x7ac] sm:$0xf]  ;;  %v6369_v35 = vor.u32 %v8124_v28, %v6368_v27  ;;  %v6352_v38 = vld [vmem:[%s12628_s1 + $0x780] sm:$0xf] }
  0xcd   :  { %1832 = vmatpush.bf16.msra.mxu1 %v6207_v47  ;;  %1846 = vmatpush.bf16.msra.mxu2 %v6211_v48  ;;  %v8069_v47 = vld [vmem:[%s12628_s1 + $0x604] sm:$0xf]  ;;  %v6124_v48 = vld [vmem:[%s12628_s1 + $0x610] sm:$0xf0]  ;;  %v6377_v37 = vor.u32 %v8125_v33, %v6376_v10  ;;  %v8120_v39 = vld [vmem:[%s12628_s1 + $0x78c] sm:$0xf0] }
  0xce   :  { %1860 = vmatpush.bf16.msra.mxu3 %v6215_v54  ;;  %v8070_v54 = vld [vmem:[%s12628_s1 + $0x60c] sm:$0xf]  ;;  %v8113_v14 = vld [vmem:[%s12628_s1 + $0x754] sm:$0xf0]  ;;  %v6312_v10 = vld [vmem:[%s12628_s1 + $0x728] sm:$0xf] }
  0xcf   :  { %v6135_v44 = vor.u32 %v8070_v54, %v6132_v55  ;;  %v8109_v33 = vld [vmem:[%s12628_s1 + $0x734] sm:$0xf0] }
  0xd0   :  { %1819 = vmatpush.bf16.msra.mxu0 %v6187_v63  ;;  %v8133_v63 = vld [vmem:[%s12628_s1 + $0x7f4] sm:$0xf0] }
  0xd1   :  { %1833 = vmatpush.bf16.msra.mxu1 %v6191_v1  ;;  %1847 = vmatpush.bf16.msra.mxu2 %v6195_v2  ;;  %v6127_v1 = vor.u32 %v8069_v47, %v6124_v48  ;;  %v6131_v2 = vor.u32 %v8072_v53, %v6130_v51  ;;  %v6409_v7 = vor.u32 %v8133_v63, %v6408_v62  ;;  %v9990_v41 = vpop.f32.mrf.mxu2  ;;  %v8121_v47 = vld [vmem:[%s12628_s1 + $0x794] sm:$0xf0]  ;;  %v6362_v53 = vld [vmem:[%s12628_s1 + $0x798] sm:$0xf0]  ;;  %v8116_v62 = vld [vmem:[%s12628_s1 + $0x76c] sm:$0xf0] }
  0xd2   :  { %1861 = vmatpush.bf16.msra.mxu3 %v6199_v5  ;;  %v6401_v5 = vor.u32 %v8132_v57, %v6400_v56  ;;  %v10001_v48 = vpop.f32.mrf.mxu3  ;;  %v6353_v56 = vor.u32 %v8120_v39, %v6352_v38  ;;  %v6313_v39 = vor.u32 %v8109_v33, %v6312_v10  ;;  %v8158_v10 = vld [vmem:[%s12628_s1 + $0x8b4] sm:$0xf0]  ;;  %v8156_v33 = vld [vmem:[%s12628_s1 + $0x8ac] sm:$0xf] }
  0xd4   :  { %1820 = vmatpush.bf16.msra.mxu0 %v6171_v11  ;;  %v8126_v11 = vld [vmem:[%s12628_s1 + $0x7c4] sm:$0xf] }
  0xd5   :  { %1834 = vmatpush.bf16.msra.mxu1 %v6175_v12  ;;  %1848 = vmatpush.bf16.msra.mxu2 %v6179_v13  ;;  %v6413_v12 = vor.u32 %v8131_v3, %v6410_v4  ;;  %v6386_v13 = vld [vmem:[%s12628_s1 + $0x7d0] sm:$0xf0]  ;;  %v8115_v3 = vld [vmem:[%s12628_s1 + $0x76c] sm:$0xf]  ;;  %v6346_v4 = vld [vmem:[%s12628_s1 + $0x778] sm:$0xf0] }
  0xd6   :  { %1862 = vmatpush.bf16.msra.mxu3 %v6183_v18  ;;  %v8127_v18 = vld [vmem:[%s12628_s1 + $0x7cc] sm:$0xf]  ;;  %v6389_v23 = vor.u32 %v8126_v11, %v6386_v13  ;;  %v6349_v9 = vor.u32 %v8115_v3, %v6346_v4  ;;  %v6328_v13 = vld [vmem:[%s12628_s1 + $0x748] sm:$0xf]  ;;  %v8101_v4 = vld [vmem:[%s12629_s0 + $0x38] sm:$0xff] }
  0xd7   :  { %v6329_v28 = vor.u32 %v8113_v14, %v6328_v13  ;;  %v8160_v14 = vld [vmem:[%s12628_s1 + $0x8cc] sm:$0xf] }
  0xd8   :  { %1821 = vmatpush.bf16.msra.mxu0 %v6155_v30  ;;  %v8122_v30 = vld [vmem:[%s12628_s1 + $0x7a4] sm:$0xf] }
  0xd9   :  { %1835 = vmatpush.bf16.msra.mxu1 %v6159_v31  ;;  %1849 = vmatpush.bf16.msra.mxu2 %v6163_v32  ;;  %v6397_v31 = vor.u32 %v8127_v18, %v6394_v19  ;;  %v6370_v32 = vld [vmem:[%s12628_s1 + $0x7b0] sm:$0xf0]  ;;  %v8111_v19 = vld [vmem:[%s12628_s1 + $0x74c] sm:$0xf] }
  0xda   :  { %1863 = vmatpush.bf16.msra.mxu3 %v6167_v15  ;;  %v6378_v15 = vld [vmem:[%s12628_s1 + $0x7b8] sm:$0xf0]  ;;  %v6373_v36 = vor.u32 %v8122_v30, %v6370_v32  ;;  %v8108_v30 = vld [vmem:[%s12628_s1 + $0x72c] sm:$0xf0]  ;;  %v6306_v32 = vld [vmem:[%s12628_s1 + $0x730] sm:$0xf0] }
  0xdb   :  { %v6381_v42 = vor.u32 %v8123_v34, %v6378_v15  ;;  %v8107_v34 = vld [vmem:[%s12628_s1 + $0x72c] sm:$0xf]  ;;  %v6314_v15 = vld [vmem:[%s12628_s1 + $0x738] sm:$0xf0] }
  0xdc   :  { %1822 = vmatpush.bf16.msra.mxu0 %v6139_v40  ;;  %v8118_v40 = vld [vmem:[%s12628_s1 + $0x784] sm:$0xf] }
  0xdd   :  { %1836 = vmatpush.bf16.msra.mxu1 %v6143_v43  ;;  %1850 = vmatpush.bf16.msra.mxu2 %v6147_v45  ;;  %v6354_v43 = vld [vmem:[%s12628_s1 + $0x790] sm:$0xf0]  ;;  %v6360_v45 = vld [vmem:[%s12628_s1 + $0x788] sm:$0xf] }
  0xde   :  { %1864 = vmatpush.bf16.msra.mxu3 %v6151_v52  ;;  %v8119_v52 = vld [vmem:[%s12628_s1 + $0x78c] sm:$0xf]  ;;  %v6357_v58 = vor.u32 %v8118_v40, %v6354_v43  ;;  %v8102_v40 = vld [vmem:[%s12628_s1 + $0x704] sm:$0xf]  ;;  %v6296_v43 = vld [vmem:[%s12628_s1 + $0x708] sm:$0xf] }
  0xdf   :  { %v6365_v63 = vor.u32 %v8119_v52, %v6362_v53  ;;  %v6298_v52 = vld [vmem:[%s12628_s1 + $0x718] sm:$0xf0]  ;;  %v6566_v53 = vld [vmem:[%s12628_s1 + $0x8e0] sm:$0xf] }
  0xe0   :  { %1823 = vmatpush.bf16.msra.mxu0 %v6123_v59  ;;  %v761_v51 = vpop.f32.mrf.mxu0  ;;  %v6361_v59 = vor.u32 %v8121_v47, %v6360_v45  ;;  %v6317_v45 = vor.u32 %v8107_v34, %v6314_v15  ;;  %v8105_v47 = vld [vmem:[%s12628_s1 + $0x714] sm:$0xf0]  ;;  %v6544_v34 = vld [vmem:[%s12628_s1 + $0x8b8] sm:$0xf0] }
  0xe1   :  { %1837 = vmatpush.bf16.msra.mxu1 %v6127_v1  ;;  %1851 = vmatpush.bf16.msra.mxu2 %v6131_v2  ;;  %v10010_v54 = vadd.f32 %v761_v51, %v9795_v61  ;;  %v775_v55 = vpop.f32.mrf.mxu1  ;;  %v8114_v61 = vld [vmem:[%s12628_s1 + $0x764] sm:$0xf]  ;;  %v6344_v1 = vld [vmem:[%s12628_s1 + $0x768] sm:$0xf]  ;;  %v8117_v2 = vld [vmem:[%s12628_s1 + $0x774] sm:$0xf0] }
  0xe2   :  { %1865 = vmatpush.bf16.msra.mxu3 %v6135_v44  ;;  %v10013_v57 = vadd.f32 %v775_v55, %v9798_v0  ;;  %v6338_v0 = vld [vmem:[%s12628_s1 + $0x770] sm:$0xf0]  ;;  %v6337_v44 = vor.u32 %v8116_v62, %v6336_v60  ;;  %v8103_v51 = vld [vmem:[%s12628_s1 + $0x70c] sm:$0xf]  ;;  %v8165_v55 = vld [vmem:[%s12628_s1 + $0x8ec] sm:$0xf0] }
  0xe3   :  { %1824 = vmatmul.bf16.vlgmr.msra.gmra.mxu0 %v8068_v49  ;;  %v6574_v60 = vld [vmem:[%s12628_s1 + $0x8e8] sm:$0xf]  ;;  %v8166_v62 = vld [vmem:[%s12628_s1 + $0x8f4] sm:$0xf0]  ;;  %v6567_v3 = vor.u32 %v8165_v55, %v6566_v53  ;;  %v8152_v53 = vld [vmem:[%s12628_s1 + $0x88c] sm:$0xf] }
  0xe4   :  { %2082 = vmatpush.bf16.msrb.mxu0 %v6401_v5  ;;  %1838 = vmatmul.bf16.vlgmr.msra.gmra.mxu1 %v8068_v49  ;;  %v6341_v5 = vor.u32 %v8114_v61, %v6338_v0  ;;  %v8164_v0 = vld [vmem:[%s12628_s1 + $0x8ec] sm:$0xf]  ;;  %v6528_v55 = vld [vmem:[%s12628_s1 + $0x898] sm:$0xf0] }
  0xe5   :  { %2096 = vmatpush.bf16.msrb.mxu1 %v6405_v6  ;;  %2110 = vmatpush.bf16.msrb.mxu2 %v6409_v7  ;;  %v6320_v6 = vld [vmem:[%s12628_s1 + $0x740] sm:$0xf]  ;;  %v8112_v7 = vld [vmem:[%s12628_s1 + $0x74c] sm:$0xf0] }
  0xe6   :  { %2124 = vmatpush.bf16.msrb.mxu3 %v6413_v12  ;;  %1852 = vmatmul.bf16.vlgmr.msra.gmra.mxu2 %v8068_v49  ;;  %v6322_v12 = vld [vmem:[%s12628_s1 + $0x750] sm:$0xf0] }
  0xe7   :  { %1866 = vmatmul.bf16.vlgmr.msra.gmra.mxu3 %v8068_v49  ;;  %v6345_v49 = vor.u32 %v8117_v2, %v6344_v1  ;;  %v6325_v27 = vor.u32 %v8110_v8, %v6322_v12  ;;  %v6576_v1 = vld [vmem:[%s12628_s1 + $0x8f8] sm:$0xf0]  ;;  %v6301_v2 = vor.u32 %v8103_v51, %v6298_v52  ;;  %v8162_v12 = vld [vmem:[%s12628_s1 + $0x8d4] sm:$0xf0] }
  0xe8   :  { %2083 = vmatpush.bf16.msrb.mxu0 %v6385_v22  ;;  %v6330_v22 = vld [vmem:[%s12628_s1 + $0x758] sm:$0xf0]  ;;  %v6579_v8 = vor.u32 %v8164_v0, %v6576_v1  ;;  %v10162_v13 = vpop.f32.mrf.mxu0  ;;  %v8149_v0 = vld [vmem:[%s12628_s1 + $0x86c] sm:$0xf0]  ;;  %v6531_v1 = vor.u32 %v8152_v53, %v6528_v55  ;;  %v6462_v53 = vld [vmem:[%s12628_s1 + $0x808] sm:$0xf] }
  0xe9   :  { %2097 = vmatpush.bf16.msrb.mxu1 %v6389_v23  ;;  %2111 = vmatpush.bf16.msrb.mxu2 %v6393_v25  ;;  %v789_v11 = vpop.f32.mrf.mxu2  ;;  %v6321_v25 = vor.u32 %v8112_v7, %v6320_v6  ;;  %v8161_v6 = vld [vmem:[%s12628_s1 + $0x8cc] sm:$0xf0]  ;;  %v8159_v7 = vld [vmem:[%s12628_s1 + $0x8c4] sm:$0xf] }
  0xea   :  { %2125 = vmatpush.bf16.msrb.mxu3 %v6397_v31  ;;  %v10058_v16 = vadd.f32 %v789_v11, %v9843_v24  ;;  %v803_v18 = vpop.f32.mrf.mxu3  ;;  %v6304_v24 = vld [vmem:[%s12628_s1 + $0x720] sm:$0xf]  ;;  %v8106_v31 = vld [vmem:[%s12628_s1 + $0x724] sm:$0xf]  ;;  %v6558_v11 = vld [vmem:[%s12628_s1 + $0x8c8] sm:$0xf] }
  0xeb   :  { %v10067_v23 = vadd.f32 %v803_v18, %v9852_v29  ;;  %v6333_v29 = vor.u32 %v8111_v19, %v6330_v22  ;;  %v6309_v38 = vor.u32 %v8106_v31, %v6306_v32  ;;  %v6560_v18 = vld [vmem:[%s12628_s1 + $0x8d8] sm:$0xf0]  ;;  %v10170_v19 = vpop.f32.mrf.mxu1  ;;  %v6542_v32 = vld [vmem:[%s12628_s1 + $0x8a8] sm:$0xf] }
  0xec   :  { %2084 = vmatpush.bf16.msrb.mxu0 %v6369_v35  ;;  %v6305_v35 = vor.u32 %v8108_v30, %v6304_v24  ;;  %v8157_v24 = vld [vmem:[%s12628_s1 + $0x8ac] sm:$0xf0]  ;;  %v8155_v30 = vld [vmem:[%s12628_s1 + $0x8a4] sm:$0xf]  ;;  %v6563_v31 = vor.u32 %v8160_v14, %v6560_v18  ;;  %v6488_v14 = vld [vmem:[%s12628_s1 + $0x850] sm:$0xf0] }
  0xed   :  { %2098 = vmatpush.bf16.msrb.mxu1 %v6373_v36  ;;  %2112 = vmatpush.bf16.msrb.mxu2 %v6377_v37  ;;  %v6288_v36 = vld [vmem:[%s12628_s1 + $0x700] sm:$0xf]  ;;  %v8104_v37 = vld [vmem:[%s12628_s1 + $0x70c] sm:$0xf0]  ;;  %v6494_v18 = vld [vmem:[%s12628_s1 + $0x848] sm:$0xf] }
  0xee   :  { %2126 = vmatpush.bf16.msrb.mxu3 %v6381_v42  ;;  %v6290_v42 = vld [vmem:[%s12628_s1 + $0x710] sm:$0xf0] }
  0xef   :  { %v6293_v61 = vor.u32 %v8102_v40, %v6290_v42  ;;  %v6547_v42 = vor.u32 %v8156_v33, %v6544_v34  ;;  %v8139_v33 = vld [vmem:[%s12628_s1 + $0x824] sm:$0xf]  ;;  %v6472_v34 = vld [vmem:[%s12628_s1 + $0x830] sm:$0xf0] }
  0xf0   :  { %2085 = vmatpush.bf16.msrb.mxu0 %v6353_v56  ;;  %v8163_v56 = vld [vmem:[%s12628_s1 + $0x8e4] sm:$0xf] }
  0xf1   :  { %2099 = vmatpush.bf16.msrb.mxu1 %v6357_v58  ;;  %2113 = vmatpush.bf16.msrb.mxu2 %v6361_v59  ;;  %v6289_v58 = vor.u32 %v8104_v37, %v6288_v36  ;;  %v6568_v59 = vld [vmem:[%s12628_s1 + $0x8f0] sm:$0xf0]  ;;  %v6543_v36 = vor.u32 %v8158_v10, %v6542_v32  ;;  %v6518_v37 = vld [vmem:[%s12628_s1 + $0x880] sm:$0xf]  ;;  %v10205_v40 = vpop.f32.mrf.mxu2  ;;  %v8141_v10 = vld [vmem:[%s12628_s1 + $0x82c] sm:$0xf0] }
  0xf2   :  { %2127 = vmatpush.bf16.msrb.mxu3 %v6365_v63  ;;  %v6297_v63 = vor.u32 %v8105_v47, %v6296_v43  ;;  %v6520_v43 = vld [vmem:[%s12628_s1 + $0x890] sm:$0xf0]  ;;  %v8154_v47 = vld [vmem:[%s12628_s1 + $0x894] sm:$0xf0]  ;;  %v10216_v51 = vpop.f32.mrf.mxu3 }
  0xf4   :  { %2086 = vmatpush.bf16.msrb.mxu0 %v6337_v44  ;;  %v6571_v44 = vor.u32 %v8163_v56, %v6568_v59 }
  0xf5   :  { %2100 = vmatpush.bf16.msrb.mxu1 %v6341_v5  ;;  %2114 = vmatpush.bf16.msrb.mxu2 %v6345_v49  ;;  %v6575_v5 = vor.u32 %v8166_v62, %v6574_v60  ;;  %v6550_v49 = vld [vmem:[%s12628_s1 + $0x8c0] sm:$0xf] }
  0xf6   :  { %2128 = vmatpush.bf16.msrb.mxu3 %v6349_v9  ;;  %v6552_v9 = vld [vmem:[%s12628_s1 + $0x8d0] sm:$0xf0]  ;;  %v6551_v22 = vor.u32 %v8161_v6, %v6550_v49 }
  0xf8   :  { %2087 = vmatpush.bf16.msrb.mxu0 %v6321_v25  ;;  %v6555_v25 = vor.u32 %v8159_v7, %v6552_v9  ;;  %v6486_v7 = vld [vmem:[%s12628_s1 + $0x840] sm:$0xf]  ;;  %v8143_v9 = vld [vmem:[%s12628_s1 + $0x844] sm:$0xf] }
  0xf9   :  { %2101 = vmatpush.bf16.msrb.mxu1 %v6325_v27  ;;  %2115 = vmatpush.bf16.msrb.mxu2 %v6329_v28  ;;  %v6559_v27 = vor.u32 %v8162_v12, %v6558_v11  ;;  %v6534_v28 = vld [vmem:[%s12628_s1 + $0x8a0] sm:$0xf] }
  0xfa   :  { %2129 = vmatpush.bf16.msrb.mxu3 %v6333_v29  ;;  %v6536_v29 = vld [vmem:[%s12628_s1 + $0x8b0] sm:$0xf0]  ;;  %v6535_v15 = vor.u32 %v8157_v24, %v6534_v28  ;;  %v8144_v28 = vld [vmem:[%s12628_s1 + $0x84c] sm:$0xf]  ;;  %v6496_v24 = vld [vmem:[%s12628_s1 + $0x858] sm:$0xf0] }
  0xfc   :  { %2088 = vmatpush.bf16.msrb.mxu0 %v6305_v35  ;;  %v6539_v35 = vor.u32 %v8155_v30, %v6536_v29  ;;  %v6491_v29 = vor.u32 %v8143_v9, %v6488_v14  ;;  %v8192_v14 = vld [vmem:[%s12628_s1 + $0x9c4] sm:$0xf] }
  0xfd   :  { %2102 = vmatpush.bf16.msrb.mxu1 %v6309_v38  ;;  %2116 = vmatpush.bf16.msrb.mxu2 %v6313_v39  ;;  %v8153_v38 = vld [vmem:[%s12628_s1 + $0x88c] sm:$0xf0]  ;;  %v8151_v39 = vld [vmem:[%s12628_s1 + $0x884] sm:$0xf] }
  0xfe   :  { %2130 = vmatpush.bf16.msrb.mxu3 %v6317_v45  ;;  %v6526_v45 = vld [vmem:[%s12628_s1 + $0x888] sm:$0xf]  ;;  %v6519_v59 = vor.u32 %v8153_v38, %v6518_v37  ;;  %v6523_v62 = vor.u32 %v8151_v39, %v6520_v43  ;;  %v6480_v37 = vld [vmem:[%s12628_s1 + $0x838] sm:$0xf0]  ;;  %v6454_v39 = vld [vmem:[%s12628_s1 + $0x800] sm:$0xf]  ;;  %v6475_v43 = vor.u32 %v8139_v33, %v6472_v34 }
  0xff   :  { %v8190_v34 = vld [vmem:[%s12628_s1 + $0x9ac] sm:$0xf0] }
 0x100   :  { %2089 = vmatpush.bf16.msrb.mxu0 %v6289_v58  ;;  %v1027_v52 = vpop.f32.mrf.mxu0 }
 0x101   :  { %2103 = vmatpush.bf16.msrb.mxu1 %v6293_v61  ;;  %2117 = vmatpush.bf16.msrb.mxu2 %v6297_v63  ;;  %v10225_v56 = vadd.f32 %v1027_v52, %v10010_v54  ;;  %v1041_v58 = vpop.f32.mrf.mxu1  ;;  %v6527_v61 = vor.u32 %v8154_v47, %v6526_v45  ;;  %v6502_v63 = vld [vmem:[%s12628_s1 + $0x860] sm:$0xf]  ;;  %v8147_v54 = vld [vmem:[%s12628_s1 + $0x864] sm:$0xf]  ;;  %v6456_v52 = vld [vmem:[%s12628_s1 + $0x810] sm:$0xf0] }
 0x102   :  { %2131 = vmatpush.bf16.msrb.mxu3 %v6301_v2  ;;  %v10228_v60 = vadd.f32 %v1041_v58, %v10013_v57  ;;  %v6504_v57 = vld [vmem:[%s12628_s1 + $0x870] sm:$0xf0]  ;;  %v6510_v2 = vld [vmem:[%s12628_s1 + $0x868] sm:$0xf]  ;;  %v8135_v47 = vld [vmem:[%s12628_s1 + $0x804] sm:$0xf] }
 0x103   :  { %2090 = vmatmul.bf16.vlgmr.msrb.gmra.mxu0 %v8101_v4  ;;  %v6507_v49 = vor.u32 %v8147_v54, %v6504_v57  ;;  %v8138_v58 = vld [vmem:[%s12628_s1 + $0x814] sm:$0xf0]  ;;  %v6740_v57 = vld [vmem:[%s12628_s1 + $0x9e8] sm:$0xf] }
 0x104   :  { %2348 = vmatpush.bf16.msra.mxu0 %v6567_v3  ;;  %2104 = vmatmul.bf16.vlgmr.msrb.gmra.mxu1 %v8101_v4  ;;  %v8150_v3 = vld [vmem:[%s12628_s1 + $0x874] sm:$0xf0] }
 0x105   :  { %2362 = vmatpush.bf16.msra.mxu1 %v6571_v44  ;;  %2376 = vmatpush.bf16.msra.mxu2 %v6575_v5  ;;  %v6512_v44 = vld [vmem:[%s12628_s1 + $0x878] sm:$0xf0]  ;;  %v6503_v5 = vor.u32 %v8149_v0, %v6502_v63  ;;  %v6511_v6 = vor.u32 %v8150_v3, %v6510_v2  ;;  %v8198_v63 = vld [vmem:[%s12628_s1 + $0x9ec] sm:$0xf0]  ;;  %v8196_v0 = vld [vmem:[%s12628_s1 + $0x9e4] sm:$0xf]  ;;  %v6459_v3 = vor.u32 %v8135_v47, %v6456_v52 }
 0x106   :  { %2390 = vmatpush.bf16.msra.mxu3 %v6579_v8  ;;  %2118 = vmatmul.bf16.vlgmr.msrb.gmra.mxu2 %v8101_v4  ;;  %v8145_v8 = vld [vmem:[%s12628_s1 + $0x84c] sm:$0xf0]  ;;  %v8199_v2 = vld [vmem:[%s12628_s1 + $0x9f4] sm:$0xf0]  ;;  %v6684_v52 = vld [vmem:[%s12628_s1 + $0x980] sm:$0xf] }
 0x107   :  { %2132 = vmatmul.bf16.vlgmr.msrb.gmra.mxu3 %v8101_v4  ;;  %v8148_v4 = vld [vmem:[%s12628_s1 + $0x86c] sm:$0xf]  ;;  %v6741_v9 = vor.u32 %v8199_v2, %v6740_v57  ;;  %v6694_v57 = vld [vmem:[%s12628_s1 + $0x998] sm:$0xf0] }
 0x108   :  { %2349 = vmatpush.bf16.msra.mxu0 %v6551_v22  ;;  %v6515_v11 = vor.u32 %v8148_v4, %v6512_v44  ;;  %v8146_v22 = vld [vmem:[%s12628_s1 + $0x854] sm:$0xf0]  ;;  %v6463_v4 = vor.u32 %v8138_v58, %v6462_v53  ;;  %v8197_v44 = vld [vmem:[%s12628_s1 + $0x9ec] sm:$0xf]  ;;  %v8186_v53 = vld [vmem:[%s12628_s1 + $0x98c] sm:$0xf0] }
 0x109   :  { %2363 = vmatpush.bf16.msra.mxu1 %v6555_v25  ;;  %2377 = vmatpush.bf16.msra.mxu2 %v6559_v27  ;;  %v1055_v12 = vpop.f32.mrf.mxu2  ;;  %v6495_v32 = vor.u32 %v8146_v22, %v6494_v18  ;;  %v6718_v22 = vld [vmem:[%s12628_s1 + $0x9d0] sm:$0xf0] }
 0x10a   :  { %2391 = vmatpush.bf16.msra.mxu3 %v6563_v31  ;;  %v10273_v25 = vadd.f32 %v1055_v12, %v10058_v16  ;;  %v1069_v27 = vpop.f32.mrf.mxu3  ;;  %v6487_v31 = vor.u32 %v8145_v8, %v6486_v7  ;;  %v6470_v16 = vld [vmem:[%s12628_s1 + $0x820] sm:$0xf]  ;;  %v8194_v12 = vld [vmem:[%s12628_s1 + $0x9cc] sm:$0xf0] }
 0x10b   :  { %v10282_v30 = vadd.f32 %v1069_v27, %v10067_v23  ;;  %v6499_v23 = vor.u32 %v8144_v28, %v6496_v24  ;;  %v6471_v38 = vor.u32 %v8141_v10, %v6470_v16  ;;  %v8134_v7 = vld [vmem:[%s12629_s0 + $0x40] sm:$0xff]  ;;  %v6724_v27 = vld [vmem:[%s12628_s1 + $0x9c8] sm:$0xf]  ;;  %v8195_v28 = vld [vmem:[%s12628_s1 + $0x9d4] sm:$0xf0]  ;;  %v10377_v24 = vpop.f32.mrf.mxu0  ;;  %v6721_v10 = vor.u32 %v8192_v14, %v6718_v22 }
 0x10c   :  { %2350 = vmatpush.bf16.msra.mxu0 %v6535_v15  ;;  %v6478_v15 = vld [vmem:[%s12628_s1 + $0x828] sm:$0xf]  ;;  %v6725_v33 = vor.u32 %v8195_v28, %v6724_v27  ;;  %v6678_v14 = vld [vmem:[%s12628_s1 + $0x978] sm:$0xf0]  ;;  %v6652_v28 = vld [vmem:[%s12628_s1 + $0x940] sm:$0xf] }
 0x10d   :  { %2364 = vmatpush.bf16.msra.mxu1 %v6539_v35  ;;  %2378 = vmatpush.bf16.msra.mxu2 %v6543_v36  ;;  %v8142_v35 = vld [vmem:[%s12628_s1 + $0x834] sm:$0xf0]  ;;  %v8140_v36 = vld [vmem:[%s12628_s1 + $0x82c] sm:$0xf] }
 0x10e   :  { %2392 = vmatpush.bf16.msra.mxu3 %v6547_v42  ;;  %v8137_v42 = vld [vmem:[%s12628_s1 + $0x80c] sm:$0xf0]  ;;  %v6479_v45 = vor.u32 %v8142_v35, %v6478_v15  ;;  %v6483_v55 = vor.u32 %v8140_v36, %v6480_v37  ;;  %v8188_v15 = vld [vmem:[%s12628_s1 + $0x9a4] sm:$0xf]  ;;  %v6702_v36 = vld [vmem:[%s12628_s1 + $0x9b0] sm:$0xf0] }
 0x10f   :  { %v6455_v54 = vor.u32 %v8137_v42, %v6454_v39  ;;  %v6708_v37 = vld [vmem:[%s12628_s1 + $0x9a8] sm:$0xf]  ;;  %v8189_v39 = vld [vmem:[%s12628_s1 + $0x9ac] sm:$0xf]  ;;  %v6710_v42 = vld [vmem:[%s12628_s1 + $0x9b8] sm:$0xf0] }
 0x110   :  { %2351 = vmatpush.bf16.msra.mxu0 %v6519_v59  ;;  %v8136_v59 = vld [vmem:[%s12628_s1 + $0x80c] sm:$0xf] }
 0x111   :  { %2365 = vmatpush.bf16.msra.mxu1 %v6523_v62  ;;  %2379 = vmatpush.bf16.msra.mxu2 %v6527_v61  ;;  %v6464_v62 = vld [vmem:[%s12628_s1 + $0x818] sm:$0xf0]  ;;  %v6732_v61 = vld [vmem:[%s12628_s1 + $0x9e0] sm:$0xf]  ;;  %v10420_v58 = vpop.f32.mrf.mxu2 }
 0x112   :  { %2393 = vmatpush.bf16.msra.mxu3 %v6531_v1  ;;  %v6734_v1 = vld [vmem:[%s12628_s1 + $0x9f0] sm:$0xf0] }
 0x113   :  { %v6737_v8 = vor.u32 %v8196_v0, %v6734_v1  ;;  %v10431_v0 = vpop.f32.mrf.mxu3  ;;  %v8185_v1 = vld [vmem:[%s12628_s1 + $0x98c] sm:$0xf] }
 0x114   :  { %2352 = vmatpush.bf16.msra.mxu0 %v6503_v5  ;;  %v6742_v5 = vld [vmem:[%s12628_s1 + $0x9f8] sm:$0xf0] }
 0x115   :  { %2366 = vmatpush.bf16.msra.mxu1 %v6507_v49  ;;  %2380 = vmatpush.bf16.msra.mxu2 %v6511_v6  ;;  %v6467_v49 = vor.u32 %v8136_v59, %v6464_v62  ;;  %v6733_v6 = vor.u32 %v8198_v63, %v6732_v61  ;;  %v6745_v18 = vor.u32 %v8197_v44, %v6742_v5  ;;  %v6686_v62 = vld [vmem:[%s12628_s1 + $0x990] sm:$0xf0]  ;;  %v6692_v61 = vld [vmem:[%s12628_s1 + $0x988] sm:$0xf]  ;;  %v8187_v63 = vld [vmem:[%s12628_s1 + $0x994] sm:$0xf0] }
 0x116   :  { %2394 = vmatpush.bf16.msra.mxu3 %v6515_v11  ;;  %v6716_v11 = vld [vmem:[%s12628_s1 + $0x9c0] sm:$0xf]  ;;  %v6713_v59 = vor.u32 %v8189_v39, %v6710_v42 }
 0x117   :  { %v6717_v16 = vor.u32 %v8194_v12, %v6716_v11  ;;  %v8183_v11 = vld [vmem:[%s12628_s1 + $0x974] sm:$0xf0]  ;;  %v8181_v12 = vld [vmem:[%s12628_s1 + $0x96c] sm:$0xf] }
 0x118   :  { %2353 = vmatpush.bf16.msra.mxu0 %v6487_v31  ;;  %v8193_v31 = vld [vmem:[%s12628_s1 + $0x9cc] sm:$0xf] }
 0x119   :  { %2367 = vmatpush.bf16.msra.mxu1 %v6491_v29  ;;  %2381 = vmatpush.bf16.msra.mxu2 %v6495_v32  ;;  %v6726_v29 = vld [vmem:[%s12628_s1 + $0x9d8] sm:$0xf0]  ;;  %v10385_v32 = vpop.f32.mrf.mxu1 }
 0x11a   :  { %2395 = vmatpush.bf16.msra.mxu3 %v6499_v23  ;;  %v6700_v23 = vld [vmem:[%s12628_s1 + $0x9a0] sm:$0xf]  ;;  %v6729_v35 = vor.u32 %v8193_v31, %v6726_v29  ;;  %v8178_v31 = vld [vmem:[%s12628_s1 + $0x94c] sm:$0xf0]  ;;  %v8176_v29 = vld [vmem:[%s12628_s1 + $0x944] sm:$0xf] }
 0x11b   :  { %v6653_v39 = vor.u32 %v8178_v31, %v6652_v28  ;;  %v8230_v28 = vld [vmem:[%s12628_s1 + $0xaec] sm:$0xf]  ;;  %v6908_v31 = vld [vmem:[%s12628_s1 + $0xaf8] sm:$0xf0] }
 0x11c   :  { %2354 = vmatpush.bf16.msra.mxu0 %v6471_v38  ;;  %v8191_v38 = vld [vmem:[%s12628_s1 + $0x9b4] sm:$0xf0] }
 0x11d   :  { %2368 = vmatpush.bf16.msra.mxu1 %v6475_v43  ;;  %2382 = vmatpush.bf16.msra.mxu2 %v6479_v45  ;;  %v6701_v43 = vor.u32 %v8190_v34, %v6700_v23  ;;  %v6705_v45 = vor.u32 %v8188_v15, %v6702_v36  ;;  %v6709_v47 = vor.u32 %v8191_v38, %v6708_v37  ;;  %v6660_v23 = vld [vmem:[%s12628_s1 + $0x948] sm:$0xf]  ;;  %v8179_v34 = vld [vmem:[%s12628_s1 + $0x954] sm:$0xf0]  ;;  %v8177_v36 = vld [vmem:[%s12628_s1 + $0x94c] sm:$0xf] }
 0x11e   :  { %2396 = vmatpush.bf16.msra.mxu3 %v6483_v55  ;;  %v8184_v55 = vld [vmem:[%s12628_s1 + $0x984] sm:$0xf]  ;;  %v6662_v37 = vld [vmem:[%s12628_s1 + $0x958] sm:$0xf0] }
 0x11f   :  { %v6689_v5 = vor.u32 %v8184_v55, %v6686_v62  ;;  %v8175_v55 = vld [vmem:[%s12628_s1 + $0x934] sm:$0xf0]  ;;  %v6646_v62 = vld [vmem:[%s12628_s1 + $0x938] sm:$0xf0] }
 0x120   :  { %2355 = vmatpush.bf16.msra.mxu0 %v6455_v54  ;;  %v1293_v54 = vpop.f32.mrf.mxu0 }
 0x121   :  { %2369 = vmatpush.bf16.msra.mxu1 %v6459_v3  ;;  %2383 = vmatpush.bf16.msra.mxu2 %v6463_v4  ;;  %v10440_v2 = vadd.f32 %v1293_v54, %v10225_v56  ;;  %v1307_v3 = vpop.f32.mrf.mxu1  ;;  %v6685_v4 = vor.u32 %v8186_v53, %v6684_v52  ;;  %v8180_v56 = vld [vmem:[%s12628_s1 + $0x964] sm:$0xf]  ;;  %v6638_v52 = vld [vmem:[%s12628_s1 + $0x930] sm:$0xf0]  ;;  %v6644_v53 = vld [vmem:[%s12628_s1 + $0x928] sm:$0xf] }
 0x122   :  { %2397 = vmatpush.bf16.msra.mxu3 %v6467_v49  ;;  %v10443_v44 = vadd.f32 %v1307_v3, %v10228_v60  ;;  %v6693_v49 = vor.u32 %v8187_v63, %v6692_v61  ;;  %v6670_v60 = vld [vmem:[%s12628_s1 + $0x970] sm:$0xf0]  ;;  %v6620_v63 = vld [vmem:[%s12628_s1 + $0x900] sm:$0xf]  ;;  %v8170_v54 = vld [vmem:[%s12628_s1 + $0x90c] sm:$0xf0] }
 0x123   :  { %2356 = vmatmul.bf16.vlgmr.msra.gmra.mxu0 %v8134_v7  ;;  %v6673_v22 = vor.u32 %v8180_v56, %v6670_v60  ;;  %v8168_v3 = vld [vmem:[%s12628_s1 + $0x904] sm:$0xf]  ;;  %v6630_v56 = vld [vmem:[%s12628_s1 + $0x918] sm:$0xf0]  ;;  %v8231_v60 = vld [vmem:[%s12628_s1 + $0xaec] sm:$0xf0] }
 0x124   :  { %2614 = vmatpush.bf16.msrb.mxu0 %v6733_v6  ;;  %2370 = vmatmul.bf16.vlgmr.msra.gmra.mxu1 %v8134_v7  ;;  %v6668_v6 = vld [vmem:[%s12628_s1 + $0x960] sm:$0xf] }
 0x125   :  { %2628 = vmatpush.bf16.msrb.mxu1 %v6737_v8  ;;  %2642 = vmatpush.bf16.msrb.mxu2 %v6741_v9  ;;  %v6697_v8 = vor.u32 %v8185_v1, %v6694_v57  ;;  %v6676_v9 = vld [vmem:[%s12628_s1 + $0x968] sm:$0xf]  ;;  %v6645_v57 = vor.u32 %v8175_v55, %v6644_v53  ;;  %v6866_v53 = vld [vmem:[%s12628_s1 + $0xaa0] sm:$0xf]  ;;  %v8223_v55 = vld [vmem:[%s12628_s1 + $0xaac] sm:$0xf0] }
 0x126   :  { %2656 = vmatpush.bf16.msrb.mxu3 %v6745_v18  ;;  %2384 = vmatmul.bf16.vlgmr.msra.gmra.mxu2 %v8134_v7  ;;  %v6677_v27 = vor.u32 %v8183_v11, %v6676_v9  ;;  %v8229_v9 = vld [vmem:[%s12628_s1 + $0xae4] sm:$0xf]  ;;  %v6621_v11 = vor.u32 %v8170_v54, %v6620_v63  ;;  %v6874_v63 = vld [vmem:[%s12628_s1 + $0xaa8] sm:$0xf]  ;;  %v8224_v54 = vld [vmem:[%s12628_s1 + $0xab4] sm:$0xf0] }
 0x127   :  { %2398 = vmatmul.bf16.vlgmr.msra.gmra.mxu3 %v8134_v7  ;;  %v8182_v7 = vld [vmem:[%s12628_s1 + $0x96c] sm:$0xf0] }
 0x128   :  { %2615 = vmatpush.bf16.msrb.mxu0 %v6717_v16  ;;  %v6669_v18 = vor.u32 %v8182_v7, %v6668_v6  ;;  %v6681_v16 = vor.u32 %v8181_v12, %v6678_v14  ;;  %v8171_v6 = vld [vmem:[%s12628_s1 + $0x914] sm:$0xf0]  ;;  %v8169_v7 = vld [vmem:[%s12628_s1 + $0x90c] sm:$0xf]  ;;  %v6900_v12 = vld [vmem:[%s12628_s1 + $0xaf0] sm:$0xf0] }
 0x129   :  { %2629 = vmatpush.bf16.msrb.mxu1 %v6721_v10  ;;  %2643 = vmatpush.bf16.msrb.mxu2 %v6725_v33  ;;  %v1321_v10 = vpop.f32.mrf.mxu2  ;;  %v6654_v33 = vld [vmem:[%s12628_s1 + $0x950] sm:$0xf0]  ;;  %v6906_v14 = vld [vmem:[%s12628_s1 + $0xae8] sm:$0xf] }
 0x12a   :  { %2657 = vmatpush.bf16.msrb.mxu3 %v6729_v35  ;;  %v10488_v15 = vadd.f32 %v1321_v10, %v10273_v25  ;;  %v1335_v35 = vpop.f32.mrf.mxu3  ;;  %v6657_v42 = vor.u32 %v8176_v29, %v6654_v33  ;;  %v6636_v25 = vld [vmem:[%s12628_s1 + $0x920] sm:$0xf]  ;;  %v6633_v29 = vor.u32 %v8169_v7, %v6630_v56  ;;  %v8167_v10 = vld [vmem:[%s12629_s0 + $0x48] sm:$0xff]  ;;  %v6903_v33 = vor.u32 %v8229_v9, %v6900_v12  ;;  %v8217_v7 = vld [vmem:[%s12628_s1 + $0xa84] sm:$0xf] }
 0x12b   :  { %v10497_v38 = vadd.f32 %v1335_v35, %v10282_v30  ;;  %v6665_v30 = vor.u32 %v8177_v36, %v6662_v37  ;;  %v8227_v35 = vld [vmem:[%s12628_s1 + $0xacc] sm:$0xf0]  ;;  %v8225_v36 = vld [vmem:[%s12628_s1 + $0xac4] sm:$0xf]  ;;  %v6911_v37 = vor.u32 %v8230_v28, %v6908_v31  ;;  %v8220_v9 = vld [vmem:[%s12628_s1 + $0xa94] sm:$0xf0] }
 0x12c   :  { %2616 = vmatpush.bf16.msrb.mxu0 %v6701_v43  ;;  %v6661_v43 = vor.u32 %v8179_v34, %v6660_v23  ;;  %v6882_v34 = vld [vmem:[%s12628_s1 + $0xac0] sm:$0xf]  ;;  %v6860_v12 = vld [vmem:[%s12628_s1 + $0xa98] sm:$0xf0]  ;;  %v8215_v28 = vld [vmem:[%s12628_s1 + $0xa6c] sm:$0xf0] }
 0x12d   :  { %2630 = vmatpush.bf16.msrb.mxu1 %v6705_v45  ;;  %2644 = vmatpush.bf16.msrb.mxu2 %v6709_v47  ;;  %v8174_v45 = vld [vmem:[%s12628_s1 + $0x92c] sm:$0xf0]  ;;  %v8172_v47 = vld [vmem:[%s12628_s1 + $0x924] sm:$0xf] }
 0x12e   :  { %2658 = vmatpush.bf16.msrb.mxu3 %v6713_v59  ;;  %v8173_v59 = vld [vmem:[%s12628_s1 + $0x92c] sm:$0xf]  ;;  %v6637_v61 = vor.u32 %v8174_v45, %v6636_v25  ;;  %v6641_v1 = vor.u32 %v8172_v47, %v6638_v52  ;;  %v6892_v45 = vld [vmem:[%s12628_s1 + $0xad8] sm:$0xf0]  ;;  %v6883_v47 = vor.u32 %v8227_v35, %v6882_v34  ;;  %v8213_v31 = vld [vmem:[%s12628_s1 + $0xa64] sm:$0xf] }
 0x12f   :  { %v8226_v25 = vld [vmem:[%s12628_s1 + $0xacc] sm:$0xf]  ;;  %v6844_v35 = vld [vmem:[%s12628_s1 + $0xa78] sm:$0xf0] }
 0x130   :  { %2617 = vmatpush.bf16.msrb.mxu0 %v6685_v4  ;;  %v6622_v4 = vld [vmem:[%s12628_s1 + $0x910] sm:$0xf0]  ;;  %v8214_v34 = vld [vmem:[%s12628_s1 + $0xa6c] sm:$0xf] }
 0x131   :  { %2631 = vmatpush.bf16.msrb.mxu1 %v6689_v5  ;;  %2645 = vmatpush.bf16.msrb.mxu2 %v6693_v49  ;;  %v6628_v5 = vld [vmem:[%s12628_s1 + $0x908] sm:$0xf]  ;;  %v6649_v49 = vor.u32 %v8173_v59, %v6646_v62  ;;  %v8221_v59 = vld [vmem:[%s12628_s1 + $0xaa4] sm:$0xf]  ;;  %v6895_v62 = vor.u32 %v8226_v25, %v6892_v45  ;;  %v8211_v25 = vld [vmem:[%s12628_s1 + $0xa4c] sm:$0xf0] }
 0x132   :  { %2659 = vmatpush.bf16.msrb.mxu3 %v6697_v8  ;;  %v6898_v8 = vld [vmem:[%s12628_s1 + $0xae0] sm:$0xf]  ;;  %v8209_v45 = vld [vmem:[%s12628_s1 + $0xa44] sm:$0xf] }
 0x134   :  { %2618 = vmatpush.bf16.msrb.mxu0 %v6669_v18  ;;  %v8232_v18 = vld [vmem:[%s12628_s1 + $0xaf4] sm:$0xf0] }
 0x135   :  { %2632 = vmatpush.bf16.msrb.mxu1 %v6673_v22  ;;  %2646 = vmatpush.bf16.msrb.mxu2 %v6677_v27  ;;  %v6625_v22 = vor.u32 %v8168_v3, %v6622_v4  ;;  %v6629_v27 = vor.u32 %v8171_v6, %v6628_v5  ;;  %v6907_v23 = vor.u32 %v8232_v18, %v6906_v14  ;;  %v8219_v6 = vld [vmem:[%s12628_s1 + $0xa8c] sm:$0xf0] }
 0x136   :  { %2660 = vmatpush.bf16.msrb.mxu3 %v6681_v16  ;;  %v6899_v16 = vor.u32 %v8231_v60, %v6898_v8  ;;  %v6867_v3 = vor.u32 %v8223_v55, %v6866_v53  ;;  %v6875_v5 = vor.u32 %v8224_v54, %v6874_v63  ;;  %v6852_v8 = vld [vmem:[%s12628_s1 + $0xa90] sm:$0xf0]  ;;  %v6858_v60 = vld [vmem:[%s12628_s1 + $0xa88] sm:$0xf]  ;;  %v8212_v53 = vld [vmem:[%s12628_s1 + $0xa54] sm:$0xf0] }
 0x137   :  { %v6855_v18 = vor.u32 %v8217_v7, %v6852_v8  ;;  %v8210_v55 = vld [vmem:[%s12628_s1 + $0xa4c] sm:$0xf]  ;;  %v6802_v54 = vld [vmem:[%s12628_s1 + $0xa20] sm:$0xf]  ;;  %v10718_v7 = vpop.f32.mrf.mxu3 }
 0x138   :  { %2619 = vmatpush.bf16.msrb.mxu0 %v6653_v39  ;;  %v6884_v39 = vld [vmem:[%s12628_s1 + $0xad0] sm:$0xf0]  ;;  %v8206_v8 = vld [vmem:[%s12628_s1 + $0xa2c] sm:$0xf] }
 0x139   :  { %2633 = vmatpush.bf16.msrb.mxu1 %v6657_v42  ;;  %2647 = vmatpush.bf16.msrb.mxu2 %v6661_v43  ;;  %v6890_v42 = vld [vmem:[%s12628_s1 + $0xac8] sm:$0xf]  ;;  %v8228_v43 = vld [vmem:[%s12628_s1 + $0xad4] sm:$0xf0] }
 0x13a   :  { %2661 = vmatpush.bf16.msrb.mxu3 %v6665_v30  ;;  %v6887_v30 = vor.u32 %v8225_v36, %v6884_v39  ;;  %v6891_v52 = vor.u32 %v8228_v43, %v6890_v42  ;;  %v10672_v36 = vpop.f32.mrf.mxu1  ;;  %v6818_v43 = vld [vmem:[%s12628_s1 + $0xa40] sm:$0xf] }
 0x13c   :  { %2620 = vmatpush.bf16.msrb.mxu0 %v6637_v61  ;;  %v6868_v61 = vld [vmem:[%s12628_s1 + $0xab0] sm:$0xf0] }
 0x13d   :  { %2634 = vmatpush.bf16.msrb.mxu1 %v6641_v1  ;;  %2648 = vmatpush.bf16.msrb.mxu2 %v6645_v57  ;;  %v8222_v1 = vld [vmem:[%s12628_s1 + $0xaac] sm:$0xf]  ;;  %v6876_v57 = vld [vmem:[%s12628_s1 + $0xab8] sm:$0xf0]  ;;  %v6871_v4 = vor.u32 %v8221_v59, %v6868_v61 }
 0x13e   :  { %2662 = vmatpush.bf16.msrb.mxu3 %v6649_v49  ;;  %v6850_v49 = vld [vmem:[%s12628_s1 + $0xa80] sm:$0xf]  ;;  %v6879_v56 = vor.u32 %v8222_v1, %v6876_v57  ;;  %v6828_v59 = vld [vmem:[%s12628_s1 + $0xa58] sm:$0xf0]  ;;  %v8207_v1 = vld [vmem:[%s12628_s1 + $0xa2c] sm:$0xf0] }
 0x13f   :  { %v6851_v14 = vor.u32 %v8219_v6, %v6850_v49  ;;  %v8205_v57 = vld [vmem:[%s12628_s1 + $0xa24] sm:$0xf]  ;;  %v6810_v49 = vld [vmem:[%s12628_s1 + $0xa28] sm:$0xf]  ;;  %v8208_v6 = vld [vmem:[%s12628_s1 + $0xa34] sm:$0xf0] }
 0x140   :  { %2621 = vmatpush.bf16.msrb.mxu0 %v6621_v11  ;;  %v8218_v11 = vld [vmem:[%s12628_s1 + $0xa8c] sm:$0xf] }
 0x141   :  { %2635 = vmatpush.bf16.msrb.mxu1 %v6625_v22  ;;  %2649 = vmatpush.bf16.msrb.mxu2 %v6629_v27  ;;  %v6859_v22 = vor.u32 %v8220_v9, %v6858_v60  ;;  %v6834_v27 = vld [vmem:[%s12628_s1 + $0xa60] sm:$0xf]  ;;  %v6812_v60 = vld [vmem:[%s12628_s1 + $0xa38] sm:$0xf0] }
 0x142   :  { %2663 = vmatpush.bf16.msrb.mxu3 %v6633_v29  ;;  %v6863_v29 = vor.u32 %v8218_v11, %v6860_v12  ;;  %v10728_v9 = vpop.f32.mrf.mxu1  ;;  %v6803_v11 = vor.u32 %v8207_v1, %v6802_v54  ;;  %v6786_v12 = vld [vmem:[%s12628_s1 + $0xa00] sm:$0xf] }
 0x143   :  { %2622 = vmatmul.bf16.vlgmr.msrb.gmra.mxu0 %v8167_v10  ;;  %v7048_v1 = vld [vmem:[%s12628_s1 + $0xbc0] sm:$0xf] }
 0x144   :  { %2880 = vmatpush.bf16.msra.mxu0 %v6899_v16  ;;  %2636 = vmatmul.bf16.vlgmr.msrb.gmra.mxu1 %v8167_v10  ;;  %v6836_v16 = vld [vmem:[%s12628_s1 + $0xa70] sm:$0xf0] }
 0x145   :  { %2894 = vmatpush.bf16.msra.mxu1 %v6903_v33  ;;  %2908 = vmatpush.bf16.msra.mxu2 %v6907_v23  ;;  %v8216_v33 = vld [vmem:[%s12628_s1 + $0xa74] sm:$0xf0]  ;;  %v10664_v23 = vpop.f32.mrf.mxu0  ;;  %v6839_v39 = vor.u32 %v8213_v31, %v6836_v16  ;;  %v6794_v31 = vld [vmem:[%s12628_s1 + $0xa08] sm:$0xf] }
 0x146   :  { %2922 = vmatpush.bf16.msra.mxu3 %v6911_v37  ;;  %2650 = vmatmul.bf16.vlgmr.msrb.gmra.mxu2 %v8167_v10  ;;  %v6835_v37 = vor.u32 %v8215_v28, %v6834_v27  ;;  %v8201_v27 = vld [vmem:[%s12628_s1 + $0xa04] sm:$0xf]  ;;  %v6788_v28 = vld [vmem:[%s12628_s1 + $0xa10] sm:$0xf0]  ;;  %v8204_v16 = vld [vmem:[%s12628_s1 + $0xa14] sm:$0xf0] }
 0x147   :  { %2664 = vmatmul.bf16.vlgmr.msrb.gmra.mxu3 %v8167_v10  ;;  %v6842_v10 = vld [vmem:[%s12628_s1 + $0xa68] sm:$0xf] }
 0x148   :  { %2881 = vmatpush.bf16.msra.mxu0 %v6883_v47  ;;  %v6843_v42 = vor.u32 %v8216_v33, %v6842_v10  ;;  %v6847_v47 = vor.u32 %v8214_v34, %v6844_v35  ;;  %v8202_v10 = vld [vmem:[%s12628_s1 + $0xa0c] sm:$0xf]  ;;  %v6796_v33 = vld [vmem:[%s12628_s1 + $0xa18] sm:$0xf0]  ;;  %v7064_v34 = vld [vmem:[%s12628_s1 + $0xbe0] sm:$0xf] }
 0x149   :  { %2895 = vmatpush.bf16.msra.mxu1 %v6887_v30  ;;  %2909 = vmatpush.bf16.msra.mxu2 %v6891_v52  ;;  %v6820_v30 = vld [vmem:[%s12628_s1 + $0xa50] sm:$0xf0]  ;;  %v6826_v52 = vld [vmem:[%s12628_s1 + $0xa48] sm:$0xf]  ;;  %v8264_v35 = vld [vmem:[%s12628_s1 + $0xbec] sm:$0xf0] }
 0x14a   :  { %2923 = vmatpush.bf16.msra.mxu3 %v6895_v62  ;;  %v6819_v62 = vor.u32 %v8211_v25, %v6818_v43  ;;  %v6823_v61 = vor.u32 %v8209_v45, %v6820_v30  ;;  %v6827_v63 = vor.u32 %v8212_v53, %v6826_v52  ;;  %v7072_v43 = vld [vmem:[%s12628_s1 + $0xbe8] sm:$0xf]  ;;  %v8265_v25 = vld [vmem:[%s12628_s1 + $0xbf4] sm:$0xf0]  ;;  %v6791_v45 = vor.u32 %v8201_v27, %v6788_v28  ;;  %v8263_v30 = vld [vmem:[%s12628_s1 + $0xbec] sm:$0xf] }
 0x14b   :  { %v7074_v52 = vld [vmem:[%s12628_s1 + $0xbf8] sm:$0xf0]  ;;  %v7073_v54 = vor.u32 %v8265_v25, %v7072_v43  ;;  %v7032_v28 = vld [vmem:[%s12628_s1 + $0xba0] sm:$0xf] }
 0x14c   :  { %2882 = vmatpush.bf16.msra.mxu0 %v6867_v3  ;;  %v10707_v3 = vpop.f32.mrf.mxu2  ;;  %v7016_v25 = vld [vmem:[%s12628_s1 + $0xb80] sm:$0xf] }
 0x14d   :  { %2896 = vmatpush.bf16.msra.mxu1 %v6871_v4  ;;  %2910 = vmatpush.bf16.msra.mxu2 %v6875_v5  ;;  %v6831_v4 = vor.u32 %v8210_v55, %v6828_v59  ;;  %v6804_v5 = vld [vmem:[%s12628_s1 + $0xa30] sm:$0xf0]  ;;  %v6799_v55 = vor.u32 %v8202_v10, %v6796_v33  ;;  %v7065_v59 = vor.u32 %v8264_v35, %v7064_v34  ;;  %v7040_v33 = vld [vmem:[%s12628_s1 + $0xba8] sm:$0xf]  ;;  %v8257_v34 = vld [vmem:[%s12628_s1 + $0xbb4] sm:$0xf0] }
 0x14e   :  { %2924 = vmatpush.bf16.msra.mxu3 %v6879_v56  ;;  %v10720_v56 = vpop.f32.mrf.mxu0  ;;  %v7034_v10 = vld [vmem:[%s12628_s1 + $0xbb0] sm:$0xf0]  ;;  %v8255_v35 = vld [vmem:[%s12628_s1 + $0xbac] sm:$0xf]  ;;  %v7041_v43 = vor.u32 %v8257_v34, %v7040_v33 }
 0x150   :  { %2883 = vmatpush.bf16.msra.mxu0 %v6851_v14  ;;  %v8203_v14 = vld [vmem:[%s12628_s1 + $0xa0c] sm:$0xf0] }
 0x151   :  { %2897 = vmatpush.bf16.msra.mxu1 %v6855_v18  ;;  %2911 = vmatpush.bf16.msra.mxu2 %v6859_v22  ;;  %v6807_v18 = vor.u32 %v8205_v57, %v6804_v5  ;;  %v6811_v22 = vor.u32 %v8208_v6, %v6810_v49  ;;  %v8260_v57 = vld [vmem:[%s12628_s1 + $0xbcc] sm:$0xf0]  ;;  %v7077_v5 = vor.u32 %v8263_v30, %v7074_v52  ;;  %v7050_v49 = vld [vmem:[%s12628_s1 + $0xbd0] sm:$0xf0]  ;;  %v7056_v6 = vld [vmem:[%s12628_s1 + $0xbc8] sm:$0xf] }
 0x152   :  { %2925 = vmatpush.bf16.msra.mxu3 %v6863_v29  ;;  %v6815_v29 = vor.u32 %v8206_v8, %v6812_v60  ;;  %v8261_v8 = vld [vmem:[%s12628_s1 + $0xbd4] sm:$0xf0]  ;;  %v1606_v30 = vadd.f32 %v10720_v56, %v10440_v2 }
 0x153   :  { %v7057_v27 = vor.u32 %v8261_v8, %v7056_v6  ;;  %v7000_v8 = vld [vmem:[%s12628_s1 + $0xb60] sm:$0xf] }
 0x154   :  { %2884 = vmatpush.bf16.msra.mxu0 %v6835_v37  ;;  %v8262_v37 = vld [vmem:[%s12628_s1 + $0xbe4] sm:$0xf]  ;;  %v10778_v53 = vpop.f32.mrf.mxu2 }
 0x155   :  { %2898 = vmatpush.bf16.msra.mxu1 %v6839_v39  ;;  %2912 = vmatpush.bf16.msra.mxu2 %v6843_v42  ;;  %v6787_v39 = vor.u32 %v8203_v14, %v6786_v12  ;;  %v7066_v42 = vld [vmem:[%s12628_s1 + $0xbf0] sm:$0xf0]  ;;  %v7058_v12 = vld [vmem:[%s12628_s1 + $0xbd8] sm:$0xf0]  ;;  %v10811_v14 = vpop.f32.mrf.mxu1 }
 0x156   :  { %2926 = vmatpush.bf16.msra.mxu3 %v6847_v47  ;;  %v6795_v47 = vor.u32 %v8204_v16, %v6794_v31  ;;  %v10803_v60 = vpop.f32.mrf.mxu0  ;;  %v8256_v31 = vld [vmem:[%s12628_s1 + $0xbac] sm:$0xf0] }
 0x158   :  { %2885 = vmatpush.bf16.msra.mxu0 %v6819_v62  ;;  %v8200_v62 = vld [vmem:[%s12629_s0 + $0x50] sm:$0xff] }
 0x159   :  { %2899 = vmatpush.bf16.msra.mxu1 %v6823_v61  ;;  %2913 = vmatpush.bf16.msra.mxu2 %v6827_v63  ;;  %v10783_v61 = vpop.f32.mrf.mxu3  ;;  %v7069_v63 = vor.u32 %v8262_v37, %v7066_v42  ;;  %v7042_v37 = vld [vmem:[%s12628_s1 + $0xbb8] sm:$0xf0] }
 0x15a   :  { %2927 = vmatpush.bf16.msra.mxu3 %v6831_v4  ;;  %v8258_v4 = vld [vmem:[%s12628_s1 + $0xbc4] sm:$0xf] }
 0x15c   :  { %2886 = vmatpush.bf16.msra.mxu0 %v6803_v11  ;;  %v8259_v11 = vld [vmem:[%s12628_s1 + $0xbcc] sm:$0xf]  ;;  %v10848_v52 = vpop.f32.mrf.mxu2 }
 0x15d   :  { %2900 = vmatpush.bf16.msra.mxu1 %v6807_v18  ;;  %2914 = vmatpush.bf16.msra.mxu2 %v6811_v22  ;;  %v7049_v18 = vor.u32 %v8260_v57, %v7048_v1  ;;  %v7053_v22 = vor.u32 %v8258_v4, %v7050_v49  ;;  %v7061_v16 = vor.u32 %v8259_v11, %v7058_v12  ;;  %v8251_v1 = vld [vmem:[%s12628_s1 + $0xb8c] sm:$0xf]  ;;  %v7026_v57 = vld [vmem:[%s12628_s1 + $0xb98] sm:$0xf0]  ;;  %v8248_v11 = vld [vmem:[%s12628_s1 + $0xb6c] sm:$0xf0] }
 0x15e   :  { %2928 = vmatpush.bf16.msra.mxu3 %v6815_v29  ;;  %v8254_v29 = vld [vmem:[%s12628_s1 + $0xba4] sm:$0xf] }
 0x15f   :  { %v7037_v42 = vor.u32 %v8254_v29, %v7034_v10  ;;  %v8246_v12 = vld [vmem:[%s12628_s1 + $0xb64] sm:$0xf]  ;;  %v7010_v29 = vld [vmem:[%s12628_s1 + $0xb78] sm:$0xf0]  ;;  %v1608_v10 = vadd.f32 %v10778_v53, %v10488_v15 }
 0x160   :  { %2887 = vmatpush.bf16.msra.mxu0 %v6787_v39  ;;  %v7033_v39 = vor.u32 %v8256_v31, %v7032_v28  ;;  %v1825_v56 = vpop.f32.mrf.mxu0  ;;  %v8249_v28 = vld [vmem:[%s12628_s1 + $0xb74] sm:$0xf0]  ;;  %v8247_v31 = vld [vmem:[%s12628_s1 + $0xb6c] sm:$0xf] }
 0x161   :  { %2901 = vmatpush.bf16.msra.mxu1 %v6791_v45  ;;  %2915 = vmatpush.bf16.msra.mxu2 %v6795_v47  ;;  %v8252_v45 = vld [vmem:[%s12628_s1 + $0xb8c] sm:$0xf0]  ;;  %v8250_v47 = vld [vmem:[%s12628_s1 + $0xb84] sm:$0xf]  ;;  %v10861_v2 = vpop.f32.mrf.mxu3  ;;  %v10869_v4 = vadd.f32 %v1825_v56, %v1606_v30  ;;  %v7013_v15 = vor.u32 %v8247_v31, %v7010_v29  ;;  %v6954_v31 = vld [vmem:[%s12628_s1 + $0xb10] sm:$0xf0] }
 0x162   :  { %2929 = vmatpush.bf16.msra.mxu3 %v6799_v55  ;;  %v7045_v55 = vor.u32 %v8255_v35, %v7042_v37  ;;  %v7017_v49 = vor.u32 %v8252_v45, %v7016_v25  ;;  %v6984_v35 = vld [vmem:[%s12628_s1 + $0xb40] sm:$0xf]  ;;  %v8244_v37 = vld [vmem:[%s12628_s1 + $0xb4c] sm:$0xf0]  ;;  %v6992_v25 = vld [vmem:[%s12628_s1 + $0xb48] sm:$0xf] }
 0x163   :  { %2888 = vmatmul.bf16.vlgmr.msra.gmra.mxu0 %v8200_v62  ;;  %v8245_v45 = vld [vmem:[%s12628_s1 + $0xb54] sm:$0xf0]  ;;  %v8240_v56 = vld [vmem:[%s12628_s1 + $0xb2c] sm:$0xf0]  ;;  %v6960_v29 = vld [vmem:[%s12628_s1 + $0xb08] sm:$0xf] }
 0x164   :  { %3146 = vmatpush.bf16.msrb.mxu0 %v7065_v59  ;;  %2902 = vmatmul.bf16.vlgmr.msra.gmra.mxu1 %v8200_v62  ;;  %v7018_v59 = vld [vmem:[%s12628_s1 + $0xb90] sm:$0xf0] }
 0x165   :  { %3160 = vmatpush.bf16.msrb.mxu1 %v7069_v63  ;;  %3174 = vmatpush.bf16.msrb.mxu2 %v7073_v54  ;;  %v8253_v63 = vld [vmem:[%s12628_s1 + $0xb94] sm:$0xf0]  ;;  %v1607_v54 = vadd.f32 %v10728_v9, %v10443_v44  ;;  %v7021_v44 = vor.u32 %v8250_v47, %v7018_v59  ;;  %v6985_v59 = vor.u32 %v8244_v37, %v6984_v35  ;;  %v7230_v35 = vld [vmem:[%s12628_s1 + $0xce0] sm:$0xf]  ;;  %v8297_v37 = vld [vmem:[%s12628_s1 + $0xcec] sm:$0xf0] }
 0x166   :  { %3188 = vmatpush.bf16.msrb.mxu3 %v7077_v5  ;;  %2916 = vmatmul.bf16.vlgmr.msra.gmra.mxu2 %v8200_v62  ;;  %v1839_v5 = vpop.f32.mrf.mxu1 }
 0x167   :  { %2930 = vmatmul.bf16.vlgmr.msra.gmra.mxu3 %v8200_v62  ;;  %v7024_v62 = vld [vmem:[%s12628_s1 + $0xb88] sm:$0xf]  ;;  %v10871_v6 = vadd.f32 %v1839_v5, %v1607_v54  ;;  %v6968_v54 = vld [vmem:[%s12628_s1 + $0xb20] sm:$0xf]  ;;  %v6970_v5 = vld [vmem:[%s12628_s1 + $0xb30] sm:$0xf0] }
 0x168   :  { %3147 = vmatpush.bf16.msrb.mxu0 %v7049_v18  ;;  %v7025_v9 = vor.u32 %v8253_v63, %v7024_v62  ;;  %v7029_v18 = vor.u32 %v8251_v1, %v7026_v57  ;;  %v6993_v63 = vor.u32 %v8245_v45, %v6992_v25  ;;  %v8238_v1 = vld [vmem:[%s12628_s1 + $0xb24] sm:$0xf] }
 0x169   :  { %3161 = vmatpush.bf16.msrb.mxu1 %v7053_v22  ;;  %3175 = vmatpush.bf16.msrb.mxu2 %v7057_v27  ;;  %v7002_v22 = vld [vmem:[%s12628_s1 + $0xb70] sm:$0xf0]  ;;  %v7008_v27 = vld [vmem:[%s12628_s1 + $0xb68] sm:$0xf]  ;;  %v1853_v53 = vpop.f32.mrf.mxu2 }
 0x16a   :  { %3189 = vmatpush.bf16.msrb.mxu3 %v7061_v16  ;;  %v7001_v16 = vor.u32 %v8248_v11, %v7000_v8  ;;  %v7005_v33 = vor.u32 %v8246_v12, %v7002_v22  ;;  %v7009_v34 = vor.u32 %v8249_v28, %v7008_v27  ;;  %v10919_v47 = vadd.f32 %v1853_v53, %v1608_v10  ;;  %v1867_v30 = vpop.f32.mrf.mxu3  ;;  %v6978_v8 = vld [vmem:[%s12628_s1 + $0xb38] sm:$0xf0]  ;;  %v6952_v12 = vld [vmem:[%s12628_s1 + $0xb00] sm:$0xf]  ;;  %v8234_v28 = vld [vmem:[%s12628_s1 + $0xb04] sm:$0xf] }
 0x16b   :  { %v6969_v11 = vor.u32 %v8240_v56, %v6968_v54  ;;  %v6973_v22 = vor.u32 %v8238_v1, %v6970_v5  ;;  %v8237_v10 = vld [vmem:[%s12628_s1 + $0xb14] sm:$0xf0]  ;;  %v7238_v53 = vld [vmem:[%s12628_s1 + $0xce8] sm:$0xf]  ;;  %v6957_v25 = vor.u32 %v8234_v28, %v6954_v31  ;;  %v7214_v56 = vld [vmem:[%s12628_s1 + $0xcc0] sm:$0xf] }
 0x16c   :  { %3148 = vmatpush.bf16.msrb.mxu0 %v7033_v39  ;;  %v8242_v39 = vld [vmem:[%s12628_s1 + $0xb44] sm:$0xf]  ;;  %v6961_v45 = vor.u32 %v8237_v10, %v6960_v29  ;;  %v8293_v1 = vld [vmem:[%s12628_s1 + $0xccc] sm:$0xf0]  ;;  %v7198_v31 = vld [vmem:[%s12628_s1 + $0xca0] sm:$0xf] }
 0x16d   :  { %3162 = vmatpush.bf16.msrb.mxu1 %v7037_v42  ;;  %3176 = vmatpush.bf16.msrb.mxu2 %v7041_v43  ;;  %v1609_v42 = vadd.f32 %v10783_v61, %v10497_v38  ;;  %v6986_v43 = vld [vmem:[%s12628_s1 + $0xb50] sm:$0xf0]  ;;  %v8243_v38 = vld [vmem:[%s12628_s1 + $0xb4c] sm:$0xf]  ;;  %v6994_v61 = vld [vmem:[%s12628_s1 + $0xb58] sm:$0xf0] }
 0x16e   :  { %3190 = vmatpush.bf16.msrb.mxu3 %v7045_v55  ;;  %v6989_v62 = vor.u32 %v8242_v39, %v6986_v43  ;;  %v6997_v57 = vor.u32 %v8243_v38, %v6994_v61  ;;  %v8295_v39 = vld [vmem:[%s12628_s1 + $0xce4] sm:$0xf]  ;;  %v8298_v43 = vld [vmem:[%s12628_s1 + $0xcf4] sm:$0xf0]  ;;  %v7240_v38 = vld [vmem:[%s12628_s1 + $0xcf8] sm:$0xf0] }
 0x16f   :  { %v10927_v55 = vadd.f32 %v1867_v30, %v1609_v42  ;;  %v8296_v30 = vld [vmem:[%s12628_s1 + $0xcec] sm:$0xf]  ;;  %v7239_v54 = vor.u32 %v8298_v43, %v7238_v53  ;;  %v8289_v29 = vld [vmem:[%s12628_s1 + $0xcac] sm:$0xf0] }
 0x170   :  { %3149 = vmatpush.bf16.msrb.mxu0 %v7017_v49  ;;  %v6976_v49 = vld [vmem:[%s12628_s1 + $0xb28] sm:$0xf]  ;;  %v7243_v5 = vor.u32 %v8296_v30, %v7240_v38  ;;  %v7199_v53 = vor.u32 %v8289_v29, %v7198_v31  ;;  %v8285_v30 = vld [vmem:[%s12628_s1 + $0xc8c] sm:$0xf0]  ;;  %v8282_v29 = vld [vmem:[%s12628_s1 + $0xc74] sm:$0xf0] }
 0x171   :  { %3163 = vmatpush.bf16.msrb.mxu1 %v7021_v44  ;;  %3177 = vmatpush.bf16.msrb.mxu2 %v7025_v9  ;;  %v8241_v44 = vld [vmem:[%s12628_s1 + $0xb34] sm:$0xf0]  ;;  %v8239_v9 = vld [vmem:[%s12628_s1 + $0xb2c] sm:$0xf]  ;;  %v7174_v31 = vld [vmem:[%s12628_s1 + $0xc68] sm:$0xf] }
 0x172   :  { %3191 = vmatpush.bf16.msrb.mxu3 %v7029_v18  ;;  %v8236_v18 = vld [vmem:[%s12628_s1 + $0xb0c] sm:$0xf0]  ;;  %v6977_v27 = vor.u32 %v8241_v44, %v6976_v49  ;;  %v7216_v49 = vld [vmem:[%s12628_s1 + $0xcd0] sm:$0xf0]  ;;  %v7222_v44 = vld [vmem:[%s12628_s1 + $0xcc8] sm:$0xf] }
 0x173   :  { %v6953_v42 = vor.u32 %v8236_v18, %v6952_v12  ;;  %v7224_v12 = vld [vmem:[%s12628_s1 + $0xcd8] sm:$0xf0]  ;;  %v11030_v18 = vpop.f32.mrf.mxu1 }
 0x174   :  { %3150 = vmatpush.bf16.msrb.mxu0 %v7001_v16  ;;  %v6981_v16 = vor.u32 %v8239_v9, %v6978_v8  ;;  %v8294_v9 = vld [vmem:[%s12628_s1 + $0xcd4] sm:$0xf0]  ;;  %v11022_v8 = vpop.f32.mrf.mxu0 }
 0x175   :  { %3164 = vmatpush.bf16.msrb.mxu1 %v7005_v33  ;;  %3178 = vmatpush.bf16.msrb.mxu2 %v7009_v34  ;;  %v8235_v33 = vld [vmem:[%s12628_s1 + $0xb0c] sm:$0xf]  ;;  %v6962_v34 = vld [vmem:[%s12628_s1 + $0xb18] sm:$0xf0]  ;;  %v7223_v28 = vor.u32 %v8294_v9, %v7222_v44 }
 0x176   :  { %3192 = vmatpush.bf16.msrb.mxu3 %v7013_v15  ;;  %v7232_v15 = vld [vmem:[%s12628_s1 + $0xcf0] sm:$0xf0]  ;;  %v6965_v61 = vor.u32 %v8235_v33, %v6962_v34  ;;  %v7206_v34 = vld [vmem:[%s12628_s1 + $0xca8] sm:$0xf] }
 0x177   :  { %v7200_v33 = vld [vmem:[%s12628_s1 + $0xcb0] sm:$0xf0] }
 0x178   :  { %3151 = vmatpush.bf16.msrb.mxu0 %v6985_v59  ;;  %v7231_v59 = vor.u32 %v8297_v37, %v7230_v35  ;;  %v8290_v35 = vld [vmem:[%s12628_s1 + $0xcb4] sm:$0xf0]  ;;  %v8288_v37 = vld [vmem:[%s12628_s1 + $0xcac] sm:$0xf] }
 0x179   :  { %3165 = vmatpush.bf16.msrb.mxu1 %v6989_v62  ;;  %3179 = vmatpush.bf16.msrb.mxu2 %v6993_v63  ;;  %v8233_v62 = vld [vmem:[%s12629_s0 + $0x58] sm:$0xff]  ;;  %v7235_v63 = vor.u32 %v8295_v39, %v7232_v15  ;;  %v520_v15 = vadd.f32 %v9955_v20, %v9725_v26  ;;  %v11071_v20 = vpop.f32.mrf.mxu2 }
 0x17a   :  { %3193 = vmatpush.bf16.msrb.mxu3 %v6997_v57  ;;  %v8291_v57 = vld [vmem:[%s12628_s1 + $0xcc4] sm:$0xf]  ;;  %v7208_v39 = vld [vmem:[%s12628_s1 + $0xcb8] sm:$0xf0] }
 0x17b   :  { %v7211_v38 = vor.u32 %v8288_v37, %v7208_v39 }
 0x17c   :  { %3152 = vmatpush.bf16.msrb.mxu0 %v6969_v11  ;;  %v8292_v11 = vld [vmem:[%s12628_s1 + $0xccc] sm:$0xf] }
 0x17d   :  { %3166 = vmatpush.bf16.msrb.mxu1 %v6973_v22  ;;  %3180 = vmatpush.bf16.msrb.mxu2 %v6977_v27  ;;  %v7215_v22 = vor.u32 %v8293_v1, %v7214_v56  ;;  %v7219_v27 = vor.u32 %v8291_v57, %v7216_v49  ;;  %v7227_v10 = vor.u32 %v8292_v11, %v7224_v12  ;;  %v7166_v12 = vld [vmem:[%s12628_s1 + $0xc60] sm:$0xf] }
 0x17e   :  { %3194 = vmatpush.bf16.msrb.mxu3 %v6981_v16  ;;  %v8287_v16 = vld [vmem:[%s12628_s1 + $0xca4] sm:$0xf] }
 0x17f   :  { %v7203_v43 = vor.u32 %v8287_v16, %v7200_v33 }
 0x180   :  { %3153 = vmatpush.bf16.msrb.mxu0 %v6953_v42  ;;  %v506_v42 = vadd.f32 %v9947_v17, %v9714_v21  ;;  %v8283_v21 = vld [vmem:[%s12628_s1 + $0xc84] sm:$0xf]  ;;  %v813_v17 = vadd.f32 %v10170_v19, %v520_v15  ;;  %v8284_v19 = vld [vmem:[%s12628_s1 + $0xc8c] sm:$0xf]  ;;  %v7158_v15 = vld [vmem:[%s12628_s1 + $0xc48] sm:$0xf] }
 0x181   :  { %3167 = vmatpush.bf16.msrb.mxu1 %v6957_v25  ;;  %3181 = vmatpush.bf16.msrb.mxu2 %v6961_v45  ;;  %v7207_v25 = vor.u32 %v8290_v35, %v7206_v34  ;;  %v7182_v45 = vld [vmem:[%s12628_s1 + $0xc80] sm:$0xf]  ;;  %v7175_v34 = vor.u32 %v8282_v29, %v7174_v31  ;;  %v8270_v31 = vld [vmem:[%s12628_s1 + $0xc14] sm:$0xf0]  ;;  %v8268_v29 = vld [vmem:[%s12628_s1 + $0xc0c] sm:$0xf] }
 0x182   :  { %3195 = vmatpush.bf16.msrb.mxu3 %v6965_v61  ;;  %v812_v26 = vadd.f32 %v10162_v13, %v506_v42  ;;  %v7184_v61 = vld [vmem:[%s12628_s1 + $0xc90] sm:$0xf0]  ;;  %v2091_v13 = vpop.f32.mrf.mxu0  ;;  %v1079_v1 = vadd.f32 %v10385_v32, %v813_v17  ;;  %v7183_v49 = vor.u32 %v8285_v30, %v7182_v45  ;;  %v8279_v32 = vld [vmem:[%s12628_s1 + $0xc64] sm:$0xf]  ;;  %v7150_v35 = vld [vmem:[%s12628_s1 + $0xc40] sm:$0xf] }
 0x183   :  { %3154 = vmatmul.bf16.vlgmr.msrb.gmra.mxu0 %v8233_v62  ;;  %v11093_v57 = vadd.f32 %v2091_v13, %v10869_v4  ;;  %v7187_v9 = vor.u32 %v8283_v21, %v7184_v61  ;;  %v534_v4 = vadd.f32 %v9990_v41, %v9766_v46  ;;  %v7176_v41 = vld [vmem:[%s12628_s1 + $0xc78] sm:$0xf0]  ;;  %v7152_v42 = vld [vmem:[%s12628_s1 + $0xc50] sm:$0xf0]  ;;  %v8276_v30 = vld [vmem:[%s12628_s1 + $0xc4c] sm:$0xf] }
 0x184   :  { %3412 = vmatpush.bf16.msra.mxu0 %v7231_v59  ;;  %3168 = vmatmul.bf16.vlgmr.msrb.gmra.mxu1 %v8233_v62  ;;  %v7190_v59 = vld [vmem:[%s12628_s1 + $0xc88] sm:$0xf]  ;;  %v1078_v56 = vadd.f32 %v10377_v24, %v812_v26  ;;  %v8281_v24 = vld [vmem:[%s12628_s1 + $0xc6c] sm:$0xf0]  ;;  %v1345_v46 = vadd.f32 %v10672_v36, %v1079_v1  ;;  %v7160_v21 = vld [vmem:[%s12628_s1 + $0xc58] sm:$0xf0] }
 0x185   :  { %3426 = vmatpush.bf16.msra.mxu1 %v7235_v63  ;;  %3440 = vmatpush.bf16.msra.mxu2 %v7239_v54  ;;  %v11082_v63 = vpop.f32.mrf.mxu3  ;;  %v7192_v54 = vld [vmem:[%s12628_s1 + $0xc98] sm:$0xf0]  ;;  %v8274_v1 = vld [vmem:[%s12628_s1 + $0xc34] sm:$0xf0] }
 0x186   :  { %3454 = vmatpush.bf16.msra.mxu3 %v7243_v5  ;;  %3182 = vmatmul.bf16.vlgmr.msrb.gmra.mxu2 %v8233_v62  ;;  %v2105_v5 = vpop.f32.mrf.mxu1  ;;  %v1611_v33 = vadd.f32 %v10811_v14, %v1345_v46  ;;  %v7128_v46 = vld [vmem:[%s12628_s1 + $0xc18] sm:$0xf0] }
 0x187   :  { %3196 = vmatmul.bf16.vlgmr.msrb.gmra.mxu3 %v8233_v62  ;;  %v8286_v62 = vld [vmem:[%s12628_s1 + $0xc94] sm:$0xf0]  ;;  %v11096_v44 = vadd.f32 %v2105_v5, %v10871_v6  ;;  %v548_v6 = vadd.f32 %v10001_v48, %v9768_v50  ;;  %v8280_v50 = vld [vmem:[%s12628_s1 + $0xc6c] sm:$0xf]  ;;  %v814_v48 = vadd.f32 %v10205_v40, %v534_v4  ;;  %v8277_v40 = vld [vmem:[%s12628_s1 + $0xc4c] sm:$0xf0] }
 0x188   :  { %3413 = vmatpush.bf16.msra.mxu0 %v7215_v22  ;;  %v7191_v11 = vor.u32 %v8286_v62, %v7190_v59  ;;  %v1344_v22 = vadd.f32 %v10664_v23, %v1078_v56  ;;  %v7179_v37 = vor.u32 %v8280_v50, %v7176_v41  ;;  %v7151_v17 = vor.u32 %v8277_v40, %v7150_v35  ;;  %v7134_v62 = vld [vmem:[%s12628_s1 + $0xc20] sm:$0xf]  ;;  %v7142_v56 = vld [vmem:[%s12628_s1 + $0xc28] sm:$0xf] }
 0x189   :  { %3427 = vmatpush.bf16.msra.mxu1 %v7219_v27  ;;  %3441 = vmatpush.bf16.msra.mxu2 %v7223_v28  ;;  %v7195_v27 = vor.u32 %v8284_v19, %v7192_v54  ;;  %v7168_v28 = vld [vmem:[%s12628_s1 + $0xc70] sm:$0xf0]  ;;  %v815_v23 = vadd.f32 %v10216_v51, %v548_v6  ;;  %v8275_v51 = vld [vmem:[%s12628_s1 + $0xc44] sm:$0xf]  ;;  %v2119_v39 = vpop.f32.mrf.mxu2  ;;  %v7163_v19 = vor.u32 %v8276_v30, %v7160_v21  ;;  %v7388_v30 = vld [vmem:[%s12628_s1 + $0xdc8] sm:$0xf] }
 0x18a   :  { %3455 = vmatpush.bf16.msra.mxu3 %v7227_v10  ;;  %v1610_v16 = vadd.f32 %v10803_v60, %v1344_v22  ;;  %v7167_v10 = vor.u32 %v8281_v24, %v7166_v12  ;;  %v7171_v36 = vor.u32 %v8279_v32, %v7168_v28  ;;  %v1080_v60 = vadd.f32 %v10420_v58, %v814_v48  ;;  %v2093_v45 = vpop.f32.mrf.mxu0  ;;  %v7136_v54 = vld [vmem:[%s12628_s1 + $0xc30] sm:$0xf0]  ;;  %v7118_v12 = vld [vmem:[%s12628_s1 + $0xc00] sm:$0xf]  ;;  %v7126_v22 = vld [vmem:[%s12628_s1 + $0xc08] sm:$0xf] }
 0x18b   :  { %v1877_v58 = vadd.f32 %v11030_v18, %v1611_v33  ;;  %v7155_v61 = vor.u32 %v8275_v51, %v7152_v42  ;;  %v7143_v4 = vor.u32 %v8274_v1, %v7142_v56  ;;  %v7120_v6 = vld [vmem:[%s12628_s1 + $0xc10] sm:$0xf0]  ;;  %v8330_v48 = vld [vmem:[%s12628_s1 + $0xdec] sm:$0xf0]  ;;  %v7127_v40 = vor.u32 %v8270_v31, %v7126_v22  ;;  %v8329_v51 = vld [vmem:[%s12628_s1 + $0xdec] sm:$0xf] }
 0x18c   :  { %3414 = vmatpush.bf16.msra.mxu0 %v7199_v53  ;;  %v1876_v14 = vadd.f32 %v11022_v8, %v1610_v16  ;;  %v8278_v53 = vld [vmem:[%s12628_s1 + $0xc54] sm:$0xf0]  ;;  %v11155_v8 = vadd.f32 %v2119_v39, %v10919_v47  ;;  %v1346_v26 = vadd.f32 %v10707_v3, %v1080_v60  ;;  %v8273_v3 = vld [vmem:[%s12628_s1 + $0xc2c] sm:$0xf0]  ;;  %v7398_v33 = vld [vmem:[%s12628_s1 + $0xdf0] sm:$0xf0] }
 0x18d   :  { %3428 = vmatpush.bf16.msra.mxu1 %v7203_v43  ;;  %3442 = vmatpush.bf16.msra.mxu2 %v7207_v25  ;;  %v1081_v43 = vadd.f32 %v10431_v0, %v815_v23  ;;  %v2133_v25 = vpop.f32.mrf.mxu3  ;;  %v7159_v59 = vor.u32 %v8278_v53, %v7158_v15  ;;  %v8328_v23 = vld [vmem:[%s12628_s1 + $0xde4] sm:$0xf]  ;;  %v7406_v60 = vld [vmem:[%s12628_s1 + $0xdf8] sm:$0xf0]  ;;  %v7380_v53 = vld [vmem:[%s12628_s1 + $0xdc0] sm:$0xf] }
 0x18e   :  { %3456 = vmatpush.bf16.msra.mxu3 %v7211_v38  ;;  %v11165_v0 = vadd.f32 %v2133_v25, %v10927_v55  ;;  %v11167_v18 = vadd.f32 %v2093_v45, %v1876_v14  ;;  %v2107_v47 = vpop.f32.mrf.mxu1  ;;  %v8271_v55 = vld [vmem:[%s12628_s1 + $0xc24] sm:$0xf]  ;;  %v1612_v5 = vadd.f32 %v10848_v52, %v1346_v26  ;;  %v8269_v52 = vld [vmem:[%s12628_s1 + $0xc0c] sm:$0xf0]  ;;  %v7131_v14 = vor.u32 %v8268_v29, %v7128_v46  ;;  %v7382_v45 = vld [vmem:[%s12628_s1 + $0xdd0] sm:$0xf0] }
 0x18f   :  { %v11169_v38 = vadd.f32 %v2107_v47, %v1877_v58  ;;  %v1347_v13 = vadd.f32 %v10718_v7, %v1081_v43  ;;  %v8272_v7 = vld [vmem:[%s12628_s1 + $0xc2c] sm:$0xf]  ;;  %v7139_v32 = vor.u32 %v8271_v55, %v7136_v54  ;;  %v8266_v39 = vld [vmem:[%s12629_s0 + $0x60] sm:$0xff]  ;;  %v7401_v42 = vor.u32 %v8328_v23, %v7398_v33  ;;  %v8326_v43 = vld [vmem:[%s12628_s1 + $0xdcc] sm:$0xf0] }
 0x190   :  { %3415 = vmatpush.bf16.msra.mxu0 %v7183_v49  ;;  %v7144_v49 = vld [vmem:[%s12628_s1 + $0xc38] sm:$0xf0]  ;;  %v1878_v24 = vadd.f32 %v11071_v20, %v1612_v5  ;;  %v8324_v58 = vld [vmem:[%s12628_s1 + $0xdc4] sm:$0xf]  ;;  %v7409_v25 = vor.u32 %v8329_v51, %v7406_v60  ;;  %v8327_v21 = vld [vmem:[%s12628_s1 + $0xdd4] sm:$0xf0] }
 0x191   :  { %3429 = vmatpush.bf16.msra.mxu1 %v7187_v9  ;;  %3443 = vmatpush.bf16.msra.mxu2 %v7191_v11  ;;  %v1613_v9 = vadd.f32 %v10861_v2, %v1347_v13  ;;  %v7135_v11 = vor.u32 %v8273_v3, %v7134_v62  ;;  %v8267_v2 = vld [vmem:[%s12628_s1 + $0xc04] sm:$0xf]  ;;  %v7147_v20 = vor.u32 %v8272_v7, %v7144_v49  ;;  %v2121_v28 = vpop.f32.mrf.mxu2  ;;  %v8325_v26 = vld [vmem:[%s12628_s1 + $0xdcc] sm:$0xf]  ;;  %v7390_v47 = vld [vmem:[%s12628_s1 + $0xdd8] sm:$0xf0] }
 0x192   :  { %3457 = vmatpush.bf16.msra.mxu3 %v7195_v27  ;;  %v11224_v50 = vadd.f32 %v2121_v28, %v1878_v24  ;;  %v7123_v35 = vor.u32 %v8267_v2, %v7120_v6  ;;  %v7364_v62 = vld [vmem:[%s12628_s1 + $0xda0] sm:$0xf]  ;;  %v8322_v3 = vld [vmem:[%s12628_s1 + $0xdac] sm:$0xf0]  ;;  %v8320_v55 = vld [vmem:[%s12628_s1 + $0xda4] sm:$0xf]  ;;  %v7393_v13 = vor.u32 %v8325_v26, %v7390_v47 }
 0x193   :  { %v1879_v27 = vadd.f32 %v11082_v63, %v1613_v9  ;;  %v7396_v63 = vld [vmem:[%s12628_s1 + $0xde0] sm:$0xf]  ;;  %v7372_v54 = vld [vmem:[%s12628_s1 + $0xda8] sm:$0xf]  ;;  %v8323_v56 = vld [vmem:[%s12628_s1 + $0xdb4] sm:$0xf0]  ;;  %v7365_v7 = vor.u32 %v8322_v3, %v7364_v62 }
 0x194   :  { %3416 = vmatpush.bf16.msra.mxu0 %v7167_v10  ;;  %v7119_v10 = vor.u32 %v8269_v52, %v7118_v12  ;;  %v8321_v1 = vld [vmem:[%s12628_s1 + $0xdac] sm:$0xf]  ;;  %v7374_v5 = vld [vmem:[%s12628_s1 + $0xdb8] sm:$0xf0]  ;;  %v7373_v9 = vor.u32 %v8323_v56, %v7372_v54  ;;  %v8318_v12 = vld [vmem:[%s12628_s1 + $0xd8c] sm:$0xf0] }
 0x195   :  { %3430 = vmatpush.bf16.msra.mxu1 %v7171_v36  ;;  %3444 = vmatpush.bf16.msra.mxu2 %v7175_v34  ;;  %v2135_v41 = vpop.f32.mrf.mxu3  ;;  %v7404_v36 = vld [vmem:[%s12628_s1 + $0xde8] sm:$0xf]  ;;  %v8331_v34 = vld [vmem:[%s12628_s1 + $0xdf4] sm:$0xf0]  ;;  %v8316_v52 = vld [vmem:[%s12628_s1 + $0xd84] sm:$0xf]  ;;  %v7377_v24 = vor.u32 %v8321_v1, %v7374_v5 }
 0x196   :  { %3458 = vmatpush.bf16.msra.mxu3 %v7179_v37  ;;  %v11235_v16 = vadd.f32 %v2135_v41, %v1879_v27  ;;  %v7397_v37 = vor.u32 %v8330_v48, %v7396_v63  ;;  %v7405_v15 = vor.u32 %v8331_v34, %v7404_v36  ;;  %v8319_v2 = vld [vmem:[%s12628_s1 + $0xd94] sm:$0xf0]  ;;  %v8317_v22 = vld [vmem:[%s12628_s1 + $0xd8c] sm:$0xf]  ;;  %v7358_v27 = vld [vmem:[%s12628_s1 + $0xd98] sm:$0xf0] }
 0x197   :  { %v7332_v63 = vld [vmem:[%s12628_s1 + $0xd60] sm:$0xf]  ;;  %v8314_v48 = vld [vmem:[%s12628_s1 + $0xd6c] sm:$0xf0]  ;;  %v7361_v23 = vor.u32 %v8317_v22, %v7358_v27  ;;  %v8315_v33 = vld [vmem:[%s12628_s1 + $0xd74] sm:$0xf0] }
 0x198   :  { %3417 = vmatpush.bf16.msra.mxu0 %v7151_v17  ;;  %v7381_v17 = vor.u32 %v8326_v43, %v7380_v53  ;;  %v8313_v36 = vld [vmem:[%s12628_s1 + $0xd6c] sm:$0xf]  ;;  %v7342_v34 = vld [vmem:[%s12628_s1 + $0xd78] sm:$0xf0]  ;;  %v7316_v60 = vld [vmem:[%s12628_s1 + $0xd40] sm:$0xf] }
 0x199   :  { %3431 = vmatpush.bf16.msra.mxu1 %v7155_v61  ;;  %3445 = vmatpush.bf16.msra.mxu2 %v7159_v59  ;;  %v7385_v61 = vor.u32 %v8324_v58, %v7382_v45  ;;  %v7389_v59 = vor.u32 %v8327_v21, %v7388_v30  ;;  %v7324_v53 = vld [vmem:[%s12628_s1 + $0xd48] sm:$0xf]  ;;  %v8311_v43 = vld [vmem:[%s12628_s1 + $0xd54] sm:$0xf0]  ;;  %v8309_v30 = vld [vmem:[%s12628_s1 + $0xd4c] sm:$0xf] }
 0x19a   :  { %3459 = vmatpush.bf16.msra.mxu3 %v7163_v19  ;;  %v7366_v19 = vld [vmem:[%s12628_s1 + $0xdb0] sm:$0xf0]  ;;  %v7326_v21 = vld [vmem:[%s12628_s1 + $0xd58] sm:$0xf0]  ;;  %v7325_v62 = vor.u32 %v8311_v43, %v7324_v53  ;;  %v7300_v3 = vld [vmem:[%s12628_s1 + $0xd20] sm:$0xf] }
 0x19b   :  { %v7369_v49 = vor.u32 %v8320_v55, %v7366_v19  ;;  %v7329_v55 = vor.u32 %v8309_v30, %v7326_v21  ;;  %v8307_v19 = vld [vmem:[%s12628_s1 + $0xd34] sm:$0xf0]  ;;  %v8305_v54 = vld [vmem:[%s12628_s1 + $0xd2c] sm:$0xf]  ;;  %v7310_v56 = vld [vmem:[%s12628_s1 + $0xd38] sm:$0xf0] }
 0x19c   :  { %3418 = vmatpush.bf16.msra.mxu0 %v7135_v11  ;;  %v7348_v11 = vld [vmem:[%s12628_s1 + $0xd80] sm:$0xf]  ;;  %v8358_v53 = vld [vmem:[%s12628_s1 + $0xecc] sm:$0xf]  ;;  %v7556_v43 = vld [vmem:[%s12628_s1 + $0xed8] sm:$0xf0] }
 0x19d   :  { %3432 = vmatpush.bf16.msra.mxu1 %v7139_v32  ;;  %3446 = vmatpush.bf16.msra.mxu2 %v7143_v4  ;;  %v7350_v32 = vld [vmem:[%s12628_s1 + $0xd90] sm:$0xf0]  ;;  %v7356_v4 = vld [vmem:[%s12628_s1 + $0xd88] sm:$0xf]  ;;  %v7349_v31 = vor.u32 %v8318_v12, %v7348_v11  ;;  %v7284_v5 = vld [vmem:[%s12628_s1 + $0xd00] sm:$0xf] }
 0x19e   :  { %3460 = vmatpush.bf16.msra.mxu3 %v7147_v20  ;;  %v7353_v46 = vor.u32 %v8316_v52, %v7350_v32  ;;  %v7357_v41 = vor.u32 %v8319_v2, %v7356_v4  ;;  %v8300_v11 = vld [vmem:[%s12628_s1 + $0xd04] sm:$0xf]  ;;  %v7286_v12 = vld [vmem:[%s12628_s1 + $0xd10] sm:$0xf0]  ;;  %v7292_v52 = vld [vmem:[%s12628_s1 + $0xd08] sm:$0xf] }
 0x19f   :  { %v8303_v4 = vld [vmem:[%s12628_s1 + $0xd14] sm:$0xf0]  ;;  %v8301_v2 = vld [vmem:[%s12628_s1 + $0xd0c] sm:$0xf]  ;;  %v7530_v21 = vld [vmem:[%s12628_s1 + $0xea0] sm:$0xf] }
 0x1a0   :  { %3419 = vmatpush.bf16.msra.mxu0 %v7119_v10  ;;  %v2357_v6 = vpop.f32.mrf.mxu0  ;;  %v7340_v10 = vld [vmem:[%s12628_s1 + $0xd68] sm:$0xf] }
 0x1a1   :  { %3433 = vmatpush.bf16.msra.mxu1 %v7123_v35  ;;  %3447 = vmatpush.bf16.msra.mxu2 %v7127_v40  ;;  %v11328_v20 = vadd.f32 %v2357_v6, %v11093_v57  ;;  %v2371_v28 = vpop.f32.mrf.mxu1  ;;  %v8312_v57 = vld [vmem:[%s12628_s1 + $0xd64] sm:$0xf]  ;;  %v7333_v35 = vor.u32 %v8314_v48, %v7332_v63  ;;  %v7341_v51 = vor.u32 %v8315_v33, %v7340_v10  ;;  %v7294_v6 = vld [vmem:[%s12628_s1 + $0xd18] sm:$0xf0]  ;;  %v7570_v48 = vld [vmem:[%s12628_s1 + $0xee8] sm:$0xf] }
 0x1a2   :  { %3461 = vmatpush.bf16.msra.mxu3 %v7131_v14  ;;  %v11331_v29 = vadd.f32 %v2371_v28, %v11096_v44  ;;  %v7334_v44 = vld [vmem:[%s12628_s1 + $0xd70] sm:$0xf0]  ;;  %v8310_v14 = vld [vmem:[%s12628_s1 + $0xd4c] sm:$0xf0]  ;;  %v7562_v28 = vld [vmem:[%s12628_s1 + $0xee0] sm:$0xf]  ;;  %v7297_v33 = vor.u32 %v8301_v2, %v7294_v6 }
 0x1a3   :  { %3420 = vmatmul.bf16.vlgmr.msra.gmra.mxu0 %v8266_v39  ;;  %v7337_v40 = vor.u32 %v8312_v57, %v7334_v44  ;;  %v8364_v57 = vld [vmem:[%s12628_s1 + $0xef4] sm:$0xf0]  ;;  %v7293_v44 = vor.u32 %v8303_v4, %v7292_v52  ;;  %v7572_v10 = vld [vmem:[%s12628_s1 + $0xef8] sm:$0xf0] }
 0x1a4   :  { %3678 = vmatpush.bf16.msrb.mxu0 %v7397_v37  ;;  %3434 = vmatmul.bf16.vlgmr.msra.gmra.mxu1 %v8266_v39  ;;  %v8308_v37 = vld [vmem:[%s12628_s1 + $0xd44] sm:$0xf]  ;;  %v7524_v52 = vld [vmem:[%s12628_s1 + $0xe98] sm:$0xf0] }
 0x1a5   :  { %3692 = vmatpush.bf16.msrb.mxu1 %v7401_v42  ;;  %3706 = vmatpush.bf16.msrb.mxu2 %v7405_v15  ;;  %v7318_v15 = vld [vmem:[%s12628_s1 + $0xd50] sm:$0xf0] }
 0x1a6   :  { %3720 = vmatpush.bf16.msrb.mxu3 %v7409_v25  ;;  %3448 = vmatmul.bf16.vlgmr.msra.gmra.mxu2 %v8266_v39 }
 0x1a7   :  { %3462 = vmatmul.bf16.vlgmr.msra.gmra.mxu3 %v8266_v39  ;;  %v7345_v39 = vor.u32 %v8313_v36, %v7342_v34  ;;  %v8299_v34 = vld [vmem:[%s12629_s0 + $0x68] sm:$0xff] }
 0x1a8   :  { %3679 = vmatpush.bf16.msrb.mxu0 %v7381_v17  ;;  %v2359_v45 = vpop.f32.mrf.mxu0 }
 0x1a9   :  { %3693 = vmatpush.bf16.msrb.mxu1 %v7385_v61  ;;  %3707 = vmatpush.bf16.msrb.mxu2 %v7389_v59  ;;  %v2385_v42 = vpop.f32.mrf.mxu2  ;;  %v11388_v47 = vadd.f32 %v2359_v45, %v11167_v18  ;;  %v2373_v17 = vpop.f32.mrf.mxu1  ;;  %v7321_v59 = vor.u32 %v8308_v37, %v7318_v15  ;;  %v8304_v18 = vld [vmem:[%s12628_s1 + $0xd24] sm:$0xf]  ;;  %v8360_v15 = vld [vmem:[%s12628_s1 + $0xed4] sm:$0xf0] }
 0x1aa   :  { %3721 = vmatpush.bf16.msrb.mxu3 %v7393_v13  ;;  %v11376_v58 = vadd.f32 %v2385_v42, %v11155_v8  ;;  %v2399_v25 = vpop.f32.mrf.mxu3  ;;  %v7317_v8 = vor.u32 %v8310_v14, %v7316_v60  ;;  %v11391_v61 = vadd.f32 %v2373_v17, %v11169_v38  ;;  %v7302_v38 = vld [vmem:[%s12628_s1 + $0xd30] sm:$0xf0]  ;;  %v7308_v13 = vld [vmem:[%s12628_s1 + $0xd28] sm:$0xf]  ;;  %v8359_v60 = vld [vmem:[%s12628_s1 + $0xecc] sm:$0xf0] }
 0x1ab   :  { %v11385_v26 = vadd.f32 %v2399_v25, %v11165_v0  ;;  %v8306_v0 = vld [vmem:[%s12628_s1 + $0xd2c] sm:$0xf0]  ;;  %v8357_v14 = vld [vmem:[%s12628_s1 + $0xec4] sm:$0xf]  ;;  %v7554_v42 = vld [vmem:[%s12628_s1 + $0xec8] sm:$0xf] }
 0x1ac   :  { %3680 = vmatpush.bf16.msrb.mxu0 %v7365_v7  ;;  %v7301_v1 = vor.u32 %v8306_v0, %v7300_v3  ;;  %v8302_v7 = vld [vmem:[%s12628_s1 + $0xd0c] sm:$0xf0]  ;;  %v7555_v30 = vor.u32 %v8360_v15, %v7554_v42  ;;  %v7538_v3 = vld [vmem:[%s12628_s1 + $0xea8] sm:$0xf]  ;;  %v8356_v0 = vld [vmem:[%s12628_s1 + $0xeb4] sm:$0xf0] }
 0x1ad   :  { %3694 = vmatpush.bf16.msrb.mxu1 %v7369_v49  ;;  %3708 = vmatpush.bf16.msrb.mxu2 %v7373_v9  ;;  %v7305_v49 = vor.u32 %v8304_v18, %v7302_v38  ;;  %v7309_v9 = vor.u32 %v8307_v19, %v7308_v13  ;;  %v7285_v63 = vor.u32 %v8302_v7, %v7284_v5  ;;  %v8355_v17 = vld [vmem:[%s12628_s1 + $0xeac] sm:$0xf0]  ;;  %v8354_v18 = vld [vmem:[%s12628_s1 + $0xeac] sm:$0xf]  ;;  %v7516_v7 = vld [vmem:[%s12628_s1 + $0xe90] sm:$0xf0] }
 0x1ae   :  { %3722 = vmatpush.bf16.msrb.mxu3 %v7377_v24  ;;  %v7313_v24 = vor.u32 %v8305_v54, %v7310_v56  ;;  %v7531_v38 = vor.u32 %v8355_v17, %v7530_v21  ;;  %v7539_v19 = vor.u32 %v8356_v0, %v7538_v3  ;;  %v7514_v54 = vld [vmem:[%s12628_s1 + $0xe80] sm:$0xf]  ;;  %v8351_v56 = vld [vmem:[%s12628_s1 + $0xe8c] sm:$0xf0]  ;;  %v8342_v42 = vld [vmem:[%s12628_s1 + $0xe4c] sm:$0xf] }
 0x1af   :  { %v7515_v4 = vor.u32 %v8351_v56, %v7514_v54  ;;  %v7492_v15 = vld [vmem:[%s12628_s1 + $0xe58] sm:$0xf0]  ;;  %v7466_v17 = vld [vmem:[%s12628_s1 + $0xe20] sm:$0xf]  ;;  %v8338_v3 = vld [vmem:[%s12628_s1 + $0xe2c] sm:$0xf] }
 0x1b0   :  { %3681 = vmatpush.bf16.msrb.mxu0 %v7349_v31  ;;  %v8363_v31 = vld [vmem:[%s12628_s1 + $0xeec] sm:$0xf0]  ;;  %v7476_v0 = vld [vmem:[%s12628_s1 + $0xe38] sm:$0xf0]  ;;  %v8333_v54 = vld [vmem:[%s12628_s1 + $0xe04] sm:$0xf] }
 0x1b1   :  { %3695 = vmatpush.bf16.msrb.mxu1 %v7353_v46  ;;  %3709 = vmatpush.bf16.msrb.mxu2 %v7357_v41  ;;  %v2387_v32 = vpop.f32.mrf.mxu2  ;;  %v8361_v46 = vld [vmem:[%s12628_s1 + $0xee4] sm:$0xf]  ;;  %v7563_v36 = vor.u32 %v8363_v31, %v7562_v28  ;;  %v7498_v28 = vld [vmem:[%s12628_s1 + $0xe60] sm:$0xf]  ;;  %v8347_v31 = vld [vmem:[%s12628_s1 + $0xe6c] sm:$0xf0] }
 0x1b2   :  { %3723 = vmatpush.bf16.msrb.mxu3 %v7361_v23  ;;  %v11442_v22 = vadd.f32 %v2387_v32, %v11224_v50  ;;  %v2401_v27 = vpop.f32.mrf.mxu3  ;;  %v7564_v50 = vld [vmem:[%s12628_s1 + $0xef0] sm:$0xf0]  ;;  %v7289_v23 = vor.u32 %v8300_v11, %v7286_v12  ;;  %v8350_v12 = vld [vmem:[%s12628_s1 + $0xe8c] sm:$0xf] }
 0x1b3   :  { %v11454_v41 = vadd.f32 %v2401_v27, %v11235_v16  ;;  %v8362_v16 = vld [vmem:[%s12628_s1 + $0xeec] sm:$0xf]  ;;  %v7452_v56 = vld [vmem:[%s12628_s1 + $0xe10] sm:$0xf0] }
 0x1b4   :  { %3682 = vmatpush.bf16.msrb.mxu0 %v7333_v35  ;;  %v7567_v35 = vor.u32 %v8361_v46, %v7564_v50  ;;  %v7575_v37 = vor.u32 %v8362_v16, %v7572_v10  ;;  %v7527_v46 = vor.u32 %v8350_v12, %v7524_v52  ;;  %v8348_v50 = vld [vmem:[%s12628_s1 + $0xe74] sm:$0xf0]  ;;  %v7482_v10 = vld [vmem:[%s12628_s1 + $0xe40] sm:$0xf] }
 0x1b5   :  { %3696 = vmatpush.bf16.msrb.mxu1 %v7337_v40  ;;  %3710 = vmatpush.bf16.msrb.mxu2 %v7341_v51  ;;  %v7571_v40 = vor.u32 %v8364_v57, %v7570_v48  ;;  %v7546_v51 = vld [vmem:[%s12628_s1 + $0xec0] sm:$0xf]  ;;  %v8346_v48 = vld [vmem:[%s12628_s1 + $0xe6c] sm:$0xf]  ;;  %v7508_v57 = vld [vmem:[%s12628_s1 + $0xe78] sm:$0xf0] }
 0x1b6   :  { %3724 = vmatpush.bf16.msrb.mxu3 %v7345_v39  ;;  %v7548_v39 = vld [vmem:[%s12628_s1 + $0xed0] sm:$0xf0]  ;;  %v7547_v25 = vor.u32 %v8359_v60, %v7546_v51  ;;  %v7490_v51 = vld [vmem:[%s12628_s1 + $0xe48] sm:$0xf]  ;;  %v8344_v60 = vld [vmem:[%s12628_s1 + $0xe54] sm:$0xf0] }
 0x1b7   :  { %v7551_v45 = vor.u32 %v8357_v14, %v7548_v39  ;;  %v7491_v21 = vor.u32 %v8344_v60, %v7490_v51  ;;  %v8391_v51 = vld [vmem:[%s12628_s1 + $0xfcc] sm:$0xf]  ;;  %v7722_v60 = vld [vmem:[%s12628_s1 + $0xfd8] sm:$0xf0] }
 0x1b8   :  { %3683 = vmatpush.bf16.msrb.mxu0 %v7317_v8  ;;  %v8353_v8 = vld [vmem:[%s12628_s1 + $0xea4] sm:$0xf] }
 0x1b9   :  { %3697 = vmatpush.bf16.msrb.mxu1 %v7321_v59  ;;  %3711 = vmatpush.bf16.msrb.mxu2 %v7325_v62  ;;  %v7559_v59 = vor.u32 %v8358_v53, %v7556_v43  ;;  %v7532_v62 = vld [vmem:[%s12628_s1 + $0xeb0] sm:$0xf0] }
 0x1ba   :  { %3725 = vmatpush.bf16.msrb.mxu3 %v7329_v55  ;;  %v7540_v55 = vld [vmem:[%s12628_s1 + $0xeb8] sm:$0xf0]  ;;  %v7535_v13 = vor.u32 %v8353_v8, %v7532_v62  ;;  %v7495_v8 = vor.u32 %v8342_v42, %v7492_v15  ;;  %v8340_v62 = vld [vmem:[%s12628_s1 + $0xe34] sm:$0xf0]  ;;  %v7696_v15 = vld [vmem:[%s12628_s1 + $0xfa0] sm:$0xf] }
 0x1bb   :  { %v7543_v5 = vor.u32 %v8354_v18, %v7540_v55  ;;  %v7450_v55 = vld [vmem:[%s12628_s1 + $0xe00] sm:$0xf] }
 0x1bc   :  { %3684 = vmatpush.bf16.msrb.mxu0 %v7301_v1  ;;  %v8349_v1 = vld [vmem:[%s12628_s1 + $0xe84] sm:$0xf] }
 0x1bd   :  { %3698 = vmatpush.bf16.msrb.mxu1 %v7305_v49  ;;  %3712 = vmatpush.bf16.msrb.mxu2 %v7309_v9  ;;  %v7522_v49 = vld [vmem:[%s12628_s1 + $0xe88] sm:$0xf]  ;;  %v8352_v9 = vld [vmem:[%s12628_s1 + $0xe94] sm:$0xf0]  ;;  %v7519_v6 = vor.u32 %v8349_v1, %v7516_v7 }
 0x1be   :  { %3726 = vmatpush.bf16.msrb.mxu3 %v7313_v24  ;;  %v7523_v27 = vor.u32 %v8352_v9, %v7522_v49  ;;  %v7458_v1 = vld [vmem:[%s12628_s1 + $0xe08] sm:$0xf]  ;;  %v8336_v49 = vld [vmem:[%s12628_s1 + $0xe14] sm:$0xf0]  ;;  %v8334_v9 = vld [vmem:[%s12628_s1 + $0xe0c] sm:$0xf] }
 0x1c0   :  { %3685 = vmatpush.bf16.msrb.mxu0 %v7285_v63  ;;  %v2623_v11 = vpop.f32.mrf.mxu0  ;;  %v7506_v63 = vld [vmem:[%s12628_s1 + $0xe68] sm:$0xf] }
 0x1c1   :  { %3699 = vmatpush.bf16.msrb.mxu1 %v7289_v23  ;;  %3713 = vmatpush.bf16.msrb.mxu2 %v7293_v44  ;;  %v11547_v24 = vadd.f32 %v2623_v11, %v11328_v20  ;;  %v2637_v32 = vpop.f32.mrf.mxu1  ;;  %v8345_v20 = vld [vmem:[%s12628_s1 + $0xe64] sm:$0xf]  ;;  %v7499_v23 = vor.u32 %v8347_v31, %v7498_v28  ;;  %v7507_v16 = vor.u32 %v8348_v50, %v7506_v63  ;;  %v7460_v11 = vld [vmem:[%s12628_s1 + $0xe18] sm:$0xf0]  ;;  %v7736_v31 = vld [vmem:[%s12628_s1 + $0xfe8] sm:$0xf] }
 0x1c2   :  { %3727 = vmatpush.bf16.msrb.mxu3 %v7297_v33  ;;  %v11550_v2 = vadd.f32 %v2637_v32, %v11331_v29  ;;  %v7500_v29 = vld [vmem:[%s12628_s1 + $0xe70] sm:$0xf0]  ;;  %v8343_v33 = vld [vmem:[%s12628_s1 + $0xe4c] sm:$0xf0]  ;;  %v7728_v32 = vld [vmem:[%s12628_s1 + $0xfe0] sm:$0xf]  ;;  %v7463_v50 = vor.u32 %v8334_v9, %v7460_v11 }
 0x1c3   :  { %3686 = vmatmul.bf16.vlgmr.msrb.gmra.mxu0 %v8299_v34  ;;  %v7503_v44 = vor.u32 %v8345_v20, %v7500_v29  ;;  %v8397_v20 = vld [vmem:[%s12628_s1 + $0xff4] sm:$0xf0]  ;;  %v7459_v29 = vor.u32 %v8336_v49, %v7458_v1  ;;  %v7738_v63 = vld [vmem:[%s12628_s1 + $0xff8] sm:$0xf0] }
 0x1c4   :  { %3944 = vmatpush.bf16.msra.mxu0 %v7563_v36  ;;  %3700 = vmatmul.bf16.vlgmr.msrb.gmra.mxu1 %v8299_v34  ;;  %v8341_v36 = vld [vmem:[%s12628_s1 + $0xe44] sm:$0xf]  ;;  %v7690_v1 = vld [vmem:[%s12628_s1 + $0xf98] sm:$0xf0] }
 0x1c5   :  { %3958 = vmatpush.bf16.msra.mxu1 %v7567_v35  ;;  %3972 = vmatpush.bf16.msra.mxu2 %v7571_v40  ;;  %v7484_v40 = vld [vmem:[%s12628_s1 + $0xe50] sm:$0xf0] }
 0x1c6   :  { %3986 = vmatpush.bf16.msra.mxu3 %v7575_v37  ;;  %3714 = vmatmul.bf16.vlgmr.msrb.gmra.mxu2 %v8299_v34 }
 0x1c7   :  { %3728 = vmatmul.bf16.vlgmr.msrb.gmra.mxu3 %v8299_v34  ;;  %v7511_v34 = vor.u32 %v8346_v48, %v7508_v57  ;;  %v8332_v57 = vld [vmem:[%s12629_s0 + $0x70] sm:$0xff] }
 0x1c8   :  { %3945 = vmatpush.bf16.msra.mxu0 %v7547_v25  ;;  %v2625_v39 = vpop.f32.mrf.mxu0 }
 0x1c9   :  { %3959 = vmatpush.bf16.msra.mxu1 %v7551_v45  ;;  %3973 = vmatpush.bf16.msra.mxu2 %v7555_v30  ;;  %v2651_v35 = vpop.f32.mrf.mxu2  ;;  %v11607_v43 = vadd.f32 %v2625_v39, %v11388_v47  ;;  %v2639_v25 = vpop.f32.mrf.mxu1  ;;  %v7487_v30 = vor.u32 %v8341_v36, %v7484_v40  ;;  %v8337_v47 = vld [vmem:[%s12628_s1 + $0xe24] sm:$0xf]  ;;  %v8393_v40 = vld [vmem:[%s12628_s1 + $0xfd4] sm:$0xf0] }
 0x1ca   :  { %3987 = vmatpush.bf16.msra.mxu3 %v7559_v59  ;;  %v11595_v14 = vadd.f32 %v2651_v35, %v11376_v58  ;;  %v2665_v37 = vpop.f32.mrf.mxu3  ;;  %v7483_v58 = vor.u32 %v8343_v33, %v7482_v10  ;;  %v11610_v45 = vadd.f32 %v2639_v25, %v11391_v61  ;;  %v7468_v61 = vld [vmem:[%s12628_s1 + $0xe30] sm:$0xf0]  ;;  %v7474_v59 = vld [vmem:[%s12628_s1 + $0xe28] sm:$0xf]  ;;  %v8392_v10 = vld [vmem:[%s12628_s1 + $0xfcc] sm:$0xf0] }
 0x1cb   :  { %v11604_v53 = vadd.f32 %v2665_v37, %v11385_v26  ;;  %v8339_v26 = vld [vmem:[%s12628_s1 + $0xe2c] sm:$0xf0]  ;;  %v8390_v33 = vld [vmem:[%s12628_s1 + $0xfc4] sm:$0xf]  ;;  %v7720_v35 = vld [vmem:[%s12628_s1 + $0xfc8] sm:$0xf] }
 0x1cc   :  { %3946 = vmatpush.bf16.msra.mxu0 %v7531_v38  ;;  %v7467_v18 = vor.u32 %v8339_v26, %v7466_v17  ;;  %v8335_v38 = vld [vmem:[%s12628_s1 + $0xe0c] sm:$0xf0]  ;;  %v7721_v42 = vor.u32 %v8393_v40, %v7720_v35  ;;  %v7704_v17 = vld [vmem:[%s12628_s1 + $0xfa8] sm:$0xf]  ;;  %v8389_v26 = vld [vmem:[%s12628_s1 + $0xfb4] sm:$0xf0] }
 0x1cd   :  { %3960 = vmatpush.bf16.msra.mxu1 %v7535_v13  ;;  %3974 = vmatpush.bf16.msra.mxu2 %v7539_v19  ;;  %v7471_v13 = vor.u32 %v8337_v47, %v7468_v61  ;;  %v7475_v19 = vor.u32 %v8340_v62, %v7474_v59  ;;  %v7451_v28 = vor.u32 %v8335_v38, %v7450_v55  ;;  %v8388_v25 = vld [vmem:[%s12628_s1 + $0xfac] sm:$0xf0]  ;;  %v8387_v47 = vld [vmem:[%s12628_s1 + $0xfac] sm:$0xf]  ;;  %v7682_v38 = vld [vmem:[%s12628_s1 + $0xf90] sm:$0xf0] }
 0x1ce   :  { %3988 = vmatpush.bf16.msra.mxu3 %v7543_v5  ;;  %v7479_v5 = vor.u32 %v8338_v3, %v7476_v0  ;;  %v7697_v61 = vor.u32 %v8388_v25, %v7696_v15  ;;  %v7705_v62 = vor.u32 %v8389_v26, %v7704_v17  ;;  %v7680_v3 = vld [vmem:[%s12628_s1 + $0xf80] sm:$0xf]  ;;  %v8384_v0 = vld [vmem:[%s12628_s1 + $0xf8c] sm:$0xf0]  ;;  %v8375_v35 = vld [vmem:[%s12628_s1 + $0xf4c] sm:$0xf] }
 0x1cf   :  { %v7681_v49 = vor.u32 %v8384_v0, %v7680_v3  ;;  %v7658_v40 = vld [vmem:[%s12628_s1 + $0xf58] sm:$0xf0]  ;;  %v7632_v25 = vld [vmem:[%s12628_s1 + $0xf20] sm:$0xf]  ;;  %v8371_v17 = vld [vmem:[%s12628_s1 + $0xf2c] sm:$0xf] }
 0x1d0   :  { %3947 = vmatpush.bf16.msra.mxu0 %v7515_v4  ;;  %v8396_v4 = vld [vmem:[%s12628_s1 + $0xfec] sm:$0xf0]  ;;  %v7642_v26 = vld [vmem:[%s12628_s1 + $0xf38] sm:$0xf0]  ;;  %v8366_v3 = vld [vmem:[%s12628_s1 + $0xf04] sm:$0xf] }
 0x1d1   :  { %3961 = vmatpush.bf16.msra.mxu1 %v7519_v6  ;;  %3975 = vmatpush.bf16.msra.mxu2 %v7523_v27  ;;  %v2653_v7 = vpop.f32.mrf.mxu2  ;;  %v8394_v6 = vld [vmem:[%s12628_s1 + $0xfe4] sm:$0xf]  ;;  %v7729_v48 = vor.u32 %v8396_v4, %v7728_v32  ;;  %v7664_v32 = vld [vmem:[%s12628_s1 + $0xf60] sm:$0xf]  ;;  %v8380_v4 = vld [vmem:[%s12628_s1 + $0xf6c] sm:$0xf0]  ;;  %v7645_v0 = vor.u32 %v8371_v17, %v7642_v26 }
 0x1d2   :  { %3989 = vmatpush.bf16.msra.mxu3 %v7527_v46  ;;  %v11661_v12 = vadd.f32 %v2653_v7, %v11442_v22  ;;  %v2667_v52 = vpop.f32.mrf.mxu3  ;;  %v7730_v22 = vld [vmem:[%s12628_s1 + $0xff0] sm:$0xf0]  ;;  %v7455_v46 = vor.u32 %v8333_v54, %v7452_v56  ;;  %v8383_v56 = vld [vmem:[%s12628_s1 + $0xf8c] sm:$0xf]  ;;  %v8418_v26 = vld [vmem:[%s12631_s3 + $0xa0] sm:$0xff] }
 0x1d3   :  { %v11673_v27 = vadd.f32 %v2667_v52, %v11454_v41  ;;  %v8395_v41 = vld [vmem:[%s12628_s1 + $0xfec] sm:$0xf] }
 0x1d4   :  { %3948 = vmatpush.bf16.msra.mxu0 %v7499_v23  ;;  %v7733_v23 = vor.u32 %v8394_v6, %v7730_v22  ;;  %v7741_v36 = vor.u32 %v8395_v41, %v7738_v63  ;;  %v7693_v6 = vor.u32 %v8383_v56, %v7690_v1  ;;  %v8381_v22 = vld [vmem:[%s12628_s1 + $0xf74] sm:$0xf0]  ;;  %v7648_v63 = vld [vmem:[%s12628_s1 + $0xf40] sm:$0xf]  ;;  %v8367_v56 = vld [vmem:[%s12628_s1 + $0xf0c] sm:$0xf] }
 0x1d5   :  { %3962 = vmatpush.bf16.msra.mxu1 %v7503_v44  ;;  %3976 = vmatpush.bf16.msra.mxu2 %v7507_v16  ;;  %v7737_v44 = vor.u32 %v8397_v20, %v7736_v31  ;;  %v7712_v16 = vld [vmem:[%s12628_s1 + $0xfc0] sm:$0xf]  ;;  %v8379_v31 = vld [vmem:[%s12628_s1 + $0xf6c] sm:$0xf]  ;;  %v7674_v20 = vld [vmem:[%s12628_s1 + $0xf78] sm:$0xf0] }
 0x1d6   :  { %3990 = vmatpush.bf16.msra.mxu3 %v7511_v34  ;;  %v7714_v34 = vld [vmem:[%s12628_s1 + $0xfd0] sm:$0xf0]  ;;  %v7713_v37 = vor.u32 %v8392_v10, %v7712_v16  ;;  %v7656_v16 = vld [vmem:[%s12628_s1 + $0xf48] sm:$0xf]  ;;  %v8377_v10 = vld [vmem:[%s12628_s1 + $0xf54] sm:$0xf0] }
 0x1d7   :  { %v7717_v39 = vor.u32 %v8390_v33, %v7714_v34  ;;  %v7657_v15 = vor.u32 %v8377_v10, %v7656_v16  ;;  %v7626_v1 = vld [vmem:[%s12628_s1 + $0xf18] sm:$0xf0]  ;;  %v8412_v16 = vld [vmem:[%s12631_s3 + $0x70] sm:$0xff] }
 0x1d8   :  { %3949 = vmatpush.bf16.msra.mxu0 %v7483_v58  ;;  %v8386_v58 = vld [vmem:[%s12628_s1 + $0xfa4] sm:$0xf]  ;;  %v8421_v10 = vld [vmem:[%s12631_s3 + $0xb8] sm:$0xff] }
 0x1d9   :  { %3963 = vmatpush.bf16.msra.mxu1 %v7487_v30  ;;  %3977 = vmatpush.bf16.msra.mxu2 %v7491_v21  ;;  %v7725_v30 = vor.u32 %v8391_v51, %v7722_v60  ;;  %v7698_v21 = vld [vmem:[%s12628_s1 + $0xfb0] sm:$0xf0] }
 0x1da   :  { %3991 = vmatpush.bf16.msra.mxu3 %v7495_v8  ;;  %v7706_v8 = vld [vmem:[%s12628_s1 + $0xfb8] sm:$0xf0]  ;;  %v7701_v59 = vor.u32 %v8386_v58, %v7698_v21  ;;  %v7661_v58 = vor.u32 %v8375_v35, %v7658_v40  ;;  %v8373_v21 = vld [vmem:[%s12628_s1 + $0xf34] sm:$0xf0]  ;;  %v8428_v35 = vld [vmem:[%s12631_s3 + $0xf0] sm:$0xff] }
 0x1db   :  { %v7709_v55 = vor.u32 %v8387_v47, %v7706_v8  ;;  %v8403_v40 = vld [vmem:[%s12631_s3 + $0x28] sm:$0xff] }
 0x1dc   :  { %3950 = vmatpush.bf16.msra.mxu0 %v7467_v18  ;;  %v8382_v18 = vld [vmem:[%s12628_s1 + $0xf84] sm:$0xf] }
 0x1dd   :  { %3964 = vmatpush.bf16.msra.mxu1 %v7471_v13  ;;  %3978 = vmatpush.bf16.msra.mxu2 %v7475_v19  ;;  %v7688_v13 = vld [vmem:[%s12628_s1 + $0xf88] sm:$0xf]  ;;  %v8385_v19 = vld [vmem:[%s12628_s1 + $0xf94] sm:$0xf0]  ;;  %v7685_v11 = vor.u32 %v8382_v18, %v7682_v38 }
 0x1de   :  { %3992 = vmatpush.bf16.msra.mxu3 %v7479_v5  ;;  %v7689_v52 = vor.u32 %v8385_v19, %v7688_v13  ;;  %v7624_v38 = vld [vmem:[%s12628_s1 + $0xf08] sm:$0xf]  ;;  %v8369_v13 = vld [vmem:[%s12628_s1 + $0xf14] sm:$0xf0] }
 0x1e0   :  { %3951 = vmatpush.bf16.msra.mxu0 %v7451_v28  ;;  %v2889_v54 = vpop.f32.mrf.mxu0  ;;  %v7672_v28 = vld [vmem:[%s12628_s1 + $0xf68] sm:$0xf] }
 0x1e1   :  { %3965 = vmatpush.bf16.msra.mxu1 %v7455_v46  ;;  %3979 = vmatpush.bf16.msra.mxu2 %v7459_v29  ;;  %v11766_v5 = vadd.f32 %v2889_v54, %v11547_v24  ;;  %v2903_v7 = vpop.f32.mrf.mxu1  ;;  %v8378_v24 = vld [vmem:[%s12628_s1 + $0xf64] sm:$0xf]  ;;  %v7665_v46 = vor.u32 %v8380_v4, %v7664_v32  ;;  %v7673_v41 = vor.u32 %v8381_v22, %v7672_v28  ;;  %v8365_v32 = vld [vmem:[%s12629_s0 + $0x78] sm:$0xff] }
 0x1e2   :  { %3993 = vmatpush.bf16.msra.mxu3 %v7463_v50  ;;  %v11769_v9 = vadd.f32 %v2903_v7, %v11550_v2  ;;  %v7666_v2 = vld [vmem:[%s12628_s1 + $0xf70] sm:$0xf0]  ;;  %v8376_v50 = vld [vmem:[%s12628_s1 + $0xf4c] sm:$0xf0] }
 0x1e3   :  { %3952 = vmatmul.bf16.vlgmr.msra.gmra.mxu0 %v8332_v57  ;;  %v7669_v29 = vor.u32 %v8378_v24, %v7666_v2 }
 0x1e4   :  { %4210 = vmatpush.bf16.msrb.mxu0 %v7729_v48  ;;  %3966 = vmatmul.bf16.vlgmr.msra.gmra.mxu1 %v8332_v57  ;;  %v8374_v48 = vld [vmem:[%s12628_s1 + $0xf44] sm:$0xf] }
 0x1e5   :  { %4224 = vmatpush.bf16.msrb.mxu1 %v7733_v23  ;;  %4238 = vmatpush.bf16.msrb.mxu2 %v7737_v44  ;;  %v7650_v44 = vld [vmem:[%s12628_s1 + $0xf50] sm:$0xf0] }
 0x1e6   :  { %4252 = vmatpush.bf16.msrb.mxu3 %v7741_v36  ;;  %3980 = vmatmul.bf16.vlgmr.msra.gmra.mxu2 %v8332_v57 }
 0x1e7   :  { %3994 = vmatmul.bf16.vlgmr.msra.gmra.mxu3 %v8332_v57  ;;  %v7677_v57 = vor.u32 %v8379_v31, %v7674_v20 }
 0x1e8   :  { %4211 = vmatpush.bf16.msrb.mxu0 %v7713_v37  ;;  %v2891_v34 = vpop.f32.mrf.mxu0 }
 0x1e9   :  { %4225 = vmatpush.bf16.msrb.mxu1 %v7717_v39  ;;  %4239 = vmatpush.bf16.msrb.mxu2 %v7721_v42  ;;  %v2917_v23 = vpop.f32.mrf.mxu2  ;;  %v11826_v60 = vadd.f32 %v2891_v34, %v11607_v43  ;;  %v2905_v37 = vpop.f32.mrf.mxu1  ;;  %v7653_v42 = vor.u32 %v8374_v48, %v7650_v44  ;;  %v8370_v43 = vld [vmem:[%s12628_s1 + $0xf24] sm:$0xf]  ;;  %v8405_v48 = vld [vmem:[%s12631_s3 + $0x38] sm:$0xff]  ;;  %v8404_v44 = vld [vmem:[%s12631_s3 + $0x30] sm:$0xff] }
 0x1ea   :  { %4253 = vmatpush.bf16.msrb.mxu3 %v7725_v30  ;;  %v11814_v33 = vadd.f32 %v2917_v23, %v11595_v14  ;;  %v2931_v36 = vpop.f32.mrf.mxu3  ;;  %v7649_v14 = vor.u32 %v8376_v50, %v7648_v63  ;;  %v11829_v39 = vadd.f32 %v2905_v37, %v11610_v45  ;;  %v7634_v45 = vld [vmem:[%s12628_s1 + $0xf30] sm:$0xf0]  ;;  %v7640_v30 = vld [vmem:[%s12628_s1 + $0xf28] sm:$0xf] }
 0x1eb   :  { %v11823_v51 = vadd.f32 %v2931_v36, %v11604_v53  ;;  %v8372_v53 = vld [vmem:[%s12628_s1 + $0xf2c] sm:$0xf0]  ;;  %v7637_v8 = vor.u32 %v8370_v43, %v7634_v45  ;;  %v8429_v36 = vld [vmem:[%s12631_s3 + $0xf8] sm:$0xff]  ;;  %v8419_v43 = vld [vmem:[%s12631_s3 + $0xa8] sm:$0xff] }
 0x1ec   :  { %4212 = vmatpush.bf16.msrb.mxu0 %v7697_v61  ;;  %v7633_v47 = vor.u32 %v8372_v53, %v7632_v25  ;;  %v7641_v61 = vor.u32 %v8373_v21, %v7640_v30  ;;  %v8420_v34 = vld [vmem:[%s12631_s3 + $0xb0] sm:$0xff]  ;;  %v8410_v25 = vld [vmem:[%s12631_s3 + $0x60] sm:$0xff]  ;;  %v8401_v45 = vld [vmem:[%s12631_s3 + $0x18] sm:$0xff] }
 0x1ed   :  { %4226 = vmatpush.bf16.msrb.mxu1 %v7701_v59  ;;  %4240 = vmatpush.bf16.msrb.mxu2 %v7705_v62  ;;  %v7616_v59 = vld [vmem:[%s12628_s1 + $0xf00] sm:$0xf]  ;;  %v8368_v62 = vld [vmem:[%s12628_s1 + $0xf0c] sm:$0xf0]  ;;  %v8409_v30 = vld [vmem:[%s12631_s3 + $0x58] sm:$0xff] }
 0x1ee   :  { %4254 = vmatpush.bf16.msrb.mxu3 %v7709_v55  ;;  %v7618_v55 = vld [vmem:[%s12628_s1 + $0xf10] sm:$0xf0] }
 0x1f0   :  { %4213 = vmatpush.bf16.msrb.mxu0 %v7681_v49  ;;  %v7617_v49 = vor.u32 %v8368_v62, %v7616_v59  ;;  %v8408_v59 = vld [vmem:[%s12631_s3 + $0x50] sm:$0xff] }
 0x1f1   :  { %4227 = vmatpush.bf16.msrb.mxu1 %v7685_v11  ;;  %4241 = vmatpush.bf16.msrb.mxu2 %v7689_v52  ;;  %v2919_v18 = vpop.f32.mrf.mxu2  ;;  %v7621_v11 = vor.u32 %v8366_v3, %v7618_v55  ;;  %v7625_v52 = vor.u32 %v8369_v13, %v7624_v38  ;;  %v8417_v3 = vld [vmem:[%s12631_s3 + $0x98] sm:$0xff]  ;;  %v8407_v55 = vld [vmem:[%s12631_s3 + $0x48] sm:$0xff]  ;;  %v8416_v38 = vld [vmem:[%s12631_s3 + $0x90] sm:$0xff] }
 0x1f2   :  { %4255 = vmatpush.bf16.msrb.mxu3 %v7693_v6  ;;  %v11874_v19 = vadd.f32 %v2919_v18, %v11661_v12  ;;  %v2933_v54 = vpop.f32.mrf.mxu3  ;;  %v7629_v12 = vor.u32 %v8367_v56, %v7626_v1  ;;  %v8399_v18 = vld [vmem:[%s12631_s3 + $0x8] sm:$0xff]  ;;  %v8424_v13 = vld [vmem:[%s12631_s3 + $0xd0] sm:$0xff] }
 0x1f3   :  { %v11883_v7 = vadd.f32 %v2933_v54, %v11673_v27 }
 0x1f4   :  { %4214 = vmatpush.bf16.msrb.mxu0 %v7665_v46 }
 0x1f5   :  { %4228 = vmatpush.bf16.msrb.mxu1 %v7669_v29  ;;  %4242 = vmatpush.bf16.msrb.mxu2 %v7673_v41 }
 0x1f6   :  { %4256 = vmatpush.bf16.msrb.mxu3 %v7677_v57  ;;  %v8413_v57 = vld [vmem:[%s12631_s3 + $0x78] sm:$0xff] }
 0x1f8   :  { %4215 = vmatpush.bf16.msrb.mxu0 %v7649_v14 }
 0x1f9   :  { %4229 = vmatpush.bf16.msrb.mxu1 %v7653_v42  ;;  %4243 = vmatpush.bf16.msrb.mxu2 %v7657_v15  ;;  %v8402_v15 = vld [vmem:[%s12631_s3 + $0x20] sm:$0xff] }
 0x1fa   :  { %4257 = vmatpush.bf16.msrb.mxu3 %v7661_v58  ;;  %v8427_v58 = vld [vmem:[%s12631_s3 + $0xe8] sm:$0xff] }
 0x1fc   :  { %4216 = vmatpush.bf16.msrb.mxu0 %v7633_v47  ;;  %v8426_v47 = vld [vmem:[%s12631_s3 + $0xe0] sm:$0xff] }
 0x1fd   :  { %4230 = vmatpush.bf16.msrb.mxu1 %v7637_v8  ;;  %4244 = vmatpush.bf16.msrb.mxu2 %v7641_v61  ;;  %v8400_v61 = vld [vmem:[%s12631_s3 + $0x10] sm:$0xff] }
 0x1fe   :  { %4258 = vmatpush.bf16.msrb.mxu3 %v7645_v0  ;;  %v8425_v0 = vld [vmem:[%s12631_s3 + $0xd8] sm:$0xff] }
 0x200   :  { %4217 = vmatpush.bf16.msrb.mxu0 %v7617_v49  ;;  %v3155_v27 = vpop.f32.mrf.mxu0  ;;  %v8398_v49 = vld [vmem:[%s12631_s3] sm:$0xff] }
 0x201   :  { %4231 = vmatpush.bf16.msrb.mxu1 %v7621_v11  ;;  %4245 = vmatpush.bf16.msrb.mxu2 %v7625_v52  ;;  %v11889_v4 = vadd.f32 %v3155_v27, %v11766_v5  ;;  %v3169_v24 = vpop.f32.mrf.mxu1  ;;  %v8406_v11 = vld [vmem:[%s12631_s3 + $0x40] sm:$0xff] }
 0x202   :  { %4259 = vmatpush.bf16.msrb.mxu3 %v7629_v12  ;;  %v11892_v6 = vadd.f32 %v3169_v24, %v11769_v9  ;;  %v8415_v12 = vld [vmem:[%s12631_s3 + $0x88] sm:$0xff]  ;;  %v8414_v27 = vld [vmem:[%s12631_s3 + $0x80] sm:$0xff] }
 0x203   :  { %4218 = vmatmul.bf16.vlgmr.msrb.gmra.mxu0 %v8365_v32  ;;  %v8422_v24 = vld [vmem:[%s12631_s3 + $0xc0] sm:$0xff] }
 0x204   :  { %4232 = vmatmul.bf16.vlgmr.msrb.gmra.mxu1 %v8365_v32  ;;  %4246 = vmatmul.bf16.vlgmr.msrb.gmra.mxu2 %v8365_v32 }
 0x205   :  { %4260 = vmatmul.bf16.vlgmr.msrb.gmra.mxu3 %v8365_v32  ;;  %4564 = vmatpush.bf16.msra.mxu0 %v8405_v48  ;;  %v8423_v32 = vld [vmem:[%s12631_s3 + $0xc8] sm:$0xff] }
 0x206   :  { %4578 = vmatpush.bf16.msra.mxu1 %v8413_v57  ;;  %4592 = vmatpush.bf16.msra.mxu2 %v8421_v10 }
 0x207   :  { %4606 = vmatpush.bf16.msra.mxu3 %v8429_v36 }
 0x208   :  { %v11900_v20 = vpop.f32.mrf.mxu0 }
 0x209   :  { %v3183_v2 = vpop.f32.mrf.mxu2  ;;  %v11902_v46 = vpop.f32.mrf.mxu1  ;;  %4565 = vmatpush.bf16.msra.mxu0 %v8404_v44 }
 0x20a   :  { %v11895_v28 = vadd.f32 %v3183_v2, %v11814_v33  ;;  %v3197_v22 = vpop.f32.mrf.mxu3  ;;  %4579 = vmatpush.bf16.msra.mxu1 %v8412_v16  ;;  %4593 = vmatpush.bf16.msra.mxu2 %v8420_v34 }
 0x20b   :  { %v11898_v31 = vadd.f32 %v3197_v22, %v11823_v51  ;;  %v8411_v51 = vld [vmem:[%s12631_s3 + $0x68] sm:$0xff]  ;;  %4607 = vmatpush.bf16.msra.mxu3 %v8428_v35  ;;  %v3206_v35 = vadd.f32 %v11900_v20, %v11826_v60 }
 0x20d   :  { %4566 = vmatpush.bf16.msra.mxu0 %v8403_v40 }
 0x20e   :  { %4580 = vmatpush.bf16.msra.mxu1 %v8411_v51  ;;  %4594 = vmatpush.bf16.msra.mxu2 %v8419_v43 }
 0x20f   :  { %4608 = vmatpush.bf16.msra.mxu3 %v8427_v58 }
 0x211   :  { %v11904_v29 = vpop.f32.mrf.mxu2  ;;  %4567 = vmatpush.bf16.msra.mxu0 %v8402_v15  ;;  %v3207_v15 = vadd.f32 %v11902_v46, %v11829_v39 }
 0x212   :  { %v11906_v5 = vpop.f32.mrf.mxu3  ;;  %4581 = vmatpush.bf16.msra.mxu1 %v8410_v25  ;;  %4595 = vmatpush.bf16.msra.mxu2 %v8418_v26 }
 0x213   :  { %4609 = vmatpush.bf16.msra.mxu3 %v8426_v47 }
 0x215   :  { %4568 = vmatpush.bf16.msra.mxu0 %v8401_v45 }
 0x216   :  { %4582 = vmatpush.bf16.msra.mxu1 %v8409_v30  ;;  %4596 = vmatpush.bf16.msra.mxu2 %v8417_v3 }
 0x217   :  { %4610 = vmatpush.bf16.msra.mxu3 %v8425_v0 }
 0x219   :  { %4569 = vmatpush.bf16.msra.mxu0 %v8400_v61 }
 0x21a   :  { %4583 = vmatpush.bf16.msra.mxu1 %v8408_v59  ;;  %4597 = vmatpush.bf16.msra.mxu2 %v8416_v38 }
 0x21b   :  { %4611 = vmatpush.bf16.msra.mxu3 %v8424_v13 }
 0x21d   :  { %4570 = vmatpush.bf16.msra.mxu0 %v8399_v18 }
 0x21e   :  { %4584 = vmatpush.bf16.msra.mxu1 %v8407_v55  ;;  %4598 = vmatpush.bf16.msra.mxu2 %v8415_v12 }
 0x21f   :  { %4612 = vmatpush.bf16.msra.mxu3 %v8423_v32 }
 0x220   :  { %v11908_v41 = vpop.f32.mrf.mxu0 }
 0x221   :  { %v11910_v9 = vpop.f32.mrf.mxu1  ;;  %4571 = vmatpush.bf16.msra.mxu0 %v8398_v49  ;;  %v3468_v44 = vadd.f32 %v11908_v41, %v11889_v4  ;;  %v4274_v4 = vld [vmem:[%s12632_s2] sm:$0xf] }
 0x222   :  { %4585 = vmatpush.bf16.msra.mxu1 %v8406_v11  ;;  %4599 = vmatpush.bf16.msra.mxu2 %v8414_v27  ;;  %v3469_v10 = vadd.f32 %v11910_v9, %v11892_v6  ;;  %v4276_v20 = vperm.slane %v4274_v4, 0  ;;  %v4277_v46 = vperm.slane %v4274_v4, 1  ;;  %v4278_v55 = vperm.slane %v4274_v4, 2 }
 0x223   :  { %4613 = vmatpush.bf16.msra.mxu3 %v8422_v24 }
 0x228   :  { %v11922_v23 = vpop.f32.mrf.mxu0 }
 0x229   :  { %v11912_v63 = vpop.f32.mrf.mxu2  ;;  %v11933_v33 = vpop.f32.mrf.mxu1  ;;  %v3472_v41 = vadd.f32 %v11922_v23, %v3206_v35 }
 0x22a   :  { %v11914_v50 = vpop.f32.mrf.mxu3  ;;  %v3473_v9 = vadd.f32 %v11933_v33, %v3207_v15  ;;  %v3209_v33 = vadd.f32 %v11906_v5, %v11883_v7  ;;  %v16_v15 = vstv %s12634_s6 }
 0x22b   :  { %v3471_v30 = vadd.f32 %v11914_v50, %v11898_v31  ;;  %17 = vst [vmem:[#allocation2] sm:$0x1] %v16_v15 }
 0x231   :  { %v11950_v37 = vpop.f32.mrf.mxu2 }
 0x232   :  { %v11952_v14 = vpop.f32.mrf.mxu3 }
 0x233   :  { %v3475_v31 = vadd.f32 %v11952_v14, %v3209_v33 }
 0x240   :  { %v11954_v42 = vpop.f32.mrf.mxu0 }
 0x241   :  { %v11962_v53 = vpop.f32.mrf.mxu1  ;;  %v3734_v40 = vadd.f32 %v11954_v42, %v3468_v44  ;;  %v3470_v42 = vadd.f32 %v11912_v63, %v11895_v28 }
 0x242   :  { %v3735_v25 = vadd.f32 %v11962_v53, %v3469_v10  ;;  %v3208_v53 = vadd.f32 %v11904_v29, %v11874_v19 }
 0x244   :  { %v3474_v28 = vadd.f32 %v11950_v37, %v3208_v53  ;;  %v8434_v53 = vld [vmem:[%s12633_s5] ss:$0 sm:$0xff] }
 0x248   :  { %v3689_v8 = vpop.f32.mrf.mxu0 }
 0x249   :  { %v11976_v21 = vpop.f32.mrf.mxu2  ;;  %v3703_v62 = vpop.f32.mrf.mxu1  ;;  %v3738_v58 = vadd.f32 %v3689_v8, %v3472_v41 }
 0x24a   :  { %v11978_v17 = vpop.f32.mrf.mxu3  ;;  %v3739_v45 = vadd.f32 %v3703_v62, %v3473_v9  ;;  %v3736_v47 = vadd.f32 %v11976_v21, %v3470_v42 }
 0x24b   :  { %v3737_v63 = vadd.f32 %v11978_v17, %v3471_v30 }
 0x251   :  { %v12010_v54 = vpop.f32.mrf.mxu2 }
 0x252   :  { %v12012_v56 = vpop.f32.mrf.mxu3  ;;  %v3740_v7 = vadd.f32 %v12010_v54, %v3474_v28 }
 0x253   :  { %v3741_v18 = vadd.f32 %v12012_v56, %v3475_v31 }
 0x260   :  { %v3953_v1 = vpop.f32.mrf.mxu0 }
 0x261   :  { %v3967_v52 = vpop.f32.mrf.mxu1  ;;  %v4000_v6 = vadd.f32 %v3953_v1, %v3734_v40  ;;  %v4279_v1 = vperm.slane %v4274_v4, 3 }
 0x262   :  { %v4001_v43 = vadd.f32 %v3967_v52, %v3735_v25  ;;  %v8433_v25 = vld [vmem:[%s12630_s4] ss:$0 sm:$0xff] }
 0x268   :  { %v3955_v48 = vpop.f32.mrf.mxu0 }
 0x269   :  { %v3981_v2 = vpop.f32.mrf.mxu2  ;;  %v3969_v57 = vpop.f32.mrf.mxu1  ;;  %v4004_v23 = vadd.f32 %v3955_v48, %v3738_v58 }
 0x26a   :  { %v3995_v22 = vpop.f32.mrf.mxu3  ;;  %v4005_v8 = vadd.f32 %v3969_v57, %v3739_v45  ;;  %v4002_v50 = vadd.f32 %v3981_v2, %v3736_v47 }
 0x26b   :  { %v4003_v5 = vadd.f32 %v3995_v22, %v3737_v63 }
 0x271   :  { %v3983_v16 = vpop.f32.mrf.mxu2 }
 0x272   :  { %v3997_v36 = vpop.f32.mrf.mxu3  ;;  %v4006_v49 = vadd.f32 %v3983_v16, %v3740_v7 }
 0x273   :  { %v4007_v52 = vadd.f32 %v3997_v36, %v3741_v18 }
 0x280   :  { %v4219_v34 = vpop.f32.mrf.mxu0 }
 0x281   :  { %v4233_v51 = vpop.f32.mrf.mxu1  ;;  %v4266_v60 = vadd.f32 %v4219_v34, %v4000_v6 }
 0x282   :  { %v4267_v39 = vadd.f32 %v4233_v51, %v4001_v43 }
 0x283   :  { %v12058_v62 = vadd.f32 %v4276_v20, %v4266_v60 }
 0x284   :  { %v12061_v3 = vadd.f32 %v4277_v46, %v4267_v39 }
 0x285   :  { %12659 = vst [vmem:[#allocation3_spill] sm:$0xff] %v12058_v62  ;;  %v12646_v38 = vmax.f32 %v12058_v62, 0.0  ;;  %v12474_v62 = vld [vmem:[%s12635_s7 + $0x8] sm:$0xff] }
 0x286   :  { %12660 = vst [vmem:[#allocation4_spill] sm:$0xff] %v12061_v3  ;;  %v12645_v11 = vmax.f32 %v12061_v3, 0.0  ;;  %v12469_v3 = vld [vmem:[%s12635_s7 + $0x190] sm:$0xff] }
 0x287   :  { %v4247_v26 = vpop.f32.mrf.mxu2 }
 0x288   :  { %v4261_v61 = vpop.f32.mrf.mxu3  ;;  %v4221_v59 = vpop.f32.mrf.mxu0  ;;  %v4268_v37 = vadd.f32 %v4247_v26, %v4002_v50 }
 0x289   :  { %v4270_v19 = vadd.f32 %v4221_v59, %v4004_v23  ;;  %v4235_v29 = vpop.f32.mrf.mxu1  ;;  %v4269_v13 = vadd.f32 %v4261_v61, %v4003_v5  ;;  %v8435_v59 = vld [vmem:[#allocation2] ss:$0 sm:$0xff] }
 0x28a   :  { %v4271_v0 = vadd.f32 %v4235_v29, %v4005_v8  ;;  %v12077_v32 = vadd.f32 %v4278_v55, %v4268_v37 }
 0x28b   :  { %v12064_v21 = vadd.f32 %v4276_v20, %v4270_v19  ;;  %v12083_v22 = vadd.f32 %v4279_v1, %v4269_v13 }
 0x28c   :  { %v12067_v17 = vadd.f32 %v4277_v46, %v4271_v0  ;;  %12663 = vst [vmem:[#allocation7_spill] sm:$0xff] %v12077_v32  ;;  %v12644_v16 = vmax.f32 %v12077_v32, 0.0 }
 0x28d   :  { %12661 = vst [vmem:[#allocation5_spill] sm:$0xff] %v12064_v21  ;;  %v12642_v14 = vmax.f32 %v12064_v21, 0.0  ;;  %v12643_v36 = vmax.f32 %v12083_v22, 0.0  ;;  %v12444_v21 = vld [vmem:[%s12635_s7 + $0x198] sm:$0xff] }
 0x28e   :  { %12662 = vst [vmem:[#allocation6_spill] sm:$0xff] %v12067_v17  ;;  %v12641_v54 = vmax.f32 %v12067_v17, 0.0 }
 0x28f   :  { %v4300_v56 = vpack.c.bf16 %v12642_v14, %v12646_v38  ;;  %v4249_v12 = vpop.f32.mrf.mxu2  ;;  %12664 = vst [vmem:[#allocation8_spill] sm:$0xff] %v12083_v22  ;;  %v12400_v38 = vld [vmem:[%s12635_s7 + $0xa0] sm:$0xff]  ;;  %v12449_v22 = vld [vmem:[%s12635_s7 + $0x10] sm:$0xff] }
 0x290   :  { %v4301_v27 = vpack.c.bf16 %v12641_v54, %v12645_v11  ;;  %v4272_v24 = vadd.f32 %v4249_v12, %v4006_v49  ;;  %v4263_v2 = vpop.f32.mrf.mxu3  ;;  %v12374_v54 = vld [vmem:[%s12635_s7 + $0xa8] sm:$0xff]  ;;  %12669 = vst [vmem:[#allocation13_spill] sm:$0xff] %v12444_v21 }
 0x291   :  { %v4273_v48 = vadd.f32 %v4263_v2, %v4007_v52  ;;  %4572 = vmatmul.bf16.vlgmr.msra.gmra.mxu0 %v4300_v56  ;;  %v8456_v56 = vmov 0   ;;  %12670 = vst [vmem:[#allocation14_spill] sm:$0xff] %v12449_v22 }
 0x292   :  { %v12085_v57 = vadd.f32 %v4278_v55, %v4272_v24  ;;  %4586 = vmatmul.bf16.vlgmr.msra.gmra.mxu1 %v4301_v27  ;;  %8431 = vset.pattern.permute.xlu1 %v8456_v56 }
 0x293   :  { %v12087_v44 = vadd.f32 %v4279_v1, %v4273_v48  ;;  %8432 = vset.pattern.permute.xlu0 %v8456_v56 }
 0x294   :  { %12665 = vst [vmem:[#allocation9_spill] sm:$0xff] %v12085_v57  ;;  %v12640_v10 = vmax.f32 %v12085_v57, 0.0 }
 0x295   :  { %12666 = vst [vmem:[#allocation10_spill] sm:$0xff] %v12087_v44  ;;  %v12639_v34 = vmax.f32 %v12087_v44, 0.0 }
 0x296   :  { %v4302_v35 = vpack.c.bf16 %v12640_v10, %v12644_v16  ;;  %v12369_v10 = vld [vmem:[%s12635_s7 + $0x28] sm:$0xff] }
 0x297   :  { %v4303_v40 = vpack.c.bf16 %v12639_v34, %v12643_v36  ;;  %v12387_v36 = vld [vmem:[%s12635_s7 + $0x1a8] sm:$0xff] }
 0x298   :  { %4600 = vmatmul.bf16.vlgmr.msra.gmra.mxu2 %v4302_v35 }
 0x299   :  { %4614 = vmatmul.bf16.vlgmr.msra.gmra.mxu3 %v4303_v40 }
 0x30e   :  { %v4573_v51 = vpop.f32.mrf.mxu0 }
 0x30f   :  { %v4574_v4 = vadd.f32 %v8433_v25, %v4573_v51  ;;  %v4587_v41 = vpop.f32.mrf.mxu1 }
 0x311   :  { %v4588_v6 = vadd.f32 %v4587_v41, %v4574_v4 }
 0x316   :  { %v4575_v9 = vpop.f32.mrf.mxu0 }
 0x317   :  { %v4576_v20 = vadd.f32 %v8433_v25, %v4575_v9  ;;  %v4589_v45 = vpop.f32.mrf.mxu1 }
 0x319   :  { %v4590_v39 = vadd.f32 %v4589_v45, %v4576_v20  ;;  %v12140_v45 = vld [vmem:[%s12635_s7 + $0x1f8] sm:$0xff] }
 0x31a   :  { %4829 = vmatpush.msrb.mxu3 %v12140_v45 }
 0x31b   :  { %v4601_v43 = vpop.f32.mrf.mxu2 }
 0x31c   :  { %v4602_v58 = vadd.f32 %v4601_v43, %v4588_v6  ;;  %v4615_v60 = vpop.f32.mrf.mxu3  ;;  %v12123_v43 = vld [vmem:[%s12635_s7 + $0x78] sm:$0xff] }
 0x31d   :  { %4769 = vmatpush.msrb.mxu0 %v12123_v43 }
 0x31e   :  { %v4616_v42 = vadd.f32 %v4615_v60, %v4602_v58  ;;  %v12128_v58 = vld [vmem:[%s12635_s7 + $0xf8] sm:$0xff] }
 0x31f   :  { %v12133_v60 = vld [vmem:[%s12635_s7 + $0x178] sm:$0xff]  ;;  %4789 = vmatpush.msrb.mxu1 %v12128_v58 }
 0x320   :  { %8436 = vtanh.f32 %v4616_v42  ;;  %4809 = vmatpush.msrb.mxu2 %v12133_v60 }
 0x323   :  { %v4603_v46 = vpop.f32.mrf.mxu2 }
 0x324   :  { %v4604_v30 = vadd.f32 %v4603_v46, %v4590_v39  ;;  %v4617_v23 = vpop.f32.mrf.mxu3  ;;  %v12145_v39 = vld [vmem:[%s12635_s7 + $0x70] sm:$0xff] }
 0x325   :  { %v12150_v46 = vld [vmem:[%s12635_s7 + $0xf0] sm:$0xff]  ;;  %4770 = vmatpush.msrb.mxu0 %v12145_v39 }
 0x326   :  { %v8437_v26 = vpop.eup %8436  ;;  %v4618_v33 = vadd.f32 %v4617_v23, %v4604_v30  ;;  %v12162_v30 = vld [vmem:[%s12635_s7 + $0x1f0] sm:$0xff]  ;;  %v12167_v23 = vld [vmem:[%s12635_s7 + $0x68] sm:$0xff]  ;;  %4790 = vmatpush.msrb.mxu1 %v12150_v46 }
 0x327   :  { %v4626_v47 = vmul.f32 %v8437_v26, %v8434_v53  ;;  %4830 = vmatpush.msrb.mxu3 %v12162_v30  ;;  %4771 = vmatpush.msrb.mxu0 %v12167_v23 }
 0x328   :  { %8438 = vtanh.f32 %v4618_v33 }
 0x329   :  { %4628 = vadd.xlane.f32.xlu0 %v4626_v47  ;;  %v12176_v47 = vld [vmem:[%s12635_s7 + $0xe8] sm:$0xff] }
 0x32a   :  { %4791 = vmatpush.msrb.mxu1 %v12176_v47 }
 0x32e   :  { %v8439_v8 = vpop.eup %8438 }
 0x32f   :  { %v4627_v61 = vmul.f32 %v8439_v8, %v8434_v53  ;;  %v12157_v53 = vld [vmem:[%s12635_s7 + $0x170] sm:$0xff]  ;;  %v12181_v8 = vld [vmem:[%s12635_s7 + $0x168] sm:$0xff] }
 0x330   :  { %4810 = vmatpush.msrb.mxu2 %v12157_v53 }
 0x331   :  { %4630 = vadd.xlane.f32.xlu0 %v4627_v61  ;;  %v12186_v61 = vld [vmem:[%s12635_s7 + $0x1e8] sm:$0xff] }
 0x332   :  { %4811 = vmatpush.msrb.mxu2 %v12181_v8  ;;  %4831 = vmatpush.msrb.mxu3 %v12186_v61 }
 0x39c   :  { %v4629_v28 = vpop.xlane.xlu0 %4628 }
 0x39d   :  { %v4636_v63 = vadd.f32 %v8435_v59, %v4629_v28  ;;  %v12198_v28 = vld [vmem:[%s12635_s7 + $0xe0] sm:$0xff] }
 0x39e   :  { %4792 = vmatpush.msrb.mxu1 %v12198_v28 }
 0x39f   :  { %v4639_v19 = vsel %vm4638_vm0, %v4636_v63, -inf }
 0x3a0   :  { %v4640_v29 = vrot.slane %v4639_v19, 4 }
 0x3a2   :  { %v4641_v31 = vmax.f32 %v4639_v19, %v4640_v29  ;;  %v12206_v19 = vld [vmem:[%s12635_s7 + $0x160] sm:$0xff] }
 0x3a3   :  { %v12211_v29 = vld [vmem:[%s12635_s7 + $0x1e0] sm:$0xff]  ;;  %4812 = vmatpush.msrb.mxu2 %v12206_v19 }
 0x3a4   :  { %v4642_v50 = vrot.slane %v4641_v31, 2  ;;  %v4631_v0 = vpop.xlane.xlu0 %4630  ;;  %4832 = vmatpush.msrb.mxu3 %v12211_v29 }
 0x3a5   :  { %v4637_v7 = vadd.f32 %v8435_v59, %v4631_v0  ;;  %v12193_v59 = vld [vmem:[%s12635_s7 + $0x60] sm:$0xff] }
 0x3a6   :  { %v4643_v5 = vmax.f32 %v4641_v31, %v4642_v50  ;;  %v12218_v31 = vld [vmem:[%s12635_s7 + $0x58] sm:$0xff]  ;;  %4772 = vmatpush.msrb.mxu0 %v12193_v59 }
 0x3a7   :  { %v4876_v18 = vsel %vm4638_vm0, %v4637_v7, -inf  ;;  %v12223_v50 = vld [vmem:[%s12635_s7 + $0xd8] sm:$0xff] }
 0x3a8   :  { %v4644_v37 = vrot.slane %v4643_v5, 1  ;;  %v4877_v55 = vrot.slane %v4876_v18, 4  ;;  %4773 = vmatpush.msrb.mxu0 %v12218_v31  ;;  %4793 = vmatpush.msrb.mxu1 %v12223_v50 }
 0x3aa   :  { %v4645_v13 = vmax.f32 %v4643_v5, %v4644_v37  ;;  %v4878_v1 = vmax.f32 %v4876_v18, %v4877_v55  ;;  %v12235_v5 = vld [vmem:[%s12635_s7 + $0x1d8] sm:$0xff]  ;;  %v12242_v18 = vld [vmem:[%s12635_s7 + $0x50] sm:$0xff] }
 0x3ab   :  { %v12247_v37 = vld [vmem:[%s12635_s7 + $0xd0] sm:$0xff]  ;;  %4833 = vmatpush.msrb.mxu3 %v12235_v5  ;;  %4774 = vmatpush.msrb.mxu0 %v12242_v18 }
 0x3ac   :  { %v4646_v49 = vsub.f32 %v4636_v63, %v4645_v13  ;;  %v4879_v52 = vrot.slane %v4878_v1, 2  ;;  %v12254_v13 = vld [vmem:[%s12635_s7 + $0x150] sm:$0xff]  ;;  %4794 = vmatpush.msrb.mxu1 %v12247_v37 }
 0x3ae   :  { %v4647_v12 = vmul.f32 1.442695, %v4646_v49  ;;  %v4880_v27 = vmax.f32 %v4878_v1, %v4879_v52  ;;  %v12259_v1 = vld [vmem:[%s12635_s7 + $0x1d0] sm:$0xff]  ;;  %v12266_v49 = vld [vmem:[%s12635_s7 + $0x48] sm:$0xff] }
 0x3af   :  { %v12271_v52 = vld [vmem:[%s12635_s7 + $0xc8] sm:$0xff]  ;;  %4834 = vmatpush.msrb.mxu3 %v12259_v1  ;;  %4775 = vmatpush.msrb.mxu0 %v12266_v49 }
 0x3b0   :  { %8440 = vpow2.f32 %v4647_v12  ;;  %v4881_v24 = vrot.slane %v4880_v27, 1  ;;  %4795 = vmatpush.msrb.mxu1 %v12271_v52 }
 0x3b2   :  { %v4882_v2 = vmax.f32 %v4880_v27, %v4881_v24  ;;  %v12280_v27 = vld [vmem:[%s12635_s7 + $0x148] sm:$0xff] }
 0x3b3   :  { %v12285_v24 = vld [vmem:[%s12635_s7 + $0x1c8] sm:$0xff] }
 0x3b4   :  { %v4883_v48 = vsub.f32 %v4637_v7, %v4882_v2  ;;  %v12230_v7 = vld [vmem:[%s12635_s7 + $0x158] sm:$0xff]  ;;  %4835 = vmatpush.msrb.mxu3 %v12285_v24 }
 0x3b5   :  { %4813 = vmatpush.msrb.mxu2 %v12230_v7 }
 0x3b6   :  { %v12112_v35 = vpop.eup %8440  ;;  %v4884_v40 = vmul.f32 1.442695, %v4883_v48  ;;  %v12293_v48 = vld [vmem:[%s12635_s7 + $0x40] sm:$0xff] }
 0x3b7   :  { %v4649_v51 = vsel %vm4638_vm0, %v12112_v35, 0.0  ;;  %4814 = vmatpush.msrb.mxu2 %v12254_v13  ;;  %4776 = vmatpush.msrb.mxu0 %v12293_v48 }
 0x3b8   :  { %v4650_v15 = vrot.slane %v4649_v51, 4  ;;  %8442 = vpow2.f32 %v4884_v40  ;;  %v12298_v40 = vld [vmem:[%s12635_s7 + $0xc0] sm:$0xff] }
 0x3b9   :  { %4815 = vmatpush.msrb.mxu2 %v12280_v27  ;;  %4796 = vmatpush.msrb.mxu1 %v12298_v40 }
 0x3ba   :  { %v4651_v25 = vadd.f32 %v4650_v15, %v4649_v51  ;;  %v12306_v51 = vld [vmem:[%s12635_s7 + $0x140] sm:$0xff] }
 0x3bb   :  { %v12311_v15 = vld [vmem:[%s12635_s7 + $0x1c0] sm:$0xff]  ;;  %4816 = vmatpush.msrb.mxu2 %v12306_v51 }
 0x3bc   :  { %v4652_v4 = vrot.slane %v4651_v25, 2  ;;  %4836 = vmatpush.msrb.mxu3 %v12311_v15 }
 0x3be   :  { %v12116_v41 = vpop.eup %8442  ;;  %v4653_v6 = vadd.f32 %v4652_v4, %v4651_v25  ;;  %v12318_v4 = vld [vmem:[%s12635_s7 + $0x38] sm:$0xff] }
 0x3bf   :  { %v4886_v9 = vsel %vm4638_vm0, %v12116_v41, 0.0  ;;  %4777 = vmatpush.msrb.mxu0 %v12318_v4 }
 0x3c0   :  { %v4654_v20 = vrot.slane %v4653_v6, 1  ;;  %v4887_v42 = vrot.slane %v4886_v9, 4 }
 0x3c2   :  { %v12169_v26 = vadd.f32 %v4654_v20, %v4653_v6  ;;  %v4888_v33 = vadd.f32 %v4887_v42, %v4886_v9  ;;  %v12323_v6 = vld [vmem:[%s12635_s7 + $0xb8] sm:$0xff] }
 0x3c3   :  { %v12331_v20 = vld [vmem:[%s12635_s7 + $0x138] sm:$0xff]  ;;  %4797 = vmatpush.msrb.mxu1 %v12323_v6 }
 0x3c4   :  { %8444 = vrcp.f32 %v12169_v26  ;;  %v4889_v63 = vrot.slane %v4888_v33, 2  ;;  %v4667_v9 = vand.u32 2147483648, %v12169_v26  ;;  %v12336_v42 = vld [vmem:[%s12635_s7 + $0x1b8] sm:$0xff]  ;;  %vm4661_vm2 = vweird.f32 %v12169_v26  ;;  %4817 = vmatpush.msrb.mxu2 %v12331_v20 }
 0x3c5   :  { %4837 = vmatpush.msrb.mxu3 %v12336_v42 }
 0x3c6   :  { %v4890_v0 = vadd.f32 %v4889_v63, %v4888_v33  ;;  %v4665_v63 = vand.u32 2147483647, %v12169_v26 }
 0x3c8   :  { %v4891_v55 = vrot.slane %v4890_v0, 1  ;;  %vm4666_vm4 = vcmp.eq.f32.partialorder %v4665_v63, 8.507059e+37 }
 0x3ca   :  { %v8445_v56 = vpop.eup %8444  ;;  %v12273_v12 = vadd.f32 %v4891_v55, %v4890_v0  ;;  %v12344_v0 = vld [vmem:[%s12635_s7 + $0x30] sm:$0xff] }
 0x3cb   :  { %v4657_v2 = vmul.f32 %v8445_v56, %v12169_v26  ;;  %vm4662_vm1 = vweird.f32 %v8445_v56  ;;  %v12349_v55 = vld [vmem:[%s12635_s7 + $0xb0] sm:$0xff]  ;;  %4778 = vmatpush.msrb.mxu0 %v12344_v0  ;;  %v12382_v26 = vld [vmem:[%s12635_s7 + $0x128] sm:$0xff] }
 0x3cc   :  { %8446 = vrcp.f32 %v12273_v12  ;;  %vm4663_vm3 = vmor %vm4661_vm2, %vm4662_vm1  ;;  %4798 = vmatpush.msrb.mxu1 %v12349_v55  ;;  %v4904_v57 = vand.u32 2147483648, %v12273_v12  ;;  %v4902_v17 = vand.u32 2147483647, %v12273_v12  ;;  %vm4898_vm6 = vweird.f32 %v12273_v12 }
 0x3cd   :  { %v4658_v25 = vsub.f32 1.0, %v4657_v2  ;;  %v12356_v2 = vld [vmem:[%s12635_s7 + $0x130] sm:$0xff]  ;;  %4779 = vmatpush.msrb.mxu0 %v12369_v10 }
 0x3ce   :  { %4818 = vmatpush.msrb.mxu2 %v12356_v2  ;;  %4799 = vmatpush.msrb.mxu1 %v12374_v54  ;;  %vm4903_vm8 = vcmp.eq.f32.partialorder %v4902_v17, 8.507059e+37  ;;  %v12506_v17 = vld [vmem:[%s12635_s7 + $0x80] sm:$0xff] }
 0x3cf   :  { %v4659_v33 = vmul.f32 %v8445_v56, %v4658_v25  ;;  %v12361_v25 = vld [vmem:[%s12635_s7 + $0x1b0] sm:$0xff] }
 0x3d0   :  { %4838 = vmatpush.msrb.mxu3 %v12361_v25  ;;  %4819 = vmatpush.msrb.mxu2 %v12382_v26 }
 0x3d1   :  { %v4660_v34 = vadd.f32 %v8445_v56, %v4659_v33  ;;  %v4668_v33 = vor.u32 1.1754944e-38, %v4667_v9  ;;  %v12395_v9 = vld [vmem:[%s12635_s7 + $0x20] sm:$0xff]  ;;  %4800 = vmatpush.msrb.mxu1 %v12400_v38 }
 0x3d2   :  { %v8447_v14 = vpop.eup %8446  ;;  %4839 = vmatpush.msrb.mxu3 %v12387_v36  ;;  %4780 = vmatpush.msrb.mxu0 %v12395_v9 }
 0x3d3   :  { %v4664_v16 = vsel %vm4663_vm3, %v8445_v56, %v4660_v34  ;;  %v4894_v11 = vmul.f32 %v8447_v14, %v12273_v12  ;;  %v12407_v34 = vld [vmem:[%s12635_s7 + $0x120] sm:$0xff]  ;;  %vm4899_vm5 = vweird.f32 %v8447_v14  ;;  %v12482_v12 = vld [vmem:[%s12635_s7 + $0x88] sm:$0xff] }
 0x3d4   :  { %v4669_v44 = vsel %vm4666_vm4, %v4668_v33, %v4664_v16  ;;  %v12415_v16 = vld [vmem:[%s12635_s7 + $0x1a0] sm:$0xff]  ;;  %v12420_v33 = vld [vmem:[%s12635_s7 + $0x18] sm:$0xff]  ;;  %4820 = vmatpush.msrb.mxu2 %v12407_v34  ;;  %vm4900_vm7 = vmor %vm4898_vm6, %vm4899_vm5 }
 0x3d5   :  { %v4670_v56 = vmul.f32 %v12112_v35, %v4669_v44  ;;  %v4895_v63 = vsub.f32 1.0, %v4894_v11  ;;  %12667 = vst [vmem:[#allocation11_spill] sm:$0xff] %v12420_v33  ;;  %v12428_v11 = vld [vmem:[%s12635_s7 + $0x98] sm:$0xff]  ;;  %4840 = vmatpush.msrb.mxu3 %v12415_v16  ;;  %4781 = vmatpush.msrb.mxu0 %v12420_v33  ;;  %v4905_v33 = vor.u32 1.1754944e-38, %v4904_v57  ;;  %v12494_v57 = vld [vmem:[%s12635_s7 + $0x188] sm:$0xff] }
 0x3d6   :  { %v12433_v44 = vld [vmem:[%s12635_s7 + $0x118] sm:$0xff]  ;;  %4801 = vmatpush.msrb.mxu1 %v12428_v11 }
 0x3d7   :  { %12668 = vst [vmem:[#allocation12_spill] sm:$0xff] %v12433_v44  ;;  %4673 = vperm.xlu1 %8431, %v4670_v56   ;;  %v4896_v35 = vmul.f32 %v8447_v14, %v4895_v63  ;;  %v12461_v63 = vld [vmem:[%s12635_s7 + $0x110] sm:$0xff]  ;;  %4821 = vmatpush.msrb.mxu2 %v12433_v44 }
 0x3d8   :  { %4875 = vst.msk [vmem:[%s12636_s10] sm:$0xff] %vm4638_vm0, %v4670_v56  ;;  %v12456_v56 = vld [vmem:[%s12635_s7 + $0x90] sm:$0xff]  ;;  %4841 = vmatpush.msrb.mxu3 %v12444_v21  ;;  %4782 = vmatpush.msrb.mxu0 %v12449_v22  ;;  %v12499_v22 = vld [vmem:[%s12635_s7] sm:$0xff] }
 0x3d9   :  { %v4897_v32 = vadd.f32 %v8447_v14, %v4896_v35  ;;  %v12487_v35 = vld [vmem:[%s12635_s7 + $0x108] sm:$0xff]  ;;  %4802 = vmatpush.msrb.mxu1 %v12456_v56  ;;  %4822 = vmatpush.msrb.mxu2 %v12461_v63 }
 0x3da   :  { %4842 = vmatpush.msrb.mxu3 %v12469_v3  ;;  %4783 = vmatpush.msrb.mxu0 %v12474_v62 }
 0x3db   :  { %v4901_v44 = vsel %vm4900_vm7, %v8447_v14, %v4897_v32  ;;  %4803 = vmatpush.msrb.mxu1 %v12482_v12  ;;  %4823 = vmatpush.msrb.mxu2 %v12487_v35  ;;  %v12514_v32 = vld [vmem:[%s12635_s7 + $0x100] sm:$0xff] }
 0x3dc   :  { %v4906_v21 = vsel %vm4903_vm8, %v4905_v33, %v4901_v44  ;;  %v12519_v33 = vld [vmem:[%s12635_s7 + $0x180] sm:$0xff]  ;;  %4843 = vmatpush.msrb.mxu3 %v12494_v57  ;;  %4784 = vmatpush.msrb.mxu0 %v12499_v22 }
 0x3dd   :  { %v4907_v14 = vmul.f32 %v12116_v41, %v4906_v21  ;;  %4804 = vmatpush.msrb.mxu1 %v12506_v17  ;;  %4824 = vmatpush.msrb.mxu2 %v12514_v32  ;;  %v12671_v21 = vld [vmem:[#allocation11_spill] sm:$0xff] }
 0x3de   :  { %4844 = vmatpush.msrb.mxu3 %v12519_v33  ;;  %5006 = vmatpush.msra.mxu0 %v12123_v43  ;;  %v12672_v41 = vld [vmem:[#allocation12_spill] sm:$0xff] }
 0x3df   :  { %4910 = vperm.xlu1 %8431, %v4907_v14   ;;  %5111 = vst.msk [vmem:[%s12636_s10 + $0x8] sm:$0xff] %vm4638_vm0, %v4907_v14  ;;  %5026 = vmatpush.msra.mxu1 %v12128_v58  ;;  %v12677_v58 = vld [vmem:[#allocation4_spill] sm:$0xff] }
 0x3e0   :  { %5046 = vmatpush.msra.mxu2 %v12133_v60  ;;  %5066 = vmatpush.msra.mxu3 %v12140_v45  ;;  %v12679_v45 = vld [vmem:[#allocation7_spill] sm:$0xff] }
 0x3e1   :  { %5007 = vmatpush.msra.mxu0 %v12145_v39  ;;  %5027 = vmatpush.msra.mxu1 %v12150_v46  ;;  %v12680_v39 = vmax.f32 %v12679_v45, 0.0 }
 0x3e2   :  { %5047 = vmatpush.msra.mxu2 %v12157_v53  ;;  %5067 = vmatpush.msra.mxu3 %v12162_v30  ;;  %v12681_v53 = vld [vmem:[#allocation8_spill] sm:$0xff] }
 0x3e3   :  { %5008 = vmatpush.msra.mxu0 %v12167_v23  ;;  %5028 = vmatpush.msra.mxu1 %v12176_v47  ;;  %v12682_v30 = vmax.f32 %v12681_v53, 0.0  ;;  %v4768_v53 = vld [vmem:[%s12637_s8] sm:$0x1] }
 0x3e4   :  { %5048 = vmatpush.msra.mxu2 %v12181_v8  ;;  %5068 = vmatpush.msra.mxu3 %v12186_v61 }
 0x3e5   :  { %5009 = vmatpush.msra.mxu0 %v12193_v59  ;;  %5029 = vmatpush.msra.mxu1 %v12198_v28 }
 0x3e6   :  { %5049 = vmatpush.msra.mxu2 %v12206_v19  ;;  %5069 = vmatpush.msra.mxu3 %v12211_v29 }
 0x3e7   :  { %5010 = vmatpush.msra.mxu0 %v12218_v31  ;;  %5030 = vmatpush.msra.mxu1 %v12223_v50 }
 0x3e8   :  { %5050 = vmatpush.msra.mxu2 %v12230_v7  ;;  %5070 = vmatpush.msra.mxu3 %v12235_v5 }
 0x3e9   :  { %5011 = vmatpush.msra.mxu0 %v12242_v18  ;;  %5031 = vmatpush.msra.mxu1 %v12247_v37 }
 0x3ea   :  { %5051 = vmatpush.msra.mxu2 %v12254_v13  ;;  %5071 = vmatpush.msra.mxu3 %v12259_v1 }
 0x3eb   :  { %5012 = vmatpush.msra.mxu0 %v12266_v49  ;;  %5032 = vmatpush.msra.mxu1 %v12271_v52  ;;  %v12683_v52 = vld [vmem:[#allocation5_spill] sm:$0xff] }
 0x3ec   :  { %5052 = vmatpush.msra.mxu2 %v12280_v27  ;;  %5072 = vmatpush.msra.mxu3 %v12285_v24  ;;  %v12684_v27 = vmax.f32 %v12683_v52, 0.0 }
 0x3ed   :  { %5013 = vmatpush.msra.mxu0 %v12293_v48  ;;  %5033 = vmatpush.msra.mxu1 %v12298_v40  ;;  %v12685_v48 = vld [vmem:[#allocation6_spill] sm:$0xff] }
 0x3ee   :  { %5053 = vmatpush.msra.mxu2 %v12306_v51  ;;  %5073 = vmatpush.msra.mxu3 %v12311_v15  ;;  %v12686_v40 = vmax.f32 %v12685_v48, 0.0  ;;  %v12687_v15 = vld [vmem:[#allocation9_spill] sm:$0xff] }
 0x3ef   :  { %5014 = vmatpush.msra.mxu0 %v12318_v4  ;;  %5034 = vmatpush.msra.mxu1 %v12323_v6  ;;  %v12688_v4 = vmax.f32 %v12687_v15, 0.0 }
 0x3f0   :  { %5054 = vmatpush.msra.mxu2 %v12331_v20  ;;  %5074 = vmatpush.msra.mxu3 %v12336_v42  ;;  %v12689_v20 = vld [vmem:[#allocation10_spill] sm:$0xff] }
 0x3f1   :  { %5015 = vmatpush.msra.mxu0 %v12344_v0  ;;  %5035 = vmatpush.msra.mxu1 %v12349_v55  ;;  %v12690_v42 = vmax.f32 %v12689_v20, 0.0 }
 0x3f2   :  { %5055 = vmatpush.msra.mxu2 %v12356_v2  ;;  %5075 = vmatpush.msra.mxu3 %v12361_v25 }
 0x3f3   :  { %5016 = vmatpush.msra.mxu0 %v12369_v10  ;;  %5036 = vmatpush.msra.mxu1 %v12374_v54  ;;  %v12673_v10 = vld [vmem:[#allocation13_spill] sm:$0xff]  ;;  %v12674_v54 = vld [vmem:[#allocation14_spill] sm:$0xff] }
 0x3f4   :  { %5056 = vmatpush.msra.mxu2 %v12382_v26  ;;  %5076 = vmatpush.msra.mxu3 %v12387_v36  ;;  %v12675_v36 = vld [vmem:[#allocation3_spill] sm:$0xff] }
 0x3f5   :  { %5017 = vmatpush.msra.mxu0 %v12395_v9  ;;  %5037 = vmatpush.msra.mxu1 %v12400_v38  ;;  %v12676_v43 = vmax.f32 %v12675_v36, 0.0 }
 0x3f6   :  { %5057 = vmatpush.msra.mxu2 %v12407_v34  ;;  %5077 = vmatpush.msra.mxu3 %v12415_v16 }
 0x3f7   :  { %5018 = vmatpush.msra.mxu0 %v12671_v21  ;;  %5038 = vmatpush.msra.mxu1 %v12428_v11 }
 0x3f8   :  { %5058 = vmatpush.msra.mxu2 %v12672_v41  ;;  %5078 = vmatpush.msra.mxu3 %v12673_v10 }
 0x3f9   :  { %5019 = vmatpush.msra.mxu0 %v12674_v54  ;;  %5039 = vmatpush.msra.mxu1 %v12456_v56 }
 0x3fa   :  { %5059 = vmatpush.msra.mxu2 %v12461_v63  ;;  %5079 = vmatpush.msra.mxu3 %v12469_v3 }
 0x3fb   :  { %5020 = vmatpush.msra.mxu0 %v12474_v62  ;;  %5040 = vmatpush.msra.mxu1 %v12482_v12  ;;  %v12678_v62 = vmax.f32 %v12677_v58, 0.0 }
 0x3fc   :  { %5060 = vmatpush.msra.mxu2 %v12487_v35  ;;  %5080 = vmatpush.msra.mxu3 %v12494_v57 }
 0x3fd   :  { %5021 = vmatpush.msra.mxu0 %v12499_v22  ;;  %5041 = vmatpush.msra.mxu1 %v12506_v17 }
 0x3fe   :  { %5061 = vmatpush.msra.mxu2 %v12514_v32  ;;  %5081 = vmatpush.msra.mxu3 %v12519_v33 }
 0x449   :  { %v4674_v38 = vpop.permute.xlu1 %4673 }
 0x44a   :  { %v4676_v3 = vmul.f32 %v4674_v38, %v12676_v43  ;;  %v4677_v60 = vmul.f32 %v4674_v38, %v12678_v62  ;;  %v4678_v46 = vmul.f32 %v4674_v38, %v12680_v39  ;;  %v4679_v23 = vmul.f32 %v4674_v38, %v12682_v30 }
 0x44c   :  { %v4680_v22 = vrot.slane %v4676_v3, 4  ;;  %v4686_v47 = vrot.slane %v4677_v60, 4  ;;  %v4692_v8 = vrot.slane %v4678_v46, 4  ;;  %v4698_v61 = vrot.slane %v4679_v23, 4 }
 0x44e   :  { %v4681_v59 = vadd.f32 %v4680_v22, %v4676_v3  ;;  %v4687_v28 = vadd.f32 %v4686_v47, %v4677_v60  ;;  %v4693_v19 = vadd.f32 %v4692_v8, %v4678_v46  ;;  %v4699_v29 = vadd.f32 %v4698_v61, %v4679_v23 }
 0x450   :  { %v4682_v31 = vrot.slane %v4681_v59, 2  ;;  %v4688_v50 = vrot.slane %v4687_v28, 2  ;;  %v4694_v7 = vrot.slane %v4693_v19, 2  ;;  %v4700_v5 = vrot.slane %v4699_v29, 2 }
 0x451   :  { %v4911_v18 = vpop.permute.xlu1 %4910 }
 0x452   :  { %v4683_v37 = vadd.f32 %v4682_v31, %v4681_v59  ;;  %v4689_v13 = vadd.f32 %v4688_v50, %v4687_v28  ;;  %v4695_v1 = vadd.f32 %v4694_v7, %v4693_v19  ;;  %v4701_v49 = vadd.f32 %v4700_v5, %v4699_v29  ;;  %v5005_v28 = vld [vmem:[%s12637_s8] sm:$0x1] }
 0x453   :  { %v4913_v24 = vmul.f32 %v4911_v18, %v12684_v27  ;;  %v4914_v51 = vmul.f32 %v4911_v18, %v12686_v40  ;;  %v4915_v6 = vmul.f32 %v4911_v18, %v12688_v4  ;;  %v4916_v0 = vmul.f32 %v4911_v18, %v12690_v42 }
 0x454   :  { %v4684_v55 = vrot.slane %v4683_v37, 1  ;;  %v4690_v2 = vrot.slane %v4689_v13, 1  ;;  %v4696_v25 = vrot.slane %v4695_v1, 1  ;;  %v4702_v26 = vrot.slane %v4701_v49, 1 }
 0x455   :  { %v4917_v9 = vrot.slane %v4913_v24, 4  ;;  %v4923_v34 = vrot.slane %v4914_v51, 4  ;;  %v4929_v16 = vrot.slane %v4915_v6, 4  ;;  %v4935_v11 = vrot.slane %v4916_v0, 4 }
 0x456   :  { %v4685_v44 = vadd.f32 %v4684_v55, %v4683_v37  ;;  %v4691_v56 = vadd.f32 %v4690_v2, %v4689_v13  ;;  %v4697_v63 = vadd.f32 %v4696_v25, %v4695_v1  ;;  %v4703_v12 = vadd.f32 %v4702_v26, %v4701_v49 }
 0x457   :  { %v4918_v35 = vadd.f32 %v4917_v9, %v4913_v24  ;;  %v4924_v57 = vadd.f32 %v4923_v34, %v4914_v51  ;;  %v4930_v17 = vadd.f32 %v4929_v16, %v4915_v6  ;;  %v4936_v14 = vadd.f32 %v4935_v11, %v4916_v0 }
 0x458   :  { %4785 = vmatmul.f32.vlgmr.msrb.gmra.mxu0 %v4685_v44  ;;  %4805 = vmatmul.f32.vlgmr.msrb.gmra.mxu1 %v4691_v56 }
 0x459   :  { %v4919_v32 = vrot.slane %v4918_v35, 2  ;;  %v4925_v33 = vrot.slane %v4924_v57, 2  ;;  %v4931_v21 = vrot.slane %v4930_v17, 2  ;;  %v4937_v41 = vrot.slane %v4936_v14, 2  ;;  %4825 = vmatmul.f32.vlgmr.msrb.gmra.mxu2 %v4697_v63  ;;  %4845 = vmatmul.f32.vlgmr.msrb.gmra.mxu3 %v4703_v12 }
 0x45b   :  { %v4920_v10 = vadd.f32 %v4919_v32, %v4918_v35  ;;  %v4926_v54 = vadd.f32 %v4925_v33, %v4924_v57  ;;  %v4932_v38 = vadd.f32 %v4931_v21, %v4930_v17  ;;  %v4938_v36 = vadd.f32 %v4937_v41, %v4936_v14 }
 0x45d   :  { %v4921_v43 = vrot.slane %v4920_v10, 1  ;;  %v4927_v3 = vrot.slane %v4926_v54, 1  ;;  %v4933_v58 = vrot.slane %v4932_v38, 1  ;;  %v4939_v62 = vrot.slane %v4938_v36, 1 }
 0x45f   :  { %v4922_v60 = vadd.f32 %v4921_v43, %v4920_v10  ;;  %v4928_v45 = vadd.f32 %v4927_v3, %v4926_v54  ;;  %v4934_v39 = vadd.f32 %v4933_v58, %v4932_v38  ;;  %v4940_v46 = vadd.f32 %v4939_v62, %v4938_v36 }
 0x461   :  { %5022 = vmatmul.f32.vlgmr.msra.gmra.mxu0 %v4922_v60  ;;  %5042 = vmatmul.f32.vlgmr.msra.gmra.mxu1 %v4928_v45 }
 0x462   :  { %5062 = vmatmul.f32.vlgmr.msra.gmra.mxu2 %v4934_v39  ;;  %5082 = vmatmul.f32.vlgmr.msra.gmra.mxu3 %v4940_v46 }
 0x4d5   :  { %v4786_v30 = vpop.f32.mrf.mxu0  ;;  %v4806_v22 = vpop.f32.mrf.mxu1 }
 0x4d6   :  { %v4787_v23 = vadd.f32 %v4786_v30, %v4768_v53 }
 0x4d8   :  { %v4807_v47 = vadd.f32 %v4806_v22, %v4787_v23 }
 0x4dc   :  { %v4826_v8 = vpop.f32.mrf.mxu2  ;;  %v4846_v59 = vpop.f32.mrf.mxu3 }
 0x4dd   :  { %v4827_v61 = vadd.f32 %v4826_v8, %v4807_v47 }
 0x4de   :  { %v5023_v19 = vpop.f32.mrf.mxu0  ;;  %v5043_v7 = vpop.f32.mrf.mxu1 }
 0x4df   :  { %v4847_v29 = vadd.f32 %v4846_v59, %v4827_v61  ;;  %v5024_v31 = vadd.f32 %v5023_v19, %v5005_v28 }
 0x4e1   :  { %v4850_v50 = vsel %vm4849_vm9, %v4847_v29, -inf  ;;  %v5044_v5 = vadd.f32 %v5043_v7, %v5024_v31 }
 0x4e2   :  { %4851 = vmax.xlane.f32.xlu2 %v4850_v50 }
 0x4e5   :  { %v5063_v18 = vpop.f32.mrf.mxu2  ;;  %v5083_v13 = vpop.f32.mrf.mxu3 }
 0x4e6   :  { %v5064_v37 = vadd.f32 %v5063_v18, %v5044_v5 }
 0x4e8   :  { %v5084_v1 = vadd.f32 %v5083_v13, %v5064_v37 }
 0x4ea   :  { %v5086_v49 = vsel %vm4849_vm9, %v5084_v1, -inf }
 0x4eb   :  { %5087 = vmax.xlane.f32.xlu2 %v5086_v49 }
 0x555   :  { %v4852_v52 = vpop.xlane.xlu2 %4851 }
 0x556   :  { %v4853_v27 = vsub.f32 %v4847_v29, %v4852_v52 }
 0x558   :  { %v4854_v24 = vmul.f32 1.442695, %v4853_v27 }
 0x55a   :  { %8448 = vpow2.f32 %v4854_v24 }
 0x55e   :  { %v5088_v48 = vpop.xlane.xlu2 %5087 }
 0x55f   :  { %v5089_v40 = vsub.f32 %v5084_v1, %v5088_v48 }
 0x560   :  { %v8449_v51 = vpop.eup %8448 }
 0x561   :  { %v5090_v15 = vmul.f32 1.442695, %v5089_v40  ;;  %v4856_v4 = vsel %vm4849_vm9, %v8449_v51, 0.0 }
 0x562   :  { %4857 = vadd.xlane.f32.xlu0 %v4856_v4 }
 0x563   :  { %8450 = vpow2.f32 %v5090_v15 }
 0x569   :  { %v8451_v6 = vpop.eup %8450 }
 0x56a   :  { %v5092_v20 = vsel %vm4849_vm9, %v8451_v6, 0.0 }
 0x56b   :  { %5093 = vadd.xlane.f32.xlu1 %v5092_v20 }
 0x5d5   :  { %v4858_v42 = vpop.xlane.xlu0 %4857 }
 0x5d6   :  { %8452 = vrcp.f32 %v4858_v42  ;;  %v4870_v26 = vand.u32 2147483648, %v4858_v42  ;;  %v4868_v34 = vand.u32 2147483647, %v4858_v42  ;;  %vm4864_vm11 = vweird.f32 %v4858_v42 }
 0x5d8   :  { %v4871_v11 = vor.u32 1.1754944e-38, %v4870_v26  ;;  %vm4869_vm13 = vcmp.eq.f32.partialorder %v4868_v34, 8.507059e+37 }
 0x5dc   :  { %v8453_v0 = vpop.eup %8452 }
 0x5dd   :  { %v4860_v55 = vmul.f32 %v8453_v0, %v4858_v42  ;;  %vm4865_vm10 = vweird.f32 %v8453_v0 }
 0x5de   :  { %v5094_v2 = vpop.xlane.xlu1 %5093  ;;  %vm4866_vm12 = vmor %vm4864_vm11, %vm4865_vm10 }
 0x5df   :  { %v4861_v25 = vsub.f32 1.0, %v4860_v55  ;;  %8454 = vrcp.f32 %v5094_v2  ;;  %v5106_v17 = vand.u32 2147483648, %v5094_v2  ;;  %v5104_v32 = vand.u32 2147483647, %v5094_v2 }
 0x5e0   :  { %vm5100_vm15 = vweird.f32 %v5094_v2 }
 0x5e1   :  { %v4862_v9 = vmul.f32 %v8453_v0, %v4861_v25  ;;  %v5107_v21 = vor.u32 1.1754944e-38, %v5106_v17  ;;  %vm5105_vm1 = vcmp.eq.f32.partialorder %v5104_v32, 8.507059e+37 }
 0x5e3   :  { %v4863_v16 = vadd.f32 %v8453_v0, %v4862_v9 }
 0x5e5   :  { %v8455_v44 = vpop.eup %8454  ;;  %v4867_v56 = vsel %vm4866_vm12, %v8453_v0, %v4863_v16 }
 0x5e6   :  { %v4872_v63 = vsel %vm4869_vm13, %v4871_v11, %v4867_v56  ;;  %v5096_v12 = vmul.f32 %v8455_v44, %v5094_v2  ;;  %vm5101_vm14 = vweird.f32 %v8455_v44 }
 0x5e7   :  { %v4873_v35 = vmul.f32 %v8449_v51, %v4872_v63  ;;  %vm5102_vm0 = vmor %vm5100_vm15, %vm5101_vm14 }
 0x5e8   :  { %v5097_v57 = vsub.f32 1.0, %v5096_v12 }
 0x5e9   :  { %4874 = vst.msk [vmem:[%s12638_s9] sm:$0x1] %vm4849_vm9, %v4873_v35 }
 0x5ea   :  { %v5098_v14 = vmul.f32 %v8455_v44, %v5097_v57 }
 0x5ec   :  { %v5099_v33 = vadd.f32 %v8455_v44, %v5098_v14 }
 0x5ee   :  { %v5103_v41 = vsel %vm5102_vm0, %v8455_v44, %v5099_v33 }
 0x5ef   :  { %v5108_v10 = vsel %vm5105_vm1, %v5107_v21, %v5103_v41 }
 0x5f0   :  { %v5109_v54 = vmul.f32 %v8451_v6, %v5108_v10 }
 0x5f2   :  { %5110 = vst.msk [vmem:[%s12638_s9 + $0x1] sm:$0x1] %vm4849_vm9, %v5109_v54 }

</bundles_post_ra>
